<compile_context>
chip_gen: v7x
topology: tpu7x:2x2x1
jax: 0.10.0
libtpu: 0.0.40
codegen_flags: <defaults>
</compile_context>

<pallas_src>
import functools

import jax
import jax.numpy as jnp
from jax import lax
from jax.experimental import pallas as pl
from jax.experimental.pallas import tpu as pltpu

EPS = 1e-5           # PyTorch InstanceNorm2d default eps
NEG_SLOPE = 0.1      # LeakyReLU negative slope


def _leaky_relu(x):
    return jnp.where(x > 0, x, NEG_SLOPE * x)


# ----------------------------------------------------------------------------
# Kernel 1: 3x3 conv (same padding) + LeakyReLU(0.1) + InstanceNorm.
#   - input is row-padded only (H+2, W, Cin); dx shifts realized with pltpu.roll + mask
#   - the 3 dx taps are concatenated on the channel axis -> one K=3*Cin bf16 matmul per dy
#   - optionally fuses the leading InstanceNorm2d(Cin) of the network (first layer only)
# ----------------------------------------------------------------------------
def _conv_block_kernel(xp_ref, w_ref, b_ref, o_ref, *, H, W, Cin, Cout, fuse_input_norm):
    x32 = xp_ref[0].astype(jnp.float32)                      # (H+2, W, Cin)

    if fuse_input_norm:
        # InstanceNorm of the raw input, computed over the valid H*W region
        # (zero pad rows contribute nothing to sum / sum-of-squares).
        n = float(H * W)
        flat = x32.reshape((H + 2) * W, Cin)
        s = jnp.sum(flat, axis=0, keepdims=True)
        ss = jnp.sum(flat * flat, axis=0, keepdims=True)
        mean = s / n
        var = ss / n - mean * mean
        xn = (flat - mean) * lax.rsqrt(var + EPS)
        row = lax.broadcasted_iota(jnp.int32, (H + 2, W, 1), 0)
        inside = jnp.logical_and(row >= 1, row <= H)
        x32 = jnp.where(inside, xn.reshape(H + 2, W, Cin), 0.0)  # keep pad rows zero

    # Column-shifted variants (XLU roll + border mask), grouped on the channel axis.
    col = lax.broadcasted_iota(jnp.int32, (H + 2, W, 1), 1)
    x_l = jnp.where(col >= 1, pltpu.roll(x32, 1, axis=1), 0.0)        # x[:, w-1]
    x_r = jnp.where(col < W - 1, pltpu.roll(x32, W - 1, axis=1), 0.0)  # x[:, w+1]
    xcat = jnp.concatenate([x_l, x32, x_r], axis=-1).astype(jnp.bfloat16)  # (H+2, W, 3*Cin)

    acc = jnp.zeros((H * W, Cout), jnp.float32)
    for dy in range(3):                                     # 3 deep (K=3*Cin) bf16 matmuls
        patch = xcat[dy:dy + H].reshape(H * W, 3 * Cin)
        acc = acc + jnp.dot(patch, w_ref[dy], preferred_element_type=jnp.float32)

    acc = acc + b_ref[...]                                  # (1, Cout) broadcast
    acc = _leaky_relu(acc)

    # InstanceNorm of the conv output (f32 statistics).
    mean = jnp.mean(acc, axis=0, keepdims=True)
    var = jnp.mean((acc - mean) ** 2, axis=0, keepdims=True)
    y = (acc - mean) * lax.rsqrt(var + EPS)
    o_ref[...] = y.reshape(1, H, W, Cout).astype(jnp.bfloat16)


def conv3x3_block(x, w, b, *, fuse_input_norm=False):
    # x: (B, H, W, Cin) ; w: (3, 3*Cin, Cout) bf16, layout w[dy, dx*Cin + ci, co] ; b: (1, Cout) f32
    B, H, W, Cin = x.shape
    Cout = w.shape[-1]
    xp = jnp.pad(x, ((0, 0), (1, 1), (0, 0), (0, 0)))       # row padding only (glue)
    kernel = functools.partial(_conv_block_kernel, H=H, W=W, Cin=Cin, Cout=Cout,
                               fuse_input_norm=fuse_input_norm)
    return pl.pallas_call(
        kernel,
        out_shape=jax.ShapeDtypeStruct((B, H, W, Cout), jnp.bfloat16),
        grid_spec=pltpu.PrefetchScalarGridSpec(
            num_scalar_prefetch=0,
            grid=(B,),
            in_specs=[
                pl.BlockSpec((1, H + 2, W, Cin), lambda bb: (bb, 0, 0, 0)),
                pl.BlockSpec((3, 3 * Cin, Cout), lambda bb: (0, 0, 0)),
                pl.BlockSpec((1, Cout), lambda bb: (0, 0)),
            ],
            out_specs=pl.BlockSpec((1, H, W, Cout), lambda bb: (bb, 0, 0, 0)),
        ),
        compiler_params=pltpu.CompilerParams(dimension_semantics=("parallel",)),
    )(xp, w, b)


# ----------------------------------------------------------------------------
# Kernel 2: matching. Row-tiled grid (B, H//TH). The two 1x1-conv matmuls are done ONCE per
# row tile (hoisted out of the disparity loop); each disparity is then a roll (XLU) + mask +
# bias + LeakyReLU + channel lane-reduce. Output is lane-dense (B, D, H*W).
# ----------------------------------------------------------------------------
def _matching_kernel(l_ref, r_ref, w1a_ref, w1b_ref, b1_ref, w2_ref, b2_ref, o_ref,
                     *, TH, W, C, D):
    C2 = 2 * C
    l = l_ref[0].reshape(TH * W, C)                          # bf16
    r = r_ref[0].reshape(TH * W, C)

    # Hoisted 1x1-conv matmuls (bf16 in, f32 accumulate).
    L1 = jnp.dot(l, w1a_ref[...], preferred_element_type=jnp.float32).reshape(TH, W, C2)
    R1 = jnp.dot(r, w1b_ref[...], preferred_element_type=jnp.float32).reshape(TH, W, C2)

    b1 = b1_ref[...].reshape(1, 1, C2)
    w2 = w2_ref[...].reshape(1, 1, C2)
    b2 = b2_ref[0, 0]
    col = lax.broadcasted_iota(jnp.int32, (TH, W, 1), 1)

    costs = []
    for d in range(D):                                       # static unrolled loop
        r_d = R1 if d == 0 else pltpu.roll(R1, d, axis=1)    # R1[:, w-d]; wrap masked below
        h = jnp.where(col >= d, L1 + r_d, 0.0) + b1          # cols < d -> just the bias
        h = _leaky_relu(h)
        costs.append(jnp.sum(h * w2, axis=-1))               # (TH, W) channel reduce

    cost = jnp.stack(costs, axis=0) + b2                     # (D, TH, W)
    o_ref[...] = cost.reshape(1, D, TH * W)                  # lane-dense store


def matching_cost_volume(left, right, w1a, w1b, b1, w2, b2, max_disp, *, th):
    # left/right: (B, H, W, C) bf16 embeddings; returns (B, max_disp+1, H, W) f32
    B, H, W, C = left.shape
    D = max_disp + 1
    nT = H // th
    kernel = functools.partial(_matching_kernel, TH=th, W=W, C=C, D=D)
    cost = pl.pallas_call(
        kernel,
        out_shape=jax.ShapeDtypeStruct((B, D, H * W), jnp.float32),
        grid_spec=pltpu.PrefetchScalarGridSpec(
            num_scalar_prefetch=0,
            grid=(B, nT),
            in_specs=[
                pl.BlockSpec((1, th, W, C), lambda b, t: (b, t, 0, 0)),
                pl.BlockSpec((1, th, W, C), lambda b, t: (b, t, 0, 0)),
                pl.BlockSpec((C, 2 * C), lambda b, t: (0, 0)),
                pl.BlockSpec((C, 2 * C), lambda b, t: (0, 0)),
                pl.BlockSpec((1, 2 * C), lambda b, t: (0, 0)),
                pl.BlockSpec((1, 2 * C), lambda b, t: (0, 0)),
                pl.BlockSpec(memory_space=pltpu.MemorySpace.SMEM),   # b2 scalar
            ],
            out_specs=pl.BlockSpec((1, D, th * W), lambda b, t: (b, 0, t)),
        ),
        compiler_params=pltpu.CompilerParams(
            dimension_semantics=("parallel", "parallel")),
    )(left, right, w1a, w1b, b1, w2, b2)
    return cost.reshape(B, D, H, W)


def _pick_row_tile(H):
    for t in (128, 64, 32, 16, 8):
        if H % t == 0 and t < H:
            return t
    return H


# ----------------------------------------------------------------------------
# Full forward (training-mode PyTorch output: the matching cost volume)
# ----------------------------------------------------------------------------
def shallow_event_stereo_forward(left_event_queue, right_event_queue, params, *, max_disp):
    def embed(x_nchw):
        x = jnp.transpose(x_nchw, (0, 2, 3, 1)).astype(jnp.float32)  # NCHW -> NHWC
        # Dummy temporal aggregation = identity; input InstanceNorm2d fused into the 1st conv.
        for i, (w, b) in enumerate(params["spatial"]):
            x = conv3x3_block(x, w, b, fuse_input_norm=(i == 0))
        return x                                                     # (B, H, W, 64) bf16

    left_embedding = embed(left_event_queue)
    right_embedding = embed(right_event_queue)

    H = left_embedding.shape[1]
    th = _pick_row_tile(H)
    cost = matching_cost_volume(left_embedding, right_embedding,
                                params["w1a"], params["w1b"], params["b1"],
                                params["w2"], params["b2"], max_disp, th=th)
    return cost  # (B, max_disp+1, H, W)


if __name__ == "__main__":
    key = jax.random.PRNGKey(0)
    B, Cin, H, W = 2, 4, 16, 16
    feats = 64
    maximum_disparity = 8            # net.set_maximum_disparity(8) -> Matching max_disp = 7
    max_disp = maximum_disparity - 1

    keys = jax.random.split(key, 16)
    left = jax.random.normal(keys[0], (B, Cin, H, W), jnp.float32)
    right = jax.random.normal(keys[1], (B, Cin, H, W), jnp.float32)

    # Deterministic synthetic parameters (shapes follow the module's __init__).
    # Conv weight layout: (3, 3*Cin, Cout) with index [dy, dx*Cin + ci, co].
    spatial = []
    cin = Cin
    for i in range(4):
        w = (0.1 * jax.random.normal(keys[2 + i], (3, 3 * cin, feats), jnp.float32)
             ).astype(jnp.bfloat16)
        b = 0.01 * jax.random.normal(keys[6 + i], (1, feats), jnp.float32)
        spatial.append((w, b))
        cin = feats
    w1 = 0.05 * jax.random.normal(keys[10], (2 * feats, 2 * feats), jnp.float32)  # 1x1 conv 128->128
    w1a = w1[:feats].astype(jnp.bfloat16)     # multiplies the left embedding
    w1b = w1[feats:].astype(jnp.bfloat16)     # multiplies the (shifted) right embedding
    b1 = 0.01 * jax.random.normal(keys[11], (1, 2 * feats), jnp.float32)
    w2 = 0.05 * jax.random.normal(keys[12], (1, 2 * feats), jnp.float32)          # 1x1 conv 128->1
    b2 = 0.01 * jax.random.normal(keys[13], (1, 1), jnp.float32)
    params = {"spatial": spatial, "w1a": w1a, "w1b": w1b, "b1": b1, "w2": w2, "b2": b2}

    fwd = jax.jit(functools.partial(shallow_event_stereo_forward, max_disp=max_disp))
    cost = fwd(left, right, params)
    jax.block_until_ready(cost)

    assert cost.shape == (B, max_disp + 1, H, W), cost.shape
    assert bool(jnp.all(jnp.isfinite(cost)))
    print("KERNEL_OK")
</pallas_src>

<mosaic_0001>
module attributes {stable_mosaic.version = 11 : i64} {
  func.func @_conv_block_kernel(%arg0: i32, %arg1: memref<1x18x16x4xf32, #tpu.memory_space<vmem>>, %arg2: memref<3x12x64xbf16, #tpu.memory_space<vmem>>, %arg3: memref<1x64xf32, #tpu.memory_space<vmem>>, %arg4: memref<1x16x16x64xbf16, #tpu.memory_space<vmem>>) attributes {dimension_semantics = [#tpu.dimension_semantics<parallel>], iteration_bounds = array<i64: 2>, scalar_prefetch = 0 : i64, scratch_operands = 0 : i64, tpu.core_type = #tpu.core_type<tc>, window_params = [{transform_indices = @transform_0, window_bounds = array<i64: 1, 18, 16, 4>}, {pipeline_mode = #tpu.pipeline_mode<synchronous>, transform_indices = @transform_1, window_bounds = array<i64: 3, 12, 64>}, {pipeline_mode = #tpu.pipeline_mode<synchronous>, transform_indices = @transform_2, window_bounds = array<i64: 1, 64>}, {transform_indices = @transform_3, window_bounds = array<i64: 1, 16, 16, 64>}]} {
    %c0 = arith.constant 0 : index
    %c0_0 = arith.constant 0 : index
    %c0_1 = arith.constant 0 : index
    %c0_2 = arith.constant 0 : index
    %0 = vector.load %arg1[%c0, %c0_0, %c0_1, %c0_2] : memref<1x18x16x4xf32, #tpu.memory_space<vmem>>, vector<1x18x16x4xf32>
    %1 = vector.shape_cast %0 : vector<1x18x16x4xf32> to vector<18x16x4xf32>
    %2 = vector.shape_cast %1 : vector<18x16x4xf32> to vector<288x4xf32>
    %cst = arith.constant dense<0.000000e+00> : vector<4xf32>
    %3 = vector.multi_reduction <add>, %2, %cst [0] : vector<288x4xf32> to vector<4xf32>
    %4 = vector.shape_cast %3 : vector<4xf32> to vector<1x4xf32>
    %5 = arith.mulf %2, %2 : vector<288x4xf32>
    %cst_3 = arith.constant dense<0.000000e+00> : vector<4xf32>
    %6 = vector.multi_reduction <add>, %5, %cst_3 [0] : vector<288x4xf32> to vector<4xf32>
    %7 = vector.shape_cast %6 : vector<4xf32> to vector<1x4xf32>
    %cst_4 = arith.constant 2.560000e+02 : f32
    %8 = vector.broadcast %cst_4 : f32 to vector<1x4xf32>
    %9 = arith.divf %4, %8 : vector<1x4xf32>
    %cst_5 = arith.constant 2.560000e+02 : f32
    %10 = vector.broadcast %cst_5 : f32 to vector<1x4xf32>
    %11 = arith.divf %7, %10 : vector<1x4xf32>
    %12 = arith.mulf %9, %9 : vector<1x4xf32>
    %13 = arith.subf %11, %12 : vector<1x4xf32>
    %14 = vector.broadcast %9 : vector<1x4xf32> to vector<288x4xf32>
    %15 = arith.subf %2, %14 : vector<288x4xf32>
    %cst_6 = arith.constant 9.99999974E-6 : f32
    %16 = vector.broadcast %cst_6 : f32 to vector<1x4xf32>
    %17 = arith.addf %13, %16 : vector<1x4xf32>
    %18 = math.rsqrt %17 : vector<1x4xf32>
    %19 = vector.broadcast %18 : vector<1x4xf32> to vector<288x4xf32>
    %20 = arith.mulf %15, %19 : vector<288x4xf32>
    %21 = tpu.iota {dimensions = array<i32: 0>} : vector<18x16x1xi32>
    %c1_i32 = arith.constant 1 : i32
    %22 = vector.broadcast %c1_i32 : i32 to vector<18x16x1xi32>
    %23 = arith.cmpi sge, %21, %22 : vector<18x16x1xi32>
    %c16_i32 = arith.constant 16 : i32
    %24 = vector.broadcast %c16_i32 : i32 to vector<18x16x1xi32>
    %25 = arith.cmpi sle, %21, %24 : vector<18x16x1xi32>
    %26 = arith.andi %23, %25 : vector<18x16x1xi1>
    %27 = vector.shape_cast %20 : vector<288x4xf32> to vector<18x16x4xf32>
    %cst_7 = arith.constant 0.000000e+00 : f32
    %28 = vector.shape_cast %26 : vector<18x16x1xi1> to vector<18x16x1xi1>
    %29 = vector.broadcast %28 : vector<18x16x1xi1> to vector<18x16x4xi1>
    %30 = vector.broadcast %cst_7 : f32 to vector<18x16x4xf32>
    %31 = arith.select %29, %27, %30 : vector<18x16x4xi1>, vector<18x16x4xf32>
    %32 = tpu.iota {dimensions = array<i32: 1>} : vector<18x16x1xi32>
    %c1_i32_8 = arith.constant 1 : i32
    %33 = vector.broadcast %c1_i32_8 : i32 to vector<18x16x1xi32>
    %34 = arith.cmpi sge, %32, %33 : vector<18x16x1xi32>
    %c1_i32_9 = arith.constant 1 : i32
    %35 = tpu.dynamic_rotate %31 by %c1_i32_9 dim 1 : vector<18x16x4xf32>, i32 -> vector<18x16x4xf32>
    %cst_10 = arith.constant 0.000000e+00 : f32
    %36 = vector.shape_cast %34 : vector<18x16x1xi1> to vector<18x16x1xi1>
    %37 = vector.broadcast %36 : vector<18x16x1xi1> to vector<18x16x4xi1>
    %38 = vector.broadcast %cst_10 : f32 to vector<18x16x4xf32>
    %39 = arith.select %37, %35, %38 : vector<18x16x4xi1>, vector<18x16x4xf32>
    %c15_i32 = arith.constant 15 : i32
    %40 = vector.broadcast %c15_i32 : i32 to vector<18x16x1xi32>
    %41 = arith.cmpi slt, %32, %40 : vector<18x16x1xi32>
    %c15_i32_11 = arith.constant 15 : i32
    %42 = tpu.dynamic_rotate %31 by %c15_i32_11 dim 1 : vector<18x16x4xf32>, i32 -> vector<18x16x4xf32>
    %cst_12 = arith.constant 0.000000e+00 : f32
    %43 = vector.shape_cast %41 : vector<18x16x1xi1> to vector<18x16x1xi1>
    %44 = vector.broadcast %43 : vector<18x16x1xi1> to vector<18x16x4xi1>
    %45 = vector.broadcast %cst_12 : f32 to vector<18x16x4xf32>
    %46 = arith.select %44, %42, %45 : vector<18x16x4xi1>, vector<18x16x4xf32>
    %47 = tpu.concatenate %39, %31, %46 in 2 : vector<18x16x4xf32>, vector<18x16x4xf32>, vector<18x16x4xf32> -> vector<18x16x12xf32>
    %48 = arith.truncf %47 : vector<18x16x12xf32> to vector<18x16x12xbf16>
    %cst_13 = arith.constant 0.000000e+00 : f32
    %49 = vector.broadcast %cst_13 : f32 to vector<256x64xf32>
    %50 = vector.extract_strided_slice %48 {offsets = [0, 0, 0], sizes = [16, 16, 12], strides = [1, 1, 1]} : vector<18x16x12xbf16> to vector<16x16x12xbf16>
    %51 = vector.shape_cast %50 : vector<16x16x12xbf16> to vector<256x12xbf16>
    %c0_14 = arith.constant 0 : index
    %c0_15 = arith.constant 0 : index
    %c0_16 = arith.constant 0 : index
    %52 = vector.load %arg2[%c0_14, %c0_15, %c0_16] : memref<3x12x64xbf16, #tpu.memory_space<vmem>>, vector<1x12x64xbf16>
    %53 = vector.shape_cast %52 : vector<1x12x64xbf16> to vector<12x64xbf16>
    %cst_17 = arith.constant dense<0.000000e+00> : vector<256x64xf32>
    %54 = tpu.matmul %51, %53, %cst_17 {dimension_numbers = #tpu.dot_dimension_numbers<[1], [0], [0], [1], [0, 0, 1, 1], [], []>} : vector<256x12xbf16>, vector<12x64xbf16>, vector<256x64xf32> -> vector<256x64xf32>
    %55 = arith.addf %49, %54 : vector<256x64xf32>
    %56 = vector.extract_strided_slice %48 {offsets = [1, 0, 0], sizes = [16, 16, 12], strides = [1, 1, 1]} : vector<18x16x12xbf16> to vector<16x16x12xbf16>
    %57 = vector.shape_cast %56 : vector<16x16x12xbf16> to vector<256x12xbf16>
    %c1 = arith.constant 1 : index
    %c0_18 = arith.constant 0 : index
    %c0_19 = arith.constant 0 : index
    %58 = vector.load %arg2[%c1, %c0_18, %c0_19] : memref<3x12x64xbf16, #tpu.memory_space<vmem>>, vector<1x12x64xbf16>
    %59 = vector.shape_cast %58 : vector<1x12x64xbf16> to vector<12x64xbf16>
    %cst_20 = arith.constant dense<0.000000e+00> : vector<256x64xf32>
    %60 = tpu.matmul %57, %59, %cst_20 {dimension_numbers = #tpu.dot_dimension_numbers<[1], [0], [0], [1], [0, 0, 1, 1], [], []>} : vector<256x12xbf16>, vector<12x64xbf16>, vector<256x64xf32> -> vector<256x64xf32>
    %61 = arith.addf %55, %60 : vector<256x64xf32>
    %62 = vector.extract_strided_slice %48 {offsets = [2, 0, 0], sizes = [16, 16, 12], strides = [1, 1, 1]} : vector<18x16x12xbf16> to vector<16x16x12xbf16>
    %63 = vector.shape_cast %62 : vector<16x16x12xbf16> to vector<256x12xbf16>
    %c2 = arith.constant 2 : index
    %c0_21 = arith.constant 0 : index
    %c0_22 = arith.constant 0 : index
    %64 = vector.load %arg2[%c2, %c0_21, %c0_22] : memref<3x12x64xbf16, #tpu.memory_space<vmem>>, vector<1x12x64xbf16>
    %65 = vector.shape_cast %64 : vector<1x12x64xbf16> to vector<12x64xbf16>
    %cst_23 = arith.constant dense<0.000000e+00> : vector<256x64xf32>
    %66 = tpu.matmul %63, %65, %cst_23 {dimension_numbers = #tpu.dot_dimension_numbers<[1], [0], [0], [1], [0, 0, 1, 1], [], []>} : vector<256x12xbf16>, vector<12x64xbf16>, vector<256x64xf32> -> vector<256x64xf32>
    %67 = arith.addf %61, %66 : vector<256x64xf32>
    %c0_24 = arith.constant 0 : index
    %c0_25 = arith.constant 0 : index
    %68 = vector.load %arg3[%c0_24, %c0_25] : memref<1x64xf32, #tpu.memory_space<vmem>>, vector<1x64xf32>
    %69 = vector.broadcast %68 : vector<1x64xf32> to vector<256x64xf32>
    %70 = arith.addf %67, %69 : vector<256x64xf32>
    %cst_26 = arith.constant 0.000000e+00 : f32
    %71 = vector.broadcast %cst_26 : f32 to vector<256x64xf32>
    %72 = arith.cmpf ogt, %70, %71 : vector<256x64xf32>
    %cst_27 = arith.constant 1.000000e-01 : f32
    %73 = vector.broadcast %cst_27 : f32 to vector<256x64xf32>
    %74 = arith.mulf %73, %70 : vector<256x64xf32>
    %75 = arith.select %72, %70, %74 : vector<256x64xi1>, vector<256x64xf32>
    %cst_28 = arith.constant dense<0.000000e+00> : vector<64xf32>
    %76 = vector.multi_reduction <add>, %75, %cst_28 [0] : vector<256x64xf32> to vector<64xf32>
    %77 = vector.shape_cast %76 : vector<64xf32> to vector<1x64xf32>
    %cst_29 = arith.constant 2.560000e+02 : f32
    %78 = vector.broadcast %cst_29 : f32 to vector<1x64xf32>
    %79 = arith.divf %77, %78 : vector<1x64xf32>
    %80 = vector.broadcast %79 : vector<1x64xf32> to vector<256x64xf32>
    %81 = arith.subf %75, %80 : vector<256x64xf32>
    %82 = arith.mulf %81, %81 : vector<256x64xf32>
    %cst_30 = arith.constant dense<0.000000e+00> : vector<64xf32>
    %83 = vector.multi_reduction <add>, %82, %cst_30 [0] : vector<256x64xf32> to vector<64xf32>
    %84 = vector.shape_cast %83 : vector<64xf32> to vector<1x64xf32>
    %cst_31 = arith.constant 2.560000e+02 : f32
    %85 = vector.broadcast %cst_31 : f32 to vector<1x64xf32>
    %86 = arith.divf %84, %85 : vector<1x64xf32>
    %87 = vector.broadcast %79 : vector<1x64xf32> to vector<256x64xf32>
    %88 = arith.subf %75, %87 : vector<256x64xf32>
    %cst_32 = arith.constant 9.99999974E-6 : f32
    %89 = vector.broadcast %cst_32 : f32 to vector<1x64xf32>
    %90 = arith.addf %86, %89 : vector<1x64xf32>
    %91 = math.rsqrt %90 : vector<1x64xf32>
    %92 = vector.broadcast %91 : vector<1x64xf32> to vector<256x64xf32>
    %93 = arith.mulf %88, %92 : vector<256x64xf32>
    %94 = vector.shape_cast %93 : vector<256x64xf32> to vector<1x16x16x64xf32>
    %95 = arith.truncf %94 : vector<1x16x16x64xf32> to vector<1x16x16x64xbf16>
    %c0_33 = arith.constant 0 : index
    %c0_34 = arith.constant 0 : index
    %c0_35 = arith.constant 0 : index
    %c0_36 = arith.constant 0 : index
    %96 = vector.load %arg4[%c0_33, %c0_34, %c0_35, %c0_36] : memref<1x16x16x64xbf16, #tpu.memory_space<vmem>>, vector<1x16x16x64xbf16>
    tpu.vector_store %arg4[%c0_33, %c0_34, %c0_35, %c0_36], %95 {strides = array<i32>} : memref<1x16x16x64xbf16, #tpu.memory_space<vmem>>, vector<1x16x16x64xbf16>,
    return
  }
  func.func @transform_0(%arg0: i32) -> (i32, i32, i32, i32) {
    %c0_i32 = arith.constant 0 : i32
    %c0_i32_0 = arith.constant 0 : i32
    %c0_i32_1 = arith.constant 0 : i32
    %c0_i32_2 = arith.constant 0 : i32
    return %arg0, %c0_i32, %c0_i32_0, %c0_i32_1 : i32, i32, i32, i32
  }
  func.func @transform_1(%arg0: i32) -> (i32, i32, i32) {
    %c0_i32 = arith.constant 0 : i32
    %c0_i32_0 = arith.constant 0 : i32
    %c0_i32_1 = arith.constant 0 : i32
    %c0_i32_2 = arith.constant 0 : i32
    return %c0_i32, %c0_i32_0, %c0_i32_1 : i32, i32, i32
  }
  func.func @transform_2(%arg0: i32) -> (i32, i32) {
    %c0_i32 = arith.constant 0 : i32
    %c0_i32_0 = arith.constant 0 : i32
    %c0_i32_1 = arith.constant 0 : i32
    return %c0_i32, %c0_i32_0 : i32, i32
  }
  func.func @transform_3(%arg0: i32) -> (i32, i32, i32, i32) {
    %c0_i32 = arith.constant 0 : i32
    %c0_i32_0 = arith.constant 0 : i32
    %c0_i32_1 = arith.constant 0 : i32
    %c0_i32_2 = arith.constant 0 : i32
    return %arg0, %c0_i32, %c0_i32_0, %c0_i32_1 : i32, i32, i32, i32
  }
}

module attributes {stable_mosaic.version = 11 : i64} {
  func.func @_conv_block_kernel(%arg0: i32, %arg1: memref<1x18x16x64xbf16, #tpu.memory_space<vmem>>, %arg2: memref<3x192x64xbf16, #tpu.memory_space<vmem>>, %arg3: memref<1x64xf32, #tpu.memory_space<vmem>>, %arg4: memref<1x16x16x64xbf16, #tpu.memory_space<vmem>>) attributes {dimension_semantics = [#tpu.dimension_semantics<parallel>], iteration_bounds = array<i64: 2>, scalar_prefetch = 0 : i64, scratch_operands = 0 : i64, tpu.core_type = #tpu.core_type<tc>, window_params = [{transform_indices = @transform_0, window_bounds = array<i64: 1, 18, 16, 64>}, {pipeline_mode = #tpu.pipeline_mode<synchronous>, transform_indices = @transform_1, window_bounds = array<i64: 3, 192, 64>}, {pipeline_mode = #tpu.pipeline_mode<synchronous>, transform_indices = @transform_2, window_bounds = array<i64: 1, 64>}, {transform_indices = @transform_3, window_bounds = array<i64: 1, 16, 16, 64>}]} {
    %c0 = arith.constant 0 : index
    %c0_0 = arith.constant 0 : index
    %c0_1 = arith.constant 0 : index
    %c0_2 = arith.constant 0 : index
    %0 = vector.load %arg1[%c0, %c0_0, %c0_1, %c0_2] : memref<1x18x16x64xbf16, #tpu.memory_space<vmem>>, vector<1x18x16x64xbf16>
    %1 = vector.shape_cast %0 : vector<1x18x16x64xbf16> to vector<18x16x64xbf16>
    %2 = arith.extf %1 : vector<18x16x64xbf16> to vector<18x16x64xf32>
    %3 = tpu.iota {dimensions = array<i32: 1>} : vector<18x16x1xi32>
    %c1_i32 = arith.constant 1 : i32
    %4 = vector.broadcast %c1_i32 : i32 to vector<18x16x1xi32>
    %5 = arith.cmpi sge, %3, %4 : vector<18x16x1xi32>
    %c1_i32_3 = arith.constant 1 : i32
    %6 = tpu.dynamic_rotate %2 by %c1_i32_3 dim 1 : vector<18x16x64xf32>, i32 -> vector<18x16x64xf32>
    %cst = arith.constant 0.000000e+00 : f32
    %7 = vector.shape_cast %5 : vector<18x16x1xi1> to vector<18x16x1xi1>
    %8 = vector.broadcast %7 : vector<18x16x1xi1> to vector<18x16x64xi1>
    %9 = vector.broadcast %cst : f32 to vector<18x16x64xf32>
    %10 = arith.select %8, %6, %9 : vector<18x16x64xi1>, vector<18x16x64xf32>
    %c15_i32 = arith.constant 15 : i32
    %11 = vector.broadcast %c15_i32 : i32 to vector<18x16x1xi32>
    %12 = arith.cmpi slt, %3, %11 : vector<18x16x1xi32>
    %c15_i32_4 = arith.constant 15 : i32
    %13 = tpu.dynamic_rotate %2 by %c15_i32_4 dim 1 : vector<18x16x64xf32>, i32 -> vector<18x16x64xf32>
    %cst_5 = arith.constant 0.000000e+00 : f32
    %14 = vector.shape_cast %12 : vector<18x16x1xi1> to vector<18x16x1xi1>
    %15 = vector.broadcast %14 : vector<18x16x1xi1> to vector<18x16x64xi1>
    %16 = vector.broadcast %cst_5 : f32 to vector<18x16x64xf32>
    %17 = arith.select %15, %13, %16 : vector<18x16x64xi1>, vector<18x16x64xf32>
    %18 = tpu.concatenate %10, %2, %17 in 2 : vector<18x16x64xf32>, vector<18x16x64xf32>, vector<18x16x64xf32> -> vector<18x16x192xf32>
    %19 = arith.truncf %18 : vector<18x16x192xf32> to vector<18x16x192xbf16>
    %cst_6 = arith.constant 0.000000e+00 : f32
    %20 = vector.broadcast %cst_6 : f32 to vector<256x64xf32>
    %21 = vector.extract_strided_slice %19 {offsets = [0, 0, 0], sizes = [16, 16, 192], strides = [1, 1, 1]} : vector<18x16x192xbf16> to vector<16x16x192xbf16>
    %22 = vector.shape_cast %21 : vector<16x16x192xbf16> to vector<256x192xbf16>
    %c0_7 = arith.constant 0 : index
    %c0_8 = arith.constant 0 : index
    %c0_9 = arith.constant 0 : index
    %23 = vector.load %arg2[%c0_7, %c0_8, %c0_9] : memref<3x192x64xbf16, #tpu.memory_space<vmem>>, vector<1x192x64xbf16>
    %24 = vector.shape_cast %23 : vector<1x192x64xbf16> to vector<192x64xbf16>
    %cst_10 = arith.constant dense<0.000000e+00> : vector<256x64xf32>
    %25 = tpu.matmul %22, %24, %cst_10 {dimension_numbers = #tpu.dot_dimension_numbers<[1], [0], [0], [1], [0, 0, 1, 1], [], []>} : vector<256x192xbf16>, vector<192x64xbf16>, vector<256x64xf32> -> vector<256x64xf32>
    %26 = arith.addf %20, %25 : vector<256x64xf32>
    %27 = vector.extract_strided_slice %19 {offsets = [1, 0, 0], sizes = [16, 16, 192], strides = [1, 1, 1]} : vector<18x16x192xbf16> to vector<16x16x192xbf16>
    %28 = vector.shape_cast %27 : vector<16x16x192xbf16> to vector<256x192xbf16>
    %c1 = arith.constant 1 : index
    %c0_11 = arith.constant 0 : index
    %c0_12 = arith.constant 0 : index
    %29 = vector.load %arg2[%c1, %c0_11, %c0_12] : memref<3x192x64xbf16, #tpu.memory_space<vmem>>, vector<1x192x64xbf16>
    %30 = vector.shape_cast %29 : vector<1x192x64xbf16> to vector<192x64xbf16>
    %cst_13 = arith.constant dense<0.000000e+00> : vector<256x64xf32>
    %31 = tpu.matmul %28, %30, %cst_13 {dimension_numbers = #tpu.dot_dimension_numbers<[1], [0], [0], [1], [0, 0, 1, 1], [], []>} : vector<256x192xbf16>, vector<192x64xbf16>, vector<256x64xf32> -> vector<256x64xf32>
    %32 = arith.addf %26, %31 : vector<256x64xf32>
    %33 = vector.extract_strided_slice %19 {offsets = [2, 0, 0], sizes = [16, 16, 192], strides = [1, 1, 1]} : vector<18x16x192xbf16> to vector<16x16x192xbf16>
    %34 = vector.shape_cast %33 : vector<16x16x192xbf16> to vector<256x192xbf16>
    %c2 = arith.constant 2 : index
    %c0_14 = arith.constant 0 : index
    %c0_15 = arith.constant 0 : index
    %35 = vector.load %arg2[%c2, %c0_14, %c0_15] : memref<3x192x64xbf16, #tpu.memory_space<vmem>>, vector<1x192x64xbf16>
    %36 = vector.shape_cast %35 : vector<1x192x64xbf16> to vector<192x64xbf16>
    %cst_16 = arith.constant dense<0.000000e+00> : vector<256x64xf32>
    %37 = tpu.matmul %34, %36, %cst_16 {dimension_numbers = #tpu.dot_dimension_numbers<[1], [0], [0], [1], [0, 0, 1, 1], [], []>} : vector<256x192xbf16>, vector<192x64xbf16>, vector<256x64xf32> -> vector<256x64xf32>
    %38 = arith.addf %32, %37 : vector<256x64xf32>
    %c0_17 = arith.constant 0 : index
    %c0_18 = arith.constant 0 : index
    %39 = vector.load %arg3[%c0_17, %c0_18] : memref<1x64xf32, #tpu.memory_space<vmem>>, vector<1x64xf32>
    %40 = vector.broadcast %39 : vector<1x64xf32> to vector<256x64xf32>
    %41 = arith.addf %38, %40 : vector<256x64xf32>
    %cst_19 = arith.constant 0.000000e+00 : f32
    %42 = vector.broadcast %cst_19 : f32 to vector<256x64xf32>
    %43 = arith.cmpf ogt, %41, %42 : vector<256x64xf32>
    %cst_20 = arith.constant 1.000000e-01 : f32
    %44 = vector.broadcast %cst_20 : f32 to vector<256x64xf32>
    %45 = arith.mulf %44, %41 : vector<256x64xf32>
    %46 = arith.select %43, %41, %45 : vector<256x64xi1>, vector<256x64xf32>
    %cst_21 = arith.constant dense<0.000000e+00> : vector<64xf32>
    %47 = vector.multi_reduction <add>, %46, %cst_21 [0] : vector<256x64xf32> to vector<64xf32>
    %48 = vector.shape_cast %47 : vector<64xf32> to vector<1x64xf32>
    %cst_22 = arith.constant 2.560000e+02 : f32
    %49 = vector.broadcast %cst_22 : f32 to vector<1x64xf32>
    %50 = arith.divf %48, %49 : vector<1x64xf32>
    %51 = vector.broadcast %50 : vector<1x64xf32> to vector<256x64xf32>
    %52 = arith.subf %46, %51 : vector<256x64xf32>
    %53 = arith.mulf %52, %52 : vector<256x64xf32>
    %cst_23 = arith.constant dense<0.000000e+00> : vector<64xf32>
    %54 = vector.multi_reduction <add>, %53, %cst_23 [0] : vector<256x64xf32> to vector<64xf32>
    %55 = vector.shape_cast %54 : vector<64xf32> to vector<1x64xf32>
    %cst_24 = arith.constant 2.560000e+02 : f32
    %56 = vector.broadcast %cst_24 : f32 to vector<1x64xf32>
    %57 = arith.divf %55, %56 : vector<1x64xf32>
    %58 = vector.broadcast %50 : vector<1x64xf32> to vector<256x64xf32>
    %59 = arith.subf %46, %58 : vector<256x64xf32>
    %cst_25 = arith.constant 9.99999974E-6 : f32
    %60 = vector.broadcast %cst_25 : f32 to vector<1x64xf32>
    %61 = arith.addf %57, %60 : vector<1x64xf32>
    %62 = math.rsqrt %61 : vector<1x64xf32>
    %63 = vector.broadcast %62 : vector<1x64xf32> to vector<256x64xf32>
    %64 = arith.mulf %59, %63 : vector<256x64xf32>
    %65 = vector.shape_cast %64 : vector<256x64xf32> to vector<1x16x16x64xf32>
    %66 = arith.truncf %65 : vector<1x16x16x64xf32> to vector<1x16x16x64xbf16>
    %c0_26 = arith.constant 0 : index
    %c0_27 = arith.constant 0 : index
    %c0_28 = arith.constant 0 : index
    %c0_29 = arith.constant 0 : index
    %67 = vector.load %arg4[%c0_26, %c0_27, %c0_28, %c0_29] : memref<1x16x16x64xbf16, #tpu.memory_space<vmem>>, vector<1x16x16x64xbf16>
    tpu.vector_store %arg4[%c0_26, %c0_27, %c0_28, %c0_29], %66 {strides = array<i32>} : memref<1x16x16x64xbf16, #tpu.memory_space<vmem>>, vector<1x16x16x64xbf16>,
    return
  }
  func.func @transform_0(%arg0: i32) -> (i32, i32, i32, i32) {
    %c0_i32 = arith.constant 0 : i32
    %c0_i32_0 = arith.constant 0 : i32
    %c0_i32_1 = arith.constant 0 : i32
    %c0_i32_2 = arith.constant 0 : i32
    return %arg0, %c0_i32, %c0_i32_0, %c0_i32_1 : i32, i32, i32, i32
  }
  func.func @transform_1(%arg0: i32) -> (i32, i32, i32) {
    %c0_i32 = arith.constant 0 : i32
    %c0_i32_0 = arith.constant 0 : i32
    %c0_i32_1 = arith.constant 0 : i32
    %c0_i32_2 = arith.constant 0 : i32
    return %c0_i32, %c0_i32_0, %c0_i32_1 : i32, i32, i32
  }
  func.func @transform_2(%arg0: i32) -> (i32, i32) {
    %c0_i32 = arith.constant 0 : i32
    %c0_i32_0 = arith.constant 0 : i32
    %c0_i32_1 = arith.constant 0 : i32
    return %c0_i32, %c0_i32_0 : i32, i32
  }
  func.func @transform_3(%arg0: i32) -> (i32, i32, i32, i32) {
    %c0_i32 = arith.constant 0 : i32
    %c0_i32_0 = arith.constant 0 : i32
    %c0_i32_1 = arith.constant 0 : i32
    %c0_i32_2 = arith.constant 0 : i32
    return %arg0, %c0_i32, %c0_i32_0, %c0_i32_1 : i32, i32, i32, i32
  }
}

module attributes {stable_mosaic.version = 11 : i64} {
  func.func @_matching_kernel(%arg0: i32, %arg1: i32, %arg2: memref<1x8x16x64xbf16, #tpu.memory_space<vmem>>, %arg3: memref<1x8x16x64xbf16, #tpu.memory_space<vmem>>, %arg4: memref<64x128xbf16, #tpu.memory_space<vmem>>, %arg5: memref<64x128xbf16, #tpu.memory_space<vmem>>, %arg6: memref<1x128xf32, #tpu.memory_space<vmem>>, %arg7: memref<1x128xf32, #tpu.memory_space<vmem>>, %arg8: memref<1x1xf32, #tpu.memory_space<smem>>, %arg9: memref<1x8x128xf32, #tpu.memory_space<vmem>>) attributes {dimension_semantics = [#tpu.dimension_semantics<parallel>, #tpu.dimension_semantics<parallel>], iteration_bounds = array<i64: 2, 2>, scalar_prefetch = 0 : i64, scratch_operands = 0 : i64, tpu.core_type = #tpu.core_type<tc>, window_params = [{transform_indices = @transform_0, window_bounds = array<i64: 1, 8, 16, 64>}, {transform_indices = @transform_1, window_bounds = array<i64: 1, 8, 16, 64>}, {pipeline_mode = #tpu.pipeline_mode<synchronous>, transform_indices = @transform_2, window_bounds = array<i64: 64, 128>}, {pipeline_mode = #tpu.pipeline_mode<synchronous>, transform_indices = @transform_3, window_bounds = array<i64: 64, 128>}, {pipeline_mode = #tpu.pipeline_mode<synchronous>, transform_indices = @transform_4, window_bounds = array<i64: 1, 128>}, {pipeline_mode = #tpu.pipeline_mode<synchronous>, transform_indices = @transform_5, window_bounds = array<i64: 1, 128>}, {transform_indices = @transform_6, window_bounds = array<i64: 1, 1>}, {transform_indices = @transform_7, window_bounds = array<i64: 1, 8, 128>}]} {
    %c0 = arith.constant 0 : index
    %c0_0 = arith.constant 0 : index
    %c0_1 = arith.constant 0 : index
    %c0_2 = arith.constant 0 : index
    %0 = vector.load %arg2[%c0, %c0_0, %c0_1, %c0_2] : memref<1x8x16x64xbf16, #tpu.memory_space<vmem>>, vector<1x8x16x64xbf16>
    %1 = vector.shape_cast %0 : vector<1x8x16x64xbf16> to vector<8x16x64xbf16>
    %2 = vector.shape_cast %1 : vector<8x16x64xbf16> to vector<128x64xbf16>
    %c0_3 = arith.constant 0 : index
    %c0_4 = arith.constant 0 : index
    %c0_5 = arith.constant 0 : index
    %c0_6 = arith.constant 0 : index
    %3 = vector.load %arg3[%c0_3, %c0_4, %c0_5, %c0_6] : memref<1x8x16x64xbf16, #tpu.memory_space<vmem>>, vector<1x8x16x64xbf16>
    %4 = vector.shape_cast %3 : vector<1x8x16x64xbf16> to vector<8x16x64xbf16>
    %5 = vector.shape_cast %4 : vector<8x16x64xbf16> to vector<128x64xbf16>
    %c0_7 = arith.constant 0 : index
    %c0_8 = arith.constant 0 : index
    %6 = vector.load %arg4[%c0_7, %c0_8] : memref<64x128xbf16, #tpu.memory_space<vmem>>, vector<64x128xbf16>
    %cst = arith.constant dense<0.000000e+00> : vector<128x128xf32>
    %7 = tpu.matmul %2, %6, %cst {dimension_numbers = #tpu.dot_dimension_numbers<[1], [0], [0], [1], [0, 0, 1, 1], [], []>} : vector<128x64xbf16>, vector<64x128xbf16>, vector<128x128xf32> -> vector<128x128xf32>
    %8 = vector.shape_cast %7 : vector<128x128xf32> to vector<8x16x128xf32>
    %c0_9 = arith.constant 0 : index
    %c0_10 = arith.constant 0 : index
    %9 = vector.load %arg5[%c0_9, %c0_10] : memref<64x128xbf16, #tpu.memory_space<vmem>>, vector<64x128xbf16>
    %cst_11 = arith.constant dense<0.000000e+00> : vector<128x128xf32>
    %10 = tpu.matmul %5, %9, %cst_11 {dimension_numbers = #tpu.dot_dimension_numbers<[1], [0], [0], [1], [0, 0, 1, 1], [], []>} : vector<128x64xbf16>, vector<64x128xbf16>, vector<128x128xf32> -> vector<128x128xf32>
    %11 = vector.shape_cast %10 : vector<128x128xf32> to vector<8x16x128xf32>
    %c0_12 = arith.constant 0 : index
    %c0_13 = arith.constant 0 : index
    %12 = vector.load %arg6[%c0_12, %c0_13] : memref<1x128xf32, #tpu.memory_space<vmem>>, vector<1x128xf32>
    %13 = vector.shape_cast %12 : vector<1x128xf32> to vector<1x1x128xf32>
    %c0_14 = arith.constant 0 : index
    %c0_15 = arith.constant 0 : index
    %14 = vector.load %arg7[%c0_14, %c0_15] : memref<1x128xf32, #tpu.memory_space<vmem>>, vector<1x128xf32>
    %15 = vector.shape_cast %14 : vector<1x128xf32> to vector<1x1x128xf32>
    %c0_16 = arith.constant 0 : index
    %c0_17 = arith.constant 0 : index
    %16 = memref.load %arg8[%c0_16, %c0_17] : memref<1x1xf32, #tpu.memory_space<smem>>
    %17 = tpu.iota {dimensions = array<i32: 1>} : vector<8x16x1xi32>
    %c0_i32 = arith.constant 0 : i32
    %18 = vector.broadcast %c0_i32 : i32 to vector<8x16x1xi32>
    %19 = arith.cmpi sge, %17, %18 : vector<8x16x1xi32>
    %20 = arith.addf %8, %11 : vector<8x16x128xf32>
    %cst_18 = arith.constant 0.000000e+00 : f32
    %21 = vector.shape_cast %19 : vector<8x16x1xi1> to vector<8x16x1xi1>
    %22 = vector.broadcast %21 : vector<8x16x1xi1> to vector<8x16x128xi1>
    %23 = vector.broadcast %cst_18 : f32 to vector<8x16x128xf32>
    %24 = arith.select %22, %20, %23 : vector<8x16x128xi1>, vector<8x16x128xf32>
    %25 = vector.broadcast %13 : vector<1x1x128xf32> to vector<8x16x128xf32>
    %26 = arith.addf %24, %25 : vector<8x16x128xf32>
    %cst_19 = arith.constant 0.000000e+00 : f32
    %27 = vector.broadcast %cst_19 : f32 to vector<8x16x128xf32>
    %28 = arith.cmpf ogt, %26, %27 : vector<8x16x128xf32>
    %cst_20 = arith.constant 1.000000e-01 : f32
    %29 = vector.broadcast %cst_20 : f32 to vector<8x16x128xf32>
    %30 = arith.mulf %29, %26 : vector<8x16x128xf32>
    %31 = arith.select %28, %26, %30 : vector<8x16x128xi1>, vector<8x16x128xf32>
    %32 = vector.broadcast %15 : vector<1x1x128xf32> to vector<8x16x128xf32>
    %33 = arith.mulf %31, %32 : vector<8x16x128xf32>
    %cst_21 = arith.constant dense<0.000000e+00> : vector<8x16xf32>
    %34 = vector.multi_reduction <add>, %33, %cst_21 [2] : vector<8x16x128xf32> to vector<8x16xf32>
    %c1_i32 = arith.constant 1 : i32
    %35 = tpu.dynamic_rotate %11 by %c1_i32 dim 1 : vector<8x16x128xf32>, i32 -> vector<8x16x128xf32>
    %c1_i32_22 = arith.constant 1 : i32
    %36 = vector.broadcast %c1_i32_22 : i32 to vector<8x16x1xi32>
    %37 = arith.cmpi sge, %17, %36 : vector<8x16x1xi32>
    %38 = arith.addf %8, %35 : vector<8x16x128xf32>
    %cst_23 = arith.constant 0.000000e+00 : f32
    %39 = vector.shape_cast %37 : vector<8x16x1xi1> to vector<8x16x1xi1>
    %40 = vector.broadcast %39 : vector<8x16x1xi1> to vector<8x16x128xi1>
    %41 = vector.broadcast %cst_23 : f32 to vector<8x16x128xf32>
    %42 = arith.select %40, %38, %41 : vector<8x16x128xi1>, vector<8x16x128xf32>
    %43 = vector.broadcast %13 : vector<1x1x128xf32> to vector<8x16x128xf32>
    %44 = arith.addf %42, %43 : vector<8x16x128xf32>
    %cst_24 = arith.constant 0.000000e+00 : f32
    %45 = vector.broadcast %cst_24 : f32 to vector<8x16x128xf32>
    %46 = arith.cmpf ogt, %44, %45 : vector<8x16x128xf32>
    %cst_25 = arith.constant 1.000000e-01 : f32
    %47 = vector.broadcast %cst_25 : f32 to vector<8x16x128xf32>
    %48 = arith.mulf %47, %44 : vector<8x16x128xf32>
    %49 = arith.select %46, %44, %48 : vector<8x16x128xi1>, vector<8x16x128xf32>
    %50 = vector.broadcast %15 : vector<1x1x128xf32> to vector<8x16x128xf32>
    %51 = arith.mulf %49, %50 : vector<8x16x128xf32>
    %cst_26 = arith.constant dense<0.000000e+00> : vector<8x16xf32>
    %52 = vector.multi_reduction <add>, %51, %cst_26 [2] : vector<8x16x128xf32> to vector<8x16xf32>
    %c2_i32 = arith.constant 2 : i32
    %53 = tpu.dynamic_rotate %11 by %c2_i32 dim 1 : vector<8x16x128xf32>, i32 -> vector<8x16x128xf32>
    %c2_i32_27 = arith.constant 2 : i32
    %54 = vector.broadcast %c2_i32_27 : i32 to vector<8x16x1xi32>
    %55 = arith.cmpi sge, %17, %54 : vector<8x16x1xi32>
    %56 = arith.addf %8, %53 : vector<8x16x128xf32>
    %cst_28 = arith.constant 0.000000e+00 : f32
    %57 = vector.shape_cast %55 : vector<8x16x1xi1> to vector<8x16x1xi1>
    %58 = vector.broadcast %57 : vector<8x16x1xi1> to vector<8x16x128xi1>
    %59 = vector.broadcast %cst_28 : f32 to vector<8x16x128xf32>
    %60 = arith.select %58, %56, %59 : vector<8x16x128xi1>, vector<8x16x128xf32>
    %61 = vector.broadcast %13 : vector<1x1x128xf32> to vector<8x16x128xf32>
    %62 = arith.addf %60, %61 : vector<8x16x128xf32>
    %cst_29 = arith.constant 0.000000e+00 : f32
    %63 = vector.broadcast %cst_29 : f32 to vector<8x16x128xf32>
    %64 = arith.cmpf ogt, %62, %63 : vector<8x16x128xf32>
    %cst_30 = arith.constant 1.000000e-01 : f32
    %65 = vector.broadcast %cst_30 : f32 to vector<8x16x128xf32>
    %66 = arith.mulf %65, %62 : vector<8x16x128xf32>
    %67 = arith.select %64, %62, %66 : vector<8x16x128xi1>, vector<8x16x128xf32>
    %68 = vector.broadcast %15 : vector<1x1x128xf32> to vector<8x16x128xf32>
    %69 = arith.mulf %67, %68 : vector<8x16x128xf32>
    %cst_31 = arith.constant dense<0.000000e+00> : vector<8x16xf32>
    %70 = vector.multi_reduction <add>, %69, %cst_31 [2] : vector<8x16x128xf32> to vector<8x16xf32>
    %c3_i32 = arith.constant 3 : i32
    %71 = tpu.dynamic_rotate %11 by %c3_i32 dim 1 : vector<8x16x128xf32>, i32 -> vector<8x16x128xf32>
    %c3_i32_32 = arith.constant 3 : i32
    %72 = vector.broadcast %c3_i32_32 : i32 to vector<8x16x1xi32>
    %73 = arith.cmpi sge, %17, %72 : vector<8x16x1xi32>
    %74 = arith.addf %8, %71 : vector<8x16x128xf32>
    %cst_33 = arith.constant 0.000000e+00 : f32
    %75 = vector.shape_cast %73 : vector<8x16x1xi1> to vector<8x16x1xi1>
    %76 = vector.broadcast %75 : vector<8x16x1xi1> to vector<8x16x128xi1>
    %77 = vector.broadcast %cst_33 : f32 to vector<8x16x128xf32>
    %78 = arith.select %76, %74, %77 : vector<8x16x128xi1>, vector<8x16x128xf32>
    %79 = vector.broadcast %13 : vector<1x1x128xf32> to vector<8x16x128xf32>
    %80 = arith.addf %78, %79 : vector<8x16x128xf32>
    %cst_34 = arith.constant 0.000000e+00 : f32
    %81 = vector.broadcast %cst_34 : f32 to vector<8x16x128xf32>
    %82 = arith.cmpf ogt, %80, %81 : vector<8x16x128xf32>
    %cst_35 = arith.constant 1.000000e-01 : f32
    %83 = vector.broadcast %cst_35 : f32 to vector<8x16x128xf32>
    %84 = arith.mulf %83, %80 : vector<8x16x128xf32>
    %85 = arith.select %82, %80, %84 : vector<8x16x128xi1>, vector<8x16x128xf32>
    %86 = vector.broadcast %15 : vector<1x1x128xf32> to vector<8x16x128xf32>
    %87 = arith.mulf %85, %86 : vector<8x16x128xf32>
    %cst_36 = arith.constant dense<0.000000e+00> : vector<8x16xf32>
    %88 = vector.multi_reduction <add>, %87, %cst_36 [2] : vector<8x16x128xf32> to vector<8x16xf32>
    %c4_i32 = arith.constant 4 : i32
    %89 = tpu.dynamic_rotate %11 by %c4_i32 dim 1 : vector<8x16x128xf32>, i32 -> vector<8x16x128xf32>
    %c4_i32_37 = arith.constant 4 : i32
    %90 = vector.broadcast %c4_i32_37 : i32 to vector<8x16x1xi32>
    %91 = arith.cmpi sge, %17, %90 : vector<8x16x1xi32>
    %92 = arith.addf %8, %89 : vector<8x16x128xf32>
    %cst_38 = arith.constant 0.000000e+00 : f32
    %93 = vector.shape_cast %91 : vector<8x16x1xi1> to vector<8x16x1xi1>
    %94 = vector.broadcast %93 : vector<8x16x1xi1> to vector<8x16x128xi1>
    %95 = vector.broadcast %cst_38 : f32 to vector<8x16x128xf32>
    %96 = arith.select %94, %92, %95 : vector<8x16x128xi1>, vector<8x16x128xf32>
    %97 = vector.broadcast %13 : vector<1x1x128xf32> to vector<8x16x128xf32>
    %98 = arith.addf %96, %97 : vector<8x16x128xf32>
    %cst_39 = arith.constant 0.000000e+00 : f32
    %99 = vector.broadcast %cst_39 : f32 to vector<8x16x128xf32>
    %100 = arith.cmpf ogt, %98, %99 : vector<8x16x128xf32>
    %cst_40 = arith.constant 1.000000e-01 : f32
    %101 = vector.broadcast %cst_40 : f32 to vector<8x16x128xf32>
    %102 = arith.mulf %101, %98 : vector<8x16x128xf32>
    %103 = arith.select %100, %98, %102 : vector<8x16x128xi1>, vector<8x16x128xf32>
    %104 = vector.broadcast %15 : vector<1x1x128xf32> to vector<8x16x128xf32>
    %105 = arith.mulf %103, %104 : vector<8x16x128xf32>
    %cst_41 = arith.constant dense<0.000000e+00> : vector<8x16xf32>
    %106 = vector.multi_reduction <add>, %105, %cst_41 [2] : vector<8x16x128xf32> to vector<8x16xf32>
    %c5_i32 = arith.constant 5 : i32
    %107 = tpu.dynamic_rotate %11 by %c5_i32 dim 1 : vector<8x16x128xf32>, i32 -> vector<8x16x128xf32>
    %c5_i32_42 = arith.constant 5 : i32
    %108 = vector.broadcast %c5_i32_42 : i32 to vector<8x16x1xi32>
    %109 = arith.cmpi sge, %17, %108 : vector<8x16x1xi32>
    %110 = arith.addf %8, %107 : vector<8x16x128xf32>
    %cst_43 = arith.constant 0.000000e+00 : f32
    %111 = vector.shape_cast %109 : vector<8x16x1xi1> to vector<8x16x1xi1>
    %112 = vector.broadcast %111 : vector<8x16x1xi1> to vector<8x16x128xi1>
    %113 = vector.broadcast %cst_43 : f32 to vector<8x16x128xf32>
    %114 = arith.select %112, %110, %113 : vector<8x16x128xi1>, vector<8x16x128xf32>
    %115 = vector.broadcast %13 : vector<1x1x128xf32> to vector<8x16x128xf32>
    %116 = arith.addf %114, %115 : vector<8x16x128xf32>
    %cst_44 = arith.constant 0.000000e+00 : f32
    %117 = vector.broadcast %cst_44 : f32 to vector<8x16x128xf32>
    %118 = arith.cmpf ogt, %116, %117 : vector<8x16x128xf32>
    %cst_45 = arith.constant 1.000000e-01 : f32
    %119 = vector.broadcast %cst_45 : f32 to vector<8x16x128xf32>
    %120 = arith.mulf %119, %116 : vector<8x16x128xf32>
    %121 = arith.select %118, %116, %120 : vector<8x16x128xi1>, vector<8x16x128xf32>
    %122 = vector.broadcast %15 : vector<1x1x128xf32> to vector<8x16x128xf32>
    %123 = arith.mulf %121, %122 : vector<8x16x128xf32>
    %cst_46 = arith.constant dense<0.000000e+00> : vector<8x16xf32>
    %124 = vector.multi_reduction <add>, %123, %cst_46 [2] : vector<8x16x128xf32> to vector<8x16xf32>
    %c6_i32 = arith.constant 6 : i32
    %125 = tpu.dynamic_rotate %11 by %c6_i32 dim 1 : vector<8x16x128xf32>, i32 -> vector<8x16x128xf32>
    %c6_i32_47 = arith.constant 6 : i32
    %126 = vector.broadcast %c6_i32_47 : i32 to vector<8x16x1xi32>
    %127 = arith.cmpi sge, %17, %126 : vector<8x16x1xi32>
    %128 = arith.addf %8, %125 : vector<8x16x128xf32>
    %cst_48 = arith.constant 0.000000e+00 : f32
    %129 = vector.shape_cast %127 : vector<8x16x1xi1> to vector<8x16x1xi1>
    %130 = vector.broadcast %129 : vector<8x16x1xi1> to vector<8x16x128xi1>
    %131 = vector.broadcast %cst_48 : f32 to vector<8x16x128xf32>
    %132 = arith.select %130, %128, %131 : vector<8x16x128xi1>, vector<8x16x128xf32>
    %133 = vector.broadcast %13 : vector<1x1x128xf32> to vector<8x16x128xf32>
    %134 = arith.addf %132, %133 : vector<8x16x128xf32>
    %cst_49 = arith.constant 0.000000e+00 : f32
    %135 = vector.broadcast %cst_49 : f32 to vector<8x16x128xf32>
    %136 = arith.cmpf ogt, %134, %135 : vector<8x16x128xf32>
    %cst_50 = arith.constant 1.000000e-01 : f32
    %137 = vector.broadcast %cst_50 : f32 to vector<8x16x128xf32>
    %138 = arith.mulf %137, %134 : vector<8x16x128xf32>
    %139 = arith.select %136, %134, %138 : vector<8x16x128xi1>, vector<8x16x128xf32>
    %140 = vector.broadcast %15 : vector<1x1x128xf32> to vector<8x16x128xf32>
    %141 = arith.mulf %139, %140 : vector<8x16x128xf32>
    %cst_51 = arith.constant dense<0.000000e+00> : vector<8x16xf32>
    %142 = vector.multi_reduction <add>, %141, %cst_51 [2] : vector<8x16x128xf32> to vector<8x16xf32>
    %c7_i32 = arith.constant 7 : i32
    %143 = tpu.dynamic_rotate %11 by %c7_i32 dim 1 : vector<8x16x128xf32>, i32 -> vector<8x16x128xf32>
    %c7_i32_52 = arith.constant 7 : i32
    %144 = vector.broadcast %c7_i32_52 : i32 to vector<8x16x1xi32>
    %145 = arith.cmpi sge, %17, %144 : vector<8x16x1xi32>
    %146 = arith.addf %8, %143 : vector<8x16x128xf32>
    %cst_53 = arith.constant 0.000000e+00 : f32
    %147 = vector.shape_cast %145 : vector<8x16x1xi1> to vector<8x16x1xi1>
    %148 = vector.broadcast %147 : vector<8x16x1xi1> to vector<8x16x128xi1>
    %149 = vector.broadcast %cst_53 : f32 to vector<8x16x128xf32>
    %150 = arith.select %148, %146, %149 : vector<8x16x128xi1>, vector<8x16x128xf32>
    %151 = vector.broadcast %13 : vector<1x1x128xf32> to vector<8x16x128xf32>
    %152 = arith.addf %150, %151 : vector<8x16x128xf32>
    %cst_54 = arith.constant 0.000000e+00 : f32
    %153 = vector.broadcast %cst_54 : f32 to vector<8x16x128xf32>
    %154 = arith.cmpf ogt, %152, %153 : vector<8x16x128xf32>
    %cst_55 = arith.constant 1.000000e-01 : f32
    %155 = vector.broadcast %cst_55 : f32 to vector<8x16x128xf32>
    %156 = arith.mulf %155, %152 : vector<8x16x128xf32>
    %157 = arith.select %154, %152, %156 : vector<8x16x128xi1>, vector<8x16x128xf32>
    %158 = vector.broadcast %15 : vector<1x1x128xf32> to vector<8x16x128xf32>
    %159 = arith.mulf %157, %158 : vector<8x16x128xf32>
    %cst_56 = arith.constant dense<0.000000e+00> : vector<8x16xf32>
    %160 = vector.multi_reduction <add>, %159, %cst_56 [2] : vector<8x16x128xf32> to vector<8x16xf32>
    %161 = vector.shape_cast %34 : vector<8x16xf32> to vector<1x8x16xf32>
    %162 = vector.shape_cast %52 : vector<8x16xf32> to vector<1x8x16xf32>
    %163 = vector.shape_cast %70 : vector<8x16xf32> to vector<1x8x16xf32>
    %164 = vector.shape_cast %88 : vector<8x16xf32> to vector<1x8x16xf32>
    %165 = vector.shape_cast %106 : vector<8x16xf32> to vector<1x8x16xf32>
    %166 = vector.shape_cast %124 : vector<8x16xf32> to vector<1x8x16xf32>
    %167 = vector.shape_cast %142 : vector<8x16xf32> to vector<1x8x16xf32>
    %168 = vector.shape_cast %160 : vector<8x16xf32> to vector<1x8x16xf32>
    %169 = tpu.concatenate %161, %162, %163, %164, %165, %166, %167, %168 in 0 : vector<1x8x16xf32>, vector<1x8x16xf32>, vector<1x8x16xf32>, vector<1x8x16xf32>, vector<1x8x16xf32>, vector<1x8x16xf32>, vector<1x8x16xf32>, vector<1x8x16xf32> -> vector<8x8x16xf32>
    %170 = vector.broadcast %16 : f32 to vector<8x8x16xf32>
    %171 = arith.addf %169, %170 : vector<8x8x16xf32>
    %172 = vector.shape_cast %171 : vector<8x8x16xf32> to vector<1x8x128xf32>
    %c0_57 = arith.constant 0 : index
    %c0_58 = arith.constant 0 : index
    %c0_59 = arith.constant 0 : index
    %173 = vector.load %arg9[%c0_57, %c0_58, %c0_59] : memref<1x8x128xf32, #tpu.memory_space<vmem>>, vector<1x8x128xf32>
    tpu.vector_store %arg9[%c0_57, %c0_58, %c0_59], %172 {strides = array<i32>} : memref<1x8x128xf32, #tpu.memory_space<vmem>>, vector<1x8x128xf32>,
    return
  }
  func.func @transform_0(%arg0: i32, %arg1: i32) -> (i32, i32, i32, i32) {
    %c0_i32 = arith.constant 0 : i32
    %c0_i32_0 = arith.constant 0 : i32
    %c0_i32_1 = arith.constant 0 : i32
    return %arg0, %arg1, %c0_i32, %c0_i32_0 : i32, i32, i32, i32
  }
  func.func @transform_1(%arg0: i32, %arg1: i32) -> (i32, i32, i32, i32) {
    %c0_i32 = arith.constant 0 : i32
    %c0_i32_0 = arith.constant 0 : i32
    %c0_i32_1 = arith.constant 0 : i32
    return %arg0, %arg1, %c0_i32, %c0_i32_0 : i32, i32, i32, i32
  }
  func.func @transform_2(%arg0: i32, %arg1: i32) -> (i32, i32) {
    %c0_i32 = arith.constant 0 : i32
    %c0_i32_0 = arith.constant 0 : i32
    %c0_i32_1 = arith.constant 0 : i32
    return %c0_i32, %c0_i32_0 : i32, i32
  }
  func.func @transform_3(%arg0: i32, %arg1: i32) -> (i32, i32) {
    %c0_i32 = arith.constant 0 : i32
    %c0_i32_0 = arith.constant 0 : i32
    %c0_i32_1 = arith.constant 0 : i32
    return %c0_i32, %c0_i32_0 : i32, i32
  }
  func.func @transform_4(%arg0: i32, %arg1: i32) -> (i32, i32) {
    %c0_i32 = arith.constant 0 : i32
    %c0_i32_0 = arith.constant 0 : i32
    %c0_i32_1 = arith.constant 0 : i32
    return %c0_i32, %c0_i32_0 : i32, i32
  }
  func.func @transform_5(%arg0: i32, %arg1: i32) -> (i32, i32) {
    %c0_i32 = arith.constant 0 : i32
    %c0_i32_0 = arith.constant 0 : i32
    %c0_i32_1 = arith.constant 0 : i32
    return %c0_i32, %c0_i32_0 : i32, i32
  }
  func.func @transform_6(%arg0: i32, %arg1: i32) -> (i32, i32) {
    %c0_i32 = arith.constant 0 : i32
    %c0_i32_0 = arith.constant 0 : i32
    %c0_i32_1 = arith.constant 0 : i32
    return %c0_i32, %c0_i32_0 : i32, i32
  }
  func.func @transform_7(%arg0: i32, %arg1: i32) -> (i32, i32, i32) {
    %c0_i32 = arith.constant 0 : i32
    %c0_i32_0 = arith.constant 0 : i32
    return %arg0, %c0_i32, %arg1 : i32, i32, i32
  }
}

</mosaic_0001>

<bundles_post_ra>
// kernel: shallow_event_stereo_forward.9
= control target key start
LH: loop header
LB: loop body
LE: loop exit
PB: predicated region body
PF: predicated region fallthrough
CT: control target
= control target key end

     0   :  { %s2903_s12 = smov 0   ;;  %s4664_s0 = inlined_call_operand.vmem [shape: f32[2,18,16,4], index: 0, kind: input, shape index: {}]   ;;  %s4665_s1 = inlined_call_operand.vmem [shape: bf16[3,12,64], index: 1, kind: input, shape index: {}]   ;;  %s4666_s2 = inlined_call_operand.vmem [shape: f32[1,64], index: 2, kind: input, shape index: {}]   ;;  %s4667_s3 = inlined_call_operand.vmem [shape: bf16[2,16,16,64], index: 3, kind: output, shape index: {}]  }
   0x1 LB: > { %s2319_s13 = sadd.s32 4294967295, %s2878_s12   ;;  %p2323_p0 = scmp.ge.s32.totalorder %s2878_s12, 1  ;;  %s2878_s12 = sphi %s2903_s12, %s13_s12  }
   0x2   : > { %p137_p1 = scmp.lt.s32.totalorder %s2878_s12, 3 }
   0x4   : > { %p138_p2 = pnand %p2323_p0, %p137_p1 }
   0x5   : > { %v514_v0 = vlaneseq (!%p138_p2)  ;;  %p161_p3 = scmp.lt.s32.totalorder (!%p138_p2), %s2319_s13, 1  ;;  %v4668_v2 = vmov (!%p138_p2), 0.0   ;;  %s2881_s14 = smov (!%p138_p2), 4   ;;  %vm208_vm1 = vcmask (!%p138_p2), 31744   ;;  %vm1071_vm4 = vcmask (!%p138_p2), 64512  }
   0x6   : > { %141 = sbr.rel (%p138_p2) target bundleno = 720 (0x2d0), region = 32  ;;  %2686 = vrot.lane.b32.xlu0 (!%p138_p2), %v4668_v2, %s2881_s14  ;;  %v634_v3 = vrot.slane (!%p138_p2), %v4668_v2, 1  ;;  %s2882_s19 = smov (!%p138_p2), 8   ;;  %vm1185_vm5 = vcmask (!%p138_p2), 1045504   ;;  %vm1136_vm6 = vcmask (!%p138_p2), 97280   ;;  %vm1864_vm10 = vcmask (!%p138_p2), 523264  }
   0x7   : > { %v2911_v1 = vshrl.u32 (!%p138_p2), %v514_v0, 7 }
   0x9   : > { %v2919_v4 = vadd.s32 (!%p138_p2), 8, %v2911_v1  ;;  %vm517_vm2 = vcmp.ge.s32.totalorder (!%p138_p2), %v2911_v1, 1  ;;  %vm670_vm3 = vcmp.lt.s32.totalorder (!%p138_p2), %v2911_v1, 7  ;;  %vm555_vm7 = vcmp.lt.s32.totalorder (!%p138_p2), %v2911_v1, 1 }
   0xb   : > { %vm633_vm0 = vcmp.lt.s32.totalorder (!%p138_p2), %v2919_v4, 15 }
   0xc   : > { %v712_v5 = vsel (!%p138_p2), %vm633_vm0, %v634_v3, 0.0 }
   0xd   : > { %s4694_s13 = smov (!%p161_p3, %s2319_s13), 1  ;;  %v2930_v6 = vpack.i.bf16 %v712_v5, %v634_v3 }
   0xe   : > { %s2673_s15 = smul.u32 288, %s4694_s13  ;;  %s2417_s28 = sshll.u32 %s4694_s13, 7 }
   0xf   : > { %2691 = vrot.lane.b32.xlu1 %v2930_v6, %s2882_s19  ;;  %s4559_s4 = scalar_lea.vmem %s4667_s3, %s2417_s28 }
  0x10   : > { %s2928_s18 = scalar_lea.vmem %s4664_s0, %s2673_s15 }
  0x11   : > { %v172_v7 = vld [vmem:[%s2928_s18] sm:$0xff]  ;;  %v173_v8 = vld [vmem:[%s2928_s18 + $0x8] sm:$0xff]  ;;  %v2935_v9 = vld [vmem:[%s2928_s18 + $0x10] sm:$0xff] }
  0x12   : > { %v2938_v10 = vld [vmem:[%s2928_s18 + $0x18] sm:$0xff]  ;;  %v209_v11 = vsel %vm208_vm1, %v172_v7, 0.0  ;;  %v210_v12 = vsel %vm208_vm1, %v173_v8, 0.0  ;;  %v212_v13 = vsel %vm208_vm1, %v2935_v9, 0.0  ;;  %v2947_v14 = vld [vmem:[%s2928_s18 + $0x20] sm:$0xff]  ;;  %v2952_v17 = vld [vmem:[%s2928_s18 + $0x28] sm:$0xff]  ;;  %v286_v38 = vmul.f32 %v172_v7, %v172_v7 }
  0x13   : > { %v211_v15 = vadd.f32 %v210_v12, %v209_v11  ;;  %v214_v16 = vsel %vm208_vm1, %v2938_v10, 0.0  ;;  %v216_v19 = vsel %vm208_vm1, %v2947_v14, 0.0  ;;  %v2957_v20 = vld [vmem:[%s2928_s18 + $0x30] sm:$0xff]  ;;  %v218_v22 = vsel %vm208_vm1, %v2952_v17, 0.0  ;;  %v2962_v23 = vld [vmem:[%s2928_s18 + $0x38] sm:$0xff]  ;;  %v2967_v26 = vld [vmem:[%s2928_s18 + $0x40] sm:$0xff] }
  0x14   : > { %v220_v25 = vsel %vm208_vm1, %v2957_v20, 0.0  ;;  %v222_v28 = vsel %vm208_vm1, %v2962_v23, 0.0  ;;  %v2972_v29 = vld [vmem:[%s2928_s18 + $0x48] sm:$0xff]  ;;  %v224_v31 = vsel %vm208_vm1, %v2967_v26, 0.0  ;;  %v2977_v32 = vld [vmem:[%s2928_s18 + $0x50] sm:$0xff]  ;;  %v2982_v35 = vld [vmem:[%s2928_s18 + $0x58] sm:$0xff]  ;;  %v287_v39 = vmul.f32 %v173_v8, %v173_v8 }
  0x15   : > { %v213_v18 = vadd.f32 %v212_v13, %v211_v15  ;;  %v226_v34 = vsel %vm208_vm1, %v2972_v29, 0.0  ;;  %v228_v37 = vsel %vm208_vm1, %v2977_v32, 0.0  ;;  %v2987_v40 = vld [vmem:[%s2928_s18 + $0x60] sm:$0xff]  ;;  %v288_v42 = vmul.f32 %v2935_v9, %v2935_v9  ;;  %v2996_v45 = vld [vmem:[%s2928_s18 + $0x68] sm:$0xff]  ;;  %v3005_v51 = vld [vmem:[%s2928_s18 + $0x70] sm:$0xff] }
  0x16   : > { %v230_v43 = vsel %vm208_vm1, %v2982_v35, 0.0  ;;  %v289_v44 = vmul.f32 %v2938_v10, %v2938_v10  ;;  %v232_v47 = vsel %vm208_vm1, %v2987_v40, 0.0  ;;  %v290_v48 = vmul.f32 %v2947_v14, %v2947_v14  ;;  %v3014_v58 = vld [vmem:[%s2928_s18 + $0x78] sm:$0xff]  ;;  %v3022_v0 = vld [vmem:[%s2928_s18 + $0x80] sm:$0xff]  ;;  %v3030_v12 = vld [vmem:[%s2928_s18 + $0x88] sm:$0xff] }
  0x17   : > { %v215_v21 = vadd.f32 %v214_v16, %v213_v18  ;;  %v322_v49 = vsel %vm208_vm1, %v286_v38, 0.0  ;;  %v323_v50 = vsel %vm208_vm1, %v287_v39, 0.0  ;;  %v325_v54 = vsel %vm208_vm1, %v288_v42, 0.0  ;;  %v3054_v38 = vld [vmem:[%s2928_s18 + $0xa0] sm:$0xff] }
  0x18   : > { %v324_v53 = vadd.f32 %v323_v50, %v322_v49  ;;  %v234_v55 = vsel %vm208_vm1, %v2996_v45, 0.0  ;;  %v291_v56 = vmul.f32 %v2952_v17, %v2952_v17  ;;  %v327_v57 = vsel %vm208_vm1, %v289_v44, 0.0 }
  0x19   : > { %v217_v24 = vadd.f32 %v216_v19, %v215_v21  ;;  %v236_v61 = vsel %vm208_vm1, %v3005_v51, 0.0  ;;  %v292_v62 = vmul.f32 %v2957_v20, %v2957_v20  ;;  %v329_v63 = vsel %vm208_vm1, %v290_v48, 0.0  ;;  %v3038_v21 = vld [vmem:[%s2928_s18 + $0x90] sm:$0xff] }
  0x1a   : > { %v326_v60 = vadd.f32 %v325_v54, %v324_v53  ;;  %v238_v7 = vsel %vm208_vm1, %v3014_v58, 0.0  ;;  %v293_v8 = vmul.f32 %v2962_v23, %v2962_v23  ;;  %v331_v11 = vsel %vm208_vm1, %v291_v56, 0.0  ;;  %v3070_v53 = vld [vmem:[%s2928_s18 + $0xb0] sm:$0xff] }
  0x1b   : > { %v219_v27 = vadd.f32 %v218_v22, %v217_v24  ;;  %v240_v16 = vsel %vm208_vm1, %v3022_v0, 0.0  ;;  %v294_v18 = vmul.f32 %v2967_v26, %v2967_v26  ;;  %v333_v19 = vsel %vm208_vm1, %v292_v62, 0.0 }
  0x1c   : > { %v328_v5 = vadd.f32 %v327_v57, %v326_v60  ;;  %v248_v49 = vsel %vm208_vm1, %v3054_v38, 0.0  ;;  %v298_v50 = vmul.f32 %v2987_v40, %v2987_v40  ;;  %v299_v57 = vmul.f32 %v2996_v45, %v2996_v45  ;;  %v3078_v60 = vld [vmem:[%s2928_s18 + $0xb8] sm:$0xff] }
  0x1d   : > { %v221_v30 = vadd.f32 %v220_v25, %v219_v27  ;;  %v242_v25 = vsel %vm208_vm1, %v3030_v12, 0.0  ;;  %v295_v27 = vmul.f32 %v2972_v29, %v2972_v29 }
  0x1e   : > { %v330_v15 = vadd.f32 %v329_v63, %v328_v5  ;;  %v252_v63 = vsel %vm208_vm1, %v3070_v53, 0.0  ;;  %v345_v5 = vsel %vm208_vm1, %v298_v50, 0.0 }
  0x1f   : > { %v223_v33 = vadd.f32 %v222_v28, %v221_v30  ;;  %v335_v28 = vsel %vm208_vm1, %v293_v8, 0.0  ;;  %v3046_v30 = vld [vmem:[%s2928_s18 + $0x98] sm:$0xff]  ;;  %v339_v44 = vsel %vm208_vm1, %v295_v27, 0.0 }
  0x20   : > { %v332_v24 = vadd.f32 %v331_v11, %v330_v15  ;;  %v246_v42 = vsel %vm208_vm1, %v3046_v30, 0.0  ;;  %v301_v15 = vmul.f32 %v3014_v58, %v3014_v58 }
  0x21   : > { %v225_v36 = vadd.f32 %v224_v31, %v223_v33 }
  0x22   : > { %v334_v33 = vadd.f32 %v333_v19, %v332_v24 }
  0x23   : > { %v227_v41 = vadd.f32 %v226_v34, %v225_v36  ;;  %v244_v34 = vsel %vm208_vm1, %v3038_v21, 0.0  ;;  %v296_v36 = vmul.f32 %v2977_v32, %v2977_v32 }
  0x25   : > { %v229_v46 = vadd.f32 %v228_v37, %v227_v41  ;;  %v337_v37 = vsel %vm208_vm1, %v294_v18, 0.0  ;;  %v336_v41 = vadd.f32 %v335_v28, %v334_v33  ;;  %v3094_v18 = vld [vmem:[%s2928_s18 + $0xc8] sm:$0xff]  ;;  %v3102_v28 = vld [vmem:[%s2928_s18 + $0xd0] sm:$0xff] }
  0x27   : > { %v231_v52 = vadd.f32 %v230_v43, %v229_v46  ;;  %v297_v43 = vmul.f32 %v2982_v35, %v2982_v35  ;;  %v3062_v46 = vld [vmem:[%s2928_s18 + $0xa8] sm:$0xff]  ;;  %v338_v48 = vadd.f32 %v337_v37, %v336_v41  ;;  %v351_v37 = vsel %vm208_vm1, %v301_v15, 0.0 }
  0x28   : > { %v250_v56 = vsel %vm208_vm1, %v3062_v46, 0.0 }
  0x29   : > { %v233_v59 = vadd.f32 %v232_v47, %v231_v52  ;;  %v341_v52 = vsel %vm208_vm1, %v296_v36, 0.0  ;;  %v303_v36 = vmul.f32 %v3030_v12, %v3030_v12 }
  0x2b   : > { %v235_v3 = vadd.f32 %v234_v55, %v233_v59  ;;  %v340_v55 = vadd.f32 %v339_v44, %v338_v48  ;;  %v343_v59 = vsel %vm208_vm1, %v297_v43, 0.0  ;;  %v260_v43 = vsel %vm208_vm1, %v3102_v28, 0.0  ;;  %v3118_v48 = vld [vmem:[%s2928_s18 + $0xe0] sm:$0xff] }
  0x2c   : > { %v304_v44 = vmul.f32 %v3038_v21, %v3038_v21 }
  0x2d   : > { %v237_v13 = vadd.f32 %v236_v61, %v235_v3  ;;  %v342_v62 = vadd.f32 %v341_v52, %v340_v55  ;;  %v300_v3 = vmul.f32 %v3005_v51, %v3005_v51  ;;  %v355_v55 = vsel %vm208_vm1, %v303_v36, 0.0 }
  0x2f   : > { %v239_v22 = vadd.f32 %v238_v7, %v237_v13  ;;  %v3086_v7 = vld [vmem:[%s2928_s18 + $0xc0] sm:$0xff]  ;;  %v344_v11 = vadd.f32 %v343_v59, %v342_v62  ;;  %v254_v13 = vsel %vm208_vm1, %v3078_v60, 0.0  ;;  %v349_v27 = vsel %vm208_vm1, %v300_v3, 0.0  ;;  %v3134_v3 = vld [vmem:[%s2928_s18 + $0xf0] sm:$0xff] }
  0x30   : > { %v256_v24 = vsel %vm208_vm1, %v3086_v7, 0.0  ;;  %v306_v62 = vmul.f32 %v3054_v38, %v3054_v38 }
  0x31   : > { %v241_v31 = vadd.f32 %v240_v16, %v239_v22  ;;  %v347_v16 = vsel %vm208_vm1, %v299_v57, 0.0  ;;  %v346_v22 = vadd.f32 %v345_v5, %v344_v11 }
  0x33   : > { %v243_v39 = vadd.f32 %v242_v25, %v241_v31  ;;  %v302_v25 = vmul.f32 %v3022_v0, %v3022_v0  ;;  %v348_v33 = vadd.f32 %v347_v16, %v346_v22  ;;  %v3142_v16 = vld [vmem:[%s2928_s18 + $0xf8] sm:$0xff] }
  0x34   : > { %v270_v36 = vsel %vm208_vm1, %v3142_v16, 0.0 }
  0x35   : > { %v245_v47 = vadd.f32 %v244_v34, %v243_v39  ;;  %v258_v34 = vsel %vm208_vm1, %v3094_v18, 0.0  ;;  %v3110_v39 = vld [vmem:[%s2928_s18 + $0xd8] sm:$0xff] }
  0x36   : > { %v262_v52 = vsel %vm208_vm1, %v3110_v39, 0.0 }
  0x37   : > { %v247_v54 = vadd.f32 %v246_v42, %v245_v47  ;;  %v350_v42 = vadd.f32 %v349_v27, %v348_v33  ;;  %v353_v47 = vsel %vm208_vm1, %v302_v25, 0.0  ;;  %v308_v25 = vmul.f32 %v3070_v53, %v3070_v53 }
  0x38   : > { %v361_v27 = vsel %vm208_vm1, %v306_v62, 0.0  ;;  %v207_v62 = vld [vmem:[%s2928_s18 + $0x118] sm:$0xff] }
  0x39   : > { %v249_v61 = vadd.f32 %v248_v49, %v247_v54  ;;  %v352_v50 = vadd.f32 %v351_v37, %v350_v42  ;;  %v305_v54 = vmul.f32 %v3046_v30, %v3046_v30  ;;  %v309_v37 = vmul.f32 %v3078_v60, %v3078_v60  ;;  %v3158_v42 = vld [vmem:[%s2928_s18 + $0x108] sm:$0xff] }
  0x3b   : > { %v251_v8 = vadd.f32 %v250_v56, %v249_v61  ;;  %v3126_v56 = vld [vmem:[%s2928_s18 + $0xe8] sm:$0xff]  ;;  %v354_v59 = vadd.f32 %v353_v47, %v352_v50  ;;  %v264_v61 = vsel %vm208_vm1, %v3118_v48, 0.0  ;;  %v359_v15 = vsel %vm208_vm1, %v305_v54, 0.0 }
  0x3c   : > { %v266_v11 = vsel %vm208_vm1, %v3126_v56, 0.0  ;;  %v365_v50 = vsel %vm208_vm1, %v308_v25, 0.0 }
  0x3d   : > { %v253_v19 = vadd.f32 %v252_v63, %v251_v8  ;;  %v357_v63 = vsel %vm208_vm1, %v304_v44, 0.0  ;;  %v356_v8 = vadd.f32 %v355_v55, %v354_v59  ;;  %v311_v59 = vmul.f32 %v3094_v18, %v3094_v18 }
  0x3f   : > { %v255_v31 = vadd.f32 %v254_v13, %v253_v19  ;;  %v307_v13 = vmul.f32 %v3062_v46, %v3062_v46  ;;  %v358_v22 = vadd.f32 %v357_v63, %v356_v8  ;;  %v371_v25 = vsel %vm208_vm1, %v311_v59, 0.0 }
  0x41   : > { %v257_v41 = vadd.f32 %v256_v24, %v255_v31  ;;  %v268_v24 = vsel %vm208_vm1, %v3134_v3, 0.0  ;;  %v3150_v31 = vld [vmem:[%s2928_s18 + $0x100] sm:$0xff] }
  0x42   : > { %v272_v47 = vsel %vm208_vm1, %v3150_v31, 0.0 }
  0x43   : > { %v259_v49 = vadd.f32 %v258_v34, %v257_v41  ;;  %v360_v34 = vadd.f32 %v359_v15, %v358_v22  ;;  %v363_v41 = vsel %vm208_vm1, %v307_v13, 0.0  ;;  %v278_v22 = vsel %vm208_vm1, %v207_v62, 0.0 }
  0x45   : > { %v261_v57 = vadd.f32 %v260_v43, %v259_v49  ;;  %v362_v44 = vadd.f32 %v361_v27, %v360_v34  ;;  %v310_v49 = vmul.f32 %v3086_v7, %v3086_v7  ;;  %v314_v34 = vmul.f32 %v3118_v48, %v3118_v48 }
  0x47   : > { %v263_v5 = vadd.f32 %v262_v52, %v261_v57  ;;  %v206_v52 = vld [vmem:[%s2928_s18 + $0x110] sm:$0xff]  ;;  %v364_v55 = vadd.f32 %v363_v41, %v362_v44  ;;  %v274_v57 = vsel %vm208_vm1, %v3158_v42, 0.0  ;;  %v369_v13 = vsel %vm208_vm1, %v310_v49, 0.0 }
  0x48   : > { %v276_v8 = vsel %vm208_vm1, %v206_v52, 0.0  ;;  %v316_v49 = vmul.f32 %v3134_v3, %v3134_v3 }
  0x49   : > { %v265_v19 = vadd.f32 %v264_v61, %v263_v5  ;;  %v367_v61 = vsel %vm208_vm1, %v309_v37, 0.0  ;;  %v366_v5 = vadd.f32 %v365_v50, %v364_v55  ;;  %v377_v50 = vsel %vm208_vm1, %v314_v34, 0.0 }
  0x4b   : > { %v267_v33 = vadd.f32 %v266_v11, %v265_v19  ;;  %v312_v11 = vmul.f32 %v3102_v28, %v3102_v28  ;;  %v368_v19 = vadd.f32 %v367_v61, %v366_v5  ;;  %v381_v5 = vsel %vm208_vm1, %v316_v49, 0.0 }
  0x4d   : > { %v269_v43 = vadd.f32 %v268_v24, %v267_v33  ;;  %v313_v24 = vmul.f32 %v3110_v39, %v3110_v39  ;;  %v370_v33 = vadd.f32 %v369_v13, %v368_v19  ;;  %v319_v13 = vmul.f32 %v3158_v42, %v3158_v42 }
  0x4f   : > { %v271_v54 = vadd.f32 %v270_v36, %v269_v43  ;;  %v373_v36 = vsel %vm208_vm1, %v312_v11, 0.0  ;;  %v372_v41 = vadd.f32 %v371_v25, %v370_v33  ;;  %v315_v43 = vmul.f32 %v3126_v56, %v3126_v56 }
  0x50   : > { %v375_v44 = vsel %vm208_vm1, %v313_v24, 0.0  ;;  %v321_v33 = vmul.f32 %v207_v62, %v207_v62  ;;  %v387_v34 = vsel %vm208_vm1, %v319_v13, 0.0 }
  0x51   : > { %v273_v63 = vadd.f32 %v272_v47, %v271_v54  ;;  %v374_v47 = vadd.f32 %v373_v36, %v372_v41  ;;  %v379_v59 = vsel %vm208_vm1, %v315_v43, 0.0 }
  0x53   : > { %v275_v15 = vadd.f32 %v274_v57, %v273_v63  ;;  %v376_v55 = vadd.f32 %v375_v44, %v374_v47  ;;  %v317_v57 = vmul.f32 %v3142_v16, %v3142_v16  ;;  %v318_v63 = vmul.f32 %v3150_v31, %v3150_v31 }
  0x54   : > { %v391_v44 = vsel %vm208_vm1, %v321_v33, 0.0 }
  0x55   : > { %v277_v27 = vadd.f32 %v276_v8, %v275_v15  ;;  %v378_v61 = vadd.f32 %v377_v50, %v376_v55  ;;  %v383_v15 = vsel %vm208_vm1, %v317_v57, 0.0  ;;  %v385_v24 = vsel %vm208_vm1, %v318_v63, 0.0 }
  0x57   : > { %v279_v37 = vadd.f32 %v278_v22, %v277_v27  ;;  %v380_v11 = vadd.f32 %v379_v59, %v378_v61  ;;  %v320_v22 = vmul.f32 %v206_v52, %v206_v52 }
  0x59   : > { %v280_v54 = vrot.slane %v279_v37, 4  ;;  %v382_v19 = vadd.f32 %v381_v5, %v380_v11  ;;  %v389_v41 = vsel %vm208_vm1, %v320_v22, 0.0 }
  0x5b   : > { %v281_v8 = vadd.f32 %v280_v54, %v279_v37  ;;  %v384_v27 = vadd.f32 %v383_v15, %v382_v19  ;;  %v3207_v19 = vrot.slane %v4668_v2, 7 }
  0x5d   : > { %v282_v25 = vrot.slane %v281_v8, 2  ;;  %v386_v36 = vadd.f32 %v385_v24, %v384_v27 }
  0x5f   : > { %v283_v43 = vadd.f32 %v282_v25, %v281_v8  ;;  %v388_v37 = vadd.f32 %v387_v34, %v386_v36 }
  0x61   : > { %v390_v47 = vadd.f32 %v389_v41, %v388_v37  ;;  %v284_v49 = vrot.slane %v283_v43, 1 }
  0x63   : > { %v392_v50 = vadd.f32 %v391_v44, %v390_v47  ;;  %v285_v55 = vadd.f32 %v284_v49, %v283_v43 }
  0x65   : > { %v393_v54 = vrot.slane %v392_v50, 4  ;;  %v3202_v61 = vmul.f32 0.00390625, %v285_v55 }
  0x67   : > { %v394_v52 = vadd.f32 %v393_v54, %v392_v50  ;;  %v402_v5 = vmul.f32 %v3202_v61, %v3202_v61  ;;  %v408_v22 = vsub.f32 %v2947_v14, %v3202_v61  ;;  %v409_v24 = vsub.f32 %v2952_v17, %v3202_v61 }
  0x68   : > { %v406_v25 = vsub.f32 %v2935_v9, %v3202_v61  ;;  %v407_v27 = vsub.f32 %v2938_v10, %v3202_v61  ;;  %v412_v33 = vsub.f32 %v2967_v26, %v3202_v61  ;;  %v413_v34 = vsub.f32 %v2972_v29, %v3202_v61 }
  0x69   : > { %v395_v57 = vrot.slane %v394_v52, 2  ;;  %v410_v14 = vsub.f32 %v2957_v20, %v3202_v61  ;;  %v411_v17 = vsub.f32 %v2962_v23, %v3202_v61  ;;  %v416_v9 = vsub.f32 %v2987_v40, %v3202_v61 }
  0x6a   : > { %v417_v10 = vsub.f32 %v2996_v45, %v3202_v61  ;;  %v414_v26 = vsub.f32 %v2977_v32, %v3202_v61  ;;  %v3235_v29 = vsel %vm517_vm2, %v3207_v19, 0.0  ;;  %v415_v20 = vsub.f32 %v2982_v35, %v3202_v61 }
  0x6b   : > { %v396_v59 = vadd.f32 %v395_v57, %v394_v52  ;;  %v420_v23 = vsub.f32 %v3022_v0, %v3202_v61  ;;  %v421_v43 = vsub.f32 %v3030_v12, %v3202_v61  ;;  %v418_v37 = vsub.f32 %v3005_v51, %v3202_v61 }
  0x6c   : > { %v419_v44 = vsub.f32 %v3014_v58, %v3202_v61 }
  0x6d   : > { %v397_v62 = vrot.slane %v396_v59, 1 }
  0x6f   : > { %v398_v63 = vadd.f32 %v397_v62, %v396_v59  ;;  %v2866_v59 = vld [vmem:[%s4665_s1] sm:$0x3f]  }
  0x70   : > { %2670 = vmatprep.subr.msk.bf16.mxu0 %vm1185_vm5, %v2866_v59 }
  0x71   : > { %v401_v11 = vmul.f32 0.00390625, %v398_v63 }
  0x73   : > { %v403_v8 = vsub.f32 %v401_v11, %v402_v5  ;;  %v2865_v11 = vld [vmem:[%s4665_s1 + $0x8] sm:$0x3f]  }
  0x74   : > { %2669 = vmatprep.subr.msk.bf16.mxu1 %vm1185_vm5, %v2865_v11  ;;  %v1187_v2 = vsel %vm1185_vm5, %v2865_v11, 0 }
  0x75   : > { %v440_v13 = vadd.f32 1e-05, %v403_v8  ;;  %2502 = vmatpush3.bf16.msra.mxu1 %v1187_v2 }
  0x76   : > { %2671 = vmatprep.subr.msk.bf16.mxu1 %vm1185_vm5, %v2866_v59 }
  0x77   : > { %2868 = vrsqrt.f32 %v440_v13 }
  0x78   : > { %v2687_v15 = vpop.permute.xlu0 %2686 }
  0x79   : > { %v2689_v36 = vunpack.i.h.bf16 %v2687_v15  ;;  %v2688_v41 = vunpack.i.l.bf16 %v2687_v15 }
  0x7b   : > { %v1035_v52 = vsel %vm208_vm1, %v3235_v29, %v2688_v41  ;;  %v1036_v57 = vsel %vm208_vm1, %v3207_v19, %v2689_v36  ;;  %v3276_v36 = vsel %vm1185_vm5, %v2866_v59, 0 }
  0x7c   : > { %2536 = vmatpush3.bf16.msra.mxu0 %v3276_v36 }
  0x81   : > { %v2692_v55 = vpop.permute.xlu1 %2691  ;;  %v3283_v13 = vpop.eup %2868 }
  0x82   : > { %v2694_v63 = vunpack.i.h.bf16 %v2692_v55  ;;  %v2693_v5 = vunpack.i.l.bf16 %v2692_v55  ;;  %v3298_v11 = vmul.f32 %v3283_v13, %v406_v25  ;;  %v3301_v62 = vmul.f32 %v3283_v13, %v407_v27 }
  0x83   : > { %v3305_v8 = vmul.f32 %v3283_v13, %v412_v33  ;;  %v3311_v2 = vmul.f32 %v3283_v13, %v410_v14  ;;  %v3385_v40 = vmul.f32 %v3283_v13, %v415_v20  ;;  %v3429_v12 = vmul.f32 %v3283_v13, %v419_v44 }
  0x84   : > { %v1072_v41 = vsel %vm1071_vm4, %v1035_v52, %v2693_v5  ;;  %v1073_v55 = vsel %vm1071_vm4, %v1036_v57, %v2694_v63  ;;  %v3292_v57 = vmul.f32 %v3283_v13, %v408_v22  ;;  %v3295_v63 = vmul.f32 %v3283_v13, %v409_v24 }
  0x85   : > { %v1108_v5 = vpack.c.bf16 %v1073_v55, %v1072_v41  ;;  %v3308_v41 = vmul.f32 %v3283_v13, %v413_v34  ;;  %v2695_v25 = vpack.i.bf16 %v3301_v62, %v3298_v11  ;;  %v3325_v34 = vld [vmem:[%s4665_s1 + $0x10] sm:$0x3f]   ;;  %v635_v14 = vrot.slane %v3298_v11, 1 }
  0x86   : > { %v2700_v24 = vpack.i.bf16 %v3295_v63, %v3292_v57  ;;  %v636_v27 = vrot.slane %v3292_v57, 1  ;;  %v654_v33 = vrot.slane %v3295_v63, 1  ;;  %v653_v59 = vrot.slane %v3301_v62, 1  ;;  %2672 = vmatprep.subr.msk.bf16.mxu0 %vm1185_vm5, %v3325_v34 }
  0x87   : > { %2537 = vmatprep.mubr.msk.bf16.mxu0 %vm1136_vm6, %v1108_v5  ;;  %v3330_v55 = vmul.f32 %v3283_v13, %v411_v17  ;;  %2696 = vrot.lane.b32.xlu0 %v2695_v25, %s2881_s14  ;;  %v638_v15 = vrot.slane %v3305_v8, 1  ;;  %v656_v54 = vrot.slane %v3308_v41, 1  ;;  %v637_v25 = vrot.slane %v3311_v2, 1 }
  0x88   : > { %2701 = vrot.lane.b32.xlu1 %v2700_v24, %s2881_s14  ;;  %v673_v22 = vsel %vm670_vm3, %v636_v27, %v654_v33  ;;  %v691_v52 = vsel %vm670_vm3, %v654_v33, %v636_v27  ;;  %v672_v5 = vsel %vm670_vm3, %v635_v14, %v653_v59  ;;  %v690_v24 = vsel %vm670_vm3, %v653_v59, %v635_v14 }
  0x89   : > { %v716_v17 = vsel %vm633_vm0, %v691_v52, 0.0  ;;  %v714_v27 = vsel %vm633_vm0, %v690_v24, 0.0  ;;  %v693_v33 = vsel %vm670_vm3, %v656_v54, %v638_v15  ;;  %v437_v52 = vsub.f32 %v3158_v42, %v3202_v61 }
  0x8a   : > { %v2715_v50 = vpack.i.bf16 %v716_v17, %v673_v22  ;;  %v2705_v49 = vpack.i.bf16 %v714_v27, %v672_v5  ;;  %v2720_v47 = vpack.i.bf16 %v3308_v41, %v3305_v8  ;;  %v655_v14 = vrot.slane %v3330_v55, 1 }
  0x8b   : > { %v3364_v22 = vmul.f32 %v3283_v13, %v416_v9  ;;  %v2710_v59 = vpack.i.bf16 %v3330_v55, %v3311_v2  ;;  %v3373_v5 = vmul.f32 %v3283_v13, %v417_v10  ;;  %v3379_v17 = vmul.f32 %v3283_v13, %v414_v26 }
  0x8c   : > { %2716 = vrot.lane.b32.xlu1 %v2715_v50, %s2882_s19  ;;  %2706 = vrot.lane.b32.xlu0 %v2705_v49, %s2882_s19  ;;  %v675_v45 = vsel %vm670_vm3, %v638_v15, %v656_v54  ;;  %v720_v9 = vsel %vm633_vm0, %v693_v33, 0.0  ;;  %v692_v32 = vsel %vm670_vm3, %v655_v14, %v637_v25  ;;  %v674_v26 = vsel %vm670_vm3, %v637_v25, %v655_v14 }
  0x8d   : > { %v640_v10 = vrot.slane %v3364_v22, 1  ;;  %v718_v35 = vsel %vm633_vm0, %v692_v32, 0.0  ;;  %v658_v20 = vrot.slane %v3373_v5, 1  ;;  %v3404_v49 = vmul.f32 %v3283_v13, %v420_v23 }
  0x8e   : > { %v639_v50 = vrot.slane %v3379_v17, 1  ;;  %v657_v54 = vrot.slane %v3385_v40, 1  ;;  %v3412_v15 = vmul.f32 %v3283_v13, %v421_v43  ;;  %v434_v24 = vsub.f32 %v3134_v3, %v3202_v61 }
  0x8f   : > { %v2735_v25 = vpack.i.bf16 %v720_v9, %v675_v45  ;;  %v695_v0 = vsel %vm670_vm3, %v658_v20, %v640_v10  ;;  %v3423_v23 = vmul.f32 %v3283_v13, %v418_v37  ;;  %v2725_v43 = vpack.i.bf16 %v718_v35, %v674_v26 }
  0x90   : > { %2721 = vrot.lane.b32.xlu1 %v2720_v47, %s2881_s14  ;;  %2711 = vrot.lane.b32.xlu0 %v2710_v59, %s2881_s14  ;;  %v2740_v47 = vpack.i.bf16 %v3373_v5, %v3364_v22  ;;  %v694_v27 = vsel %vm670_vm3, %v657_v54, %v639_v50  ;;  %v677_v37 = vsel %vm670_vm3, %v640_v10, %v658_v20  ;;  %v724_v58 = vsel %vm633_vm0, %v695_v0, 0.0 }
  0x91   : > { %v676_v44 = vsel %vm670_vm3, %v639_v50, %v657_v54  ;;  %v642_v33 = vrot.slane %v3404_v49, 1  ;;  %v722_v14 = vsel %vm633_vm0, %v694_v27, 0.0  ;;  %v660_v59 = vrot.slane %v3412_v15, 1 }
  0x92   : > { %v641_v45 = vrot.slane %v3423_v23, 1  ;;  %v659_v9 = vrot.slane %v3429_v12, 1  ;;  %v4669_v32 = vsub.f32 %v3054_v38, %v3202_v61  ;;  %v4670_v26 = vsub.f32 %v3062_v46, %v3202_v61 }
  0x93   : > { %v4671_v20 = vsub.f32 %v3038_v21, %v3202_v61  ;;  %v4672_v54 = vsub.f32 %v3046_v30, %v3202_v61  ;;  %v2730_v46 = vpack.i.bf16 %v3385_v40, %v3379_v17  ;;  %v2760_v0 = vpack.i.bf16 %v3412_v15, %v3404_v49 }
  0x94   : > { %2736 = vrot.lane.b32.xlu1 %v2735_v25, %s2882_s19  ;;  %v3455_v10 = vmul.f32 %v3283_v13, %v4669_v32  ;;  %v3461_v35 = vmul.f32 %v3283_v13, %v4670_v26  ;;  %2726 = vrot.lane.b32.xlu0 %v2725_v43, %s2882_s19  ;;  %v2755_v25 = vpack.i.bf16 %v724_v58, %v677_v37  ;;  %v527_v4 = vrot.slane %v3404_v49, 7 }
  0x95   : > { %v3467_v50 = vmul.f32 %v3283_v13, %v4671_v20  ;;  %v3473_v38 = vmul.f32 %v3283_v13, %v4672_v54  ;;  %v697_v21 = vsel %vm670_vm3, %v660_v59, %v642_v33  ;;  %v2745_v27 = vpack.i.bf16 %v722_v14, %v676_v44 }
  0x96   : > { %v2750_v32 = vpack.i.bf16 %v3429_v12, %v3423_v23  ;;  %v679_v30 = vsel %vm670_vm3, %v642_v33, %v660_v59  ;;  %v696_v43 = vsel %vm670_vm3, %v659_v9, %v641_v45  ;;  %v728_v26 = vsel %vm633_vm0, %v697_v21, 0.0 }
  0x97   : > { %v3492_v37 = vsel %vm670_vm3, %v641_v45, %v659_v9  ;;  %v644_v58 = vrot.slane %v3455_v10, 1  ;;  %v662_v44 = vrot.slane %v3461_v35, 1  ;;  %v643_v14 = vrot.slane %v3467_v50, 1 }
  0x98   : > { %2741 = vrot.lane.b32.xlu1 %v2740_v47, %s2881_s14  ;;  %v661_v33 = vrot.slane %v3473_v38, 1  ;;  %v4673_v59 = vsub.f32 %v3086_v7, %v3202_v61  ;;  %v4674_v45 = vsub.f32 %v3094_v18, %v3202_v61  ;;  %2731 = vrot.lane.b32.xlu0 %v2730_v46, %s2881_s14  ;;  %v726_v47 = vsel %vm633_vm0, %v696_v43, 0.0 }
  0x99   : > { %v699_v54 = vsel %vm670_vm3, %v662_v44, %v644_v58  ;;  %v4675_v7 = vsub.f32 %v3070_v53, %v3202_v61  ;;  %v4676_v18 = vsub.f32 %v3078_v60, %v3202_v61  ;;  %v2780_v46 = vpack.i.bf16 %v3461_v35, %v3455_v10 }
  0x9a   : > { %v3503_v20 = vmul.f32 %v3283_v13, %v4673_v59  ;;  %v3509_v9 = vmul.f32 %v3283_v13, %v4674_v45  ;;  %v2775_v45 = vpack.i.bf16 %v728_v26, %v679_v30  ;;  %v698_v51 = vsel %vm670_vm3, %v661_v33, %v643_v14 }
  0x9b   : > { %v3520_v21 = vmul.f32 %v3283_v13, %v4675_v7  ;;  %v3526_v59 = vmul.f32 %v3283_v13, %v4676_v18  ;;  %v3536_v53 = vsel %vm670_vm3, %v644_v58, %v662_v44  ;;  %v3540_v60 = vsel %vm633_vm0, %v699_v54, 0.0 }
  0x9c   : > { %v3544_v30 = vsel %vm670_vm3, %v643_v14, %v661_v33  ;;  %v646_v26 = vrot.slane %v3503_v20, 1  ;;  %2756 = vrot.lane.b32.xlu1 %v2755_v25, %s2882_s19  ;;  %v3550_v7 = vsel %vm633_vm0, %v698_v51, 0.0  ;;  %v664_v18 = vrot.slane %v3509_v9, 1  ;;  %2746 = vrot.lane.b32.xlu0 %v2745_v27, %s2882_s19 }
  0x9d   : > { %v645_v58 = vrot.slane %v3520_v21, 1  ;;  %v663_v44 = vrot.slane %v3526_v59, 1  ;;  %v4677_v14 = vsub.f32 %v3118_v48, %v3202_v61  ;;  %v4678_v51 = vsub.f32 %v3126_v56, %v3202_v61 }
  0x9e   : > { %v4679_v54 = vsub.f32 %v3102_v28, %v3202_v61  ;;  %v4680_v27 = vsub.f32 %v3110_v39, %v3202_v61  ;;  %v2795_v56 = vpack.i.bf16 %v3540_v60, %v3536_v53  ;;  %v3592_v39 = vsel %vm670_vm3, %v646_v26, %v664_v18 }
  0x9f   : > { %v3561_v33 = vmul.f32 %v3283_v13, %v4677_v14  ;;  %v3567_v25 = vmul.f32 %v3283_v13, %v4678_v51  ;;  %v2765_v14 = vpack.i.bf16 %v726_v47, %v3492_v37  ;;  %v2800_v51 = vpack.i.bf16 %v3509_v9, %v3503_v20 }
  0xa0   : > { %v3573_v43 = vmul.f32 %v3283_v13, %v4679_v54  ;;  %v3579_v48 = vmul.f32 %v3283_v13, %v4680_v27  ;;  %v2785_v54 = vpack.i.bf16 %v3550_v7, %v3544_v30  ;;  %2761 = vrot.lane.b32.xlu1 %v2760_v0, %s2881_s14  ;;  %v701_v47 = vsel %vm670_vm3, %v664_v18, %v646_v26 }
  0xa1   : > { %v3603_v53 = vsel %vm670_vm3, %v645_v58, %v663_v44  ;;  %v648_v60 = vrot.slane %v3561_v33, 1  ;;  %v666_v30 = vrot.slane %v3567_v25, 1  ;;  %2751 = vrot.lane.b32.xlu0 %v2750_v32, %s2881_s14  ;;  %v4681_v0 = vsub.f32 %v3150_v31, %v3202_v61 }
  0xa2   : > { %v647_v7 = vrot.slane %v3573_v43, 1  ;;  %v665_v27 = vrot.slane %v3579_v48, 1  ;;  %v3620_v26 = vmul.f32 %v3283_v13, %v437_v52  ;;  %v3632_v31 = vmul.f32 %v3283_v13, %v434_v24 }
  0xa3   : > { %v3614_v37 = vmul.f32 %v3283_v13, %v4681_v0  ;;  %v3624_v18 = vsel %vm670_vm3, %v648_v60, %v666_v30  ;;  %v703_v32 = vsel %vm670_vm3, %v666_v30, %v648_v60  ;;  %v4682_v0 = vsub.f32 %v3142_v16, %v3202_v61 }
  0xa4   : > { %v3642_v52 = vsel %vm633_vm0, %v703_v32, 0.0  ;;  %v3646_v28 = vsel %vm670_vm3, %v647_v7, %v665_v27  ;;  %v702_v3 = vsel %vm670_vm3, %v665_v27, %v647_v7  ;;  %2776 = vrot.lane.b32.xlu1 %v2775_v45, %s2882_s19  ;;  %v668_v30 = vrot.slane %v3620_v26, 1 }
  0xa5   : > { %v3638_v42 = vmul.f32 %v3283_v13, %v4682_v0  ;;  %v2835_v16 = vpack.i.bf16 %v3642_v52, %v3624_v18  ;;  %v3657_v61 = vsel %vm633_vm0, %v702_v3, 0.0  ;;  %v650_v60 = vrot.slane %v3614_v37, 1  ;;  %2766 = vrot.lane.b32.xlu0 %v2765_v14, %s2882_s19 }
  0xa6   : > { %v649_v45 = vrot.slane %v3632_v31, 1  ;;  %v539_v32 = vrot.slane %v3295_v63, 7  ;;  %v521_v0 = vrot.slane %v3292_v57, 7  ;;  %v523_v3 = vrot.slane %v3305_v8, 7 }
  0xa7   : > { %v667_v7 = vrot.slane %v3638_v42, 1  ;;  %v541_v13 = vrot.slane %v3308_v41, 7  ;;  %v3674_v14 = vsel %vm670_vm3, %v650_v60, %v668_v30  ;;  %v705_v24 = vsel %vm670_vm3, %v668_v30, %v650_v60 }
  0xa8   : > { %2781 = vrot.lane.b32.xlu1 %v2780_v46, %s2881_s14  ;;  %v3690_v8 = vsel %vm633_vm0, %v705_v24, 0.0  ;;  %v3698_v41 = vsel %vm555_vm7, %v521_v0, %v539_v32  ;;  %v3702_v60 = vsel %vm555_vm7, %v539_v32, %v521_v0  ;;  %v4683_v46 = vpack.i.bf16 %v3473_v38, %v3467_v50 }
  0xa9   : > { %v3680_v27 = vsel %vm670_vm3, %v649_v45, %v667_v7  ;;  %v704_v63 = vsel %vm670_vm3, %v667_v7, %v649_v45  ;;  %v700_v24 = vsel %vm670_vm3, %v663_v44, %v645_v58  ;;  %v3716_v7 = vsel %vm555_vm7, %v523_v3, %v541_v13 }
  0xaa   : > { %v3694_v57 = vsel %vm633_vm0, %v704_v63, 0.0  ;;  %2771 = vrot.lane.b32.xlu0 %v4683_v46, %s2881_s14  ;;  %v3720_v32 = vsel %vm555_vm7, %v541_v13, %v523_v3  ;;  %v522_v0 = vrot.slane %v3311_v2, 7  ;;  %v540_v63 = vrot.slane %v3330_v55, 7 }
  0xab   : > { %v520_v58 = vrot.slane %v3298_v11, 7  ;;  %v736_v44 = vsel %vm633_vm0, %v701_v47, 0.0  ;;  %v538_v46 = vrot.slane %v3301_v62, 7  ;;  %v3730_v45 = vsel %vm1185_vm5, %v3325_v34, 0 }
  0xac   : > { %v525_v30 = vrot.slane %v3364_v22, 7  ;;  %2796 = vrot.lane.b32.xlu1 %v2795_v56, %s2882_s19  ;;  %v3736_v2 = vsel %vm555_vm7, %v522_v0, %v540_v63  ;;  %v3740_v11 = vsel %vm555_vm7, %v540_v63, %v522_v0  ;;  %v543_v55 = vrot.slane %v3373_v5, 7 }
  0xad   : > { %v524_v62 = vrot.slane %v3379_v17, 7  ;;  %v734_v34 = vsel %vm633_vm0, %v700_v24, 0.0  ;;  %v3749_v22 = vsel %vm555_vm7, %v520_v58, %v538_v46  ;;  %v3753_v56 = vsel %vm555_vm7, %v538_v46, %v520_v58 }
  0xae   : > { %2786 = vrot.lane.b32.xlu0 %v2785_v54, %s2882_s19  ;;  %v542_v47 = vrot.slane %v3385_v40, 7  ;;  %v3758_v5 = vsel %vm555_vm7, %v525_v30, %v543_v55  ;;  %v3762_v17 = vsel %vm555_vm7, %v543_v55, %v525_v30  ;;  %v2815_v54 = vpack.i.bf16 %v736_v44, %v3592_v39 }
  0xaf   : > { %v545_v40 = vrot.slane %v3412_v15, 7  ;;  %v2805_v24 = vpack.i.bf16 %v734_v34, %v3603_v53  ;;  %v526_v49 = vrot.slane %v3423_v23, 7  ;;  %v544_v39 = vrot.slane %v3429_v12, 7 }
  0xb0   : > { %v3768_v13 = vsel %vm555_vm7, %v524_v62, %v542_v47  ;;  %v3772_v3 = vsel %vm555_vm7, %v542_v47, %v524_v62  ;;  %2801 = vrot.lane.b32.xlu1 %v2800_v51, %s2881_s14  ;;  %v529_v30 = vrot.slane %v3455_v10, 7  ;;  %v4684_v0 = vpack.i.bf16 %v3526_v59, %v3520_v21 }
  0xb1   : > { %v3789_v15 = vsel %vm555_vm7, %v527_v4, %v545_v40  ;;  %v3793_v51 = vsel %vm555_vm7, %v545_v40, %v527_v4  ;;  %v547_v53 = vrot.slane %v3461_v35, 7  ;;  %v528_v23 = vrot.slane %v3467_v50, 7 }
  0xb2   : > { %2791 = vrot.lane.b32.xlu0 %v4684_v0, %s2881_s14  ;;  %v3799_v12 = vsel %vm555_vm7, %v526_v49, %v544_v39  ;;  %v3803_v10 = vsel %vm555_vm7, %v544_v39, %v526_v49  ;;  %v546_v63 = vrot.slane %v3473_v38, 7  ;;  %v531_v35 = vrot.slane %v3503_v20, 7 }
  0xb3   : > { %v3808_v58 = vsel %vm555_vm7, %v529_v30, %v547_v53  ;;  %v3812_v44 = vsel %vm555_vm7, %v547_v53, %v529_v30  ;;  %v549_v38 = vrot.slane %v3509_v9, 7  ;;  %v530_v55 = vrot.slane %v3520_v21, 7 }
  0xb4   : > { %2816 = vrot.lane.b32.xlu1 %v2815_v54, %s2882_s19  ;;  %v3818_v50 = vsel %vm555_vm7, %v528_v23, %v546_v63  ;;  %v3822_v46 = vsel %vm555_vm7, %v546_v63, %v528_v23  ;;  %v548_v62 = vrot.slane %v3526_v59, 7  ;;  %v533_v20 = vrot.slane %v3561_v33, 7 }
  0xb5   : > { %v3831_v34 = vsel %vm555_vm7, %v531_v35, %v549_v38  ;;  %v3835_v47 = vsel %vm555_vm7, %v549_v38, %v531_v35  ;;  %v551_v4 = vrot.slane %v3567_v25, 7  ;;  %v532_v9 = vrot.slane %v3573_v43, 7 }
  0xb6   : > { %2806 = vrot.lane.b32.xlu0 %v2805_v24, %s2882_s19  ;;  %v3841_v54 = vsel %vm555_vm7, %v530_v55, %v548_v62  ;;  %v3845_v21 = vsel %vm555_vm7, %v548_v62, %v530_v55  ;;  %v550_v59 = vrot.slane %v3579_v48, 7  ;;  %v4685_v40 = vpack.i.bf16 %v3567_v25, %v3561_v33 }
  0xb7   : > { %v3854_v24 = vsel %vm555_vm7, %v533_v20, %v551_v4  ;;  %v3858_v49 = vsel %vm555_vm7, %v551_v4, %v533_v20  ;;  %v535_v39 = vrot.slane %v3614_v37, 7  ;;  %v4686_v30 = vpack.i.bf16 %v3579_v48, %v3573_v43 }
  0xb8   : > { %2821 = vrot.lane.b32.xlu1 %v4685_v40, %s2881_s14  ;;  %v3867_v0 = vsel %vm555_vm7, %v532_v9, %v550_v59  ;;  %v3871_v33 = vsel %vm555_vm7, %v550_v59, %v532_v9  ;;  %v553_v25 = vrot.slane %v3620_v26, 7  ;;  %v534_v53 = vrot.slane %v3632_v31, 7 }
  0xb9   : > { %v552_v23 = vrot.slane %v3638_v42, 7  ;;  %v4687_v38 = vpack.i.bf16 %v3657_v61, %v3646_v28  ;;  %v4688_v55 = vpack.i.bf16 %v3620_v26, %v3614_v37  ;;  %v4689_v18 = vpack.i.bf16 %v3638_v42, %v3632_v31 }
  0xba   : > { %2811 = vrot.lane.b32.xlu0 %v4686_v30, %s2881_s14  ;;  %v3878_v63 = vsel %vm555_vm7, %v535_v39, %v553_v25  ;;  %v3882_v43 = vsel %vm555_vm7, %v553_v25, %v535_v39  ;;  %v4690_v52 = vpack.i.bf16 %v3690_v8, %v3674_v14  ;;  %v4691_v28 = vpack.i.bf16 %v3694_v57, %v3680_v27 }
  0xbb   : > { %v3890_v48 = vsel %vm555_vm7, %v534_v53, %v552_v23  ;;  %v3894_v35 = vsel %vm555_vm7, %v552_v23, %v534_v53  ;;  %v4692_v37 = vmov 0.0   ;;  %v600_v61 = vsel %vm517_vm2, %v3702_v60, 0.0 }
  0xbc   : > { %2836 = vrot.lane.b32.xlu1 %v2835_v16, %s2882_s19  ;;  %v598_v27 = vsel %vm517_vm2, %v3753_v56, 0.0 }
  0xbe   : > { %2826 = vrot.lane.b32.xlu0 %v4687_v38, %s2882_s19 }
  0xc0   : > { %2841 = vrot.lane.b32.xlu1 %v4688_v55, %s2881_s14 }
  0xc2   : > { %2831 = vrot.lane.b32.xlu0 %v4689_v18, %s2881_s14 }
  0xc4   : > { %2851 = vrot.lane.b32.xlu1 %v4690_v52, %s2882_s19 }
  0xc6   : > { %2846 = vrot.lane.b32.xlu0 %v4691_v28, %s2882_s19  ;;  %v604_v28 = vsel %vm517_vm2, %v3720_v32, 0.0 }
  0xc8   : > { %2861 = vrot.lane.b32.xlu1 %v2930_v6, %s2882_s19 }
  0xca   : > { %2856 = vrot.lane.b32.xlu0 %v4692_v37, %s2881_s14 }
  0xf9   : > { %v2697_v16 = vpop.permute.xlu0 %2696 }
  0xfa   : > { %v2702_v26 = vpop.permute.xlu1 %2701  ;;  %v2699_v14 = vunpack.i.h.bf16 %v2697_v16  ;;  %v2698_v8 = vunpack.i.l.bf16 %v2697_v16 }
  0xfb   : > { %v2704_v31 = vunpack.i.h.bf16 %v2702_v26  ;;  %v2703_v42 = vunpack.i.l.bf16 %v2702_v26 }
  0xfc   : > { %v1037_v30 = vsel %vm208_vm1, %v598_v27, %v2698_v8  ;;  %v1038_v25 = vsel %vm208_vm1, %v3749_v22, %v2699_v14  ;;  %v602_v22 = vsel %vm517_vm2, %v3740_v11, 0.0 }
  0xfd   : > { %v1039_v4 = vsel %vm208_vm1, %v600_v61, %v2703_v42  ;;  %v1040_v9 = vsel %vm208_vm1, %v3698_v41, %v2704_v31 }
  0xfe   : > { %v2717_v62 = vpop.permute.xlu1 %2716  ;;  %v2707_v20 = vpop.permute.xlu0 %2706 }
  0xff   : > { %v2719_v57 = vunpack.i.h.bf16 %v2717_v62  ;;  %v2718_v6 = vunpack.i.l.bf16 %v2717_v62  ;;  %v2709_v59 = vunpack.i.h.bf16 %v2707_v20  ;;  %v2708_v40 = vunpack.i.l.bf16 %v2707_v20 }
 0x101   : > { %v1076_v39 = vsel %vm1071_vm4, %v1039_v4, %v2718_v6  ;;  %v1077_v60 = vsel %vm1071_vm4, %v1040_v9, %v2719_v57  ;;  %v1074_v23 = vsel %vm1071_vm4, %v1037_v30, %v2708_v40  ;;  %v1075_v38 = vsel %vm1071_vm4, %v1038_v25, %v2709_v59 }
 0x102   : > { %v3934_v56 = vpack.c.bf16 %v1077_v60, %v1076_v39  ;;  %v2722_v53 = vpop.permute.xlu1 %2721  ;;  %v2712_v55 = vpop.permute.xlu0 %2711  ;;  %v1109_v41 = vpack.c.bf16 %v1075_v38, %v1074_v23  ;;  %v606_v30 = vsel %vm517_vm2, %v3772_v3, 0.0 }
 0x103   : > { %v2724_v18 = vunpack.i.h.bf16 %v2722_v53  ;;  %v2723_v52 = vunpack.i.l.bf16 %v2722_v53  ;;  %v2714_v37 = vunpack.i.h.bf16 %v2712_v55  ;;  %v2713_v26 = vunpack.i.l.bf16 %v2712_v55 }
 0x104   : > { %2503 = vmatprep.mubr.msk.bf16.mxu1 %vm1136_vm6, %v1109_v41  ;;  %2538 = vmatmul.mubr.msk.bf16.vlgmr.msra.gmra.mrb[0].mxu0 %vm1136_vm6, %v1109_v41 }
 0x105   : > { %2504 = vmatmul.mubr.msk.bf16.vlgmr.msra.gmra.mrb[0].mxu1 %vm1136_vm6, %v3934_v56  ;;  %2541 = vmatprep.mubr.msk.bf16.mxu0 %vm1136_vm6, %v3934_v56  ;;  %v1044_v61 = vsel %vm208_vm1, %v3716_v7, %v2724_v18  ;;  %v1043_v14 = vsel %vm208_vm1, %v604_v28, %v2723_v52  ;;  %v1042_v62 = vsel %vm208_vm1, %v3736_v2, %v2714_v37  ;;  %v608_v2 = vsel %vm517_vm2, %v3762_v17, 0.0 }
 0x106   : > { %v2737_v16 = vpop.permute.xlu1 %2736  ;;  %2604 = vmatpush3.bf16.msra.mxu1 %v3276_v36  ;;  %2570 = vmatpush3.bf16.msra.mxu0 %v3730_v45  ;;  %v2727_v42 = vpop.permute.xlu0 %2726  ;;  %v1041_v27 = vsel %vm208_vm1, %v602_v22, %v2713_v26 }
 0x107   : > { %v2739_v32 = vunpack.i.h.bf16 %v2737_v16  ;;  %v2738_v31 = vunpack.i.l.bf16 %v2737_v16  ;;  %v2729_v11 = vunpack.i.h.bf16 %v2727_v42  ;;  %v2728_v8 = vunpack.i.l.bf16 %v2727_v42 }
 0x109   : > { %v1080_v57 = vsel %vm1071_vm4, %v1043_v14, %v2738_v31  ;;  %v1081_v36 = vsel %vm1071_vm4, %v1044_v61, %v2739_v32  ;;  %v1078_v6 = vsel %vm1071_vm4, %v1041_v27, %v2728_v8  ;;  %v1079_v20 = vsel %vm1071_vm4, %v1042_v62, %v2729_v11 }
 0x10a   : > { %v3960_v45 = vpack.c.bf16 %v1081_v36, %v1080_v57  ;;  %v2742_v7 = vpop.permute.xlu1 %2741  ;;  %v3964_v4 = vpack.c.bf16 %v1079_v20, %v1078_v6  ;;  %v2732_v9 = vpop.permute.xlu0 %2731  ;;  %v610_v8 = vsel %vm517_vm2, %v3803_v10, 0.0 }
 0x10b   : > { %v2744_v59 = vunpack.i.h.bf16 %v2742_v7  ;;  %v2743_v40 = vunpack.i.l.bf16 %v2742_v7  ;;  %v2734_v39 = vunpack.i.h.bf16 %v2732_v9  ;;  %v2733_v60 = vunpack.i.l.bf16 %v2732_v9 }
 0x10c   : > { %2507 = vmatprep.mubr.msk.bf16.mxu1 %vm1136_vm6, %v3964_v4  ;;  %2542 = vmatmul.mubr.msk.bf16.gmra.mrb[4].mxu0 %vm1136_vm6, %v3964_v4 }
 0x10d   : > { %2508 = vmatmul.mubr.msk.bf16.gmra.mrb[4].mxu1 %vm1136_vm6, %v3960_v45  ;;  %2545 = vmatprep.mubr.msk.bf16.mxu0 %vm1136_vm6, %v3960_v45  ;;  %v1048_v38 = vsel %vm208_vm1, %v3758_v5, %v2744_v59  ;;  %v1047_v55 = vsel %vm208_vm1, %v608_v2, %v2743_v40  ;;  %v1046_v3 = vsel %vm208_vm1, %v3768_v13, %v2734_v39  ;;  %v612_v13 = vsel %vm517_vm2, %v3793_v51, 0.0 }
 0x10e   : > { %v2757_v25 = vpop.permute.xlu1 %2756  ;;  %v2747_v23 = vpop.permute.xlu0 %2746  ;;  %v1045_v52 = vsel %vm208_vm1, %v606_v30, %v2733_v60 }
 0x10f   : > { %v2759_v17 = vunpack.i.h.bf16 %v2757_v25  ;;  %v2758_v53 = vunpack.i.l.bf16 %v2757_v25  ;;  %v2749_v41 = vunpack.i.h.bf16 %v2747_v23  ;;  %v2748_v18 = vunpack.i.l.bf16 %v2747_v23 }
 0x111   : > { %v1084_v28 = vsel %vm1071_vm4, %v1047_v55, %v2758_v53  ;;  %v1085_v37 = vsel %vm1071_vm4, %v1048_v38, %v2759_v17  ;;  %v1082_v22 = vsel %vm1071_vm4, %v1045_v52, %v2748_v18  ;;  %v1083_v16 = vsel %vm1071_vm4, %v1046_v3, %v2749_v41 }
 0x112   : > { %v3988_v26 = vpack.c.bf16 %v1085_v37, %v1084_v28  ;;  %v2762_v5 = vpop.permute.xlu1 %2761  ;;  %v3992_v32 = vpack.c.bf16 %v1083_v16, %v1082_v22  ;;  %v614_v55 = vsel %vm517_vm2, %v3822_v46, 0.0 }
 0x113   : > { %v2752_v31 = vpop.permute.xlu0 %2751  ;;  %v2764_v42 = vunpack.i.h.bf16 %v2762_v5  ;;  %v2763_v61 = vunpack.i.l.bf16 %v2762_v5 }
 0x114   : > { %v2754_v14 = vunpack.i.h.bf16 %v2752_v31  ;;  %v2753_v11 = vunpack.i.l.bf16 %v2752_v31  ;;  %2511 = vmatprep.mubr.msk.bf16.mxu1 %vm1136_vm6, %v3992_v32  ;;  %2546 = vmatmul.mubr.msk.bf16.gmra.mrb[8].mxu0 %vm1136_vm6, %v3992_v32 }
 0x115   : > { %2512 = vmatmul.mubr.msk.bf16.gmra.mrb[8].mxu1 %vm1136_vm6, %v3988_v26  ;;  %2549 = vmatprep.mubr.msk.bf16.mxu0 %vm1136_vm6, %v3988_v26  ;;  %v1052_v36 = vsel %vm208_vm1, %v3789_v15, %v2764_v42  ;;  %v1051_v6 = vsel %vm208_vm1, %v612_v13, %v2763_v61 }
 0x116   : > { %v2777_v62 = vpop.permute.xlu1 %2776  ;;  %v1050_v10 = vsel %vm208_vm1, %v3799_v12, %v2754_v14  ;;  %v1049_v9 = vsel %vm208_vm1, %v610_v8, %v2753_v11  ;;  %v616_v12 = vsel %vm517_vm2, %v3812_v44, 0.0 }
 0x117   : > { %v2779_v51 = vunpack.i.h.bf16 %v2777_v62  ;;  %v2778_v27 = vunpack.i.l.bf16 %v2777_v62  ;;  %v2767_v57 = vpop.permute.xlu0 %2766 }
 0x118   : > { %v2769_v20 = vunpack.i.h.bf16 %v2767_v57  ;;  %v2768_v7 = vunpack.i.l.bf16 %v2767_v57 }
 0x119   : > { %v1088_v59 = vsel %vm1071_vm4, %v1051_v6, %v2778_v27  ;;  %v1089_v40 = vsel %vm1071_vm4, %v1052_v36, %v2779_v51  ;;  %v618_v27 = vsel %vm517_vm2, %v3845_v21, 0.0 }
 0x11a   : > { %v4016_v2 = vpack.c.bf16 %v1089_v40, %v1088_v59  ;;  %v1086_v39 = vsel %vm1071_vm4, %v1049_v9, %v2768_v7  ;;  %v1087_v60 = vsel %vm1071_vm4, %v1050_v10, %v2769_v20  ;;  %v2782_v15 = vpop.permute.xlu1 %2781 }
 0x11b   : > { %v4020_v30 = vpack.c.bf16 %v1087_v60, %v1086_v39  ;;  %v2784_v17 = vunpack.i.h.bf16 %v2782_v15  ;;  %v2783_v53 = vunpack.i.l.bf16 %v2782_v15 }
 0x11c   : > { %v2772_v25 = vpop.permute.xlu0 %2771 }
 0x11d   : > { %v2774_v23 = vunpack.i.h.bf16 %v2772_v25  ;;  %v2773_v38 = vunpack.i.l.bf16 %v2772_v25  ;;  %2515 = vmatprep.mubr.msk.bf16.mxu1 %vm1136_vm6, %v4020_v30  ;;  %2550 = vmatmul.mubr.msk.bf16.gmra.mrb[12].mxu0 %vm1136_vm6, %v4020_v30  ;;  %v1056_v52 = vsel %vm208_vm1, %v3808_v58, %v2784_v17  ;;  %v1055_v28 = vsel %vm208_vm1, %v616_v12, %v2783_v53 }
 0x11e   : > { %2516 = vmatmul.mubr.msk.bf16.gmra.mrb[12].mxu1 %vm1136_vm6, %v4016_v2  ;;  %2571 = vmatprep.mubr.msk.bf16.mxu0 %vm1136_vm6, %v3934_v56  ;;  %v2797_v41 = vpop.permute.xlu1 %2796 }
 0x11f   : > { %v2799_v44 = vunpack.i.h.bf16 %v2797_v41  ;;  %v2798_v18 = vunpack.i.l.bf16 %v2797_v41  ;;  %v1054_v46 = vsel %vm208_vm1, %v3818_v50, %v2774_v23  ;;  %v1053_v16 = vsel %vm208_vm1, %v614_v55, %v2773_v38 }
 0x120   : > { %v2787_v3 = vpop.permute.xlu0 %2786  ;;  %v620_v50 = vsel %vm517_vm2, %v3835_v47, 0.0  ;;  %v622_v38 = vsel %vm517_vm2, %v3871_v33, 0.0 }
 0x121   : > { %v2789_v37 = vunpack.i.h.bf16 %v2787_v3  ;;  %v2788_v22 = vunpack.i.l.bf16 %v2787_v3  ;;  %v1092_v5 = vsel %vm1071_vm4, %v1055_v28, %v2798_v18  ;;  %v1093_v56 = vsel %vm1071_vm4, %v1056_v52, %v2799_v44 }
 0x122   : > { %v4044_v31 = vpack.c.bf16 %v1093_v56, %v1092_v5  ;;  %v2802_v58 = vpop.permute.xlu1 %2801 }
 0x123   : > { %v1090_v42 = vsel %vm1071_vm4, %v1053_v16, %v2788_v22  ;;  %v1091_v61 = vsel %vm1071_vm4, %v1054_v46, %v2789_v37  ;;  %v2804_v11 = vunpack.i.h.bf16 %v2802_v58  ;;  %v2803_v8 = vunpack.i.l.bf16 %v2802_v58 }
 0x124   : > { %v4048_v13 = vpack.c.bf16 %v1091_v61, %v1090_v42  ;;  %v2792_v14 = vpop.permute.xlu0 %2791 }
 0x125   : > { %v2794_v62 = vunpack.i.h.bf16 %v2792_v14  ;;  %v2793_v51 = vunpack.i.l.bf16 %v2792_v14  ;;  %2572 = vmatmul.mubr.msk.bf16.vlgmr.msra.gmra.mrb[0].mxu0 %vm1136_vm6, %v3964_v4  ;;  %v1060_v20 = vsel %vm208_vm1, %v3831_v34, %v2804_v11  ;;  %v1059_v7 = vsel %vm208_vm1, %v620_v50, %v2803_v8 }
 0x126   : > { %2519 = vmatprep.mubr.msk.bf16.mxu1 %vm1136_vm6, %v4048_v13  ;;  %2575 = vmatprep.mubr.msk.bf16.mxu0 %vm1136_vm6, %v3960_v45  ;;  %v2817_v57 = vpop.permute.xlu1 %2816  ;;  %v626_v11 = vsel %vm517_vm2, %v3894_v35, 0.0 }
 0x127   : > { %2520 = vmatmul.mubr.msk.bf16.gmra.mrb[16].mxu1 %vm1136_vm6, %v4044_v31  ;;  %v2819_v47 = vunpack.i.h.bf16 %v2817_v57  ;;  %v2818_v36 = vunpack.i.l.bf16 %v2817_v57  ;;  %v1058_v21 = vsel %vm208_vm1, %v3841_v54, %v2794_v62  ;;  %v1057_v9 = vsel %vm208_vm1, %v618_v27, %v2793_v51 }
 0x128   : > { %v2807_v6 = vpop.permute.xlu0 %2806  ;;  %v624_v54 = vsel %vm517_vm2, %v3858_v49, 0.0 }
 0x129   : > { %v2809_v4 = vunpack.i.h.bf16 %v2807_v6  ;;  %v2808_v10 = vunpack.i.l.bf16 %v2807_v6  ;;  %v1096_v59 = vsel %vm1071_vm4, %v1059_v7, %v2818_v36  ;;  %v1097_v45 = vsel %vm1071_vm4, %v1060_v20, %v2819_v47 }
 0x12a   : > { %v4072_v40 = vpack.c.bf16 %v1097_v45, %v1096_v59  ;;  %v2822_v34 = vpop.permute.xlu1 %2821 }
 0x12b   : > { %v1094_v39 = vsel %vm1071_vm4, %v1057_v9, %v2808_v10  ;;  %v1095_v60 = vsel %vm1071_vm4, %v1058_v21, %v2809_v4  ;;  %v2824_v17 = vunpack.i.h.bf16 %v2822_v34  ;;  %v2823_v53 = vunpack.i.l.bf16 %v2822_v34 }
 0x12c   : > { %v4076_v15 = vpack.c.bf16 %v1095_v60, %v1094_v39  ;;  %v2812_v25 = vpop.permute.xlu0 %2811 }
 0x12d   : > { %v2814_v12 = vunpack.i.h.bf16 %v2812_v25  ;;  %v2813_v23 = vunpack.i.l.bf16 %v2812_v25  ;;  %2576 = vmatmul.mubr.msk.bf16.gmra.mrb[4].mxu0 %vm1136_vm6, %v3992_v32  ;;  %v1064_v18 = vsel %vm208_vm1, %v3854_v24, %v2824_v17  ;;  %v1063_v3 = vsel %vm208_vm1, %v624_v54, %v2823_v53 }
 0x12e   : > { %2523 = vmatprep.mubr.msk.bf16.mxu1 %vm1136_vm6, %v4076_v15  ;;  %2579 = vmatprep.mubr.msk.bf16.mxu0 %vm1136_vm6, %v3988_v26  ;;  %v2837_v55 = vpop.permute.xlu1 %2836 }
 0x12f   : > { %2524 = vmatmul.mubr.msk.bf16.gmra.mrb[20].mxu1 %vm1136_vm6, %v4072_v40  ;;  %v2839_v49 = vunpack.i.h.bf16 %v2837_v55  ;;  %v2838_v41 = vunpack.i.l.bf16 %v2837_v55  ;;  %v1062_v33 = vsel %vm208_vm1, %v3867_v0, %v2814_v12  ;;  %v1061_v28 = vsel %vm208_vm1, %v622_v38, %v2813_v23 }
 0x130   : > { %v2827_v44 = vpop.permute.xlu0 %2826  ;;  %v628_v0 = vsel %vm517_vm2, %v3882_v43, 0.0 }
 0x131   : > { %v2829_v32 = vunpack.i.h.bf16 %v2827_v44  ;;  %v2828_v52 = vunpack.i.l.bf16 %v2827_v44  ;;  %v1100_v37 = vsel %vm1071_vm4, %v1063_v3, %v2838_v41  ;;  %v1101_v26 = vsel %vm1071_vm4, %v1064_v18, %v2839_v49  ;;  %v4177_v18 = vld [vmem:[%s4666_s2] ss:$0 sm:$0xff] }
 0x132   : > { %v1122_v22 = vpack.c.bf16 %v1101_v26, %v1100_v37  ;;  %v2842_v5 = vpop.permute.xlu1 %2841 }
 0x133   : > { %v1098_v46 = vsel %vm1071_vm4, %v1061_v28, %v2828_v52  ;;  %v1099_v16 = vsel %vm1071_vm4, %v1062_v33, %v2829_v32  ;;  %v2844_v42 = vunpack.i.h.bf16 %v2842_v5  ;;  %v2843_v61 = vunpack.i.l.bf16 %v2842_v5 }
 0x134   : > { %v1121_v24 = vpack.c.bf16 %v1099_v16, %v1098_v46  ;;  %v2832_v56 = vpop.permute.xlu0 %2831 }
 0x135   : > { %v2834_v58 = vunpack.i.h.bf16 %v2832_v56  ;;  %v2833_v14 = vunpack.i.l.bf16 %v2832_v56  ;;  %2580 = vmatmul.mubr.msk.bf16.gmra.mrb[8].mxu0 %vm1136_vm6, %v4020_v30  ;;  %v1068_v51 = vsel %vm208_vm1, %v3878_v63, %v2844_v42  ;;  %v1067_v27 = vsel %vm208_vm1, %v628_v0, %v2843_v61 }
 0x136   : > { %2527 = vmatprep.mubr.msk.bf16.mxu1 %vm1136_vm6, %v1121_v24  ;;  %2583 = vmatprep.mubr.msk.bf16.mxu0 %vm1136_vm6, %v4016_v2  ;;  %v2852_v8 = vpop.permute.xlu1 %2851 }
 0x137   : > { %2528 = vmatmul.mubr.msk.bf16.gmra.mrb[24].mxu1 %vm1136_vm6, %v1122_v22  ;;  %v2854_v50 = vunpack.i.h.bf16 %v2852_v8  ;;  %v2853_v62 = vunpack.i.l.bf16 %v2852_v8  ;;  %v1066_v1 = vsel %vm208_vm1, %v3890_v48, %v2834_v58  ;;  %v1065_v35 = vsel %vm208_vm1, %v626_v11, %v2833_v14 }
 0x138   : > { %v2847_v43 = vpop.permute.xlu0 %2846 }
 0x139   : > { %v2849_v57 = vunpack.i.h.bf16 %v2847_v43  ;;  %v2848_v30 = vunpack.i.l.bf16 %v2847_v43  ;;  %v1104_v47 = vsel %vm1071_vm4, %v1067_v27, %v2853_v62  ;;  %v1105_v36 = vsel %vm1071_vm4, %v1068_v51, %v2854_v50 }
 0x13a   : > { %v1124_v6 = vpack.c.bf16 %v1105_v36, %v1104_v47 }
 0x13b   : > { %v1102_v20 = vsel %vm1071_vm4, %v1065_v35, %v2848_v30  ;;  %v1103_v7 = vsel %vm1071_vm4, %v1066_v1, %v2849_v57 }
 0x13c   : > { %v1123_v4 = vpack.c.bf16 %v1103_v7, %v1102_v20  ;;  %v2857_v63 = vpop.permute.xlu0 %2856 }
 0x13d   : > { %2584 = vmatmul.mubr.msk.bf16.gmra.mrb[12].mxu0 %vm1136_vm6, %v4048_v13  ;;  %v2859_v48 = vunpack.i.h.bf16 %v2857_v63 }
 0x13e   : > { %2531 = vmatprep.mubr.msk.bf16.mxu1 %vm1136_vm6, %v1123_v4  ;;  %2587 = vmatprep.mubr.msk.bf16.mxu0 %vm1136_vm6, %v4044_v31 }
 0x13f   : > { %2532 = vmatmul.mubr.msk.bf16.gmra.mrb[28].mxu1 %vm1136_vm6, %v1124_v6  ;;  %v1070_v9 = vsel %vm208_vm1, %v3207_v19, %v2859_v48 }
 0x140   : > { %2553 = vmatprep.mubr.msk.bf16.mxu1 %vm1136_vm6, %v4016_v2  ;;  %v2858_v2 = vunpack.i.l.bf16 %v2857_v63 }
 0x145   : > { %2588 = vmatmul.mubr.msk.bf16.gmra.mrb[16].mxu0 %vm1136_vm6, %v4076_v15 }
 0x146   : > { %2591 = vmatprep.mubr.msk.bf16.mxu0 %vm1136_vm6, %v4072_v40 }
 0x147   : > { %2554 = vmatmul.mubr.msk.bf16.vlgmr.msra.gmra.mrb[16].mxu1 %vm1136_vm6, %v4048_v13  ;;  %v2862_v13 = vpop.permute.xlu1 %2861 }
 0x148   : > { %2557 = vmatprep.mubr.msk.bf16.mxu1 %vm1136_vm6, %v4044_v31  ;;  %v2864_v10 = vunpack.i.h.bf16 %v2862_v13  ;;  %v2863_v21 = vunpack.i.l.bf16 %v2862_v13  ;;  %v1069_v31 = vsel %vm208_vm1, %v3235_v29, %v2858_v2 }
 0x14a   : > { %v1106_v59 = vsel %vm1071_vm4, %v1069_v31, %v2863_v21  ;;  %v1107_v45 = vsel %vm1071_vm4, %v1070_v9, %v2864_v10 }
 0x14d   : > { %2592 = vmatmul.mubr.msk.bf16.gmra.mrb[20].mxu0 %vm1136_vm6, %v1121_v24 }
 0x14e   : > { %2595 = vmatprep.mubr.msk.bf16.mxu0 %vm1136_vm6, %v1122_v22 }
 0x14f   : > { %2558 = vmatmul.mubr.msk.bf16.gmra.mrb[20].mxu1 %vm1136_vm6, %v4076_v15 }
 0x150   : > { %2561 = vmatprep.mubr.msk.bf16.mxu1 %vm1136_vm6, %v4072_v40  ;;  %v1125_v40 = vpack.c.bf16 %v1107_v45, %v1106_v59 }
 0x155   : > { %2596 = vmatmul.mubr.msk.bf16.gmra.mrb[24].mxu0 %vm1136_vm6, %v1123_v4 }
 0x156   : > { %2599 = vmatprep.mubr.msk.bf16.mxu0 %vm1136_vm6, %v1124_v6 }
 0x157   : > { %2562 = vmatmul.mubr.msk.bf16.gmra.mrb[24].mxu1 %vm1136_vm6, %v1121_v24 }
 0x158   : > { %2565 = vmatprep.mubr.msk.bf16.mxu1 %vm1136_vm6, %v1122_v22 }
 0x15d   : > { %2600 = vmatmul.mubr.msk.bf16.gmra.mrb[28].mxu0 %vm1136_vm6, %v1125_v40 }
 0x15f   : > { %2566 = vmatmul.mubr.msk.bf16.gmra.mrb[28].mxu1 %vm1136_vm6, %v1123_v4 }
 0x1d8   : > { %v2505_v19 = vpop.f32.mrb[0].mxu1 }
 0x1d9   : > { %v1223_v39 = vpop.f32.mrb[1].mxu1 }
 0x1da   : > { %v2506_v29 = vpop.f32.mrb[2].mxu1 }
 0x1db   : > { %v1226_v60 = vpop.f32.mrb[3].mxu1 }
 0x1e0   : > { %v2509_v34 = vpop.f32.mrb[4].mxu1 }
 0x1e1   : > { %v1239_v15 = vpop.f32.mrb[5].mxu1 }
 0x1e2   : > { %v2510_v25 = vpop.f32.mrb[6].mxu1 }
 0x1e3   : > { %v1242_v17 = vpop.f32.mrb[7].mxu1 }
 0x1e8   : > { %v4158_v53 = vpop.f32.mrb[8].mxu1 }
 0x1e9   : > { %v4160_v54 = vpop.f32.mrb[9].mxu1 }
 0x1ea   : > { %v4162_v12 = vpop.f32.mrb[10].mxu1 }
 0x1eb   : > { %v4164_v23 = vpop.f32.mrb[11].mxu1 }
 0x1f1   : > { %v4166_v38 = vpop.f32.mrb[12].mxu1 }
 0x1f2   : > { %v4168_v55 = vpop.f32.mrb[13].mxu1 }
 0x1f3   : > { %v4170_v49 = vpop.f32.mrb[14].mxu1 }
 0x1f4   : > { %v4172_v41 = vpop.f32.mrb[15].mxu1 }
 0x1f8   : > { %v2573_v44 = vpop.f32.mrb[0].mxu0 }
 0x1f9   : > { %v2605_v3 = vadd.f32 %v2573_v44, %v2505_v19  ;;  %v1570_v32 = vpop.f32.mrb[1].mxu0 }
 0x1fa   : > { %v2606_v52 = vadd.f32 %v1570_v32, %v1223_v39  ;;  %v2574_v33 = vpop.f32.mrb[2].mxu0 }
 0x1fb   : > { %v1738_v28 = vadd.f32 %v2605_v3, %v4177_v18  ;;  %v2607_v37 = vadd.f32 %v2574_v33, %v2506_v29  ;;  %v1573_v26 = vpop.f32.mrb[3].mxu0 }
 0x1fc   : > { %v1736_v22 = vadd.f32 %v2606_v52, %v4177_v18  ;;  %v2608_v46 = vadd.f32 %v1573_v26, %v1226_v60 }
 0x1fd   : > { %v1739_v16 = vadd.f32 %v2607_v37, %v4177_v18  ;;  %v1802_v5 = vmul.f32 0.1, %v1738_v28  ;;  %vm1770_vm9 = vcmp.gt.f32.partialorder %v1738_v28, 0.0 }
 0x1fe   : > { %vm1768_vm8 = vcmp.gt.f32.partialorder %v1736_v22, 0.0  ;;  %v1800_v24 = vmul.f32 0.1, %v1736_v22  ;;  %v1737_v56 = vadd.f32 %v2608_v46, %v4177_v18 }
 0x1ff   : > { %v1803_v61 = vmul.f32 0.1, %v1739_v16  ;;  %vm1771_vm12 = vcmp.gt.f32.partialorder %v1739_v16, 0.0  ;;  %v4185_v8 = vsel %vm1770_vm9, %v1738_v28, %v1802_v5 }
 0x200   : > { %v4183_v42 = vsel %vm1768_vm8, %v1736_v22, %v1800_v24  ;;  %vm1769_vm11 = vcmp.gt.f32.partialorder %v1737_v56, 0.0  ;;  %v1801_v0 = vmul.f32 0.1, %v1737_v56  ;;  %v2577_v58 = vpop.f32.mrb[4].mxu0  ;;  %v1868_v20 = vsel %vm1864_vm10, %v4185_v8, 0.0 }
 0x201   : > { %v2609_v14 = vadd.f32 %v2577_v58, %v2509_v34  ;;  %v1586_v11 = vpop.f32.mrb[5].mxu0  ;;  %v1865_v51 = vsel %vm1864_vm10, %v4183_v42, 0.0  ;;  %v4194_v35 = vsel %vm1771_vm12, %v1739_v16, %v1803_v61 }
 0x202   : > { %v4187_v50 = vsel %vm1769_vm11, %v1737_v56, %v1801_v0  ;;  %v2610_v62 = vadd.f32 %v1586_v11, %v1239_v15  ;;  %v2578_v43 = vpop.f32.mrb[6].mxu0  ;;  %v1870_v13 = vsel %vm1864_vm10, %v4194_v35, 0.0 }
 0x203   : > { %v1866_v27 = vsel %vm1864_vm10, %v4187_v50, 0.0  ;;  %v1742_v57 = vadd.f32 %v2609_v14, %v4177_v18  ;;  %v2611_v30 = vadd.f32 %v2578_v43, %v2510_v25  ;;  %v1589_v1 = vpop.f32.mrb[7].mxu0 }
 0x204   : > { %v1867_v47 = vadd.f32 %v1866_v27, %v1865_v51  ;;  %v1740_v36 = vadd.f32 %v2610_v62, %v4177_v18  ;;  %v2612_v6 = vadd.f32 %v1589_v1, %v1242_v17 }
 0x205   : > { %v1806_v7 = vmul.f32 0.1, %v1742_v57  ;;  %v1743_v4 = vadd.f32 %v2611_v30, %v4177_v18  ;;  %vm1774_vm14 = vcmp.gt.f32.partialorder %v1742_v57, 0.0 }
 0x206   : > { %v1869_v63 = vadd.f32 %v1868_v20, %v1867_v47  ;;  %vm1772_vm13 = vcmp.gt.f32.partialorder %v1740_v36, 0.0  ;;  %v1804_v48 = vmul.f32 0.1, %v1740_v36  ;;  %v1741_v2 = vadd.f32 %v2612_v6, %v4177_v18 }
 0x207   : > { %v1807_v9 = vmul.f32 0.1, %v1743_v4  ;;  %vm1775_vm0 = vcmp.gt.f32.partialorder %v1743_v4, 0.0  ;;  %v4208_v39 = vsel %vm1774_vm14, %v1742_v57, %v1806_v7 }
 0x208   : > { %v4203_v10 = vsel %vm1772_vm13, %v1740_v36, %v1804_v48  ;;  %v1871_v21 = vadd.f32 %v1870_v13, %v1869_v63  ;;  %vm1773_vm15 = vcmp.gt.f32.partialorder %v1741_v2, 0.0  ;;  %v2581_v31 = vpop.f32.mrb[8].mxu0  ;;  %v1805_v45 = vmul.f32 0.1, %v1741_v2 }
 0x209   : > { %v1872_v59 = vsel %vm1864_vm10, %v4203_v10, 0.0  ;;  %v2613_v40 = vadd.f32 %v2581_v31, %v4158_v53  ;;  %v1602_v19 = vpop.f32.mrb[9].mxu0  ;;  %v4215_v3 = vsel %vm1775_vm0, %v1743_v4, %v1807_v9 }
 0x20a   : > { %v1873_v29 = vadd.f32 %v1872_v59, %v1871_v21  ;;  %v2614_v60 = vadd.f32 %v1602_v19, %v4160_v54  ;;  %v2582_v34 = vpop.f32.mrb[10].mxu0  ;;  %v4211_v15 = vsel %vm1773_vm15, %v1741_v2, %v1805_v45  ;;  %v1876_v54 = vsel %vm1864_vm10, %v4208_v39, 0.0 }
 0x20b   : > { %v1746_v25 = vadd.f32 %v2613_v40, %v4177_v18  ;;  %v2615_v17 = vadd.f32 %v2582_v34, %v4162_v12  ;;  %v1605_v44 = vpop.f32.mrb[11].mxu0  ;;  %v1874_v32 = vsel %vm1864_vm10, %v4211_v15, 0.0  ;;  %v1878_v22 = vsel %vm1864_vm10, %v4215_v3, 0.0 }
 0x20c   : > { %v1744_v53 = vadd.f32 %v2614_v60, %v4177_v18  ;;  %v2616_v52 = vadd.f32 %v1605_v44, %v4164_v23  ;;  %v1875_v33 = vadd.f32 %v1874_v32, %v1873_v29 }
 0x20d   : > { %v1747_v28 = vadd.f32 %v2615_v17, %v4177_v18  ;;  %v1810_v37 = vmul.f32 0.1, %v1746_v25  ;;  %vm1778_vm2 = vcmp.gt.f32.partialorder %v1746_v25, 0.0 }
 0x20e   : > { %vm1776_vm1 = vcmp.gt.f32.partialorder %v1744_v53, 0.0  ;;  %v1808_v26 = vmul.f32 0.1, %v1744_v53  ;;  %v1745_v12 = vadd.f32 %v2616_v52, %v4177_v18  ;;  %v1877_v46 = vadd.f32 %v1876_v54, %v1875_v33 }
 0x20f   : > { %v1811_v5 = vmul.f32 0.1, %v1747_v28  ;;  %vm1779_vm4 = vcmp.gt.f32.partialorder %v1747_v28, 0.0  ;;  %v4232_v14 = vsel %vm1778_vm2, %v1746_v25, %v1810_v37 }
 0x210   : > { %v4227_v16 = vsel %vm1776_vm1, %v1744_v53, %v1808_v26  ;;  %vm1777_vm3 = vcmp.gt.f32.partialorder %v1745_v12, 0.0  ;;  %v1809_v23 = vmul.f32 0.1, %v1745_v12  ;;  %v2585_v24 = vpop.f32.mrb[12].mxu0  ;;  %v1879_v56 = vadd.f32 %v1878_v22, %v1877_v46 }
 0x211   : > { %v1880_v61 = vsel %vm1864_vm10, %v4227_v16, 0.0  ;;  %v2617_v0 = vadd.f32 %v2585_v24, %v4166_v38  ;;  %v1618_v58 = vpop.f32.mrb[13].mxu0  ;;  %v4241_v47 = vsel %vm1779_vm4, %v1747_v28, %v1811_v5 }
 0x212   : > { %v4234_v11 = vsel %vm1777_vm3, %v1745_v12, %v1809_v23  ;;  %v2618_v62 = vadd.f32 %v1618_v58, %v4168_v55  ;;  %v2586_v43 = vpop.f32.mrb[14].mxu0  ;;  %v1881_v51 = vadd.f32 %v1880_v61, %v1879_v56  ;;  %v1884_v55 = vsel %vm1864_vm10, %v4232_v14, 0.0 }
 0x213   : > { %v1882_v27 = vsel %vm1864_vm10, %v4234_v11, 0.0  ;;  %v1750_v57 = vadd.f32 %v2617_v0, %v4177_v18  ;;  %v2619_v30 = vadd.f32 %v2586_v43, %v4170_v49  ;;  %v1621_v1 = vpop.f32.mrb[15].mxu0  ;;  %v1886_v49 = vsel %vm1864_vm10, %v4241_v47, 0.0 }
 0x214   : > { %v1748_v38 = vadd.f32 %v2618_v62, %v4177_v18  ;;  %v2620_v36 = vadd.f32 %v1621_v1, %v4172_v41  ;;  %v1883_v6 = vadd.f32 %v1882_v27, %v1881_v51 }
 0x215   : > { %v1751_v20 = vadd.f32 %v2619_v30, %v4177_v18  ;;  %v1814_v48 = vmul.f32 0.1, %v1750_v57  ;;  %vm1782_vm6 = vcmp.gt.f32.partialorder %v1750_v57, 0.0 }
 0x216   : > { %vm1780_vm5 = vcmp.gt.f32.partialorder %v1748_v38, 0.0  ;;  %v1812_v7 = vmul.f32 0.1, %v1748_v38  ;;  %v1749_v4 = vadd.f32 %v2620_v36, %v4177_v18  ;;  %v1885_v63 = vadd.f32 %v1884_v55, %v1883_v6 }
 0x217   : > { %v1815_v31 = vmul.f32 0.1, %v1751_v20  ;;  %vm1783_vm8 = vcmp.gt.f32.partialorder %v1751_v20, 0.0  ;;  %v4257_v34 = vsel %vm1782_vm6, %v1750_v57, %v1814_v48 }
 0x218   : > { %v4251_v2 = vsel %vm1780_vm5, %v1748_v38, %v1812_v7  ;;  %vm1781_vm7 = vcmp.gt.f32.partialorder %v1749_v4, 0.0  ;;  %v1813_v41 = vmul.f32 0.1, %v1749_v4  ;;  %v2589_v13 = vpop.f32.mrb[16].mxu0  ;;  %v1887_v21 = vadd.f32 %v1886_v49, %v1885_v63 }
 0x219   : > { %v1888_v9 = vsel %vm1864_vm10, %v4251_v2, 0.0  ;;  %v1634_v45 = vpop.f32.mrb[17].mxu0  ;;  %v4262_v28 = vsel %vm1783_vm8, %v1751_v20, %v1815_v31  ;;  %v1892_v22 = vsel %vm1864_vm10, %v4257_v34, 0.0 }
 0x21a   : > { %v2555_v59 = vpop.f32.mrb[16].mxu1  ;;  %v4255_v40 = vsel %vm1781_vm7, %v1749_v4, %v1813_v41  ;;  %v2590_v60 = vpop.f32.mrb[18].mxu0  ;;  %v1889_v25 = vadd.f32 %v1888_v9, %v1887_v21  ;;  %v1894_v61 = vsel %vm1864_vm10, %v4262_v28, 0.0 }
 0x21b   : > { %v2621_v19 = vadd.f32 %v2589_v13, %v2555_v59  ;;  %v1459_v29 = vpop.f32.mrb[17].mxu1  ;;  %v1890_v17 = vsel %vm1864_vm10, %v4255_v40, 0.0  ;;  %v1637_v53 = vpop.f32.mrb[19].mxu0 }
 0x21c   : > { %v2622_v44 = vadd.f32 %v1634_v45, %v1459_v29  ;;  %v2556_v32 = vpop.f32.mrb[18].mxu1  ;;  %v1891_v37 = vadd.f32 %v1890_v17, %v1889_v25 }
 0x21d   : > { %v1754_v52 = vadd.f32 %v2621_v19, %v4177_v18  ;;  %v2623_v54 = vadd.f32 %v2590_v60, %v2556_v32  ;;  %v1462_v33 = vpop.f32.mrb[19].mxu1 }
 0x21e   : > { %v1752_v26 = vadd.f32 %v2622_v44, %v4177_v18  ;;  %v2624_v12 = vadd.f32 %v1637_v53, %v1462_v33  ;;  %v1893_v23 = vadd.f32 %v1892_v22, %v1891_v37 }
 0x21f   : > { %v1818_v46 = vmul.f32 0.1, %v1754_v52  ;;  %v1755_v5 = vadd.f32 %v2623_v54, %v4177_v18  ;;  %vm1786_vm11 = vcmp.gt.f32.partialorder %v1754_v52, 0.0 }
 0x220   : > { %vm1784_vm9 = vcmp.gt.f32.partialorder %v1752_v26, 0.0  ;;  %v1816_v24 = vmul.f32 0.1, %v1752_v26  ;;  %v1753_v56 = vadd.f32 %v2624_v12, %v4177_v18  ;;  %v2593_v0 = vpop.f32.mrb[20].mxu0  ;;  %v1895_v62 = vadd.f32 %v1894_v61, %v1893_v23 }
 0x221   : > { %v1819_v43 = vmul.f32 0.1, %v1755_v5  ;;  %v1650_v27 = vpop.f32.mrb[21].mxu0  ;;  %v4275_v6 = vsel %vm1786_vm11, %v1754_v52, %v1818_v46  ;;  %vm1787_vm13 = vcmp.gt.f32.partialorder %v1755_v5, 0.0  ;;  %vm2231_vm11 = vcmask 519168  }
 0x222   : > { %v4271_v58 = vsel %vm1784_vm9, %v1752_v26, %v1816_v24  ;;  %vm1785_vm12 = vcmp.gt.f32.partialorder %v1753_v56, 0.0  ;;  %v2559_v51 = vpop.f32.mrb[20].mxu1  ;;  %v1817_v30 = vmul.f32 0.1, %v1753_v56  ;;  %v2594_v36 = vpop.f32.mrb[22].mxu0  ;;  %v1900_v31 = vsel %vm1864_vm10, %v4275_v6, 0.0 }
 0x223   : > { %v1896_v57 = vsel %vm1864_vm10, %v4271_v58, 0.0  ;;  %v2625_v1 = vadd.f32 %v2593_v0, %v2559_v51  ;;  %v1475_v38 = vpop.f32.mrb[21].mxu1  ;;  %v1653_v4 = vpop.f32.mrb[23].mxu0  ;;  %v4285_v59 = vsel %vm1787_vm13, %v1755_v5, %v1819_v43 }
 0x224   : > { %v1897_v20 = vadd.f32 %v1896_v57, %v1895_v62  ;;  %v2626_v55 = vadd.f32 %v1650_v27, %v1475_v38  ;;  %v2560_v7 = vpop.f32.mrb[22].mxu1  ;;  %v4277_v49 = vsel %vm1785_vm12, %v1753_v56, %v1817_v30  ;;  %v1902_v32 = vsel %vm1864_vm10, %v4285_v59, 0.0 }
 0x225   : > { %v1758_v63 = vadd.f32 %v2625_v1, %v4177_v18  ;;  %v2627_v48 = vadd.f32 %v2594_v36, %v2560_v7  ;;  %v1478_v41 = vpop.f32.mrb[23].mxu1  ;;  %v1898_v13 = vsel %vm1864_vm10, %v4277_v49, 0.0 }
 0x226   : > { %v1756_v21 = vadd.f32 %v2626_v55, %v4177_v18  ;;  %v2628_v9 = vadd.f32 %v1653_v4, %v1478_v41  ;;  %v1899_v45 = vadd.f32 %v1898_v13, %v1897_v20 }
 0x227   : > { %v1759_v19 = vadd.f32 %v2627_v48, %v4177_v18  ;;  %v1822_v29 = vmul.f32 0.1, %v1758_v63  ;;  %vm1790_vm15 = vcmp.gt.f32.partialorder %v1758_v63, 0.0 }
 0x228   : > { %vm1788_vm14 = vcmp.gt.f32.partialorder %v1756_v21, 0.0  ;;  %v1820_v60 = vmul.f32 0.1, %v1756_v21  ;;  %v1757_v25 = vadd.f32 %v2628_v9, %v4177_v18  ;;  %v1901_v17 = vadd.f32 %v1900_v31, %v1899_v45  ;;  %v2597_v44 = vpop.f32.mrb[24].mxu0 }
 0x229   : > { %v1666_v33 = vpop.f32.mrb[25].mxu0  ;;  %v1823_v12 = vmul.f32 0.1, %v1759_v19  ;;  %v4295_v23 = vsel %vm1790_vm15, %v1758_v63, %v1822_v29  ;;  %vm1791_vm1 = vcmp.gt.f32.partialorder %v1759_v19, 0.0 }
 0x22a   : > { %v4291_v53 = vsel %vm1788_vm14, %v1756_v21, %v1820_v60  ;;  %vm1789_vm0 = vcmp.gt.f32.partialorder %v1757_v25, 0.0  ;;  %v1821_v52 = vmul.f32 0.1, %v1757_v25  ;;  %v2563_v54 = vpop.f32.mrb[24].mxu1  ;;  %v1903_v37 = vadd.f32 %v1902_v32, %v1901_v17  ;;  %v2598_v5 = vpop.f32.mrb[26].mxu0 }
 0x22b   : > { %v1904_v26 = vsel %vm1864_vm10, %v4291_v53, 0.0  ;;  %v2629_v22 = vadd.f32 %v2597_v44, %v2563_v54  ;;  %v1491_v46 = vpop.f32.mrb[25].mxu1  ;;  %v1669_v0 = vpop.f32.mrb[27].mxu0  ;;  %v1908_v38 = vsel %vm1864_vm10, %v4295_v23, 0.0  ;;  %v4305_v36 = vsel %vm1791_vm1, %v1759_v19, %v1823_v12 }
 0x22c   : > { %v4297_v24 = vsel %vm1789_vm0, %v1757_v25, %v1821_v52  ;;  %v2630_v56 = vadd.f32 %v1666_v33, %v1491_v46  ;;  %v2564_v61 = vpop.f32.mrb[26].mxu1  ;;  %v1905_v62 = vadd.f32 %v1904_v26, %v1903_v37  ;;  %v1910_v21 = vsel %vm1864_vm10, %v4305_v36, 0.0 }
 0x22d   : > { %v1906_v43 = vsel %vm1864_vm10, %v4297_v24, 0.0  ;;  %v1762_v51 = vadd.f32 %v2629_v22, %v4177_v18  ;;  %v2631_v27 = vadd.f32 %v2598_v5, %v2564_v61  ;;  %v1494_v57 = vpop.f32.mrb[27].mxu1 }
 0x22e   : > { %v1760_v30 = vadd.f32 %v2630_v56, %v4177_v18  ;;  %v2632_v1 = vadd.f32 %v1669_v0, %v1494_v57  ;;  %v1907_v20 = vadd.f32 %v1906_v43, %v1905_v62 }
 0x22f   : > { %v1763_v55 = vadd.f32 %v2631_v27, %v4177_v18  ;;  %v1826_v7 = vmul.f32 0.1, %v1762_v51  ;;  %vm1794_vm3 = vcmp.gt.f32.partialorder %v1762_v51, 0.0 }
 0x230   : > { %vm1792_vm2 = vcmp.gt.f32.partialorder %v1760_v30, 0.0  ;;  %v1824_v4 = vmul.f32 0.1, %v1760_v30  ;;  %v1761_v63 = vadd.f32 %v2632_v1, %v4177_v18  ;;  %v1909_v48 = vadd.f32 %v1908_v38, %v1907_v20  ;;  %v2601_v13 = vpop.f32.mrb[28].mxu0 }
 0x231   : > { %v1827_v41 = vmul.f32 0.1, %v1763_v55  ;;  %v1682_v19 = vpop.f32.mrb[29].mxu0  ;;  %vm1795_vm5 = vcmp.gt.f32.partialorder %v1763_v55, 0.0  ;;  %v1858_v32 = vsel %vm1794_vm3, %v1762_v51, %v1826_v7 }
 0x232   : > { %v4311_v9 = vsel %vm1792_vm2, %v1760_v30, %v1824_v4  ;;  %vm1793_vm4 = vcmp.gt.f32.partialorder %v1761_v63, 0.0  ;;  %v1825_v31 = vmul.f32 0.1, %v1761_v63  ;;  %v2567_v45 = vpop.f32.mrb[28].mxu1  ;;  %v1911_v29 = vadd.f32 %v1910_v21, %v1909_v48  ;;  %v2602_v44 = vpop.f32.mrb[30].mxu0 }
 0x233   : > { %v1912_v60 = vsel %vm1864_vm10, %v4311_v9, 0.0  ;;  %v2633_v25 = vadd.f32 %v2601_v13, %v2567_v45  ;;  %v1507_v17 = vpop.f32.mrb[29].mxu1  ;;  %v1685_v37 = vpop.f32.mrb[31].mxu0  ;;  %v1859_v56 = vsel %vm1795_vm5, %v1763_v55, %v1827_v41  ;;  %v1916_v51 = vsel %vm1864_vm10, %v1858_v32, 0.0 }
 0x234   : > { %v1857_v52 = vsel %vm1793_vm4, %v1761_v63, %v1825_v31  ;;  %v2634_v54 = vadd.f32 %v1682_v19, %v1507_v17  ;;  %v2568_v33 = vpop.f32.mrb[30].mxu1  ;;  %v1913_v26 = vadd.f32 %v1912_v60, %v1911_v29  ;;  %v1918_v30 = vsel %vm1864_vm10, %v1859_v56, 0.0 }
 0x235   : > { %v1914_v12 = vsel %vm1864_vm10, %v1857_v52, 0.0  ;;  %v1766_v22 = vadd.f32 %v2633_v25, %v4177_v18  ;;  %v2635_v46 = vadd.f32 %v2602_v44, %v2568_v33  ;;  %v1510_v5 = vpop.f32.mrb[31].mxu1 }
 0x236   : > { %v1764_v61 = vadd.f32 %v2634_v54, %v4177_v18  ;;  %v2636_v0 = vadd.f32 %v1685_v37, %v1510_v5  ;;  %v1915_v62 = vadd.f32 %v1914_v12, %v1913_v26 }
 0x237   : > { %v1767_v43 = vadd.f32 %v2635_v46, %v4177_v18  ;;  %v1830_v38 = vmul.f32 0.1, %v1766_v22  ;;  %vm1798_vm7 = vcmp.gt.f32.partialorder %v1766_v22, 0.0 }
 0x238   : > { %vm1796_vm6 = vcmp.gt.f32.partialorder %v1764_v61, 0.0  ;;  %v1828_v27 = vmul.f32 0.1, %v1764_v61  ;;  %v1765_v57 = vadd.f32 %v2636_v0, %v4177_v18  ;;  %v1917_v1 = vadd.f32 %v1916_v51, %v1915_v62 }
 0x239   : > { %v1831_v63 = vmul.f32 0.1, %v1767_v43  ;;  %vm1799_vm9 = vcmp.gt.f32.partialorder %v1767_v43, 0.0  ;;  %v1862_v41 = vsel %vm1798_vm7, %v1766_v22, %v1830_v38 }
 0x23a   : > { %v1860_v20 = vsel %vm1796_vm6, %v1764_v61, %v1828_v27  ;;  %vm1797_vm8 = vcmp.gt.f32.partialorder %v1765_v57, 0.0  ;;  %v1829_v55 = vmul.f32 0.1, %v1765_v57  ;;  %v1919_v7 = vadd.f32 %v1918_v30, %v1917_v1 }
 0x23b   : > { %v1920_v4 = vsel %vm1864_vm10, %v1860_v20, 0.0  ;;  %v1863_v31 = vsel %vm1799_vm9, %v1767_v43, %v1831_v63  ;;  %v1924_v45 = vsel %vm1864_vm10, %v1862_v41, 0.0 }
 0x23c   : > { %v1861_v48 = vsel %vm1797_vm8, %v1765_v57, %v1829_v55  ;;  %v1921_v13 = vadd.f32 %v1920_v4, %v1919_v7  ;;  %v1926_v29 = vsel %vm1864_vm10, %v1863_v31, 0.0 }
 0x23d   : > { %v1922_v21 = vsel %vm1864_vm10, %v1861_v48, 0.0 }
 0x23e   : > { %v1923_v18 = vadd.f32 %v1922_v21, %v1921_v13 }
 0x240   : > { %v1925_v19 = vadd.f32 %v1924_v45, %v1923_v18 }
 0x242   : > { %v1927_v60 = vadd.f32 %v1926_v29, %v1925_v19 }
 0x244   : > { %v1928_v25 = vrot.slane %v1927_v60, 4 }
 0x246   : > { %v1929_v17 = vadd.f32 %v1928_v25, %v1927_v60 }
 0x248   : > { %v1930_v44 = vrot.slane %v1929_v17, 2 }
 0x24a   : > { %v1931_v54 = vadd.f32 %v1930_v44, %v1929_v17 }
 0x24c   : > { %v1932_v33 = vrot.slane %v1931_v54, 1 }
 0x24e   : > { %v1933_v37 = vadd.f32 %v1932_v33, %v1931_v54 }
 0x250   : > { %v1934_v26 = vmul.f32 0.00390625, %v1933_v37 }
 0x252   : > { %v4327_v12 = vsub.f32 %v4251_v2, %v1934_v26  ;;  %v4330_v22 = vsub.f32 %v4255_v40, %v1934_v26  ;;  %v4333_v46 = vsub.f32 %v4257_v34, %v1934_v26  ;;  %v4336_v5 = vsub.f32 %v4262_v28, %v1934_v26 }
 0x253   : > { %v4339_v61 = vsub.f32 %v4271_v58, %v1934_v26  ;;  %v4342_v0 = vsub.f32 %v4277_v49, %v1934_v26  ;;  %v4345_v62 = vsub.f32 %v4275_v6, %v1934_v26  ;;  %v4348_v2 = vsub.f32 %v4285_v59, %v1934_v26 }
 0x254   : > { %v4351_v40 = vsub.f32 %v4291_v53, %v1934_v26  ;;  %v4354_v34 = vsub.f32 %v4297_v24, %v1934_v26  ;;  %v4357_v28 = vsub.f32 %v4295_v23, %v1934_v26  ;;  %v4360_v58 = vsub.f32 %v4305_v36, %v1934_v26 }
 0x255   : > { %v4363_v49 = vsub.f32 %v4311_v9, %v1934_v26  ;;  %v4365_v6 = vsub.f32 %v1857_v52, %v1934_v26  ;;  %v4367_v43 = vsub.f32 %v1858_v32, %v1934_v26  ;;  %v4369_v59 = vsub.f32 %v1859_v56, %v1934_v26 }
 0x256   : > { %v4371_v53 = vsub.f32 %v1860_v20, %v1934_v26  ;;  %v4373_v51 = vsub.f32 %v1861_v48, %v1934_v26  ;;  %v4375_v24 = vsub.f32 %v1862_v41, %v1934_v26  ;;  %v4377_v23 = vsub.f32 %v1863_v31, %v1934_v26 }
 0x257   : > { %v4380_v36 = vsub.f32 %v4183_v42, %v1934_v26  ;;  %v4383_v9 = vsub.f32 %v4187_v50, %v1934_v26  ;;  %v4386_v52 = vsub.f32 %v4185_v8, %v1934_v26  ;;  %v4389_v32 = vsub.f32 %v4194_v35, %v1934_v26 }
 0x258   : > { %v4396_v57 = vsub.f32 %v4203_v10, %v1934_v26  ;;  %v4401_v50 = vsub.f32 %v4211_v15, %v1934_v26  ;;  %v4408_v38 = vsub.f32 %v4208_v39, %v1934_v26  ;;  %v4414_v15 = vsub.f32 %v4215_v3, %v1934_v26 }
 0x259   : > { %v1967_v56 = vmul.f32 %v4380_v36, %v4380_v36  ;;  %v1968_v27 = vmul.f32 %v4383_v9, %v4383_v9  ;;  %v1969_v42 = vmul.f32 %v4386_v52, %v4386_v52  ;;  %v1970_v8 = vmul.f32 %v4389_v32, %v4389_v32 }
 0x25a   : > { %v1971_v10 = vmul.f32 %v4396_v57, %v4396_v57  ;;  %v1972_v7 = vmul.f32 %v4401_v50, %v4401_v50  ;;  %v4420_v48 = vsub.f32 %v4227_v16, %v1934_v26  ;;  %v1973_v39 = vmul.f32 %v4408_v38, %v4408_v38 }
 0x25b   : > { %v1999_v35 = vsel %vm1864_vm10, %v1967_v56, 0.0  ;;  %v2000_v30 = vsel %vm1864_vm10, %v1968_v27, 0.0  ;;  %v2002_v20 = vsel %vm1864_vm10, %v1969_v42, 0.0  ;;  %v2004_v4 = vsel %vm1864_vm10, %v1970_v8, 0.0 }
 0x25c   : > { %v2001_v1 = vadd.f32 %v2000_v30, %v1999_v35  ;;  %v2006_v41 = vsel %vm1864_vm10, %v1971_v10, 0.0  ;;  %v4426_v21 = vsub.f32 %v4234_v11, %v1934_v26  ;;  %v1974_v3 = vmul.f32 %v4414_v15, %v4414_v15 }
 0x25d   : > { %v2008_v31 = vsel %vm1864_vm10, %v1972_v7, 0.0  ;;  %v4432_v45 = vsub.f32 %v4232_v14, %v1934_v26  ;;  %v1975_v16 = vmul.f32 %v4420_v48, %v4420_v48  ;;  %v2010_v19 = vsel %vm1864_vm10, %v1973_v39, 0.0 }
 0x25e   : > { %v2003_v55 = vadd.f32 %v2002_v20, %v2001_v1  ;;  %v4438_v60 = vsub.f32 %v4241_v47, %v1934_v26  ;;  %v1976_v11 = vmul.f32 %v4426_v21, %v4426_v21  ;;  %v2012_v25 = vsel %vm1864_vm10, %v1974_v3, 0.0 }
 0x25f   : > { %v1977_v44 = vmul.f32 %v4432_v45, %v4432_v45  ;;  %v2014_v14 = vsel %vm1864_vm10, %v1975_v16, 0.0  ;;  %v1979_v47 = vmul.f32 %v4327_v12, %v4327_v12  ;;  %v1980_v42 = vmul.f32 %v4330_v22, %v4330_v22 }
 0x260   : > { %v2005_v63 = vadd.f32 %v2004_v4, %v2003_v55  ;;  %v1978_v33 = vmul.f32 %v4438_v60, %v4438_v60  ;;  %v2016_v37 = vsel %vm1864_vm10, %v1976_v11, 0.0  ;;  %v1981_v30 = vmul.f32 %v4333_v46, %v4333_v46 }
 0x261   : > { %v2018_v26 = vsel %vm1864_vm10, %v1977_v44, 0.0  ;;  %v2022_v1 = vsel %vm1864_vm10, %v1979_v47, 0.0  ;;  %v1982_v20 = vmul.f32 %v4336_v5, %v4336_v5  ;;  %v2024_v55 = vsel %vm1864_vm10, %v1980_v42, 0.0 }
 0x262   : > { %v2007_v13 = vadd.f32 %v2006_v41, %v2005_v63  ;;  %v2020_v8 = vsel %vm1864_vm10, %v1978_v33, 0.0  ;;  %v1983_v4 = vmul.f32 %v4339_v61, %v4339_v61  ;;  %v2026_v63 = vsel %vm1864_vm10, %v1981_v30, 0.0 }
 0x263   : > { %v1984_v41 = vmul.f32 %v4342_v0, %v4342_v0 }
 0x264   : > { %v2009_v18 = vadd.f32 %v2008_v31, %v2007_v13  ;;  %v2028_v13 = vsel %vm1864_vm10, %v1982_v20, 0.0  ;;  %v1985_v31 = vmul.f32 %v4345_v62, %v4345_v62 }
 0x266   : > { %v2011_v29 = vadd.f32 %v2010_v19, %v2009_v18  ;;  %v2030_v18 = vsel %vm1864_vm10, %v1983_v4, 0.0  ;;  %v1986_v19 = vmul.f32 %v4348_v2, %v4348_v2 }
 0x268   : > { %v2013_v17 = vadd.f32 %v2012_v25, %v2011_v29  ;;  %v2032_v29 = vsel %vm1864_vm10, %v1984_v41, 0.0  ;;  %v1987_v25 = vmul.f32 %v4351_v40, %v4351_v40 }
 0x26a   : > { %v2015_v54 = vadd.f32 %v2014_v14, %v2013_v17  ;;  %v2034_v17 = vsel %vm1864_vm10, %v1985_v31, 0.0  ;;  %v1988_v14 = vmul.f32 %v4354_v34, %v4354_v34 }
 0x26c   : > { %v2017_v56 = vadd.f32 %v2016_v37, %v2015_v54  ;;  %v2036_v54 = vsel %vm1864_vm10, %v1986_v19, 0.0  ;;  %v1989_v37 = vmul.f32 %v4357_v28, %v4357_v28 }
 0x26e   : > { %v2019_v27 = vadd.f32 %v2018_v26, %v2017_v56  ;;  %v2038_v56 = vsel %vm1864_vm10, %v1987_v25, 0.0  ;;  %v1990_v26 = vmul.f32 %v4360_v58, %v4360_v58 }
 0x270   : > { %v2021_v35 = vadd.f32 %v2020_v8, %v2019_v27  ;;  %v2040_v27 = vsel %vm1864_vm10, %v1988_v14, 0.0  ;;  %v1991_v8 = vmul.f32 %v4363_v49, %v4363_v49 }
 0x272   : > { %v2023_v10 = vadd.f32 %v2022_v1, %v2021_v35  ;;  %v2042_v35 = vsel %vm1864_vm10, %v1989_v37, 0.0  ;;  %v1992_v1 = vmul.f32 %v4365_v6, %v4365_v6 }
 0x274   : > { %v2025_v7 = vadd.f32 %v2024_v55, %v2023_v10  ;;  %v2044_v10 = vsel %vm1864_vm10, %v1990_v26, 0.0  ;;  %v1993_v55 = vmul.f32 %v4367_v43, %v4367_v43 }
 0x276   : > { %v2027_v39 = vadd.f32 %v2026_v63, %v2025_v7  ;;  %v2046_v7 = vsel %vm1864_vm10, %v1991_v8, 0.0  ;;  %v1994_v63 = vmul.f32 %v4369_v59, %v4369_v59 }
 0x278   : > { %v2029_v3 = vadd.f32 %v2028_v13, %v2027_v39  ;;  %v2048_v39 = vsel %vm1864_vm10, %v1992_v1, 0.0  ;;  %v1995_v13 = vmul.f32 %v4371_v53, %v4371_v53 }
 0x27a   : > { %v2031_v16 = vadd.f32 %v2030_v18, %v2029_v3  ;;  %v2050_v3 = vsel %vm1864_vm10, %v1993_v55, 0.0  ;;  %v1996_v18 = vmul.f32 %v4373_v51, %v4373_v51 }
 0x27c   : > { %v2033_v11 = vadd.f32 %v2032_v29, %v2031_v16  ;;  %v2052_v16 = vsel %vm1864_vm10, %v1994_v63, 0.0  ;;  %v1997_v29 = vmul.f32 %v4375_v24, %v4375_v24 }
 0x27e   : > { %v2035_v44 = vadd.f32 %v2034_v17, %v2033_v11  ;;  %v2054_v11 = vsel %vm1864_vm10, %v1995_v13, 0.0  ;;  %v1998_v17 = vmul.f32 %v4377_v23, %v4377_v23 }
 0x280   : > { %v2037_v33 = vadd.f32 %v2036_v54, %v2035_v44  ;;  %v2056_v44 = vsel %vm1864_vm10, %v1996_v18, 0.0  ;;  %v2058_v54 = vsel %vm1864_vm10, %v1997_v29, 0.0  ;;  %v2060_v37 = vsel %vm1864_vm10, %v1998_v17, 0.0 }
 0x282   : > { %v2039_v47 = vadd.f32 %v2038_v56, %v2037_v33 }
 0x284   : > { %v2041_v42 = vadd.f32 %v2040_v27, %v2039_v47 }
 0x286   : > { %v2043_v30 = vadd.f32 %v2042_v35, %v2041_v42 }
 0x288   : > { %v2045_v20 = vadd.f32 %v2044_v10, %v2043_v30 }
 0x28a   : > { %v2047_v4 = vadd.f32 %v2046_v7, %v2045_v20 }
 0x28c   : > { %v2049_v41 = vadd.f32 %v2048_v39, %v2047_v4 }
 0x28e   : > { %v2051_v31 = vadd.f32 %v2050_v3, %v2049_v41 }
 0x290   : > { %v2053_v19 = vadd.f32 %v2052_v16, %v2051_v31 }
 0x292   : > { %v2055_v25 = vadd.f32 %v2054_v11, %v2053_v19 }
 0x294   : > { %v2057_v14 = vadd.f32 %v2056_v44, %v2055_v25 }
 0x296   : > { %v2059_v33 = vadd.f32 %v2058_v54, %v2057_v14 }
 0x298   : > { %v2061_v56 = vadd.f32 %v2060_v37, %v2059_v33 }
 0x29a   : > { %v2062_v47 = vrot.slane %v2061_v56, 4 }
 0x29c   : > { %v2063_v26 = vadd.f32 %v2062_v47, %v2061_v56 }
 0x29e   : > { %v2064_v27 = vrot.slane %v2063_v26, 2 }
 0x2a0   : > { %v2065_v42 = vadd.f32 %v2064_v27, %v2063_v26 }
 0x2a2   : > { %v2066_v8 = vrot.slane %v2065_v42, 1 }
 0x2a4   : > { %v2067_v35 = vadd.f32 %v2066_v8, %v2065_v42 }
 0x2a6   : > { %v2068_v30 = vmul.f32 0.00390625, %v2067_v35 }
 0x2a8   : > { %v2069_v1 = vadd.f32 1e-05, %v2068_v30 }
 0x2aa   : > { %2870 = vrsqrt.f32 %v2069_v1 }
 0x2b4   : > { %v2871_v10 = vpop.eup %2870 }
 0x2b5   : > { %v2071_v20 = vmul.f32 %v2871_v10, %v4380_v36  ;;  %v2072_v55 = vmul.f32 %v2871_v10, %v4383_v9  ;;  %v2073_v7 = vmul.f32 %v2871_v10, %v4386_v52  ;;  %v2074_v4 = vmul.f32 %v2871_v10, %v4389_v32 }
 0x2b6   : > { %v2075_v63 = vmul.f32 %v2871_v10, %v4396_v57  ;;  %v2076_v39 = vmul.f32 %v2871_v10, %v4401_v50  ;;  %v2077_v41 = vmul.f32 %v2871_v10, %v4408_v38  ;;  %v2078_v13 = vmul.f32 %v2871_v10, %v4414_v15 }
 0x2b7   : > { %v2079_v3 = vmul.f32 %v2871_v10, %v4420_v48  ;;  %v2080_v31 = vmul.f32 %v2871_v10, %v4426_v21  ;;  %v2081_v36 = vmul.f32 %v2871_v10, %v4432_v45  ;;  %v2082_v9 = vmul.f32 %v2871_v10, %v4438_v60 }
 0x2b8   : > { %v2083_v52 = vmul.f32 %v2871_v10, %v4327_v12  ;;  %v2084_v32 = vmul.f32 %v2871_v10, %v4330_v22  ;;  %v2085_v57 = vmul.f32 %v2871_v10, %v4333_v46  ;;  %v2086_v50 = vmul.f32 %v2871_v10, %v4336_v5 }
 0x2b9   : > { %v2087_v38 = vmul.f32 %v2871_v10, %v4339_v61  ;;  %v2088_v15 = vmul.f32 %v2871_v10, %v4342_v0  ;;  %v2089_v48 = vmul.f32 %v2871_v10, %v4345_v62  ;;  %v2090_v21 = vmul.f32 %v2871_v10, %v4348_v2 }
 0x2ba   : > { %v4533_v45 = vmul.f32 %v2871_v10, %v4351_v40  ;;  %v4536_v12 = vmul.f32 %v2871_v10, %v4354_v34  ;;  %v4539_v22 = vmul.f32 %v2871_v10, %v4357_v28  ;;  %v4542_v46 = vmul.f32 %v2871_v10, %v4360_v58 }
 0x2bb   : > { %v4545_v5 = vmul.f32 %v2871_v10, %v4363_v49  ;;  %v4548_v61 = vmul.f32 %v2871_v10, %v4365_v6  ;;  %v4551_v0 = vmul.f32 %v2871_v10, %v4367_v43  ;;  %v4554_v62 = vmul.f32 %v2871_v10, %v4369_v59 }
 0x2bc   : > { %v4562_v2 = vmul.f32 %v2871_v10, %v4371_v53  ;;  %v4565_v40 = vmul.f32 %v2871_v10, %v4373_v51  ;;  %v4568_v34 = vmul.f32 %v2871_v10, %v4375_v24  ;;  %v4571_v28 = vmul.f32 %v2871_v10, %v4377_v23 }
 0x2bd   : > { %v2418_v58 = vpack.c.bf16 %v2071_v20, %v2071_v20  ;;  %v2419_v49 = vpack.c.bf16 %v2072_v55, %v2072_v55  ;;  %v2420_v6 = vpack.c.bf16 %v2073_v7, %v2073_v7  ;;  %v2421_v43 = vpack.c.bf16 %v2074_v4, %v2074_v4 }
 0x2be   : > { %v2422_v59 = vpack.c.bf16 %v2075_v63, %v2075_v63  ;;  %v2423_v53 = vpack.c.bf16 %v2076_v39, %v2076_v39  ;;  %v2424_v60 = vpack.c.bf16 %v2077_v41, %v2077_v41  ;;  %v2425_v51 = vpack.c.bf16 %v2078_v13, %v2078_v13 }
 0x2bf   : > { %v2426_v18 = vpack.c.bf16 %v2079_v3, %v2079_v3  ;;  %v2427_v24 = vpack.c.bf16 %v2080_v31, %v2080_v31  ;;  %v2428_v16 = vpack.c.bf16 %v2081_v36, %v2081_v36  ;;  %v2429_v19 = vpack.c.bf16 %v2082_v9, %v2082_v9  ;;  %2232 = vst.msk [vmem:[%s4559_s4] sm:$0xf] %vm2231_vm11, %v2418_v58 }
 0x2c0   : > { %2233 = vst.msk [vmem:[%s4559_s4 + $0x4] sm:$0xf] %vm2231_vm11, %v2419_v49  ;;  %2234 = vst.msk [vmem:[%s4559_s4 + $0x8] sm:$0xf] %vm2231_vm11, %v2420_v6  ;;  %v2430_v23 = vpack.c.bf16 %v2083_v52, %v2083_v52  ;;  %v2431_v29 = vpack.c.bf16 %v2084_v32, %v2084_v32  ;;  %v2432_v11 = vpack.c.bf16 %v2085_v57, %v2085_v57 }
 0x2c1   : > { %2235 = vst.msk [vmem:[%s4559_s4 + $0xc] sm:$0xf] %vm2231_vm11, %v2421_v43  ;;  %v2433_v25 = vpack.c.bf16 %v2086_v50, %v2086_v50  ;;  %2236 = vst.msk [vmem:[%s4559_s4 + $0x10] sm:$0xf] %vm2231_vm11, %v2422_v59  ;;  %v2434_v17 = vpack.c.bf16 %v2087_v38, %v2087_v38  ;;  %v2435_v44 = vpack.c.bf16 %v2088_v15, %v2088_v15 }
 0x2c2   : > { %2237 = vst.msk [vmem:[%s4559_s4 + $0x14] sm:$0xf] %vm2231_vm11, %v2423_v53  ;;  %2238 = vst.msk [vmem:[%s4559_s4 + $0x18] sm:$0xf] %vm2231_vm11, %v2424_v60  ;;  %v2436_v14 = vpack.c.bf16 %v2089_v48, %v2089_v48  ;;  %v2437_v54 = vpack.c.bf16 %v2090_v21, %v2090_v21  ;;  %v2438_v33 = vpack.c.bf16 %v4533_v45, %v4533_v45 }
 0x2c3   : > { %2239 = vst.msk [vmem:[%s4559_s4 + $0x1c] sm:$0xf] %vm2231_vm11, %v2425_v51  ;;  %2240 = vst.msk [vmem:[%s4559_s4 + $0x20] sm:$0xf] %vm2231_vm11, %v2426_v18  ;;  %v2439_v37 = vpack.c.bf16 %v4536_v12, %v4536_v12  ;;  %v2440_v56 = vpack.c.bf16 %v4539_v22, %v4539_v22  ;;  %v2441_v47 = vpack.c.bf16 %v4542_v46, %v4542_v46 }
 0x2c4   : > { %2241 = vst.msk [vmem:[%s4559_s4 + $0x24] sm:$0xf] %vm2231_vm11, %v2427_v24  ;;  %2242 = vst.msk [vmem:[%s4559_s4 + $0x28] sm:$0xf] %vm2231_vm11, %v2428_v16  ;;  %v2442_v26 = vpack.c.bf16 %v4545_v5, %v4545_v5  ;;  %v2443_v27 = vpack.c.bf16 %v4548_v61, %v4548_v61  ;;  %v2444_v42 = vpack.c.bf16 %v4551_v0, %v4551_v0 }
 0x2c5   : > { %2243 = vst.msk [vmem:[%s4559_s4 + $0x2c] sm:$0xf] %vm2231_vm11, %v2429_v19  ;;  %2244 = vst.msk [vmem:[%s4559_s4 + $0x30] sm:$0xf] %vm2231_vm11, %v2430_v23  ;;  %v2445_v8 = vpack.c.bf16 %v4554_v62, %v4554_v62  ;;  %v2446_v35 = vpack.c.bf16 %v4562_v2, %v4562_v2  ;;  %v2447_v30 = vpack.c.bf16 %v4565_v40, %v4565_v40 }
 0x2c6   : > { %2245 = vst.msk [vmem:[%s4559_s4 + $0x34] sm:$0xf] %vm2231_vm11, %v2431_v29  ;;  %2246 = vst.msk [vmem:[%s4559_s4 + $0x38] sm:$0xf] %vm2231_vm11, %v2432_v11  ;;  %v2448_v1 = vpack.c.bf16 %v4568_v34, %v4568_v34  ;;  %v2449_v10 = vpack.c.bf16 %v4571_v28, %v4571_v28 }
 0x2c7   : > { %2247 = vst.msk [vmem:[%s4559_s4 + $0x3c] sm:$0xf] %vm2231_vm11, %v2433_v25  ;;  %2248 = vst.msk [vmem:[%s4559_s4 + $0x40] sm:$0xf] %vm2231_vm11, %v2434_v17 }
 0x2c8   : > { %2249 = vst.msk [vmem:[%s4559_s4 + $0x44] sm:$0xf] %vm2231_vm11, %v2435_v44  ;;  %2250 = vst.msk [vmem:[%s4559_s4 + $0x48] sm:$0xf] %vm2231_vm11, %v2436_v14 }
 0x2c9   : > { %2251 = vst.msk [vmem:[%s4559_s4 + $0x4c] sm:$0xf] %vm2231_vm11, %v2437_v54  ;;  %2252 = vst.msk [vmem:[%s4559_s4 + $0x50] sm:$0xf] %vm2231_vm11, %v2438_v33 }
 0x2ca   : > { %2253 = vst.msk [vmem:[%s4559_s4 + $0x54] sm:$0xf] %vm2231_vm11, %v2439_v37  ;;  %2254 = vst.msk [vmem:[%s4559_s4 + $0x58] sm:$0xf] %vm2231_vm11, %v2440_v56 }
 0x2cb   : > { %2255 = vst.msk [vmem:[%s4559_s4 + $0x5c] sm:$0xf] %vm2231_vm11, %v2441_v47  ;;  %2256 = vst.msk [vmem:[%s4559_s4 + $0x60] sm:$0xf] %vm2231_vm11, %v2442_v26 }
 0x2cc   : > { %2257 = vst.msk [vmem:[%s4559_s4 + $0x64] sm:$0xf] %vm2231_vm11, %v2443_v27  ;;  %2258 = vst.msk [vmem:[%s4559_s4 + $0x68] sm:$0xf] %vm2231_vm11, %v2444_v42 }
 0x2cd   : > { %2259 = vst.msk [vmem:[%s4559_s4 + $0x6c] sm:$0xf] %vm2231_vm11, %v2445_v8  ;;  %2260 = vst.msk [vmem:[%s4559_s4 + $0x70] sm:$0xf] %vm2231_vm11, %v2446_v35 }
 0x2ce   : > { %2261 = vst.msk [vmem:[%s4559_s4 + $0x74] sm:$0xf] %vm2231_vm11, %v2447_v30  ;;  %2262 = vst.msk [vmem:[%s4559_s4 + $0x78] sm:$0xf] %vm2231_vm11, %v2448_v1 }
 0x2cf   : > { %2263 = vst.msk [vmem:[%s4559_s4 + $0x7c] sm:$0xf] %vm2231_vm11, %v2449_v10 }
 0x2d0 PF: > { %s13_s12 = sadd.s32 1, %s2878_s12  }
 0x2d1   : > { %p10_p4 = scmp.ge.s32.totalorder %s13_s12, 4  }
 0x2d3   :  { %12 = sbr.rel (!%p10_p4) target bundleno = 1 (0x1), region = 64 }

// kernel: shallow_event_stereo_forward.10
= control target key start
LH: loop header
LB: loop body
LE: loop exit
PB: predicated region body
PF: predicated region fallthrough
CT: control target
= control target key end

     0   :  { %s2633_s12 = smov 0   ;;  %s4246_s0 = inlined_call_operand.vmem [shape: bf16[2,18,16,64], index: 0, kind: input, shape index: {}]   ;;  %s4247_s1 = inlined_call_operand.vmem [shape: bf16[3,192,64], index: 1, kind: input, shape index: {}]   ;;  %s4248_s2 = inlined_call_operand.vmem [shape: f32[1,64], index: 2, kind: input, shape index: {}]   ;;  %s4249_s3 = inlined_call_operand.vmem [shape: bf16[2,16,16,64], index: 3, kind: output, shape index: {}]  }
   0x1 LB: > { %s2143_s13 = sadd.s32 4294967295, %s2609_s12   ;;  %p2147_p0 = scmp.ge.s32.totalorder %s2609_s12, 1  ;;  %s2609_s12 = sphi %s2633_s12, %s13_s12  }
   0x2   : > { %p137_p1 = scmp.lt.s32.totalorder %s2609_s12, 3 }
   0x4   : > { %p138_p2 = pnand %p2147_p0, %p137_p1 }
   0x6   : > { %141 = sbr.rel (%p138_p2) target bundleno = 695 (0x2b7), region = 32 }
   0xd   : > { %p161_p3 = scmp.lt.s32.totalorder %s2143_s13, 1  ;;  %v2565_v0 = vld [vmem:[%s4247_s1 + $0x60] sm:$0xff]   ;;  %v4250_v1 = vmov 0   ;;  %v2566_v2 = vld [vmem:[%s4247_s1 + $0x68] sm:$0xff]   ;;  %v244_v3 = vlaneseq  ;;  %v2567_v4 = vld [vmem:[%s4247_s1 + $0x70] sm:$0xff]   ;;  %s2612_s26 = smov 64  }
   0xe   : > { %2440 = vmatprep.subr.bf16.mxu1 %v4250_v1  ;;  %863 = vmatprep.subr.bf16.mxu0 %v4250_v1  ;;  %v2568_v21 = vld [vmem:[%s4247_s1 + $0x78] sm:$0xff]   ;;  %v2569_v34 = vld [vmem:[%s4247_s1 + $0x80] sm:$0xff]   ;;  %v2570_v54 = vld [vmem:[%s4247_s1 + $0x88] sm:$0xff]   ;;  %vm621_vm2 = vcmask 523264  }
   0xf   : > { %s4273_s13 = smov (!%p161_p3, %s2143_s13), 1  ;;  %2452 = vmatpush1.bf16.msra.mxu1 %v2565_v0  ;;  %864 = vmatpush1.bf16.msra.mxu0 %v2565_v0  ;;  %v2667_v8 = vshrl.u32 %v244_v3, 7 }
  0x10   : > { %2441 = vmatprep.subr.bf16.mxu1 %v4250_v1  ;;  %865 = vmatprep.subr.bf16.mxu0 %v4250_v1  ;;  %s2464_s18 = smul.u32 144, %s4273_s13 }
  0x11   : > { %v2701_v26 = vadd.s32 8, %v2667_v8  ;;  %vm285_vm0 = vcmp.lt.s32.totalorder %v2667_v8, 1  ;;  %vm400_vm1 = vcmp.lt.s32.totalorder %v2667_v8, 7  ;;  %vm247_vm4 = vcmp.ge.s32.totalorder %v2667_v8, 1 }
  0x12   : > { %s2657_s21 = scalar_lea.vmem %s4246_s0, %s2464_s18  ;;  %s2318_s18 = sshll.u32 %s4273_s13, 7 }
  0x13   : > { %2453 = vmatpush1.bf16.msra.mxu1 %v2566_v2  ;;  %866 = vmatpush1.bf16.msra.mxu0 %v2566_v2  ;;  %v2431_v5 = vld [vmem:[%s2657_s21 + $0x48] sm:$0xff]   ;;  %v2432_v7 = vld [vmem:[%s2657_s21 + $0x50] sm:$0xff]   ;;  %v2433_v18 = vld [vmem:[%s2657_s21 + $0x58] sm:$0xff]   ;;  %4260 = vst [vmem:[#allocation2_spill] sm:$0xff] %v2701_v26  ;;  %vm363_vm3 = vcmp.lt.s32.totalorder %v2701_v26, 15  ;;  %s4141_s20 = scalar_lea.vmem %s4249_s3, %s2318_s18 }
  0x14   : > { %v2423_v6 = vld [vmem:[%s2657_s21 + $0x8] sm:$0xff]   ;;  %2442 = vmatprep.subr.bf16.mxu1 %v4250_v1  ;;  %867 = vmatprep.subr.bf16.mxu0 %v4250_v1  ;;  %v2669_v9 = vunpack.c.l.bf16 %v2431_v5  ;;  %v2671_v10 = vunpack.c.h.bf16 %v2431_v5  ;;  %v2424_v13 = vld [vmem:[%s2657_s21 + $0x10] sm:$0xff]   ;;  %v2678_v14 = vunpack.c.l.bf16 %v2432_v7  ;;  %v2680_v15 = vunpack.c.h.bf16 %v2432_v7  ;;  %v2425_v20 = vld [vmem:[%s2657_s21 + $0x18] sm:$0xff]  }
  0x15   : > { %v2673_v11 = vunpack.c.l.bf16 %v2423_v6  ;;  %v2675_v12 = vunpack.c.h.bf16 %v2423_v6  ;;  %v2682_v16 = vunpack.c.l.bf16 %v2424_v13  ;;  %v2684_v17 = vunpack.c.h.bf16 %v2424_v13  ;;  %v2434_v24 = vld [vmem:[%s2657_s21 + $0x60] sm:$0xff]   ;;  %v2435_v31 = vld [vmem:[%s2657_s21 + $0x68] sm:$0xff]   ;;  %v2436_v33 = vld [vmem:[%s2657_s21 + $0x70] sm:$0xff]  }
  0x16   : > { %v2475_v19 = vpack.i.bf16 %v2671_v10, %v2669_v9  ;;  %v276_v22 = vrot.slane %v2671_v10, 7  ;;  %v2485_v23 = vpack.i.bf16 %v2680_v15, %v2678_v14  ;;  %v2426_v25 = vld [vmem:[%s2657_s21 + $0x20] sm:$0xff]   ;;  %v258_v27 = vrot.slane %v2669_v9, 7  ;;  %v2427_v32 = vld [vmem:[%s2657_s21 + $0x28] sm:$0xff]   ;;  %v2428_v39 = vld [vmem:[%s2657_s21 + $0x30] sm:$0xff]  }
  0x17   : > { %2454 = vmatpush1.bf16.msra.mxu1 %v2567_v4  ;;  %868 = vmatpush1.bf16.msra.mxu0 %v2567_v4  ;;  %v2480_v28 = vpack.i.bf16 %v2675_v12, %v2673_v11  ;;  %v2707_v29 = vunpack.c.l.bf16 %v2433_v18  ;;  %v2709_v30 = vunpack.c.h.bf16 %v2433_v18  ;;  %v277_v35 = vrot.slane %v2680_v15, 7  ;;  %v2437_v44 = vld [vmem:[%s2657_s21 + $0x78] sm:$0xff]   ;;  %v2438_v59 = vld [vmem:[%s2657_s21 + $0x80] sm:$0xff]  }
  0x18   : > { %2443 = vmatprep.subr.bf16.mxu1 %v4250_v1  ;;  %869 = vmatprep.subr.bf16.mxu0 %v4250_v1  ;;  %v2490_v36 = vpack.i.bf16 %v2684_v17, %v2682_v16  ;;  %v2722_v37 = vunpack.c.l.bf16 %v2425_v20  ;;  %v2724_v38 = vunpack.c.h.bf16 %v2425_v20  ;;  %v392_v40 = vrot.slane %v2680_v15, 1  ;;  %v2429_v53 = vld [vmem:[%s2657_s21 + $0x38] sm:$0xff]   ;;  %v2430_v63 = vld [vmem:[%s2657_s21 + $0x40] sm:$0xff]  }
  0x19   : > { %2476 = vrot.lane.b32.xlu0 %v2475_v19, %s2612_s26  ;;  %2486 = vrot.lane.b32.xlu1 %v2485_v23, %s2612_s26  ;;  %v2729_v41 = vunpack.c.l.bf16 %v2434_v24  ;;  %v2731_v42 = vunpack.c.h.bf16 %v2434_v24  ;;  %v2733_v43 = vunpack.c.l.bf16 %v2426_v25  ;;  %v2736_v45 = vunpack.c.h.bf16 %v2426_v25  ;;  %v2352_v18 = vld [vmem:[%s2657_s21] sm:$0xff]   ;;  %v2571_v25 = vld [vmem:[%s4247_s1 + $0x90] sm:$0xff]  }
  0x1a   : > { %v2738_v46 = vunpack.c.l.bf16 %v2435_v31  ;;  %v2740_v47 = vunpack.c.h.bf16 %v2435_v31  ;;  %v2742_v48 = vunpack.c.l.bf16 %v2427_v32  ;;  %v2495_v49 = vpack.i.bf16 %v2709_v30, %v2707_v29 }
  0x1b   : > { %2455 = vmatpush1.bf16.msra.mxu1 %v2568_v21  ;;  %870 = vmatpush1.bf16.msra.mxu0 %v2568_v21  ;;  %v2749_v50 = vunpack.c.h.bf16 %v2427_v32  ;;  %v2751_v51 = vunpack.c.l.bf16 %v2436_v33  ;;  %v2753_v52 = vunpack.c.h.bf16 %v2436_v33  ;;  %v2500_v55 = vpack.i.bf16 %v2724_v38, %v2722_v37 }
  0x1c   : > { %2444 = vmatprep.subr.bf16.mxu1 %v4250_v1  ;;  %871 = vmatprep.subr.bf16.mxu0 %v4250_v1  ;;  %v2762_v56 = vunpack.c.l.bf16 %v2428_v39  ;;  %v2764_v57 = vunpack.c.h.bf16 %v2428_v39  ;;  %v2766_v58 = vunpack.c.l.bf16 %v2437_v44  ;;  %v259_v60 = vrot.slane %v2678_v14, 7 }
  0x1d   : > { %2481 = vrot.lane.b32.xlu0 %v2480_v28, %s2612_s26  ;;  %2491 = vrot.lane.b32.xlu1 %v2490_v36, %s2612_s26  ;;  %v2505_v61 = vpack.i.bf16 %v2731_v42, %v2729_v41  ;;  %v2772_v62 = vunpack.c.h.bf16 %v2437_v44  ;;  %v374_v0 = vrot.slane %v2678_v14, 1  ;;  %v2510_v2 = vpack.i.bf16 %v2736_v45, %v2733_v43 }
  0x1e   : > { %v2515_v3 = vpack.i.bf16 %v2740_v47, %v2738_v46  ;;  %v2520_v4 = vpack.i.bf16 %v2749_v50, %v2742_v48  ;;  %v2525_v5 = vpack.i.bf16 %v2753_v52, %v2751_v51  ;;  %v2530_v6 = vpack.i.bf16 %v2764_v57, %v2762_v56 }
  0x1f   : > { %2456 = vmatpush1.bf16.msra.mxu1 %v2569_v34  ;;  %872 = vmatpush1.bf16.msra.mxu0 %v2569_v34  ;;  %v2789_v7 = vunpack.c.l.bf16 %v2429_v53  ;;  %v2791_v13 = vunpack.c.h.bf16 %v2429_v53  ;;  %v2535_v19 = vpack.i.bf16 %v2772_v62, %v2766_v58  ;;  %v2797_v20 = vunpack.c.l.bf16 %v2438_v59 }
  0x20   : > { %2445 = vmatprep.subr.bf16.mxu1 %v4250_v1  ;;  %873 = vmatprep.subr.bf16.mxu0 %v4250_v1  ;;  %v2799_v21 = vunpack.c.h.bf16 %v2438_v59  ;;  %v2801_v23 = vunpack.c.l.bf16 %v2430_v63  ;;  %v2803_v24 = vunpack.c.h.bf16 %v2430_v63  ;;  %v373_v28 = vrot.slane %v2669_v9, 1 }
  0x21   : > { %2496 = vrot.lane.b32.xlu0 %v2495_v49, %s2612_s26  ;;  %2501 = vrot.lane.b32.xlu1 %v2500_v55, %s2612_s26  ;;  %v391_v31 = vrot.slane %v2671_v10, 1  ;;  %v2811_v32 = vunpack.c.l.bf16 %v2352_v18  ;;  %v2821_v33 = vsel %vm285_vm0, %v258_v27, %v276_v22  ;;  %v2829_v34 = vsel %vm285_vm0, %v276_v22, %v258_v27 }
  0x22   : > { %v365_v36 = vrot.slane %v2673_v11, 1  ;;  %v2540_v39 = vpack.i.bf16 %v2791_v13, %v2789_v7  ;;  %v383_v9 = vrot.slane %v2675_v12, 1  ;;  %v250_v22 = vrot.slane %v2673_v11, 7 }
  0x23   : > { %2457 = vmatpush1.bf16.msra.mxu1 %v2570_v54  ;;  %874 = vmatpush1.bf16.msra.mxu0 %v2570_v54  ;;  %v410_v44 = vsel %vm400_vm1, %v373_v28, %v391_v31  ;;  %v428_v49 = vsel %vm400_vm1, %v391_v31, %v373_v28  ;;  %v268_v27 = vrot.slane %v2675_v12, 7  ;;  %v411_v53 = vsel %vm400_vm1, %v374_v0, %v392_v40  ;;  %v2572_v54 = vld [vmem:[%s4247_s1 + $0x98] sm:$0xff]  }
  0x24   : > { %2446 = vmatprep.subr.bf16.mxu1 %v4250_v1  ;;  %875 = vmatprep.subr.bf16.mxu0 %v4250_v1  ;;  %v460_v10 = vsel %vm363_vm3, %v428_v49, 0.0  ;;  %v402_v59 = vsel %vm400_vm1, %v365_v36, %v383_v9  ;;  %v420_v11 = vsel %vm400_vm1, %v383_v9, %v365_v36  ;;  %v366_v12 = vrot.slane %v2682_v16, 1 }
  0x25   : > { %2506 = vrot.lane.b32.xlu0 %v2505_v61, %s2612_s26  ;;  %2511 = vrot.lane.b32.xlu1 %v2510_v2, %s2612_s26  ;;  %v2852_v55 = vpack.c.bf16 %v460_v10, %v410_v44  ;;  %v444_v61 = vsel %vm363_vm3, %v420_v11, 0.0  ;;  %v2865_v63 = vsel %vm285_vm0, %v250_v22, %v268_v27  ;;  %v2869_v2 = vsel %vm285_vm0, %v268_v27, %v250_v22 }
  0x26   : > { %v2545_v28 = vpack.i.bf16 %v2799_v21, %v2797_v20  ;;  %v2880_v31 = vpack.c.bf16 %v444_v61, %v402_v59  ;;  %v384_v44 = vrot.slane %v2684_v17, 1  ;;  %v251_v49 = vrot.slane %v2682_v16, 7  ;;  %v2574_v59 = vld [vmem:[%s4247_s1 + $0xa8] sm:$0xff]  }
  0x27   : > { %2458 = vmatpush1.bf16.msra.mxu1 %v2571_v25  ;;  %876 = vmatpush1.bf16.msra.mxu0 %v2571_v25  ;;  %4261 = vst [vmem:[#allocation3_spill] sm:$0xff] %v2852_v55  ;;  %v429_v25 = vsel %vm400_vm1, %v392_v40, %v374_v0  ;;  %v2890_v40 = vsel %vm285_vm0, %v259_v60, %v277_v35  ;;  %v2905_v9 = vunpack.c.h.bf16 %v2352_v18  ;;  %v269_v14 = vrot.slane %v2684_v17, 7 }
  0x28   : > { %2447 = vmatprep.subr.bf16.mxu1 %v4250_v1  ;;  %877 = vmatprep.subr.bf16.mxu0 %v4250_v1  ;;  %4262 = vst [vmem:[#allocation4_spill] sm:$0xff] %v2880_v31  ;;  %v462_v36 = vsel %vm363_vm3, %v429_v25, 0.0  ;;  %v375_v15 = vrot.slane %v2707_v29, 1  ;;  %v393_v10 = vrot.slane %v2709_v30, 1  ;;  %v403_v16 = vsel %vm400_vm1, %v366_v12, %v384_v44 }
  0x29   : > { %2516 = vrot.lane.b32.xlu0 %v2515_v3, %s2612_s26  ;;  %2195 = vmatprep.mubr.msk.bf16.mxu1 %vm621_vm2, %v2852_v55  ;;  %v2893_v0 = vpack.c.bf16 %v462_v36, %v411_v53  ;;  %v2901_v3 = vsel %vm285_vm0, %v277_v35, %v259_v60  ;;  %v421_v35 = vsel %vm400_vm1, %v384_v44, %v366_v12  ;;  %v260_v60 = vrot.slane %v2707_v29, 7 }
  0x2a   : > { %2521 = vrot.lane.b32.xlu1 %v2520_v4, %s2612_s26  ;;  %v2573_v4 = vld [vmem:[%s4247_s1 + $0xa0] sm:$0xff]   ;;  %v278_v18 = vrot.slane %v2709_v30, 7  ;;  %2187 = vmatprep.mubr.msk.bf16.mxu0 %vm621_vm2, %v2880_v31  ;;  %v446_v17 = vsel %vm363_vm3, %v421_v35, 0.0  ;;  %v2931_v22 = vsel %vm285_vm0, %v251_v49, %v269_v14  ;;  %v2935_v29 = vsel %vm285_vm0, %v269_v14, %v251_v49  ;;  %v2575_v35 = vld [vmem:[%s4247_s1 + $0xb0] sm:$0xff]  }
  0x2b   : > { %2459 = vmatpush1.bf16.msra.mxu1 %v2572_v54  ;;  %878 = vmatpush1.bf16.msra.mxu0 %v2572_v54  ;;  %v412_v30 = vsel %vm400_vm1, %v375_v15, %v393_v10  ;;  %v2945_v27 = vpack.c.bf16 %v446_v17, %v403_v16  ;;  %v430_v53 = vsel %vm400_vm1, %v393_v10, %v375_v15  ;;  %v367_v12 = vrot.slane %v2722_v37, 1 }
  0x2c   : > { %2448 = vmatprep.subr.bf16.mxu1 %v4250_v1  ;;  %879 = vmatprep.subr.bf16.mxu0 %v4250_v1  ;;  %v2951_v54 = vsel %vm285_vm0, %v260_v60, %v278_v18  ;;  %v2960_v11 = vsel %vm285_vm0, %v278_v18, %v260_v60  ;;  %v385_v61 = vrot.slane %v2724_v38, 1  ;;  %v2555_v25 = vpack.i.bf16 %v2905_v9, %v2811_v32 }
  0x2d   : > { %2526 = vrot.lane.b32.xlu0 %v2525_v5, %s2612_s26  ;;  %v2550_v5 = vpack.i.bf16 %v2803_v24, %v2801_v23  ;;  %v252_v44 = vrot.slane %v2722_v37, 7  ;;  %v270_v49 = vrot.slane %v2724_v38, 7  ;;  %v376_v15 = vrot.slane %v2729_v41, 1 }
  0x2e   : > { %2531 = vrot.lane.b32.xlu1 %v2530_v6, %s2612_s26  ;;  %v464_v6 = vsel %vm363_vm3, %v430_v53, 0.0  ;;  %v422_v14 = vsel %vm400_vm1, %v385_v61, %v367_v12  ;;  %v394_v10 = vrot.slane %v2731_v42, 1  ;;  %v261_v16 = vrot.slane %v2729_v41, 7 }
  0x2f   : > { %2460 = vmatpush1.bf16.msra.mxu1 %v2573_v4  ;;  %880 = vmatpush1.bf16.msra.mxu0 %v2573_v4  ;;  %v2968_v36 = vpack.c.bf16 %v464_v6, %v412_v30  ;;  %v404_v4 = vsel %vm400_vm1, %v367_v12, %v385_v61  ;;  %v448_v37 = vsel %vm363_vm3, %v422_v14, 0.0  ;;  %v2990_v38 = vsel %vm285_vm0, %v252_v44, %v270_v49 }
  0x30   : > { %2449 = vmatprep.subr.bf16.mxu1 %v4250_v1  ;;  %881 = vmatprep.subr.bf16.mxu0 %v4250_v1  ;;  %v413_v60 = vsel %vm400_vm1, %v376_v15, %v394_v10  ;;  %v431_v18 = vsel %vm400_vm1, %v394_v10, %v376_v15  ;;  %v279_v17 = vrot.slane %v2731_v42, 7  ;;  %v368_v30 = vrot.slane %v2733_v43, 1 }
  0x31   : > { %2536 = vrot.lane.b32.xlu0 %v2535_v19, %s2612_s26  ;;  %v2994_v19 = vsel %vm285_vm0, %v270_v49, %v252_v44  ;;  %v466_v41 = vsel %vm363_vm3, %v431_v18, 0.0  ;;  %v386_v53 = vrot.slane %v2736_v45, 1  ;;  %v253_v6 = vrot.slane %v2733_v43, 7 }
  0x32   : > { %2541 = vrot.lane.b32.xlu1 %v2540_v39, %s2612_s26  ;;  %v3000_v39 = vpack.c.bf16 %v448_v37, %v404_v4  ;;  %v271_v12 = vrot.slane %v2736_v45, 7  ;;  %v377_v61 = vrot.slane %v2738_v46, 1  ;;  %v3025_v42 = vsel %vm285_vm0, %v261_v16, %v279_v17  ;;  %v2576_v45 = vld [vmem:[%s4247_s1 + $0xb8] sm:$0xff]  }
  0x33   : > { %2461 = vmatpush1.bf16.msra.mxu1 %v2574_v59  ;;  %882 = vmatpush1.bf16.msra.mxu0 %v2574_v59  ;;  %v3017_v59 = vpack.c.bf16 %v466_v41, %v413_v60  ;;  %v3029_v44 = vsel %vm285_vm0, %v279_v17, %v261_v16  ;;  %v423_v43 = vsel %vm400_vm1, %v386_v53, %v368_v30  ;;  %v395_v15 = vrot.slane %v2740_v47, 1 }
  0x34   : > { %2450 = vmatprep.subr.bf16.mxu1 %v4250_v1  ;;  %883 = vmatprep.subr.bf16.mxu0 %v4250_v1  ;;  %v3042_v49 = vsel %vm285_vm0, %v253_v6, %v271_v12  ;;  %v3046_v4 = vsel %vm285_vm0, %v271_v12, %v253_v6  ;;  %v262_v10 = vrot.slane %v2738_v46, 7  ;;  %v280_v37 = vrot.slane %v2740_v47, 7 }
  0x35   : > { %2546 = vrot.lane.b32.xlu0 %v2545_v28, %s2612_s26  ;;  %v405_v28 = vsel %vm400_vm1, %v368_v30, %v386_v53  ;;  %v369_v16 = vrot.slane %v2742_v48, 1  ;;  %v254_v60 = vrot.slane %v2742_v48, 7  ;;  %v414_v18 = vsel %vm400_vm1, %v377_v61, %v395_v15 }
  0x36   : > { %2551 = vrot.lane.b32.xlu1 %v2550_v5, %s2612_s26  ;;  %v450_v5 = vsel %vm363_vm3, %v423_v43, 0.0  ;;  %v432_v41 = vsel %vm400_vm1, %v395_v15, %v377_v61  ;;  %v272_v17 = vrot.slane %v2749_v50, 7  ;;  %v378_v46 = vrot.slane %v2751_v51, 1 }
  0x37   : > { %2462 = vmatpush1.bf16.msra.mxu1 %v2575_v35  ;;  %884 = vmatpush1.bf16.msra.mxu0 %v2575_v35  ;;  %v3050_v14 = vpack.c.bf16 %v450_v5, %v405_v28  ;;  %v387_v35 = vrot.slane %v2749_v50, 1  ;;  %v468_v47 = vsel %vm363_vm3, %v432_v41, 0.0  ;;  %v3073_v48 = vsel %vm285_vm0, %v280_v37, %v262_v10 }
  0x38   : > { %2451 = vmatprep.subr.bf16.mxu1 %v4250_v1  ;;  %885 = vmatprep.subr.bf16.mxu0 %v4250_v1  ;;  %v3079_v50 = vpack.c.bf16 %v468_v47, %v414_v18  ;;  %v3085_v6 = vsel %vm285_vm0, %v254_v60, %v272_v17  ;;  %v3091_v61 = vsel %vm285_vm0, %v272_v17, %v254_v60  ;;  %v396_v28 = vrot.slane %v2753_v52, 1 }
  0x39   : > { %2556 = vrot.lane.b32.xlu0 %v2555_v25, %s2612_s26  ;;  %v3069_v25 = vsel %vm285_vm0, %v262_v10, %v280_v37  ;;  %v406_v30 = vsel %vm400_vm1, %v369_v16, %v387_v35  ;;  %v424_v53 = vsel %vm400_vm1, %v387_v35, %v369_v16  ;;  %v263_v43 = vrot.slane %v2751_v51, 7 }
  0x3a   : > { %v452_v12 = vsel %vm363_vm3, %v424_v53, 0.0  ;;  %v281_v5 = vrot.slane %v2753_v52, 7  ;;  %v370_v15 = vrot.slane %v2762_v56, 1  ;;  %v415_v10 = vsel %vm400_vm1, %v378_v46, %v396_v28 }
  0x3b   : > { %2463 = vmatpush1.bf16.msra.mxu1 %v2576_v45  ;;  %886 = vmatpush1.bf16.msra.mxu0 %v2576_v45  ;;  %v3095_v45 = vpack.c.bf16 %v452_v12, %v406_v30  ;;  %v433_v37 = vsel %vm400_vm1, %v396_v28, %v378_v46  ;;  %v388_v16 = vrot.slane %v2764_v57, 1  ;;  %v255_v35 = vrot.slane %v2762_v56, 7 }
  0x3c   : > { %1099 = vmatprep.subr.bf16.mxu1 %v4250_v1  ;;  %1360 = vmatprep.subr.bf16.mxu0 %v4250_v1  ;;  %v470_v60 = vsel %vm363_vm3, %v433_v37, 0.0  ;;  %v3109_v51 = vsel %vm285_vm0, %v263_v43, %v281_v5  ;;  %v3113_v52 = vsel %vm285_vm0, %v281_v5, %v263_v43  ;;  %v273_v18 = vrot.slane %v2764_v57, 7 }
  0x3d   : > { %v3116_v41 = vpack.c.bf16 %v470_v60, %v415_v10  ;;  %v407_v17 = vsel %vm400_vm1, %v370_v15, %v388_v16  ;;  %v425_v56 = vsel %vm400_vm1, %v388_v16, %v370_v15  ;;  %v379_v57 = vrot.slane %v2766_v58, 1 }
  0x3e   : > { %v454_v46 = vsel %vm363_vm3, %v425_v56, 0.0  ;;  %v3126_v47 = vsel %vm285_vm0, %v255_v35, %v273_v18  ;;  %v3130_v30 = vsel %vm285_vm0, %v273_v18, %v255_v35  ;;  %v397_v12 = vrot.slane %v2772_v62, 1 }
  0x3f   : > { %v3133_v53 = vpack.c.bf16 %v454_v46, %v407_v17  ;;  %v264_v28 = vrot.slane %v2766_v58, 7  ;;  %v282_v43 = vrot.slane %v2772_v62, 7  ;;  %v371_v5 = vrot.slane %v2789_v7, 1 }
  0x40   : > { %v389_v15 = vrot.slane %v2791_v13, 1  ;;  %v256_v10 = vrot.slane %v2789_v7, 7  ;;  %v416_v37 = vsel %vm400_vm1, %v379_v57, %v397_v12  ;;  %v434_v16 = vsel %vm400_vm1, %v397_v12, %v379_v57 }
  0x41   : > { %v274_v35 = vrot.slane %v2791_v13, 7  ;;  %v380_v60 = vrot.slane %v2797_v20, 1  ;;  %v472_v58 = vsel %vm363_vm3, %v434_v16, 0.0  ;;  %v3151_v62 = vsel %vm285_vm0, %v264_v28, %v282_v43 }
  0x42   : > { %v3155_v7 = vsel %vm285_vm0, %v282_v43, %v264_v28  ;;  %v408_v18 = vsel %vm400_vm1, %v371_v5, %v389_v15  ;;  %v3159_v17 = vpack.c.bf16 %v472_v58, %v416_v37  ;;  %v426_v13 = vsel %vm400_vm1, %v389_v15, %v371_v5 }
  0x43   : > { %v3165_v56 = vsel %vm285_vm0, %v256_v10, %v274_v35  ;;  %v456_v46 = vsel %vm363_vm3, %v426_v13, 0.0  ;;  %v3171_v57 = vsel %vm285_vm0, %v274_v35, %v256_v10  ;;  %v398_v12 = vrot.slane %v2799_v21, 1 }
  0x44   : > { %v265_v28 = vrot.slane %v2797_v20, 7  ;;  %v3175_v43 = vpack.c.bf16 %v456_v46, %v408_v18  ;;  %v283_v37 = vrot.slane %v2799_v21, 7  ;;  %v267_v5 = vrot.slane %v2905_v9, 7 }
  0x45   : > { %v417_v15 = vsel %vm400_vm1, %v380_v60, %v398_v12  ;;  %v435_v16 = vsel %vm400_vm1, %v398_v12, %v380_v60  ;;  %v249_v58 = vrot.slane %v2811_v32, 7  ;;  %v372_v10 = vrot.slane %v2801_v23, 1 }
  0x46   : > { %v474_v35 = vsel %vm363_vm3, %v435_v16, 0.0  ;;  %v3189_v20 = vsel %vm285_vm0, %v265_v28, %v283_v37  ;;  %v3193_v21 = vsel %vm285_vm0, %v283_v37, %v265_v28  ;;  %v390_v18 = vrot.slane %v2803_v24, 1 }
  0x47   : > { %v3196_v13 = vpack.c.bf16 %v474_v35, %v417_v15  ;;  %v3200_v60 = vsel %vm285_vm0, %v249_v58, %v267_v5  ;;  %v3204_v46 = vsel %vm285_vm0, %v267_v5, %v249_v58  ;;  %v257_v37 = vrot.slane %v2801_v23, 7 }
  0x48   : > { %v409_v12 = vsel %vm400_vm1, %v372_v10, %v390_v18  ;;  %v427_v28 = vsel %vm400_vm1, %v390_v18, %v372_v10  ;;  %v275_v16 = vrot.slane %v2803_v24, 7  ;;  %v364_v35 = vrot.slane %v2811_v32, 1  ;;  %v2439_v32 = vld [vmem:[%s2657_s21 + $0x88] sm:$0xff]  }
  0x49   : > { %v458_v15 = vsel %vm363_vm3, %v427_v28, 0.0  ;;  %v382_v1 = vrot.slane %v2905_v9, 1  ;;  %v3237_v10 = vunpack.c.l.bf16 %v2439_v32  ;;  %v3239_v18 = vunpack.c.h.bf16 %v2439_v32 }
  0x4a   : > { %v3216_v55 = vpack.c.bf16 %v458_v15, %v409_v12  ;;  %v3220_v5 = vsel %vm285_vm0, %v257_v37, %v275_v16  ;;  %v3224_v58 = vsel %vm285_vm0, %v275_v16, %v257_v37  ;;  %v344_v37 = vsel %vm247_vm4, %v2829_v34, 0.0 }
  0x4b   : > { %v3228_v23 = vsel %vm400_vm1, %v364_v35, %v382_v1  ;;  %v419_v24 = vsel %vm400_vm1, %v382_v1, %v364_v35  ;;  %4263 = vst [vmem:[#allocation5_spill] sm:$0xff] %v3237_v10  ;;  %4264 = vst [vmem:[#allocation6_spill] sm:$0xff] %v3239_v18  ;;  %v2560_v28 = vpack.i.bf16 %v3239_v18, %v3237_v10  ;;  %v2577_v18 = vld [vmem:[%s4247_s1] sm:$0xff]  }
  0x4c   : > { %v3235_v9 = vsel %vm363_vm3, %v419_v24, 0.0  ;;  %v346_v24 = vsel %vm247_vm4, %v2901_v3, 0.0 }
  0x4d   : > { %2561 = vrot.lane.b32.xlu1 %v2560_v28, %s2612_s26 }
  0x8b   : > { %v2477_v1 = vpop.permute.xlu0 %2476  ;;  %v2487_v35 = vpop.permute.xlu1 %2486 }
  0x8c   : > { %v2479_v15 = vunpack.i.h.bf16 %v2477_v1  ;;  %v2478_v16 = vunpack.i.l.bf16 %v2477_v1  ;;  %v2489_v32 = vunpack.i.h.bf16 %v2487_v35  ;;  %v2488_v12 = vunpack.i.l.bf16 %v2487_v35 }
  0x8d   : > { %v328_v1 = vsel %vm247_vm4, %v2869_v2, 0.0 }
  0x8e   : > { %v640_v26 = vsel %vm621_vm2, %v344_v37, %v2478_v16  ;;  %v641_v28 = vsel %vm621_vm2, %v2821_v33, %v2479_v15  ;;  %v642_v3 = vsel %vm621_vm2, %v346_v24, %v2488_v12  ;;  %v643_v35 = vsel %vm621_vm2, %v2890_v40, %v2489_v32  ;;  %v2578_v40 = vld [vmem:[%s4247_s1 + $0xc0] sm:$0xff]  }
  0x8f   : > { %v2482_v10 = vpop.permute.xlu0 %2481  ;;  %v3259_v34 = vpack.c.bf16 %v641_v28, %v640_v26  ;;  %v2492_v31 = vpop.permute.xlu1 %2491  ;;  %v3267_v33 = vpack.c.bf16 %v643_v35, %v642_v3  ;;  %v330_v15 = vsel %vm247_vm4, %v2935_v29, 0.0  ;;  %v2579_v29 = vld [vmem:[%s4247_s1 + $0x8] sm:$0xff]   ;;  %v348_v32 = vsel %vm247_vm4, %v2960_v11, 0.0  ;;  %v2581_v11 = vld [vmem:[%s4247_s1 + $0x10] sm:$0xff]  }
  0x90   : > { %v2484_v37 = vunpack.i.h.bf16 %v2482_v10  ;;  %v2483_v16 = vunpack.i.l.bf16 %v2482_v10  ;;  %v2494_v26 = vunpack.i.h.bf16 %v2492_v31  ;;  %v2493_v28 = vunpack.i.l.bf16 %v2492_v31 }
  0x91   : > { %960 = vmatmul.mubr.bf16.vlgmr.msra.gmra.mrb[0].mxu1 %v3259_v34  ;;  %v4265_v31 = vmov 0  }
  0x92   : > { %1100 = vmatpush1.bf16.msra.mxu1 %v2577_v18  ;;  %v624_v2 = vsel %vm621_vm2, %v328_v1, %v2483_v16  ;;  %v625_v12 = vsel %vm621_vm2, %v2865_v63, %v2484_v37  ;;  %2196 = vmatprep.mubr.msk.bf16.mxu1 %vm621_vm2, %v2893_v0  ;;  %v626_v24 = vsel %vm621_vm2, %v330_v15, %v2493_v28  ;;  %v332_v16 = vsel %vm247_vm4, %v2994_v19, 0.0 }
  0x93   : > { %v3284_v10 = vpack.c.bf16 %v625_v12, %v624_v2  ;;  %1101 = vmatprep.subr.bf16.mxu1 %v4265_v31  ;;  %v2497_v18 = vpop.permute.xlu0 %2496  ;;  %v627_v63 = vsel %vm621_vm2, %v2931_v22, %v2494_v26  ;;  %v2502_v37 = vpop.permute.xlu1 %2501  ;;  %v2580_v22 = vld [vmem:[%s4247_s1 + $0xc8] sm:$0xff]  }
  0x94   : > { %v2499_v1 = vunpack.i.h.bf16 %v2497_v18  ;;  %v2498_v3 = vunpack.i.l.bf16 %v2497_v18  ;;  %v3293_v35 = vpack.c.bf16 %v627_v63, %v626_v24  ;;  %v2504_v2 = vunpack.i.h.bf16 %v2502_v37 }
  0x95   : > { %896 = vmatmul.mubr.bf16.vlgmr.msra.gmra.mrb[0].mxu0 %v3284_v10  ;;  %v2503_v15 = vunpack.i.l.bf16 %v2502_v37  ;;  %v350_v18 = vsel %vm247_vm4, %v3029_v44, 0.0  ;;  %v2583_v44 = vld [vmem:[%s4247_s1 + $0x18] sm:$0xff]  }
  0x96   : > { %1361 = vmatpush1.bf16.msra.mxu0 %v2578_v40  ;;  %1102 = vmatpush1.bf16.msra.mxu1 %v2579_v29  ;;  %v644_v26 = vsel %vm621_vm2, %v348_v32, %v2498_v3  ;;  %v645_v28 = vsel %vm621_vm2, %v2951_v54, %v2499_v1  ;;  %v629_v29 = vsel %vm621_vm2, %v2990_v38, %v2504_v2  ;;  %v334_v1 = vsel %vm247_vm4, %v3046_v4, 0.0  ;;  %v2582_v38 = vld [vmem:[%s4247_s1 + $0xd0] sm:$0xff]  }
  0x97   : > { %1362 = vmatprep.subr.bf16.mxu0 %v4265_v31  ;;  %2188 = vmatprep.mubr.msk.bf16.mxu0 %vm621_vm2, %v2945_v27  ;;  %v3311_v19 = vpack.c.bf16 %v645_v28, %v644_v26  ;;  %v2507_v12 = vpop.permute.xlu0 %2506  ;;  %v628_v40 = vsel %vm621_vm2, %v332_v16, %v2503_v15  ;;  %v2512_v32 = vpop.permute.xlu1 %2511  ;;  %v352_v26 = vsel %vm247_vm4, %v3073_v48, 0.0 }
  0x98   : > { %1103 = vmatprep.subr.bf16.mxu1 %v4265_v31  ;;  %v2509_v54 = vunpack.i.h.bf16 %v2507_v12  ;;  %v2508_v24 = vunpack.i.l.bf16 %v2507_v12  ;;  %v3320_v63 = vpack.c.bf16 %v629_v29, %v628_v40  ;;  %v2514_v3 = vunpack.i.h.bf16 %v2512_v32 }
  0x99   : > { %968 = vmatmul.mubr.bf16.gmra.mrb[4].mxu1 %v3267_v33  ;;  %v2513_v37 = vunpack.i.l.bf16 %v2512_v32  ;;  %v336_v29 = vsel %vm247_vm4, %v3091_v61, 0.0  ;;  %v2585_v61 = vld [vmem:[%s4247_s1 + $0x20] sm:$0xff]  }
  0x9a   : > { %1363 = vmatpush1.bf16.msra.mxu0 %v2580_v22  ;;  %1104 = vmatpush1.bf16.msra.mxu1 %v2581_v11  ;;  %v646_v16 = vsel %vm621_vm2, %v350_v18, %v2508_v24  ;;  %v647_v2 = vsel %vm621_vm2, %v3025_v42, %v2509_v54  ;;  %v631_v11 = vsel %vm621_vm2, %v3042_v49, %v2514_v3  ;;  %v2584_v49 = vld [vmem:[%s4247_s1 + $0xd8] sm:$0xff]  }
  0x9b   : > { %1364 = vmatprep.subr.bf16.mxu0 %v4265_v31  ;;  %2197 = vmatprep.mubr.msk.bf16.mxu1 %vm621_vm2, %v2968_v36  ;;  %v3338_v4 = vpack.c.bf16 %v647_v2, %v646_v16  ;;  %v2517_v15 = vpop.permute.xlu0 %2516  ;;  %v630_v22 = vsel %vm621_vm2, %v334_v1, %v2513_v37 }
  0x9c   : > { %1105 = vmatprep.subr.bf16.mxu1 %v4265_v31  ;;  %v2519_v42 = vunpack.i.h.bf16 %v2517_v15  ;;  %v2518_v28 = vunpack.i.l.bf16 %v2517_v15  ;;  %v3347_v12 = vpack.c.bf16 %v631_v11, %v630_v22  ;;  %v2522_v40 = vpop.permute.xlu1 %2521  ;;  %v338_v15 = vsel %vm247_vm4, %v3130_v30, 0.0  ;;  %v2587_v30 = vld [vmem:[%s4247_s1 + $0x28] sm:$0xff]  }
  0x9d   : > { %904 = vmatmul.mubr.bf16.gmra.mrb[4].mxu0 %v3293_v35  ;;  %v2524_v18 = vunpack.i.h.bf16 %v2522_v40  ;;  %v2523_v54 = vunpack.i.l.bf16 %v2522_v40 }
  0x9e   : > { %1365 = vmatpush1.bf16.msra.mxu0 %v2582_v38  ;;  %1106 = vmatpush1.bf16.msra.mxu1 %v2583_v44  ;;  %v648_v48 = vsel %vm621_vm2, %v352_v26, %v2518_v28  ;;  %v649_v24 = vsel %vm621_vm2, %v3069_v25, %v2519_v42  ;;  %v354_v25 = vsel %vm247_vm4, %v3113_v52, 0.0 }
  0x9f   : > { %2189 = vmatprep.mubr.msk.bf16.mxu0 %vm621_vm2, %v3000_v39  ;;  %1366 = vmatprep.subr.bf16.mxu0 %v4265_v31  ;;  %v3365_v32 = vpack.c.bf16 %v649_v24, %v648_v48  ;;  %v2527_v1 = vpop.permute.xlu0 %2526  ;;  %v632_v3 = vsel %vm621_vm2, %v336_v29, %v2523_v54  ;;  %v633_v37 = vsel %vm621_vm2, %v3085_v6, %v2524_v18  ;;  %v2586_v6 = vld [vmem:[%s4247_s1 + $0xe0] sm:$0xff]   ;;  %v356_v18 = vsel %vm247_vm4, %v3155_v7, 0.0 }
  0xa0   : > { %1107 = vmatprep.subr.bf16.mxu1 %v4265_v31  ;;  %v2529_v38 = vunpack.i.h.bf16 %v2527_v1  ;;  %v2528_v44 = vunpack.i.l.bf16 %v2527_v1  ;;  %v3374_v16 = vpack.c.bf16 %v633_v37, %v632_v3  ;;  %v2532_v2 = vpop.permute.xlu1 %2531  ;;  %v340_v24 = vsel %vm247_vm4, %v3171_v57, 0.0  ;;  %v2589_v57 = vld [vmem:[%s4247_s1 + $0x30] sm:$0xff]  }
  0xa1   : > { %976 = vmatmul.mubr.bf16.gmra.mrb[8].mxu1 %v3311_v19  ;;  %v2534_v22 = vunpack.i.h.bf16 %v2532_v2  ;;  %v2533_v11 = vunpack.i.l.bf16 %v2532_v2  ;;  %v358_v2 = vsel %vm247_vm4, %v3193_v21, 0.0 }
  0xa2   : > { %1367 = vmatpush1.bf16.msra.mxu0 %v2584_v49  ;;  %2198 = vmatprep.mubr.msk.bf16.mxu1 %vm621_vm2, %v3017_v59  ;;  %v650_v52 = vsel %vm621_vm2, %v354_v25, %v2528_v44  ;;  %v651_v26 = vsel %vm621_vm2, %v3109_v51, %v2529_v38 }
  0xa3   : > { %1108 = vmatpush1.bf16.msra.mxu1 %v2585_v61  ;;  %1368 = vmatprep.subr.bf16.mxu0 %v4265_v31  ;;  %v3392_v42 = vpack.c.bf16 %v651_v26, %v650_v52  ;;  %v2537_v28 = vpop.permute.xlu0 %2536  ;;  %v634_v40 = vsel %vm621_vm2, %v338_v15, %v2533_v11  ;;  %v635_v29 = vsel %vm621_vm2, %v3126_v47, %v2534_v22  ;;  %v2588_v47 = vld [vmem:[%s4247_s1 + $0xe8] sm:$0xff]  }
  0xa4   : > { %1109 = vmatprep.subr.bf16.mxu1 %v4265_v31  ;;  %v2539_v51 = vunpack.i.h.bf16 %v2537_v28  ;;  %v2538_v54 = vunpack.i.l.bf16 %v2537_v28  ;;  %v3401_v49 = vpack.c.bf16 %v635_v29, %v634_v40  ;;  %v2542_v48 = vpop.permute.xlu1 %2541  ;;  %v326_v29 = vsel %vm247_vm4, %v3204_v46, 0.0  ;;  %v2592_v46 = vld [vmem:[%s4247_s1 + $0xf8] sm:$0xff]  }
  0xa5   : > { %912 = vmatmul.mubr.bf16.gmra.mrb[8].mxu0 %v3320_v63  ;;  %v2544_v61 = vunpack.i.h.bf16 %v2542_v48  ;;  %v2543_v1 = vunpack.i.l.bf16 %v2542_v48 }
  0xa6   : > { %1369 = vmatpush1.bf16.msra.mxu0 %v2586_v6  ;;  %2190 = vmatprep.mubr.msk.bf16.mxu0 %vm621_vm2, %v3050_v14  ;;  %v652_v7 = vsel %vm621_vm2, %v356_v18, %v2538_v54  ;;  %v653_v3 = vsel %vm621_vm2, %v3151_v62, %v2539_v51  ;;  %v342_v6 = vsel %vm247_vm4, %v3224_v58, 0.0  ;;  %v2591_v58 = vld [vmem:[%s4247_s1 + $0x38] sm:$0xff]  }
  0xa7   : > { %1110 = vmatpush1.bf16.msra.mxu1 %v2587_v30  ;;  %1370 = vmatprep.subr.bf16.mxu0 %v4265_v31  ;;  %v3419_v37 = vpack.c.bf16 %v653_v3, %v652_v7  ;;  %v2547_v25 = vpop.permute.xlu0 %2546  ;;  %v636_v38 = vsel %vm621_vm2, %v340_v24, %v2543_v1  ;;  %v637_v44 = vsel %vm621_vm2, %v3165_v56, %v2544_v61  ;;  %v2590_v56 = vld [vmem:[%s4247_s1 + $0xf0] sm:$0xff]   ;;  %v2593_v61 = vld [vmem:[%s4247_s1 + $0x40] sm:$0xff]   ;;  %v2596_v7 = vld [vmem:[%s4247_s1 + $0x108] sm:$0xff]  }
  0xa8   : > { %1111 = vmatprep.subr.bf16.mxu1 %v4265_v31  ;;  %v2549_v62 = vunpack.i.h.bf16 %v2547_v25  ;;  %v2548_v15 = vunpack.i.l.bf16 %v2547_v25  ;;  %v3428_v22 = vpack.c.bf16 %v637_v44, %v636_v38  ;;  %v2552_v11 = vpop.permute.xlu1 %2551  ;;  %v2597_v3 = vld [vmem:[%s4247_s1 + $0x50] sm:$0xff]   ;;  %v2599_v25 = vld [vmem:[%s4247_s1 + $0x58] sm:$0xff]   ;;  %v4266_v44 = vpack.c.bf16 %v3235_v9, %v3228_v23 }
  0xa9   : > { %984 = vmatmul.mubr.bf16.gmra.mrb[12].mxu1 %v3338_v4  ;;  %v2554_v52 = vunpack.i.h.bf16 %v2552_v11  ;;  %v2553_v26 = vunpack.i.l.bf16 %v2552_v11  ;;  %v2600_v38 = vld [vmem:[%s4247_s1 + $0x118] sm:$0xff]  }
  0xaa   : > { %2199 = vmatprep.mubr.msk.bf16.mxu1 %vm621_vm2, %v3079_v50  ;;  %1371 = vmatpush1.bf16.msra.mxu0 %v2588_v47  ;;  %v654_v21 = vsel %vm621_vm2, %v358_v2, %v2548_v15  ;;  %v655_v30 = vsel %vm621_vm2, %v3189_v20, %v2549_v62  ;;  %v2595_v47 = vld [vmem:[%s4247_s1 + $0x48] sm:$0xff]  }
  0xab   : > { %1112 = vmatpush1.bf16.msra.mxu1 %v2589_v57  ;;  %1372 = vmatprep.subr.bf16.mxu0 %v4265_v31  ;;  %v3446_v28 = vpack.c.bf16 %v655_v30, %v654_v21  ;;  %v2557_v40 = vpop.permute.xlu0 %2556  ;;  %v638_v18 = vsel %vm621_vm2, %v342_v6, %v2553_v26  ;;  %v639_v51 = vsel %vm621_vm2, %v3220_v5, %v2554_v52  ;;  %v2598_v57 = vld [vmem:[%s4247_s1 + $0x110] sm:$0xff]  }
  0xac   : > { %1113 = vmatprep.subr.bf16.mxu1 %v4265_v31  ;;  %v2559_v20 = vunpack.i.h.bf16 %v2557_v40  ;;  %v2558_v54 = vunpack.i.l.bf16 %v2557_v40  ;;  %v3455_v48 = vpack.c.bf16 %v639_v51, %v638_v18 }
  0xad   : > { %920 = vmatmul.mubr.bf16.gmra.mrb[12].mxu0 %v3347_v12 }
  0xae   : > { %2191 = vmatprep.mubr.msk.bf16.mxu0 %vm621_vm2, %v3095_v45  ;;  %1373 = vmatpush1.bf16.msra.mxu0 %v2590_v56  ;;  %v622_v24 = vsel %vm621_vm2, %v326_v29, %v2558_v54  ;;  %v623_v5 = vsel %vm621_vm2, %v3200_v60, %v2559_v20  ;;  %v2594_v60 = vld [vmem:[%s4247_s1 + $0x100] sm:$0xff]  }
  0xaf   : > { %1114 = vmatpush1.bf16.msra.mxu1 %v2591_v58  ;;  %1374 = vmatprep.subr.bf16.mxu0 %v4265_v31  ;;  %v658_v1 = vpack.c.bf16 %v623_v5, %v622_v24 }
  0xb0   : > { %1115 = vmatprep.subr.bf16.mxu1 %v4265_v31 }
  0xb1   : > { %992 = vmatmul.mubr.bf16.gmra.mrb[16].mxu1 %v3365_v32 }
  0xb2   : > { %2200 = vmatprep.mubr.msk.bf16.mxu1 %vm621_vm2, %v3116_v41  ;;  %1375 = vmatpush1.bf16.msra.mxu0 %v2592_v46 }
  0xb3   : > { %1116 = vmatpush1.bf16.msra.mxu1 %v2593_v61  ;;  %1376 = vmatprep.subr.bf16.mxu0 %v4265_v31 }
  0xb4   : > { %1117 = vmatprep.subr.bf16.mxu1 %v4265_v31 }
  0xb5   : > { %928 = vmatmul.mubr.bf16.gmra.mrb[16].mxu0 %v3374_v16 }
  0xb6   : > { %2192 = vmatprep.mubr.msk.bf16.mxu0 %vm621_vm2, %v3133_v53  ;;  %1377 = vmatpush1.bf16.msra.mxu0 %v2594_v60 }
  0xb7   : > { %1118 = vmatpush1.bf16.msra.mxu1 %v2595_v47  ;;  %1378 = vmatprep.subr.bf16.mxu0 %v4265_v31 }
  0xb8   : > { %1119 = vmatprep.subr.bf16.mxu1 %v4265_v31 }
  0xb9   : > { %1000 = vmatmul.mubr.bf16.gmra.mrb[20].mxu1 %v3392_v42 }
  0xba   : > { %2201 = vmatprep.mubr.msk.bf16.mxu1 %vm621_vm2, %v3159_v17  ;;  %1379 = vmatpush1.bf16.msra.mxu0 %v2596_v7 }
  0xbb   : > { %1120 = vmatpush1.bf16.msra.mxu1 %v2597_v3  ;;  %1380 = vmatprep.subr.bf16.mxu0 %v4265_v31 }
  0xbc   : > { %1121 = vmatprep.subr.bf16.mxu1 %v4265_v31 }
  0xbd   : > { %936 = vmatmul.mubr.bf16.gmra.mrb[20].mxu0 %v3401_v49 }
  0xbe   : > { %2193 = vmatprep.mubr.msk.bf16.mxu0 %vm621_vm2, %v3175_v43  ;;  %1381 = vmatpush1.bf16.msra.mxu0 %v2598_v57 }
  0xbf   : > { %1122 = vmatpush1.bf16.msra.mxu1 %v2599_v25  ;;  %1382 = vmatprep.subr.bf16.mxu0 %v4265_v31  ;;  %v4267_v31 = vld [vmem:[#allocation4_spill] sm:$0xff] }
  0xc1   : > { %1008 = vmatmul.mubr.bf16.gmra.mrb[24].mxu1 %v3419_v37 }
  0xc2   : > { %2202 = vmatprep.mubr.msk.bf16.mxu1 %vm621_vm2, %v3196_v13  ;;  %1383 = vmatpush1.bf16.msra.mxu0 %v2600_v38 }
  0xc5   : > { %944 = vmatmul.mubr.bf16.gmra.mrb[24].mxu0 %v3428_v22 }
  0xc6   : > { %2194 = vmatprep.mubr.msk.bf16.mxu0 %vm621_vm2, %v3216_v55 }
  0xc9   : > { %1016 = vmatmul.mubr.bf16.gmra.mrb[28].mxu1 %v3446_v28 }
  0xca   : > { %2215 = vmatprep.mubr.msk.bf16.mxu1 %vm621_vm2, %v4266_v44 }
  0xcd   : > { %952 = vmatmul.mubr.bf16.gmra.mrb[28].mxu0 %v3455_v48 }
  0xce   : > { %2267 = vmatprep.mubr.msk.bf16.mxu0 %vm621_vm2, %v2945_v27 }
  0xd1   : > { %1132 = vmatmul.mubr.bf16.vlgmr.msra.gmra.mrb[32].mxu1 %v658_v1 }
  0xd2   : > { %2216 = vmatprep.mubr.msk.bf16.mxu1 %vm621_vm2, %v4267_v31 }
  0xd5   : > { %1393 = vmatmul.mubr.bf16.vlgmr.msra.gmra.mrb[32].mxu0 %v3293_v35 }
  0xd6   : > { %2268 = vmatprep.mubr.msk.bf16.mxu0 %vm621_vm2, %v3000_v39 }
  0xd9   : > { %1140 = vmatmul.mubr.bf16.gmra.mrb[36].mxu1 %v3284_v10 }
  0xda   : > { %2217 = vmatprep.mubr.msk.bf16.mxu1 %vm621_vm2, %v2945_v27  ;;  %v4268_v27 = vld [vmem:[#allocation3_spill] sm:$0xff] }
  0xdd   : > { %1401 = vmatmul.mubr.bf16.gmra.mrb[36].mxu0 %v3320_v63 }
  0xde   : > { %2269 = vmatprep.mubr.msk.bf16.mxu0 %vm621_vm2, %v3050_v14 }
  0xe1   : > { %1148 = vmatmul.mubr.bf16.gmra.mrb[40].mxu1 %v3293_v35 }
  0xe2   : > { %2218 = vmatprep.mubr.msk.bf16.mxu1 %vm621_vm2, %v3000_v39 }
  0xe5   : > { %1409 = vmatmul.mubr.bf16.gmra.mrb[40].mxu0 %v3347_v12 }
  0xe6   : > { %2270 = vmatprep.mubr.msk.bf16.mxu0 %vm621_vm2, %v3095_v45 }
  0xe9   : > { %1156 = vmatmul.mubr.bf16.gmra.mrb[44].mxu1 %v3320_v63 }
  0xea   : > { %2219 = vmatprep.mubr.msk.bf16.mxu1 %vm621_vm2, %v3050_v14 }
  0xed   : > { %1417 = vmatmul.mubr.bf16.gmra.mrb[44].mxu0 %v3374_v16 }
  0xee   : > { %2271 = vmatprep.mubr.msk.bf16.mxu0 %vm621_vm2, %v3133_v53 }
  0xf1   : > { %1164 = vmatmul.mubr.bf16.gmra.mrb[48].mxu1 %v3347_v12 }
  0xf2   : > { %2220 = vmatprep.mubr.msk.bf16.mxu1 %vm621_vm2, %v3095_v45  ;;  %v2562_v45 = vpop.permute.xlu1 %2561 }
  0xf3   : > { %v2564_v9 = vunpack.i.h.bf16 %v2562_v45 }
  0xf5   : > { %1425 = vmatmul.mubr.bf16.gmra.mrb[48].mxu0 %v3401_v49 }
  0xf6   : > { %2272 = vmatprep.mubr.msk.bf16.mxu0 %vm621_vm2, %v3175_v43 }
  0xf9   : > { %1172 = vmatmul.mubr.bf16.gmra.mrb[52].mxu1 %v3374_v16 }
  0xfa   : > { %2221 = vmatprep.mubr.msk.bf16.mxu1 %vm621_vm2, %v3133_v53 }
  0xfd   : > { %1433 = vmatmul.mubr.bf16.gmra.mrb[52].mxu0 %v3428_v22 }
  0xfe   : > { %2273 = vmatprep.mubr.msk.bf16.mxu0 %vm621_vm2, %v3216_v55 }
 0x101   : > { %1180 = vmatmul.mubr.bf16.gmra.mrb[56].mxu1 %v3401_v49 }
 0x102   : > { %2222 = vmatprep.mubr.msk.bf16.mxu1 %vm621_vm2, %v3175_v43 }
 0x105   : > { %1441 = vmatmul.mubr.bf16.gmra.mrb[56].mxu0 %v3455_v48 }
 0x106   : > { %2274 = vmatprep.mubr.msk.bf16.mxu0 %vm621_vm2, %v4268_v27 }
 0x109   : > { %1188 = vmatmul.mubr.bf16.gmra.mrb[60].mxu1 %v3428_v22 }
 0x10a   : > { %2223 = vmatprep.mubr.msk.bf16.mxu1 %vm621_vm2, %v3216_v55  ;;  %v4269_v55 = vld [vmem:[#allocation5_spill] sm:$0xff] }
 0x10b   : > { %v266_v14 = vrot.slane %v4269_v55, 7 }
 0x10d   : > { %1449 = vmatmul.mubr.bf16.gmra.mrb[60].mxu0 %v3259_v34 }
 0x10e   : > { %2275 = vmatprep.mubr.msk.bf16.mxu0 %vm621_vm2, %v2893_v0 }
 0x111   : > { %1196 = vmatmul.mubr.bf16.gmra.mrb[64].mxu1 %v3455_v48 }
 0x112   : > { %2224 = vmatprep.mubr.msk.bf16.mxu1 %vm621_vm2, %v4268_v27 }
 0x115   : > { %1457 = vmatmul.mubr.bf16.gmra.mrb[64].mxu0 %v3267_v33 }
 0x116   : > { %2276 = vmatprep.mubr.msk.bf16.mxu0 %vm621_vm2, %v2968_v36 }
 0x119   : > { %1204 = vmatmul.mubr.bf16.gmra.mrb[68].mxu1 %v3259_v34  ;;  %v2563_v34 = vunpack.i.l.bf16 %v2562_v45 }
 0x11a   : > { %2225 = vmatprep.mubr.msk.bf16.mxu1 %vm621_vm2, %v2893_v0  ;;  %v381_v0 = vrot.slane %v4269_v55, 1 }
 0x11d   : > { %1465 = vmatmul.mubr.bf16.gmra.mrb[68].mxu0 %v3311_v19 }
 0x11e   : > { %2277 = vmatprep.mubr.msk.bf16.mxu0 %vm621_vm2, %v3017_v59 }
 0x121   : > { %1212 = vmatmul.mubr.bf16.gmra.mrb[72].mxu1 %v3267_v33 }
 0x122   : > { %2226 = vmatprep.mubr.msk.bf16.mxu1 %vm621_vm2, %v2968_v36  ;;  %v4270_v36 = vld [vmem:[#allocation6_spill] sm:$0xff] }
 0x123   : > { %v399_v39 = vrot.slane %v4270_v36, 1 }
 0x125   : > { %1473 = vmatmul.mubr.bf16.gmra.mrb[72].mxu0 %v3338_v4  ;;  %v418_v53 = vsel %vm400_vm1, %v381_v0, %v399_v39 }
 0x126   : > { %2278 = vmatprep.mubr.msk.bf16.mxu0 %vm621_vm2, %v3079_v50 }
 0x129   : > { %1220 = vmatmul.mubr.bf16.gmra.mrb[76].mxu1 %v3311_v19 }
 0x12a   : > { %2227 = vmatprep.mubr.msk.bf16.mxu1 %vm621_vm2, %v3017_v59  ;;  %v436_v59 = vsel %vm400_vm1, %v399_v39, %v381_v0 }
 0x12b   : > { %v476_v23 = vsel %vm363_vm3, %v436_v59, 0.0 }
 0x12c   : > { %v693_v33 = vpack.c.bf16 %v476_v23, %v418_v53 }
 0x12d   : > { %1481 = vmatmul.mubr.bf16.gmra.mrb[76].mxu0 %v3365_v32 }
 0x12e   : > { %2279 = vmatprep.mubr.msk.bf16.mxu0 %vm621_vm2, %v3116_v41 }
 0x131   : > { %1228 = vmatmul.mubr.bf16.gmra.mrb[80].mxu1 %v3338_v4 }
 0x132   : > { %2228 = vmatprep.mubr.msk.bf16.mxu1 %vm621_vm2, %v3079_v50  ;;  %v284_v50 = vrot.slane %v4270_v36, 7 }
 0x135   : > { %1489 = vmatmul.mubr.bf16.gmra.mrb[80].mxu0 %v3392_v42 }
 0x136   : > { %2280 = vmatprep.mubr.msk.bf16.mxu0 %vm621_vm2, %v3159_v17 }
 0x139   : > { %1236 = vmatmul.mubr.bf16.gmra.mrb[84].mxu1 %v3365_v32 }
 0x13a   : > { %2229 = vmatprep.mubr.msk.bf16.mxu1 %vm621_vm2, %v3116_v41  ;;  %v321_v41 = vsel %vm285_vm0, %v284_v50, %v266_v14 }
 0x13b   : > { %v360_v10 = vsel %vm247_vm4, %v321_v41, 0.0 }
 0x13c   : > { %v656_v35 = vsel %vm621_vm2, %v360_v10, %v2563_v34 }
 0x13d   : > { %1497 = vmatmul.mubr.bf16.gmra.mrb[84].mxu0 %v3419_v37 }
 0x13e   : > { %2281 = vmatprep.mubr.msk.bf16.mxu0 %vm621_vm2, %v3196_v13  ;;  %v303_v13 = vsel %vm285_vm0, %v266_v14, %v284_v50 }
 0x13f   : > { %v657_v19 = vsel %vm621_vm2, %v303_v13, %v2564_v9 }
 0x140   : > { %v692_v63 = vpack.c.bf16 %v657_v19, %v656_v35 }
 0x141   : > { %1244 = vmatmul.mubr.bf16.gmra.mrb[88].mxu1 %v3392_v42 }
 0x142   : > { %2230 = vmatprep.mubr.msk.bf16.mxu1 %vm621_vm2, %v3159_v17 }
 0x145   : > { %1505 = vmatmul.mubr.bf16.gmra.mrb[88].mxu0 %v3446_v28 }
 0x146   : > { %2282 = vmatprep.mubr.msk.bf16.mxu0 %vm621_vm2, %v693_v33 }
 0x149   : > { %1252 = vmatmul.mubr.bf16.gmra.mrb[92].mxu1 %v3419_v37 }
 0x14d   : > { %1513 = vmatmul.mubr.bf16.gmra.mrb[92].mxu0 %v692_v63 }
 0x164   : > { %v3632_v17 = vpop.f32.mrb[0].mxu1 }
 0x165   : > { %v963_v4 = vpop.f32.mrb[1].mxu1 }
 0x166   : > { %v3634_v12 = vpop.f32.mrb[2].mxu1 }
 0x167   : > { %v966_v32 = vpop.f32.mrb[3].mxu1 }
 0x168   : > { %v897_v8 = vpop.f32.mrb[0].mxu0 }
 0x169   : > { %v899_v16 = vpop.f32.mrb[1].mxu0 }
 0x16a   : > { %v900_v42 = vpop.f32.mrb[2].mxu0 }
 0x16b   : > { %v902_v49 = vpop.f32.mrb[3].mxu0 }
 0x16c   : > { %v3636_v2 = vpop.f32.mrb[4].mxu1 }
 0x16d   : > { %v971_v62 = vpop.f32.mrb[5].mxu1 }
 0x16e   : > { %v3638_v15 = vpop.f32.mrb[6].mxu1 }
 0x16f   : > { %v974_v22 = vpop.f32.mrb[7].mxu1 }
 0x170   : > { %v3640_v11 = vpop.f32.mrb[4].mxu0 }
 0x171   : > { %v907_v37 = vpop.f32.mrb[5].mxu0 }
 0x172   : > { %v3642_v6 = vpop.f32.mrb[6].mxu0 }
 0x173   : > { %v910_v52 = vpop.f32.mrb[7].mxu0 }
 0x174   : > { %v3644_v26 = vpop.f32.mrb[8].mxu1 }
 0x175   : > { %v979_v56 = vpop.f32.mrb[9].mxu1 }
 0x176   : > { %v3646_v21 = vpop.f32.mrb[10].mxu1 }
 0x177   : > { %v982_v30 = vpop.f32.mrb[11].mxu1 }
 0x178   : > { %v3648_v58 = vpop.f32.mrb[8].mxu0 }
 0x179   : > { %v915_v28 = vpop.f32.mrb[9].mxu0 }
 0x17a   : > { %v3650_v40 = vpop.f32.mrb[10].mxu0 }
 0x17b   : > { %v918_v29 = vpop.f32.mrb[11].mxu0 }
 0x17c   : > { %v3652_v18 = vpop.f32.mrb[12].mxu1 }
 0x17d   : > { %v987_v51 = vpop.f32.mrb[13].mxu1 }
 0x17e   : > { %v3654_v20 = vpop.f32.mrb[14].mxu1 }
 0x17f   : > { %v990_v54 = vpop.f32.mrb[15].mxu1 }
 0x180   : > { %v3656_v48 = vpop.f32.mrb[12].mxu0 }
 0x181   : > { %v923_v46 = vpop.f32.mrb[13].mxu0 }
 0x182   : > { %v3658_v24 = vpop.f32.mrb[14].mxu0 }
 0x183   : > { %v926_v5 = vpop.f32.mrb[15].mxu0 }
 0x184   : > { %v3660_v61 = vpop.f32.mrb[16].mxu1 }
 0x185   : > { %v995_v1 = vpop.f32.mrb[17].mxu1 }
 0x186   : > { %v3662_v60 = vpop.f32.mrb[18].mxu1 }
 0x187   : > { %v998_v47 = vpop.f32.mrb[19].mxu1 }
 0x188   : > { %v3664_v7 = vpop.f32.mrb[16].mxu0 }
 0x189   : > { %v931_v3 = vpop.f32.mrb[17].mxu0 }
 0x18a   : > { %v3666_v57 = vpop.f32.mrb[18].mxu0 }
 0x18b   : > { %v934_v25 = vpop.f32.mrb[19].mxu0 }
 0x18c   : > { %v3668_v38 = vpop.f32.mrb[20].mxu1 }
 0x18d   : > { %v1003_v44 = vpop.f32.mrb[21].mxu1 }
 0x18e   : > { %v3670_v31 = vpop.f32.mrb[22].mxu1 }
 0x18f   : > { %v1006_v27 = vpop.f32.mrb[23].mxu1 }
 0x190   : > { %v3672_v55 = vpop.f32.mrb[20].mxu0 }
 0x191   : > { %v939_v0 = vpop.f32.mrb[21].mxu0 }
 0x192   : > { %v3674_v36 = vpop.f32.mrb[22].mxu0 }
 0x193   : > { %v942_v39 = vpop.f32.mrb[23].mxu0 }
 0x194   : > { %v3676_v59 = vpop.f32.mrb[24].mxu1 }
 0x195   : > { %v1011_v14 = vpop.f32.mrb[25].mxu1 }
 0x196   : > { %v3678_v50 = vpop.f32.mrb[26].mxu1 }
 0x197   : > { %v1014_v45 = vpop.f32.mrb[27].mxu1 }
 0x198   : > { %v3680_v53 = vpop.f32.mrb[24].mxu0 }
 0x199   : > { %v947_v43 = vpop.f32.mrb[25].mxu0 }
 0x19a   : > { %v3682_v23 = vpop.f32.mrb[26].mxu0 }
 0x19b   : > { %v950_v41 = vpop.f32.mrb[27].mxu0 }
 0x19c   : > { %v3684_v9 = vpop.f32.mrb[28].mxu1 }
 0x19d   : > { %v1019_v34 = vpop.f32.mrb[29].mxu1 }
 0x19e   : > { %v3686_v33 = vpop.f32.mrb[30].mxu1 }
 0x19f   : > { %v1022_v13 = vpop.f32.mrb[31].mxu1 }
 0x1a0   : > { %v3688_v10 = vpop.f32.mrb[28].mxu0 }
 0x1a1   : > { %v955_v35 = vpop.f32.mrb[29].mxu0 }
 0x1a2   : > { %v3690_v19 = vpop.f32.mrb[30].mxu0 }
 0x1a3   : > { %v958_v63 = vpop.f32.mrb[31].mxu0 }
 0x1a4   : > { %v1133_v4 = vpop.f32.mrb[32].mxu1 }
 0x1a5   : > { %v1134_v32 = vadd.f32 %v1133_v4, %v897_v8  ;;  %v1135_v16 = vpop.f32.mrb[33].mxu1 }
 0x1a6   : > { %v1136_v49 = vpop.f32.mrb[34].mxu1 }
 0x1a7   : > { %v1137_v62 = vadd.f32 %v1136_v49, %v900_v42  ;;  %v1138_v22 = vpop.f32.mrb[35].mxu1 }
 0x1a8   : > { %v1394_v37 = vpop.f32.mrb[32].mxu0 }
 0x1a9   : > { %v1521_v52 = vadd.f32 %v1394_v37, %v1134_v32  ;;  %v1396_v56 = vpop.f32.mrb[33].mxu0 }
 0x1aa   : > { %v1397_v30 = vpop.f32.mrb[34].mxu0 }
 0x1ab   : > { %v1522_v28 = vadd.f32 %v1397_v30, %v1137_v62  ;;  %v1399_v29 = vpop.f32.mrb[35].mxu0 }
 0x1ac   : > { %v1141_v51 = vpop.f32.mrb[36].mxu1 }
 0x1ad   : > { %v1142_v54 = vadd.f32 %v1141_v51, %v3640_v11  ;;  %v1143_v46 = vpop.f32.mrb[37].mxu1 }
 0x1ae   : > { %v1144_v5 = vpop.f32.mrb[38].mxu1 }
 0x1af   : > { %v1145_v1 = vadd.f32 %v1144_v5, %v3642_v6  ;;  %v1146_v47 = vpop.f32.mrb[39].mxu1  ;;  %v3699_v6 = vld [vmem:[%s4248_s2] ss:$0 sm:$0xff] }
 0x1b0   : > { %v1402_v3 = vpop.f32.mrb[36].mxu0  ;;  %v1561_v35 = vadd.f32 %v3699_v6, %v1522_v28 }
 0x1b1   : > { %v1523_v8 = vadd.f32 %v1402_v3, %v1142_v54  ;;  %v1404_v25 = vpop.f32.mrb[37].mxu0 }
 0x1b2   : > { %v1405_v44 = vpop.f32.mrb[38].mxu0  ;;  %v1625_v22 = vmul.f32 0.1, %v1561_v35  ;;  %vm1593_vm5 = vcmp.gt.f32.partialorder %v1561_v35, 0.0 }
 0x1b3   : > { %v1524_v42 = vadd.f32 %v1405_v44, %v1145_v1  ;;  %v1407_v27 = vpop.f32.mrb[39].mxu0  ;;  %v1562_v16 = vadd.f32 %v3699_v6, %v1523_v8 }
 0x1b4   : > { %v1149_v0 = vpop.f32.mrb[40].mxu1  ;;  %v3707_v5 = vsel %vm1593_vm5, %v1561_v35, %v1625_v22 }
 0x1b5   : > { %v1150_v39 = vadd.f32 %v1149_v0, %v3648_v58  ;;  %v1151_v14 = vpop.f32.mrb[41].mxu1  ;;  %v1560_v58 = vadd.f32 %v3699_v6, %v1521_v52  ;;  %v1626_v51 = vmul.f32 0.1, %v1562_v16  ;;  %v1563_v28 = vadd.f32 %v3699_v6, %v1524_v42 }
 0x1b6   : > { %v1152_v45 = vpop.f32.mrb[42].mxu1  ;;  %vm1594_vm7 = vcmp.gt.f32.partialorder %v1562_v16, 0.0  ;;  %v1689_v42 = vsel %vm621_vm2, %v3707_v5, 0.0 }
 0x1b7   : > { %v1153_v43 = vadd.f32 %v1152_v45, %v3650_v40  ;;  %v1154_v41 = vpop.f32.mrb[43].mxu1  ;;  %v1624_v29 = vmul.f32 0.1, %v1560_v58  ;;  %vm1592_vm6 = vcmp.gt.f32.partialorder %v1560_v58, 0.0  ;;  %v1627_v25 = vmul.f32 0.1, %v1563_v28 }
 0x1b8   : > { %v1410_v11 = vpop.f32.mrb[40].mxu0  ;;  %vm1595_vm8 = vcmp.gt.f32.partialorder %v1563_v28, 0.0 }
 0x1b9   : > { %v1525_v34 = vadd.f32 %v1410_v11, %v1150_v39  ;;  %v1412_v13 = vpop.f32.mrb[41].mxu0  ;;  %v3710_v8 = vsel %vm1592_vm6, %v1560_v58, %v1624_v29  ;;  %v3723_v35 = vsel %vm1595_vm8, %v1563_v28, %v1627_v25 }
 0x1ba   : > { %v1413_v63 = vpop.f32.mrb[42].mxu0 }
 0x1bb   : > { %v1526_v4 = vadd.f32 %v1413_v63, %v1153_v43  ;;  %v1415_v32 = vpop.f32.mrb[43].mxu0  ;;  %v1688_v43 = vsel %vm621_vm2, %v3710_v8, 0.0 }
 0x1bc   : > { %v1157_v49 = vpop.f32.mrb[44].mxu1  ;;  %v1690_v13 = vadd.f32 %v1689_v42, %v1688_v43 }
 0x1bd   : > { %v1158_v40 = vadd.f32 %v1157_v49, %v3656_v48  ;;  %v1159_v62 = vpop.f32.mrb[45].mxu1  ;;  %v1564_v48 = vadd.f32 %v3699_v6, %v1525_v34  ;;  %v1565_v14 = vadd.f32 %v3699_v6, %v1526_v4 }
 0x1be   : > { %v1160_v37 = vpop.f32.mrb[46].mxu1  ;;  %v1693_v62 = vsel %vm621_vm2, %v3723_v35, 0.0 }
 0x1bf   : > { %v1161_v56 = vadd.f32 %v1160_v37, %v3658_v24  ;;  %v1162_v30 = vpop.f32.mrb[47].mxu1  ;;  %v3712_v24 = vsel %vm1594_vm7, %v1562_v16, %v1626_v51  ;;  %v1628_v39 = vmul.f32 0.1, %v1564_v48  ;;  %vm1596_vm9 = vcmp.gt.f32.partialorder %v1564_v48, 0.0 }
 0x1c0   : > { %v1418_v54 = vpop.f32.mrb[44].mxu0  ;;  %v1691_v41 = vsel %vm621_vm2, %v3712_v24, 0.0  ;;  %v1629_v49 = vmul.f32 0.1, %v1565_v14  ;;  %vm1597_vm10 = vcmp.gt.f32.partialorder %v1565_v14, 0.0 }
 0x1c1   : > { %v1527_v52 = vadd.f32 %v1418_v54, %v1158_v40  ;;  %v1420_v46 = vpop.f32.mrb[45].mxu0  ;;  %v1692_v4 = vadd.f32 %v1691_v41, %v1690_v13  ;;  %v3726_v16 = vsel %vm1596_vm9, %v1564_v48, %v1628_v39 }
 0x1c2   : > { %v1421_v1 = vpop.f32.mrb[46].mxu0  ;;  %v1695_v29 = vsel %vm621_vm2, %v3726_v16, 0.0 }
 0x1c3   : > { %v1528_v47 = vadd.f32 %v1421_v1, %v1161_v56  ;;  %v1423_v3 = vpop.f32.mrb[47].mxu0  ;;  %v1694_v54 = vadd.f32 %v1693_v62, %v1692_v4 }
 0x1c4   : > { %v1165_v44 = vpop.f32.mrb[48].mxu1 }
 0x1c5   : > { %v1166_v27 = vadd.f32 %v1165_v44, %v3664_v7  ;;  %v1167_v0 = vpop.f32.mrb[49].mxu1  ;;  %v1566_v7 = vadd.f32 %v3699_v6, %v1527_v52  ;;  %v1567_v56 = vadd.f32 %v3699_v6, %v1528_v47  ;;  %v3734_v52 = vsel %vm1597_vm10, %v1565_v14, %v1629_v49 }
 0x1c6   : > { %v1168_v45 = vpop.f32.mrb[50].mxu1  ;;  %v1696_v25 = vadd.f32 %v1695_v29, %v1694_v54 }
 0x1c7   : > { %v1169_v11 = vadd.f32 %v1168_v45, %v3666_v57  ;;  %v1170_v34 = vpop.f32.mrb[51].mxu1  ;;  %v1630_v37 = vmul.f32 0.1, %v1566_v7  ;;  %vm1598_vm11 = vcmp.gt.f32.partialorder %v1566_v7, 0.0  ;;  %v1631_v47 = vmul.f32 0.1, %v1567_v56 }
 0x1c8   : > { %v1426_v63 = vpop.f32.mrb[48].mxu0  ;;  %vm1599_vm12 = vcmp.gt.f32.partialorder %v1567_v56, 0.0 }
 0x1c9   : > { %v1529_v32 = vadd.f32 %v1426_v63, %v1166_v27  ;;  %v1428_v58 = vpop.f32.mrb[49].mxu0  ;;  %v3738_v44 = vsel %vm1598_vm11, %v1566_v7, %v1630_v37  ;;  %v1697_v27 = vsel %vm621_vm2, %v3734_v52, 0.0  ;;  %v3745_v34 = vsel %vm1599_vm12, %v1567_v56, %v1631_v47 }
 0x1ca   : > { %v1429_v40 = vpop.f32.mrb[50].mxu0  ;;  %v1699_v43 = vsel %vm621_vm2, %v3738_v44, 0.0  ;;  %v1701_v62 = vsel %vm621_vm2, %v3745_v34, 0.0 }
 0x1cb   : > { %v1530_v22 = vadd.f32 %v1429_v40, %v1169_v11  ;;  %v1431_v57 = vpop.f32.mrb[51].mxu0  ;;  %v1568_v46 = vadd.f32 %v3699_v6, %v1529_v32  ;;  %v1698_v11 = vadd.f32 %v1697_v27, %v1696_v25 }
 0x1cc   : > { %v1173_v30 = vpop.f32.mrb[52].mxu1 }
 0x1cd   : > { %v1174_v51 = vadd.f32 %v1173_v30, %v3672_v55  ;;  %v1175_v28 = vpop.f32.mrb[53].mxu1  ;;  %v1632_v39 = vmul.f32 0.1, %v1568_v46  ;;  %v1569_v14 = vadd.f32 %v3699_v6, %v1530_v22  ;;  %vm1600_vm13 = vcmp.gt.f32.partialorder %v1568_v46, 0.0 }
 0x1ce   : > { %v1176_v48 = vpop.f32.mrb[54].mxu1  ;;  %v1700_v58 = vadd.f32 %v1699_v43, %v1698_v11 }
 0x1cf   : > { %v1177_v1 = vadd.f32 %v1176_v48, %v3674_v36  ;;  %v1178_v3 = vpop.f32.mrb[55].mxu1  ;;  %v3749_v4 = vsel %vm1600_vm13, %v1568_v46, %v1632_v39  ;;  %v1633_v49 = vmul.f32 0.1, %v1569_v14  ;;  %vm1601_vm14 = vcmp.gt.f32.partialorder %v1569_v14, 0.0 }
 0x1d0   : > { %v1434_v42 = vpop.f32.mrb[52].mxu0  ;;  %v1702_v28 = vadd.f32 %v1701_v62, %v1700_v58 }
 0x1d1   : > { %v1531_v55 = vadd.f32 %v1434_v42, %v1174_v51  ;;  %v1436_v0 = vpop.f32.mrb[53].mxu0  ;;  %v3757_v54 = vsel %vm1601_vm14, %v1569_v14, %v1633_v49 }
 0x1d2   : > { %v1437_v45 = vpop.f32.mrb[54].mxu0  ;;  %v1705_v27 = vsel %vm621_vm2, %v3757_v54, 0.0 }
 0x1d3   : > { %v1532_v36 = vadd.f32 %v1437_v45, %v1177_v1  ;;  %v1439_v41 = vpop.f32.mrb[55].mxu0  ;;  %v1570_v13 = vadd.f32 %v3699_v6, %v1531_v55 }
 0x1d4   : > { %v1181_v7 = vpop.f32.mrb[56].mxu1 }
 0x1d5   : > { %v1182_v63 = vadd.f32 %v1181_v7, %v3680_v53  ;;  %v1183_v32 = vpop.f32.mrb[57].mxu1  ;;  %v1634_v37 = vmul.f32 0.1, %v1570_v13  ;;  %v1571_v56 = vadd.f32 %v3699_v6, %v1532_v36  ;;  %v1703_v53 = vsel %vm621_vm2, %v3749_v4, 0.0 }
 0x1d6   : > { %v1184_v40 = vpop.f32.mrb[58].mxu1  ;;  %vm1602_vm15 = vcmp.gt.f32.partialorder %v1570_v13, 0.0 }
 0x1d7   : > { %v1185_v22 = vadd.f32 %v1184_v40, %v3682_v23  ;;  %v1186_v57 = vpop.f32.mrb[59].mxu1  ;;  %v1704_v23 = vadd.f32 %v1703_v53, %v1702_v28  ;;  %v3760_v25 = vsel %vm1602_vm15, %v1570_v13, %v1634_v37  ;;  %v1635_v47 = vmul.f32 0.1, %v1571_v56 }
 0x1d8   : > { %v1442_v30 = vpop.f32.mrb[56].mxu0  ;;  %vm1603_vm0 = vcmp.gt.f32.partialorder %v1571_v56, 0.0  ;;  %v1707_v43 = vsel %vm621_vm2, %v3760_v25, 0.0 }
 0x1d9   : > { %v1533_v29 = vadd.f32 %v1442_v30, %v1182_v63  ;;  %v1444_v51 = vpop.f32.mrb[57].mxu0  ;;  %v1706_v11 = vadd.f32 %v1705_v27, %v1704_v23  ;;  %v3769_v13 = vsel %vm1603_vm0, %v1571_v56, %v1635_v47 }
 0x1da   : > { %v1445_v46 = vpop.f32.mrb[58].mxu0  ;;  %v1709_v62 = vsel %vm621_vm2, %v3769_v13, 0.0 }
 0x1db   : > { %v1572_v48 = vadd.f32 %v3699_v6, %v1533_v29  ;;  %v1534_v1 = vadd.f32 %v1445_v46, %v1185_v22  ;;  %v1447_v3 = vpop.f32.mrb[59].mxu0 }
 0x1dc   : > { %v1189_v42 = vpop.f32.mrb[60].mxu1 }
 0x1dd   : > { %v1636_v55 = vmul.f32 0.1, %v1572_v48  ;;  %v1190_v0 = vadd.f32 %v1189_v42, %v3688_v10  ;;  %v1191_v39 = vpop.f32.mrb[61].mxu1  ;;  %vm1604_vm1 = vcmp.gt.f32.partialorder %v1572_v48, 0.0  ;;  %v1573_v14 = vadd.f32 %v3699_v6, %v1534_v1 }
 0x1de   : > { %v1192_v45 = vpop.f32.mrb[62].mxu1  ;;  %v1708_v10 = vadd.f32 %v1707_v43, %v1706_v11 }
 0x1df   : > { %v1193_v36 = vadd.f32 %v1192_v45, %v3690_v19  ;;  %v1194_v41 = vpop.f32.mrb[63].mxu1  ;;  %v3771_v63 = vsel %vm1604_vm1, %v1572_v48, %v1636_v55  ;;  %v1637_v49 = vmul.f32 0.1, %v1573_v14  ;;  %vm1605_vm3 = vcmp.gt.f32.partialorder %v1573_v14, 0.0 }
 0x1e0   : > { %v1450_v7 = vpop.f32.mrb[60].mxu0  ;;  %v1711_v37 = vsel %vm621_vm2, %v3771_v63, 0.0  ;;  %v1710_v28 = vadd.f32 %v1709_v62, %v1708_v10 }
 0x1e1   : > { %v1535_v32 = vadd.f32 %v1450_v7, %v1190_v0  ;;  %v1452_v58 = vpop.f32.mrb[61].mxu0  ;;  %v3780_v46 = vsel %vm1605_vm3, %v1573_v14, %v1637_v49 }
 0x1e2   : > { %v1453_v40 = vpop.f32.mrb[62].mxu0  ;;  %v1712_v47 = vadd.f32 %v1711_v37, %v1710_v28  ;;  %v1713_v55 = vsel %vm621_vm2, %v3780_v46, 0.0 }
 0x1e3   : > { %v1574_v22 = vadd.f32 %v3699_v6, %v1535_v32  ;;  %v1536_v57 = vadd.f32 %v1453_v40, %v1193_v36  ;;  %v1455_v19 = vpop.f32.mrb[63].mxu0 }
 0x1e4   : > { %v1197_v56 = vpop.f32.mrb[64].mxu1  ;;  %v1714_v41 = vadd.f32 %v1713_v55, %v1712_v47 }
 0x1e5   : > { %vm1606_vm4 = vcmp.gt.f32.partialorder %v1574_v22, 0.0  ;;  %v1638_v30 = vmul.f32 0.1, %v1574_v22  ;;  %v1575_v53 = vadd.f32 %v3699_v6, %v1536_v57  ;;  %v1198_v29 = vadd.f32 %v1197_v56, %v3632_v17  ;;  %v1199_v51 = vpop.f32.mrb[65].mxu1 }
 0x1e6   : > { %v1200_v48 = vpop.f32.mrb[66].mxu1 }
 0x1e7   : > { %v1639_v1 = vmul.f32 0.1, %v1575_v53  ;;  %v1201_v3 = vadd.f32 %v1200_v48, %v3634_v12  ;;  %v1202_v23 = vpop.f32.mrb[67].mxu1  ;;  %v3783_v42 = vsel %vm1606_vm4, %v1574_v22, %v1638_v30  ;;  %vm1607_vm5 = vcmp.gt.f32.partialorder %v1575_v53, 0.0 }
 0x1e8   : > { %v1458_v27 = vpop.f32.mrb[64].mxu0  ;;  %v1715_v14 = vsel %vm621_vm2, %v3783_v42, 0.0 }
 0x1e9   : > { %v1537_v0 = vadd.f32 %v1458_v27, %v1198_v29  ;;  %v1460_v39 = vpop.f32.mrb[65].mxu0  ;;  %v3789_v45 = vsel %vm1607_vm5, %v1575_v53, %v1639_v1  ;;  %v1716_v49 = vadd.f32 %v1715_v14, %v1714_v41 }
 0x1ea   : > { %v1461_v17 = vpop.f32.mrb[66].mxu0  ;;  %v1717_v40 = vsel %vm621_vm2, %v3789_v45, 0.0 }
 0x1eb   : > { %v1576_v43 = vadd.f32 %v3699_v6, %v1537_v0  ;;  %v1538_v12 = vadd.f32 %v1461_v17, %v1201_v3  ;;  %v1463_v36 = vpop.f32.mrb[67].mxu0  ;;  %v1718_v51 = vadd.f32 %v1717_v40, %v1716_v49 }
 0x1ec   : > { %v1205_v11 = vpop.f32.mrb[68].mxu1 }
 0x1ed   : > { %vm1608_vm6 = vcmp.gt.f32.partialorder %v1576_v43, 0.0  ;;  %v1640_v7 = vmul.f32 0.1, %v1576_v43  ;;  %v1577_v32 = vadd.f32 %v3699_v6, %v1538_v12  ;;  %v1206_v58 = vadd.f32 %v1205_v11, %v3636_v2  ;;  %v1207_v10 = vpop.f32.mrb[69].mxu1 }
 0x1ee   : > { %v1208_v62 = vpop.f32.mrb[70].mxu1 }
 0x1ef   : > { %v3796_v22 = vsel %vm1608_vm6, %v1576_v43, %v1640_v7  ;;  %vm1609_vm7 = vcmp.gt.f32.partialorder %v1577_v32, 0.0  ;;  %v1641_v57 = vmul.f32 0.1, %v1577_v32  ;;  %v1209_v19 = vadd.f32 %v1208_v62, %v3638_v15  ;;  %v1210_v37 = vpop.f32.mrb[71].mxu1 }
 0x1f0   : > { %v1466_v56 = vpop.f32.mrb[68].mxu0  ;;  %v1719_v30 = vsel %vm621_vm2, %v3796_v22, 0.0 }
 0x1f1   : > { %v3801_v53 = vsel %vm1609_vm7, %v1577_v32, %v1641_v57  ;;  %v1539_v2 = vadd.f32 %v1466_v56, %v1206_v58  ;;  %v1468_v29 = vpop.f32.mrb[69].mxu0  ;;  %v1720_v23 = vadd.f32 %v1719_v30, %v1718_v51  ;;  %vm2055_vm7 = vcmask 519168  }
 0x1f2   : > { %v1469_v28 = vpop.f32.mrb[70].mxu0  ;;  %v1721_v47 = vsel %vm621_vm2, %v3801_v53, 0.0 }
 0x1f3   : > { %v1578_v48 = vadd.f32 %v3699_v6, %v1539_v2  ;;  %v1540_v1 = vadd.f32 %v1469_v28, %v1209_v19  ;;  %v1471_v3 = vpop.f32.mrb[71].mxu0  ;;  %v1722_v41 = vadd.f32 %v1721_v47, %v1720_v23 }
 0x1f4   : > { %v1213_v15 = vpop.f32.mrb[72].mxu1 }
 0x1f5   : > { %vm1610_vm8 = vcmp.gt.f32.partialorder %v1578_v48, 0.0  ;;  %v1642_v27 = vmul.f32 0.1, %v1578_v48  ;;  %v1579_v55 = vadd.f32 %v3699_v6, %v1540_v1  ;;  %v1214_v0 = vadd.f32 %v1213_v15, %v3644_v26  ;;  %v1215_v39 = vpop.f32.mrb[73].mxu1 }
 0x1f6   : > { %v1216_v17 = vpop.f32.mrb[74].mxu1 }
 0x1f7   : > { %v3808_v14 = vsel %vm1610_vm8, %v1578_v48, %v1642_v27  ;;  %vm1611_vm9 = vcmp.gt.f32.partialorder %v1579_v55, 0.0  ;;  %v1643_v43 = vmul.f32 0.1, %v1579_v55  ;;  %v1217_v12 = vadd.f32 %v1216_v17, %v3646_v21  ;;  %v1218_v36 = vpop.f32.mrb[75].mxu1 }
 0x1f8   : > { %v1723_v11 = vsel %vm621_vm2, %v3808_v14, 0.0  ;;  %v1474_v7 = vpop.f32.mrb[72].mxu0 }
 0x1f9   : > { %v3813_v32 = vsel %vm1611_vm9, %v1579_v55, %v1643_v43  ;;  %v1541_v58 = vadd.f32 %v1474_v7, %v1214_v0  ;;  %v1476_v10 = vpop.f32.mrb[73].mxu0  ;;  %v1724_v49 = vadd.f32 %v1723_v11, %v1722_v41 }
 0x1fa   : > { %v1477_v26 = vpop.f32.mrb[74].mxu0  ;;  %v1725_v40 = vsel %vm621_vm2, %v3813_v32, 0.0 }
 0x1fb   : > { %v1580_v62 = vadd.f32 %v3699_v6, %v1541_v58  ;;  %v1542_v57 = vadd.f32 %v1477_v26, %v1217_v12  ;;  %v1479_v19 = vpop.f32.mrb[75].mxu0  ;;  %v1726_v29 = vadd.f32 %v1725_v40, %v1724_v49 }
 0x1fc   : > { %v1221_v21 = vpop.f32.mrb[76].mxu1 }
 0x1fd   : > { %vm1612_vm10 = vcmp.gt.f32.partialorder %v1580_v62, 0.0  ;;  %v1644_v37 = vmul.f32 0.1, %v1580_v62  ;;  %v1581_v56 = vadd.f32 %v3699_v6, %v1542_v57  ;;  %v1222_v30 = vadd.f32 %v1221_v21, %v3652_v18  ;;  %v1223_v2 = vpop.f32.mrb[77].mxu1 }
 0x1fe   : > { %v1224_v51 = vpop.f32.mrb[78].mxu1 }
 0x1ff   : > { %v3820_v28 = vsel %vm1612_vm10, %v1580_v62, %v1644_v37  ;;  %vm1613_vm11 = vcmp.gt.f32.partialorder %v1581_v56, 0.0  ;;  %v1645_v48 = vmul.f32 0.1, %v1581_v56  ;;  %v1225_v1 = vadd.f32 %v1224_v51, %v3654_v20  ;;  %v1226_v3 = vpop.f32.mrb[79].mxu1 }
 0x200   : > { %v1727_v23 = vsel %vm621_vm2, %v3820_v28, 0.0  ;;  %v1482_v47 = vpop.f32.mrb[76].mxu0 }
 0x201   : > { %v1728_v15 = vadd.f32 %v1727_v23, %v1726_v29  ;;  %v3825_v27 = vsel %vm1613_vm11, %v1581_v56, %v1645_v48  ;;  %v1543_v55 = vadd.f32 %v1482_v47, %v1222_v30  ;;  %v1484_v0 = vpop.f32.mrb[77].mxu0 }
 0x202   : > { %v1729_v18 = vsel %vm621_vm2, %v3825_v27, 0.0  ;;  %v1485_v39 = vpop.f32.mrb[78].mxu0 }
 0x203   : > { %v1730_v17 = vadd.f32 %v1729_v18, %v1728_v15  ;;  %v1582_v43 = vadd.f32 %v3699_v6, %v1543_v55  ;;  %v1544_v12 = vadd.f32 %v1485_v39, %v1225_v1  ;;  %v1487_v36 = vpop.f32.mrb[79].mxu0 }
 0x204   : > { %v1229_v20 = vpop.f32.mrb[80].mxu1 }
 0x205   : > { %vm1614_vm12 = vcmp.gt.f32.partialorder %v1582_v43, 0.0  ;;  %v1646_v41 = vmul.f32 0.1, %v1582_v43  ;;  %v1583_v11 = vadd.f32 %v3699_v6, %v1544_v12  ;;  %v1230_v7 = vadd.f32 %v1229_v20, %v3660_v61  ;;  %v1231_v58 = vpop.f32.mrb[81].mxu1 }
 0x206   : > { %v1232_v10 = vpop.f32.mrb[82].mxu1 }
 0x207   : > { %v3832_v49 = vsel %vm1614_vm12, %v1582_v43, %v1646_v41  ;;  %vm1615_vm13 = vcmp.gt.f32.partialorder %v1583_v11, 0.0  ;;  %v1647_v26 = vmul.f32 0.1, %v1583_v11  ;;  %v1233_v40 = vadd.f32 %v1232_v10, %v3662_v60  ;;  %v1234_v62 = vpop.f32.mrb[83].mxu1 }
 0x208   : > { %v1731_v57 = vsel %vm621_vm2, %v3832_v49, 0.0  ;;  %v1490_v19 = vpop.f32.mrb[80].mxu0 }
 0x209   : > { %v1732_v21 = vadd.f32 %v1731_v57, %v1730_v17  ;;  %v3837_v37 = vsel %vm1615_vm13, %v1583_v11, %v1647_v26  ;;  %v1545_v56 = vadd.f32 %v1490_v19, %v1230_v7  ;;  %v1492_v30 = vpop.f32.mrb[81].mxu0 }
 0x20a   : > { %v1733_v61 = vsel %vm621_vm2, %v3837_v37, 0.0  ;;  %v1493_v2 = vpop.f32.mrb[82].mxu0 }
 0x20b   : > { %v1734_v29 = vadd.f32 %v1733_v61, %v1732_v21  ;;  %v1584_v51 = vadd.f32 %v3699_v6, %v1545_v56  ;;  %v1546_v48 = vadd.f32 %v1493_v2, %v1233_v40  ;;  %v1495_v1 = vpop.f32.mrb[83].mxu0 }
 0x20c   : > { %v1237_v60 = vpop.f32.mrb[84].mxu1 }
 0x20d   : > { %vm1616_vm14 = vcmp.gt.f32.partialorder %v1584_v51, 0.0  ;;  %v1648_v3 = vmul.f32 0.1, %v1584_v51  ;;  %v1585_v23 = vadd.f32 %v3699_v6, %v1546_v48  ;;  %v1238_v47 = vadd.f32 %v1237_v60, %v3668_v38  ;;  %v1239_v15 = vpop.f32.mrb[85].mxu1 }
 0x20e   : > { %v1240_v55 = vpop.f32.mrb[86].mxu1 }
 0x20f   : > { %v3844_v0 = vsel %vm1616_vm14, %v1584_v51, %v1648_v3  ;;  %vm1617_vm15 = vcmp.gt.f32.partialorder %v1585_v23, 0.0  ;;  %v1649_v18 = vmul.f32 0.1, %v1585_v23  ;;  %v1241_v39 = vadd.f32 %v1240_v55, %v3670_v31  ;;  %v1242_v17 = vpop.f32.mrb[87].mxu1 }
 0x210   : > { %v1735_v43 = vsel %vm621_vm2, %v3844_v0, 0.0  ;;  %v1498_v12 = vpop.f32.mrb[84].mxu0 }
 0x211   : > { %v1736_v36 = vadd.f32 %v1735_v43, %v1734_v29  ;;  %v3849_v20 = vsel %vm1617_vm15, %v1585_v23, %v1649_v18  ;;  %v1547_v41 = vadd.f32 %v1498_v12, %v1238_v47  ;;  %v1500_v11 = vpop.f32.mrb[85].mxu0 }
 0x212   : > { %v1737_v38 = vsel %vm621_vm2, %v3849_v20, 0.0  ;;  %v1501_v7 = vpop.f32.mrb[86].mxu0 }
 0x213   : > { %v1738_v58 = vadd.f32 %v1737_v38, %v1736_v36  ;;  %v1586_v10 = vadd.f32 %v3699_v6, %v1547_v41  ;;  %v1548_v26 = vadd.f32 %v1501_v7, %v1241_v39  ;;  %v1503_v40 = vpop.f32.mrb[87].mxu0 }
 0x214   : > { %v1245_v31 = vpop.f32.mrb[88].mxu1 }
 0x215   : > { %vm1618_vm0 = vcmp.gt.f32.partialorder %v1586_v10, 0.0  ;;  %v1650_v62 = vmul.f32 0.1, %v1586_v10  ;;  %v1587_v57 = vadd.f32 %v3699_v6, %v1548_v26  ;;  %v1246_v19 = vadd.f32 %v1245_v31, %v3676_v59  ;;  %v1247_v21 = vpop.f32.mrb[89].mxu1 }
 0x216   : > { %v1248_v56 = vpop.f32.mrb[90].mxu1 }
 0x217   : > { %v3856_v30 = vsel %vm1618_vm0, %v1586_v10, %v1650_v62  ;;  %vm1619_vm1 = vcmp.gt.f32.partialorder %v1587_v57, 0.0  ;;  %v1651_v61 = vmul.f32 0.1, %v1587_v57  ;;  %v1249_v2 = vadd.f32 %v1248_v56, %v3678_v50  ;;  %v1250_v29 = vpop.f32.mrb[91].mxu1 }
 0x218   : > { %v1739_v51 = vsel %vm621_vm2, %v3856_v30, 0.0  ;;  %v1506_v48 = vpop.f32.mrb[88].mxu0 }
 0x219   : > { %v1740_v1 = vadd.f32 %v1739_v51, %v1738_v58  ;;  %v1683_v60 = vsel %vm1619_vm1, %v1587_v57, %v1651_v61  ;;  %v1549_v3 = vadd.f32 %v1506_v48, %v1246_v19  ;;  %v1508_v23 = vpop.f32.mrb[89].mxu0 }
 0x21a   : > { %v1741_v47 = vsel %vm621_vm2, %v1683_v60, 0.0  ;;  %v1509_v59 = vpop.f32.mrb[90].mxu0 }
 0x21b   : > { %v1742_v15 = vadd.f32 %v1741_v47, %v1740_v1  ;;  %v1588_v55 = vadd.f32 %v3699_v6, %v1549_v3  ;;  %v1550_v18 = vadd.f32 %v1509_v59, %v1249_v2  ;;  %v1511_v39 = vpop.f32.mrb[91].mxu0 }
 0x21c   : > { %v1253_v17 = vpop.f32.mrb[92].mxu1 }
 0x21d   : > { %vm1620_vm3 = vcmp.gt.f32.partialorder %v1588_v55, 0.0  ;;  %v1652_v50 = vmul.f32 0.1, %v1588_v55  ;;  %v1589_v43 = vadd.f32 %v3699_v6, %v1550_v18  ;;  %v1254_v12 = vadd.f32 %v1253_v17, %v3684_v9  ;;  %v1255_v36 = vpop.f32.mrb[93].mxu1 }
 0x21e   : > { %v1256_v41 = vpop.f32.mrb[94].mxu1 }
 0x21f   : > { %v1684_v11 = vsel %vm1620_vm3, %v1588_v55, %v1652_v50  ;;  %vm1621_vm4 = vcmp.gt.f32.partialorder %v1589_v43, 0.0  ;;  %v1653_v38 = vmul.f32 0.1, %v1589_v43  ;;  %v1257_v7 = vadd.f32 %v1256_v41, %v3686_v33  ;;  %v1258_v58 = vpop.f32.mrb[95].mxu1 }
 0x220   : > { %v1743_v10 = vsel %vm621_vm2, %v1684_v11, 0.0  ;;  %v1514_v26 = vpop.f32.mrb[92].mxu0 }
 0x221   : > { %v1744_v40 = vadd.f32 %v1743_v10, %v1742_v15  ;;  %v1685_v31 = vsel %vm1621_vm4, %v1589_v43, %v1653_v38  ;;  %v1551_v62 = vadd.f32 %v1514_v26, %v1254_v12  ;;  %v1516_v57 = vpop.f32.mrb[93].mxu0 }
 0x222   : > { %v1745_v19 = vsel %vm621_vm2, %v1685_v31, 0.0  ;;  %v1517_v21 = vpop.f32.mrb[94].mxu0 }
 0x223   : > { %v1746_v56 = vadd.f32 %v1745_v19, %v1744_v40  ;;  %v1590_v9 = vadd.f32 %v3699_v6, %v1551_v62  ;;  %v1552_v61 = vadd.f32 %v1517_v21, %v1257_v7  ;;  %v1519_v2 = vpop.f32.mrb[95].mxu0 }
 0x225   : > { %vm1622_vm5 = vcmp.gt.f32.partialorder %v1590_v9, 0.0  ;;  %v1654_v29 = vmul.f32 0.1, %v1590_v9  ;;  %v1591_v33 = vadd.f32 %v3699_v6, %v1552_v61 }
 0x227   : > { %v1686_v51 = vsel %vm1622_vm5, %v1590_v9, %v1654_v29  ;;  %vm1623_vm6 = vcmp.gt.f32.partialorder %v1591_v33, 0.0  ;;  %v1655_v48 = vmul.f32 0.1, %v1591_v33 }
 0x228   : > { %v1747_v1 = vsel %vm621_vm2, %v1686_v51, 0.0 }
 0x229   : > { %v1748_v3 = vadd.f32 %v1747_v1, %v1746_v56  ;;  %v1687_v23 = vsel %vm1623_vm6, %v1591_v33, %v1655_v48 }
 0x22a   : > { %v1749_v47 = vsel %vm621_vm2, %v1687_v23, 0.0 }
 0x22b   : > { %v1750_v59 = vadd.f32 %v1749_v47, %v1748_v3 }
 0x22d   : > { %v1751_v15 = vrot.slane %v1750_v59, 4 }
 0x22f   : > { %v1752_v55 = vadd.f32 %v1751_v15, %v1750_v59 }
 0x231   : > { %v1753_v18 = vrot.slane %v1752_v55, 2 }
 0x233   : > { %v1754_v39 = vadd.f32 %v1753_v18, %v1752_v55 }
 0x235   : > { %v1755_v17 = vrot.slane %v1754_v39, 1 }
 0x237   : > { %v1756_v50 = vadd.f32 %v1755_v17, %v1754_v39 }
 0x239   : > { %v3872_v43 = vmul.f32 0.00390625, %v1756_v50 }
 0x23b   : > { %v3876_v6 = vsub.f32 %v3820_v28, %v3872_v43  ;;  %v3880_v12 = vsub.f32 %v3825_v27, %v3872_v43  ;;  %v3884_v36 = vsub.f32 %v3832_v49, %v3872_v43  ;;  %v3888_v41 = vsub.f32 %v3837_v37, %v3872_v43 }
 0x23c   : > { %v3892_v38 = vsub.f32 %v3844_v0, %v3872_v43  ;;  %v3896_v28 = vsub.f32 %v3849_v20, %v3872_v43  ;;  %v3900_v27 = vsub.f32 %v3856_v30, %v3872_v43  ;;  %v3903_v7 = vsub.f32 %v1683_v60, %v3872_v43 }
 0x23d   : > { %v3906_v49 = vsub.f32 %v1684_v11, %v3872_v43  ;;  %v3909_v37 = vsub.f32 %v1685_v31, %v3872_v43  ;;  %v3912_v0 = vsub.f32 %v1686_v51, %v3872_v43  ;;  %v3915_v58 = vsub.f32 %v1687_v23, %v3872_v43 }
 0x23e   : > { %v3919_v20 = vsub.f32 %v3710_v8, %v3872_v43  ;;  %v3923_v30 = vsub.f32 %v3707_v5, %v3872_v43  ;;  %v3927_v60 = vsub.f32 %v3712_v24, %v3872_v43  ;;  %v3931_v11 = vsub.f32 %v3723_v35, %v3872_v43 }
 0x23f   : > { %v3939_v8 = vsub.f32 %v3726_v16, %v3872_v43  ;;  %v3945_v24 = vsub.f32 %v3734_v52, %v3872_v43  ;;  %v3953_v57 = vsub.f32 %v3738_v44, %v3872_v43  ;;  %v3960_v52 = vsub.f32 %v3745_v34, %v3872_v43 }
 0x240   : > { %v1791_v10 = vmul.f32 %v3919_v20, %v3919_v20  ;;  %v1792_v26 = vmul.f32 %v3923_v30, %v3923_v30  ;;  %v1793_v5 = vmul.f32 %v3927_v60, %v3927_v60  ;;  %v1794_v35 = vmul.f32 %v3931_v11, %v3931_v11 }
 0x241   : > { %v1795_v16 = vmul.f32 %v3939_v8, %v3939_v8  ;;  %v1796_v56 = vmul.f32 %v3945_v24, %v3945_v24  ;;  %v3967_v44 = vsub.f32 %v3749_v4, %v3872_v43  ;;  %v1797_v2 = vmul.f32 %v3953_v57, %v3953_v57 }
 0x242   : > { %v1823_v40 = vsel %vm621_vm2, %v1791_v10, 0.0  ;;  %v1824_v31 = vsel %vm621_vm2, %v1792_v26, 0.0  ;;  %v1826_v19 = vsel %vm621_vm2, %v1793_v5, 0.0  ;;  %v1828_v9 = vsel %vm621_vm2, %v1794_v35, 0.0 }
 0x243   : > { %v1825_v62 = vadd.f32 %v1824_v31, %v1823_v40  ;;  %v1830_v29 = vsel %vm621_vm2, %v1795_v16, 0.0  ;;  %v3974_v34 = vsub.f32 %v3757_v54, %v3872_v43  ;;  %v1798_v51 = vmul.f32 %v3960_v52, %v3960_v52 }
 0x244   : > { %v1832_v48 = vsel %vm621_vm2, %v1796_v56, 0.0  ;;  %v3981_v4 = vsub.f32 %v3760_v25, %v3872_v43  ;;  %v1799_v3 = vmul.f32 %v3967_v44, %v3967_v44  ;;  %v1834_v23 = vsel %vm621_vm2, %v1797_v2, 0.0 }
 0x245   : > { %v1827_v21 = vadd.f32 %v1826_v19, %v1825_v62  ;;  %v3988_v54 = vsub.f32 %v3769_v13, %v3872_v43  ;;  %v1800_v59 = vmul.f32 %v3974_v34, %v3974_v34  ;;  %v1836_v15 = vsel %vm621_vm2, %v1798_v51, 0.0 }
 0x246   : > { %v3995_v25 = vsub.f32 %v3771_v63, %v3872_v43  ;;  %v1801_v18 = vmul.f32 %v3981_v4, %v3981_v4  ;;  %v1838_v39 = vsel %vm621_vm2, %v1799_v3, 0.0  ;;  %v4002_v13 = vsub.f32 %v3780_v46, %v3872_v43 }
 0x247   : > { %v1829_v61 = vadd.f32 %v1828_v9, %v1827_v21  ;;  %v1802_v50 = vmul.f32 %v3988_v54, %v3988_v54  ;;  %v1840_v10 = vsel %vm621_vm2, %v1800_v59, 0.0  ;;  %v4009_v63 = vsub.f32 %v3783_v42, %v3872_v43 }
 0x248   : > { %v1803_v5 = vmul.f32 %v3995_v25, %v3995_v25  ;;  %v1842_v35 = vsel %vm621_vm2, %v1801_v18, 0.0  ;;  %v4016_v46 = vsub.f32 %v3789_v45, %v3872_v43  ;;  %v1804_v31 = vmul.f32 %v4002_v13, %v4002_v13 }
 0x249   : > { %v1831_v33 = vadd.f32 %v1830_v29, %v1829_v61  ;;  %v1844_v62 = vsel %vm621_vm2, %v1802_v50, 0.0  ;;  %v4023_v42 = vsub.f32 %v3796_v22, %v3872_v43  ;;  %v1805_v19 = vmul.f32 %v4009_v63, %v4009_v63 }
 0x24a   : > { %v1846_v21 = vsel %vm621_vm2, %v1803_v5, 0.0  ;;  %v4030_v45 = vsub.f32 %v3801_v53, %v3872_v43  ;;  %v1806_v9 = vmul.f32 %v4016_v46, %v4016_v46  ;;  %v1848_v61 = vsel %vm621_vm2, %v1804_v31, 0.0 }
 0x24b   : > { %v1833_v1 = vadd.f32 %v1832_v48, %v1831_v33  ;;  %v4037_v22 = vsub.f32 %v3808_v14, %v3872_v43  ;;  %v1807_v29 = vmul.f32 %v4023_v42, %v4023_v42  ;;  %v1850_v33 = vsel %vm621_vm2, %v1805_v19, 0.0 }
 0x24c   : > { %v4044_v53 = vsub.f32 %v3813_v32, %v3872_v43  ;;  %v1808_v48 = vmul.f32 %v4030_v45, %v4030_v45  ;;  %v1811_v32 = vmul.f32 %v3876_v6, %v3876_v6 }
 0x24d   : > { %v1835_v47 = vadd.f32 %v1834_v23, %v1833_v1  ;;  %v1852_v1 = vsel %vm621_vm2, %v1806_v9, 0.0  ;;  %v1809_v14 = vmul.f32 %v4037_v22, %v4037_v22  ;;  %v1854_v23 = vsel %vm621_vm2, %v1807_v29, 0.0 }
 0x24e   : > { %v1810_v59 = vmul.f32 %v4044_v53, %v4044_v53 }
 0x24f   : > { %v1837_v55 = vadd.f32 %v1836_v15, %v1835_v47  ;;  %v1856_v15 = vsel %vm621_vm2, %v1808_v48, 0.0  ;;  %v1858_v43 = vsel %vm621_vm2, %v1809_v14, 0.0 }
 0x251   : > { %v1839_v17 = vadd.f32 %v1838_v39, %v1837_v55  ;;  %v1812_v39 = vmul.f32 %v3880_v12, %v3880_v12 }
 0x253   : > { %v1841_v26 = vadd.f32 %v1840_v10, %v1839_v17  ;;  %v1860_v17 = vsel %vm621_vm2, %v1810_v59, 0.0  ;;  %v1813_v10 = vmul.f32 %v3884_v36, %v3884_v36 }
 0x255   : > { %v1843_v40 = vadd.f32 %v1842_v35, %v1841_v26  ;;  %v1862_v26 = vsel %vm621_vm2, %v1811_v32, 0.0  ;;  %v1814_v35 = vmul.f32 %v3888_v41, %v3888_v41 }
 0x257   : > { %v1845_v16 = vadd.f32 %v1844_v62, %v1843_v40  ;;  %v1864_v40 = vsel %vm621_vm2, %v1812_v39, 0.0  ;;  %v1815_v62 = vmul.f32 %v3892_v38, %v3892_v38 }
 0x259   : > { %v1847_v56 = vadd.f32 %v1846_v21, %v1845_v16  ;;  %v1866_v16 = vsel %vm621_vm2, %v1813_v10, 0.0  ;;  %v1816_v21 = vmul.f32 %v3896_v28, %v3896_v28 }
 0x25b   : > { %v1849_v2 = vadd.f32 %v1848_v61, %v1847_v56  ;;  %v1868_v56 = vsel %vm621_vm2, %v1814_v35, 0.0  ;;  %v1817_v61 = vmul.f32 %v3900_v27, %v3900_v27 }
 0x25d   : > { %v1851_v51 = vadd.f32 %v1850_v33, %v1849_v2  ;;  %v1870_v2 = vsel %vm621_vm2, %v1815_v62, 0.0  ;;  %v1818_v33 = vmul.f32 %v3903_v7, %v3903_v7 }
 0x25f   : > { %v1853_v3 = vadd.f32 %v1852_v1, %v1851_v51  ;;  %v1872_v51 = vsel %vm621_vm2, %v1816_v21, 0.0  ;;  %v1819_v1 = vmul.f32 %v3906_v49, %v3906_v49 }
 0x261   : > { %v1855_v47 = vadd.f32 %v1854_v23, %v1853_v3  ;;  %v1874_v3 = vsel %vm621_vm2, %v1817_v61, 0.0  ;;  %v1820_v23 = vmul.f32 %v3909_v37, %v3909_v37 }
 0x263   : > { %v1857_v55 = vadd.f32 %v1856_v15, %v1855_v47  ;;  %v1876_v47 = vsel %vm621_vm2, %v1818_v33, 0.0  ;;  %v1821_v15 = vmul.f32 %v3912_v0, %v3912_v0 }
 0x265   : > { %v1859_v18 = vadd.f32 %v1858_v43, %v1857_v55  ;;  %v1878_v55 = vsel %vm621_vm2, %v1819_v1, 0.0  ;;  %v1822_v43 = vmul.f32 %v3915_v58, %v3915_v58 }
 0x267   : > { %v1861_v50 = vadd.f32 %v1860_v17, %v1859_v18  ;;  %v1880_v18 = vsel %vm621_vm2, %v1820_v23, 0.0  ;;  %v1882_v17 = vsel %vm621_vm2, %v1821_v15, 0.0  ;;  %v1884_v10 = vsel %vm621_vm2, %v1822_v43, 0.0 }
 0x269   : > { %v1863_v5 = vadd.f32 %v1862_v26, %v1861_v50 }
 0x26b   : > { %v1865_v31 = vadd.f32 %v1864_v40, %v1863_v5 }
 0x26d   : > { %v1867_v19 = vadd.f32 %v1866_v16, %v1865_v31 }
 0x26f   : > { %v1869_v9 = vadd.f32 %v1868_v56, %v1867_v19 }
 0x271   : > { %v1871_v29 = vadd.f32 %v1870_v2, %v1869_v9 }
 0x273   : > { %v1873_v48 = vadd.f32 %v1872_v51, %v1871_v29 }
 0x275   : > { %v1875_v14 = vadd.f32 %v1874_v3, %v1873_v48 }
 0x277   : > { %v1877_v59 = vadd.f32 %v1876_v47, %v1875_v14 }
 0x279   : > { %v1879_v32 = vadd.f32 %v1878_v55, %v1877_v59 }
 0x27b   : > { %v1881_v39 = vadd.f32 %v1880_v18, %v1879_v32 }
 0x27d   : > { %v1883_v50 = vadd.f32 %v1882_v17, %v1881_v39 }
 0x27f   : > { %v1885_v26 = vadd.f32 %v1884_v10, %v1883_v50 }
 0x281   : > { %v1886_v5 = vrot.slane %v1885_v26, 4 }
 0x283   : > { %v1887_v35 = vadd.f32 %v1886_v5, %v1885_v26 }
 0x285   : > { %v1888_v40 = vrot.slane %v1887_v35, 2 }
 0x287   : > { %v1889_v31 = vadd.f32 %v1888_v40, %v1887_v35 }
 0x289   : > { %v1890_v62 = vrot.slane %v1889_v31, 1 }
 0x28b   : > { %v1891_v16 = vadd.f32 %v1890_v62, %v1889_v31 }
 0x28d   : > { %v1892_v19 = vmul.f32 0.00390625, %v1891_v16 }
 0x28f   : > { %v1893_v21 = vadd.f32 1e-05, %v1892_v19 }
 0x291   : > { %2601 = vrsqrt.f32 %v1893_v21 }
 0x29b   : > { %v2602_v56 = vpop.eup %2601 }
 0x29c   : > { %v1895_v9 = vmul.f32 %v2602_v56, %v3919_v20  ;;  %v1896_v61 = vmul.f32 %v2602_v56, %v3923_v30  ;;  %v1897_v2 = vmul.f32 %v2602_v56, %v3927_v60  ;;  %v1898_v29 = vmul.f32 %v2602_v56, %v3931_v11 }
 0x29d   : > { %v1899_v33 = vmul.f32 %v2602_v56, %v3939_v8  ;;  %v1900_v51 = vmul.f32 %v2602_v56, %v3945_v24  ;;  %v1901_v48 = vmul.f32 %v2602_v56, %v3953_v57  ;;  %v1902_v1 = vmul.f32 %v2602_v56, %v3960_v52 }
 0x29e   : > { %v1903_v3 = vmul.f32 %v2602_v56, %v3967_v44  ;;  %v1904_v14 = vmul.f32 %v2602_v56, %v3974_v34  ;;  %v1905_v20 = vmul.f32 %v2602_v56, %v3981_v4  ;;  %v1906_v30 = vmul.f32 %v2602_v56, %v3988_v54 }
 0x29f   : > { %v1907_v60 = vmul.f32 %v2602_v56, %v3995_v25  ;;  %v1908_v11 = vmul.f32 %v2602_v56, %v4002_v13  ;;  %v1909_v8 = vmul.f32 %v2602_v56, %v4009_v63  ;;  %v1910_v24 = vmul.f32 %v2602_v56, %v4016_v46 }
 0x2a0   : > { %v1911_v57 = vmul.f32 %v2602_v56, %v4023_v42  ;;  %v1912_v52 = vmul.f32 %v2602_v56, %v4030_v45  ;;  %v1913_v44 = vmul.f32 %v2602_v56, %v4037_v22  ;;  %v1914_v34 = vmul.f32 %v2602_v56, %v4044_v53 }
 0x2a1   : > { %v4115_v4 = vmul.f32 %v2602_v56, %v3876_v6  ;;  %v4118_v54 = vmul.f32 %v2602_v56, %v3880_v12  ;;  %v4121_v25 = vmul.f32 %v2602_v56, %v3884_v36  ;;  %v4124_v13 = vmul.f32 %v2602_v56, %v3888_v41 }
 0x2a2   : > { %v4127_v63 = vmul.f32 %v2602_v56, %v3892_v38  ;;  %v4130_v46 = vmul.f32 %v2602_v56, %v3896_v28  ;;  %v4133_v42 = vmul.f32 %v2602_v56, %v3900_v27  ;;  %v4136_v6 = vmul.f32 %v2602_v56, %v3903_v7 }
 0x2a3   : > { %v4144_v12 = vmul.f32 %v2602_v56, %v3906_v49  ;;  %v4147_v36 = vmul.f32 %v2602_v56, %v3909_v37  ;;  %v4150_v41 = vmul.f32 %v2602_v56, %v3912_v0  ;;  %v4153_v38 = vmul.f32 %v2602_v56, %v3915_v58 }
 0x2a4   : > { %v2319_v28 = vpack.c.bf16 %v1895_v9, %v1895_v9  ;;  %v2320_v27 = vpack.c.bf16 %v1896_v61, %v1896_v61  ;;  %v2321_v7 = vpack.c.bf16 %v1897_v2, %v1897_v2  ;;  %v2322_v45 = vpack.c.bf16 %v1898_v29, %v1898_v29 }
 0x2a5   : > { %v2323_v22 = vpack.c.bf16 %v1899_v33, %v1899_v33  ;;  %v2324_v49 = vpack.c.bf16 %v1900_v51, %v1900_v51  ;;  %v2325_v53 = vpack.c.bf16 %v1901_v48, %v1901_v48  ;;  %v2326_v37 = vpack.c.bf16 %v1902_v1, %v1902_v1 }
 0x2a6   : > { %v2327_v23 = vpack.c.bf16 %v1903_v3, %v1903_v3  ;;  %v2328_v0 = vpack.c.bf16 %v1904_v14, %v1904_v14  ;;  %v2329_v47 = vpack.c.bf16 %v1905_v20, %v1905_v20  ;;  %v2330_v59 = vpack.c.bf16 %v1906_v30, %v1906_v30  ;;  %2056 = vst.msk [vmem:[%s4141_s20] sm:$0xf] %vm2055_vm7, %v2319_v28 }
 0x2a7   : > { %2057 = vst.msk [vmem:[%s4141_s20 + $0x4] sm:$0xf] %vm2055_vm7, %v2320_v27  ;;  %2058 = vst.msk [vmem:[%s4141_s20 + $0x8] sm:$0xf] %vm2055_vm7, %v2321_v7  ;;  %v2331_v58 = vpack.c.bf16 %v1907_v60, %v1907_v60  ;;  %v2332_v15 = vpack.c.bf16 %v1908_v11, %v1908_v11  ;;  %v2333_v55 = vpack.c.bf16 %v1909_v8, %v1909_v8 }
 0x2a8   : > { %2059 = vst.msk [vmem:[%s4141_s20 + $0xc] sm:$0xf] %vm2055_vm7, %v2322_v45  ;;  %v2334_v32 = vpack.c.bf16 %v1910_v24, %v1910_v24  ;;  %2060 = vst.msk [vmem:[%s4141_s20 + $0x10] sm:$0xf] %vm2055_vm7, %v2323_v22  ;;  %v2335_v43 = vpack.c.bf16 %v1911_v57, %v1911_v57  ;;  %v2336_v18 = vpack.c.bf16 %v1912_v52, %v1912_v52 }
 0x2a9   : > { %2061 = vst.msk [vmem:[%s4141_s20 + $0x14] sm:$0xf] %vm2055_vm7, %v2324_v49  ;;  %2062 = vst.msk [vmem:[%s4141_s20 + $0x18] sm:$0xf] %vm2055_vm7, %v2325_v53  ;;  %v2337_v39 = vpack.c.bf16 %v1913_v44, %v1913_v44  ;;  %v2338_v17 = vpack.c.bf16 %v1914_v34, %v1914_v34  ;;  %v2339_v50 = vpack.c.bf16 %v4115_v4, %v4115_v4 }
 0x2aa   : > { %2063 = vst.msk [vmem:[%s4141_s20 + $0x1c] sm:$0xf] %vm2055_vm7, %v2326_v37  ;;  %2064 = vst.msk [vmem:[%s4141_s20 + $0x20] sm:$0xf] %vm2055_vm7, %v2327_v23  ;;  %v2340_v10 = vpack.c.bf16 %v4118_v54, %v4118_v54  ;;  %v2341_v26 = vpack.c.bf16 %v4121_v25, %v4121_v25  ;;  %v2342_v5 = vpack.c.bf16 %v4124_v13, %v4124_v13 }
 0x2ab   : > { %2065 = vst.msk [vmem:[%s4141_s20 + $0x24] sm:$0xf] %vm2055_vm7, %v2328_v0  ;;  %2066 = vst.msk [vmem:[%s4141_s20 + $0x28] sm:$0xf] %vm2055_vm7, %v2329_v47  ;;  %v2343_v35 = vpack.c.bf16 %v4127_v63, %v4127_v63  ;;  %v2344_v40 = vpack.c.bf16 %v4130_v46, %v4130_v46  ;;  %v2345_v31 = vpack.c.bf16 %v4133_v42, %v4133_v42 }
 0x2ac   : > { %2067 = vst.msk [vmem:[%s4141_s20 + $0x2c] sm:$0xf] %vm2055_vm7, %v2330_v59  ;;  %2068 = vst.msk [vmem:[%s4141_s20 + $0x30] sm:$0xf] %vm2055_vm7, %v2331_v58  ;;  %v2346_v62 = vpack.c.bf16 %v4136_v6, %v4136_v6  ;;  %v2347_v16 = vpack.c.bf16 %v4144_v12, %v4144_v12  ;;  %v2348_v19 = vpack.c.bf16 %v4147_v36, %v4147_v36 }
 0x2ad   : > { %2069 = vst.msk [vmem:[%s4141_s20 + $0x34] sm:$0xf] %vm2055_vm7, %v2332_v15  ;;  %2070 = vst.msk [vmem:[%s4141_s20 + $0x38] sm:$0xf] %vm2055_vm7, %v2333_v55  ;;  %v2349_v21 = vpack.c.bf16 %v4150_v41, %v4150_v41  ;;  %v2350_v56 = vpack.c.bf16 %v4153_v38, %v4153_v38 }
 0x2ae   : > { %2071 = vst.msk [vmem:[%s4141_s20 + $0x3c] sm:$0xf] %vm2055_vm7, %v2334_v32  ;;  %2072 = vst.msk [vmem:[%s4141_s20 + $0x40] sm:$0xf] %vm2055_vm7, %v2335_v43 }
 0x2af   : > { %2073 = vst.msk [vmem:[%s4141_s20 + $0x44] sm:$0xf] %vm2055_vm7, %v2336_v18  ;;  %2074 = vst.msk [vmem:[%s4141_s20 + $0x48] sm:$0xf] %vm2055_vm7, %v2337_v39 }
 0x2b0   : > { %2075 = vst.msk [vmem:[%s4141_s20 + $0x4c] sm:$0xf] %vm2055_vm7, %v2338_v17  ;;  %2076 = vst.msk [vmem:[%s4141_s20 + $0x50] sm:$0xf] %vm2055_vm7, %v2339_v50 }
 0x2b1   : > { %2077 = vst.msk [vmem:[%s4141_s20 + $0x54] sm:$0xf] %vm2055_vm7, %v2340_v10  ;;  %2078 = vst.msk [vmem:[%s4141_s20 + $0x58] sm:$0xf] %vm2055_vm7, %v2341_v26 }
 0x2b2   : > { %2079 = vst.msk [vmem:[%s4141_s20 + $0x5c] sm:$0xf] %vm2055_vm7, %v2342_v5  ;;  %2080 = vst.msk [vmem:[%s4141_s20 + $0x60] sm:$0xf] %vm2055_vm7, %v2343_v35 }
 0x2b3   : > { %2081 = vst.msk [vmem:[%s4141_s20 + $0x64] sm:$0xf] %vm2055_vm7, %v2344_v40  ;;  %2082 = vst.msk [vmem:[%s4141_s20 + $0x68] sm:$0xf] %vm2055_vm7, %v2345_v31 }
 0x2b4   : > { %2083 = vst.msk [vmem:[%s4141_s20 + $0x6c] sm:$0xf] %vm2055_vm7, %v2346_v62  ;;  %2084 = vst.msk [vmem:[%s4141_s20 + $0x70] sm:$0xf] %vm2055_vm7, %v2347_v16 }
 0x2b5   : > { %2085 = vst.msk [vmem:[%s4141_s20 + $0x74] sm:$0xf] %vm2055_vm7, %v2348_v19  ;;  %2086 = vst.msk [vmem:[%s4141_s20 + $0x78] sm:$0xf] %vm2055_vm7, %v2349_v21 }
 0x2b6   : > { %2087 = vst.msk [vmem:[%s4141_s20 + $0x7c] sm:$0xf] %vm2055_vm7, %v2350_v56 }
 0x2b7 PF: > { %s13_s12 = sadd.s32 1, %s2609_s12  }
 0x2b8   : > { %p10_p4 = scmp.ge.s32.totalorder %s13_s12, 4  }
 0x2ba   :  { %12 = sbr.rel (!%p10_p4) target bundleno = 1 (0x1), region = 64 }

// kernel: shallow_event_stereo_forward.17
= control target key start
LH: loop header
LB: loop body
LE: loop exit
PB: predicated region body
PF: predicated region fallthrough
CT: control target
= control target key end

     0   :  { %s4111_s26 = smov 0   ;;  %s4113_s27 = smov 0   ;;  %s6213_s0 = inlined_call_operand.vmem [shape: bf16[2,16,16,64], index: 0, kind: input, shape index: {}]   ;;  %s6214_s1 = inlined_call_operand.vmem [shape: bf16[2,16,16,64], index: 1, kind: input, shape index: {}]   ;;  %s6215_s2 = inlined_call_operand.vmem [shape: bf16[64,128], index: 2, kind: input, shape index: {}]   ;;  %s6216_s3 = inlined_call_operand.vmem [shape: bf16[64,128], index: 3, kind: input, shape index: {}]   ;;  %s6217_s4 = inlined_call_operand.vmem [shape: f32[1,128], index: 4, kind: input, shape index: {}]   ;;  %s6218_s5 = inlined_call_operand.vmem [shape: f32[1,128], index: 5, kind: input, shape index: {}]   ;;  %s6219_s6 = inlined_call_operand.<no memory space> [shape: f32[1,1], index: 6, kind: input, shape index: {}]   ;;  %s6220_s7 = inlined_call_operand.vmem [shape: f32[2,8,256], index: 7, kind: output, shape index: {}]  }
   0x1   :  { %12 = sst [smem:[#allocation2]] %s6219_s6  ;;  %s4115_s28 = smov 0  }
   0x2   :  { %s4117_s29 = smov 0   ;;  %s4119_s30 = smov 0  }
   0x3 LB: > { %s27_s6 = sadd.s32 1, %s4048_s28  ;;  %s30_s8 = sadd.s32 1, %s4052_s29  ;;  %s4056_s30 = sphi %s4119_s30, %s18_s30   ;;  %s4052_s29 = sphi %s4117_s29, %s6333_s29   ;;  %s4048_s28 = sphi %s4115_s28, %s6332_s28   ;;  %s4044_s27 = sphi %s4113_s27, %s6331_s27   ;;  %s4040_s26 = sphi %s4111_s26, %s6330_s26  }
   0x4   : > { %p28_p0 = scmp.ge.s32.totalorder %s27_s6, 2  ;;  %p3811_p1 = scmp.ge.s32.totalorder %s4056_s30, 1 }
   0x5   : > { %p278_p2 = scmp.lt.s32.totalorder %s4056_s30, 5 }
   0x6   : > { %s6335_s6 = smov (%p28_p0, %s27_s6), 0  ;;  %s6337_s8 = smov (!%p28_p0, %s30_s8), %s4052_s29 }
   0x7   : > { %p279_p3 = pnand %p3811_p1, %p278_p2  ;;  %p32_p4 = scmp.ge.s32.totalorder %s6337_s8, 2 }
   0x9   : > { %s6339_s8 = smov (%p32_p4, %s6337_s8), 0  ;;  %282 = sbr.rel (%p279_p3) target bundleno = 1077 (0x435), region = 48 }
  0x10   : > { %v3990_v0 = vld [vmem:[%s6215_s2] sm:$0xff]   ;;  %s3812_s11 = sshll.u32 %s4040_s26, 3  ;;  %p329_p5 = scmp.lt.s32.totalorder %s4044_s27, 1  ;;  %v3992_v2 = vld [vmem:[%s6215_s2 + $0x8] sm:$0xff]   ;;  %v3994_v4 = vld [vmem:[%s6215_s2 + $0x10] sm:$0xff]   ;;  %vm6221_vm0 = vcmask 523264   ;;  %v6226_v24 = vlaneseq }
  0x11   : > { %v3991_v1 = vld [vmem:[%s6216_s3] sm:$0xff]   ;;  %3890 = vmatprep.subr.bf16.mxu0 %v3990_v0  ;;  %p331_p6 = scmp.lt.s32.totalorder %s3812_s11, 15  ;;  %v3993_v3 = vld [vmem:[%s6216_s3 + $0x8] sm:$0xff]   ;;  %v3995_v5 = vld [vmem:[%s6216_s3 + $0x10] sm:$0xff]   ;;  %s780_s15 = sld [smem:[#allocation2]] }
  0x12   : > { %3914 = vmatprep.subr.bf16.mxu1 %v3991_v1  ;;  %3891 = vmatpush3.bf16.msra.mxu0 %v3990_v0  ;;  %s6341_s27 = smov (!%p329_p5, %s4044_s27), 1  ;;  %v3996_v6 = vld [vmem:[%s6215_s2 + $0x18] sm:$0xff]   ;;  %v4214_v25 = vshrl.u32 %v6226_v24, 7  ;;  %v4221_v27 = vld [vmem:[%s6217_s4] ss:$0 sm:$0xff]  ;;  %s4063_s17 = smov 64  }
  0x13   : > { %3915 = vmatpush3.bf16.msra.mxu1 %v3991_v1  ;;  %3892 = vmatprep.subr.bf16.mxu0 %v3992_v2  ;;  %s6343_s11 = smov (!%p331_p6, %s3812_s11), 15  ;;  %s3814_s22 = sshll.u32 %s6341_s27, 5  ;;  %v3997_v7 = vld [vmem:[%s6216_s3 + $0x18] sm:$0xff]   ;;  %v4266_v51 = vld [vmem:[%s6218_s5] ss:$0 sm:$0xff] }
  0x14   : > { %3916 = vmatprep.subr.bf16.mxu1 %v3993_v3  ;;  %s3813_s23 = sshll.u32 %s6343_s11, 1  ;;  %vm962_vm1 = vcmp.lt.s32.totalorder %v4214_v25, 1  ;;  %vm979_vm2 = vcmp.ge.s32.totalorder %v4214_v25, 1  ;;  %vm1145_vm3 = vcmp.lt.s32.totalorder %v4214_v25, 2  ;;  %vm1328_vm4 = vcmp.lt.s32.totalorder %v4214_v25, 3  ;;  %s4062_s11 = smov 16  }
  0x15   : > { %s335_s24 = sadd.s32 %s3814_s22, %s3813_s23  ;;  %vm1511_vm5 = vcmp.lt.s32.totalorder %v4214_v25, 4  ;;  %vm1162_vm6 = vcmp.ge.s32.totalorder %v4214_v25, 2  ;;  %vm6222_vm9 = vcmp.ge.s32.totalorder %v4214_v25, 3  ;;  %vm6224_vm13 = vcmp.ge.s32.totalorder %v4214_v25, 4  ;;  %s4065_s19 = smov 96  }
  0x16   : > { %3893 = vmatpush3.bf16.msra.mxu0 %v3992_v2  ;;  %s3815_s10 = sshll.u32 %s335_s24, 2  ;;  %vm6225_vm14 = vcmp.lt.s32.totalorder %v4214_v25, 5  ;;  %s4066_s20 = smov 80  }
  0x17   : > { %3917 = vmatpush3.bf16.msra.mxu1 %v3993_v3  ;;  %3894 = vmatprep.subr.bf16.mxu0 %v3994_v4  ;;  %s4174_s16 = scalar_lea.vmem %s6213_s0, %s3815_s10  ;;  %s4179_s18 = scalar_lea.vmem %s6214_s1, %s3815_s10 }
  0x18   : > { %3918 = vmatprep.subr.bf16.mxu1 %v3995_v5  ;;  %v3998_v8 = vld [vmem:[%s4174_s16] sm:$0xff]   ;;  %v4000_v10 = vld [vmem:[%s4174_s16 + $0x8] sm:$0xff]   ;;  %v4002_v12 = vld [vmem:[%s4179_s18 + $0x10] sm:$0xff]   ;;  %s4067_s21 = smov 112   ;;  %p352_p7 = scmp.lt.s32.totalorder %s4040_s26, 1 }
  0x19   : > { %v3999_v9 = vld [vmem:[%s4179_s18] sm:$0xff]   ;;  %3898 = vmatprep.mubr.msk.bf16.mxu0 %vm6221_vm0, %v3998_v8  ;;  %v4001_v11 = vld [vmem:[%s4179_s18 + $0x8] sm:$0xff]   ;;  %v4004_v13 = vld [vmem:[%s4174_s16 + $0x10] sm:$0xff]   ;;  %s3820_s22 = sshll.u32 %s6341_s27, 1 }
  0x1a   : > { %3895 = vmatpush3.bf16.msra.mxu0 %v3994_v4  ;;  %3922 = vmatprep.mubr.msk.bf16.mxu1 %vm6221_vm0, %v3999_v9  ;;  %v4003_v14 = vld [vmem:[%s4179_s18 + $0x18] sm:$0xff]   ;;  %v4008_v16 = vld [vmem:[%s4174_s16 + $0x20] sm:$0xff]   ;;  %v4009_v18 = vld [vmem:[%s4174_s16 + $0x28] sm:$0xff]   ;;  %s6345_s26 = smov (!%p352_p7, %s4040_s26), 1 }
  0x1b   : > { %3919 = vmatpush3.bf16.msra.mxu1 %v3995_v5  ;;  %3896 = vmatprep.subr.bf16.mxu0 %v3996_v6  ;;  %v4005_v15 = vld [vmem:[%s4174_s16 + $0x18] sm:$0xff]   ;;  %v4006_v17 = vld [vmem:[%s4179_s18 + $0x20] sm:$0xff]   ;;  %v4007_v19 = vld [vmem:[%s4179_s18 + $0x28] sm:$0xff]   ;;  %s355_s23 = sadd.s32 %s3820_s22, %s6345_s26 }
  0x1c   : > { %3920 = vmatprep.subr.bf16.mxu1 %v3997_v7  ;;  %v4012_v20 = vld [vmem:[%s4174_s16 + $0x30] sm:$0xff]   ;;  %v4013_v22 = vld [vmem:[%s4174_s16 + $0x38] sm:$0xff]   ;;  %s4061_s16 = smov 32   ;;  %s3821_s24 = sshll.u32 %s355_s23, 3 }
  0x1d   : > { %v4010_v21 = vld [vmem:[%s4179_s18 + $0x30] sm:$0xff]   ;;  %v4011_v23 = vld [vmem:[%s4179_s18 + $0x38] sm:$0xff]   ;;  %s4064_s18 = smov 48   ;;  %s357_s10 = scalar_lea.vmem %s6220_s7, %s3821_s24 }
  0x1e   : > { %3897 = vmatpush3.bf16.msra.mxu0 %v3996_v6 }
  0x1f   : > { %3921 = vmatpush3.bf16.msra.mxu1 %v3997_v7 }
  0x21   : > { %3899 = vmatmul.mubr.msk.bf16.vlgmr.msra.gmra.mrb[0].mxu0 %vm6221_vm0, %v4000_v10 }
  0x22   : > { %3923 = vmatmul.mubr.msk.bf16.vlgmr.msra.gmra.mrb[0].mxu1 %vm6221_vm0, %v4001_v11  ;;  %3902 = vmatprep.mubr.msk.bf16.mxu0 %vm6221_vm0, %v4004_v13 }
  0x23   : > { %3926 = vmatprep.mubr.msk.bf16.mxu1 %vm6221_vm0, %v4002_v12 }
  0x29   : > { %3903 = vmatmul.mubr.msk.bf16.gmra.mrb[4].mxu0 %vm6221_vm0, %v4005_v15 }
  0x2a   : > { %3927 = vmatmul.mubr.msk.bf16.gmra.mrb[4].mxu1 %vm6221_vm0, %v4003_v14  ;;  %3906 = vmatprep.mubr.msk.bf16.mxu0 %vm6221_vm0, %v4008_v16 }
  0x2b   : > { %3930 = vmatprep.mubr.msk.bf16.mxu1 %vm6221_vm0, %v4006_v17 }
  0x31   : > { %3907 = vmatmul.mubr.msk.bf16.gmra.mrb[8].mxu0 %vm6221_vm0, %v4009_v18 }
  0x32   : > { %3931 = vmatmul.mubr.msk.bf16.gmra.mrb[8].mxu1 %vm6221_vm0, %v4007_v19  ;;  %3910 = vmatprep.mubr.msk.bf16.mxu0 %vm6221_vm0, %v4012_v20 }
  0x33   : > { %3934 = vmatprep.mubr.msk.bf16.mxu1 %vm6221_vm0, %v4010_v21 }
  0x39   : > { %3911 = vmatmul.mubr.msk.bf16.gmra.mrb[12].mxu0 %vm6221_vm0, %v4013_v22 }
  0x3a   : > { %3935 = vmatmul.mubr.msk.bf16.gmra.mrb[12].mxu1 %vm6221_vm0, %v4011_v23 }
  0xf4   : > { %v4216_v26 = vpop.f32.mrb[0].mxu0 }
  0xf5   : > { %v4223_v28 = vpop.f32.mrb[0].mxu1  ;;  %v4225_v29 = vpop.f32.mrb[1].mxu0 }
  0xf6   : > { %v4230_v30 = vpop.f32.mrb[1].mxu1  ;;  %v4232_v31 = vpop.f32.mrb[2].mxu0  ;;  %v788_v32 = vadd.f32 %v4223_v28, %v4216_v26  ;;  %v947_v33 = vrot.slane %v4223_v28, 7  ;;  %v1130_v34 = vrot.slane %v4223_v28, 6  ;;  %v1313_v35 = vrot.slane %v4223_v28, 5 }
  0xf7   : > { %v4240_v36 = vpop.f32.mrb[2].mxu1  ;;  %v4242_v37 = vpop.f32.mrb[3].mxu0  ;;  %v786_v38 = vadd.f32 %v4230_v30, %v4225_v29  ;;  %v1496_v39 = vrot.slane %v4223_v28, 4  ;;  %v1679_v40 = vrot.slane %v4223_v28, 3  ;;  %v1862_v41 = vrot.slane %v4223_v28, 2 }
  0xf8   : > { %v4250_v42 = vpop.f32.mrb[3].mxu1  ;;  %v830_v43 = vadd.f32 %v4221_v27, %v788_v32  ;;  %v789_v44 = vadd.f32 %v4240_v36, %v4232_v31  ;;  %v955_v45 = vrot.slane %v4240_v36, 7  ;;  %v1138_v46 = vrot.slane %v4240_v36, 6 }
  0xf9   : > { %v828_v47 = vadd.f32 %v4221_v27, %v786_v38  ;;  %v787_v48 = vadd.f32 %v4250_v42, %v4242_v37  ;;  %v1321_v49 = vrot.slane %v4240_v36, 5  ;;  %v1504_v50 = vrot.slane %v4240_v36, 4 }
  0xfa   : > { %vm846_vm7 = vcmp.gt.f32.partialorder %v830_v43, 0.0  ;;  %v862_v52 = vmul.f32 0.1, %v830_v43  ;;  %v831_v53 = vadd.f32 %v4221_v27, %v789_v44  ;;  %v964_v54 = vsel %vm962_vm1, %v947_v33, %v955_v45 }
  0xfb   : > { %vm844_vm8 = vcmp.gt.f32.partialorder %v828_v47, 0.0  ;;  %v860_v55 = vmul.f32 0.1, %v828_v47  ;;  %v829_v56 = vadd.f32 %v4221_v27, %v787_v48  ;;  %v984_v57 = vadd.f32 %v4232_v31, %v964_v54 }
  0xfc   : > { %v878_v58 = vsel %vm846_vm7, %v830_v43, %v862_v52  ;;  %vm847_vm10 = vcmp.gt.f32.partialorder %v831_v53, 0.0  ;;  %v863_v59 = vmul.f32 0.1, %v831_v53  ;;  %v972_v60 = vsel %vm962_vm1, %v955_v45, %v947_v33  ;;  %v4276_v61 = vpop.f32.mrb[4].mxu0 }
  0xfd   : > { %v900_v62 = vmul.f32 %v4266_v51, %v878_v58  ;;  %v876_v63 = vsel %vm844_vm8, %v828_v47, %v860_v55  ;;  %vm845_vm11 = vcmp.gt.f32.partialorder %v829_v56, 0.0  ;;  %v861_v0 = vmul.f32 0.1, %v829_v56  ;;  %v4279_v1 = vpop.f32.mrb[4].mxu1  ;;  %v4281_v2 = vpop.f32.mrb[5].mxu0 }
  0xfe   : > { %v898_v3 = vmul.f32 %v4266_v51, %v876_v63  ;;  %v879_v4 = vsel %vm847_vm10, %v831_v53, %v863_v59  ;;  %v1020_v5 = vadd.f32 %v4221_v27, %v984_v57  ;;  %v983_v6 = vadd.f32 %v4216_v26, %v972_v60  ;;  %v4286_v7 = vpop.f32.mrb[5].mxu1  ;;  %v4288_v8 = vpop.f32.mrb[6].mxu0 }
  0xff   : > { %918 = vadd.xlane.f32.xlu1 %v900_v62  ;;  %v901_v9 = vmul.f32 %v4266_v51, %v879_v4  ;;  %v877_v10 = vsel %vm845_vm11, %v829_v56, %v861_v0  ;;  %v1147_v11 = vsel %vm1145_vm3, %v1130_v34, %v1138_v46  ;;  %v1155_v12 = vsel %vm1145_vm3, %v1138_v46, %v1130_v34  ;;  %v4295_v13 = vpop.f32.mrb[6].mxu1  ;;  %v4297_v14 = vpop.f32.mrb[7].mxu0 }
 0x100   : > { %914 = vadd.xlane.f32.xlu0 %v898_v3  ;;  %v899_v15 = vmul.f32 %v4266_v51, %v877_v10  ;;  %vm1036_vm12 = vcmp.gt.f32.partialorder %v1020_v5, 0.0  ;;  %v1052_v16 = vmul.f32 0.1, %v1020_v5  ;;  %v1003_v17 = vsel %vm979_vm2, %v983_v6, 0.0  ;;  %v4302_v18 = vpop.f32.mrb[7].mxu1 }
 0x101   : > { %v1019_v19 = vadd.f32 %v4221_v27, %v1003_v17  ;;  %v1167_v20 = vadd.f32 %v4232_v31, %v1147_v11  ;;  %v1166_v21 = vadd.f32 %v4216_v26, %v1155_v12  ;;  %v1330_v22 = vsel %vm1328_vm4, %v1313_v35, %v1321_v49 }
 0x102   : > { %v1068_v23 = vsel %vm1036_vm12, %v1020_v5, %v1052_v16  ;;  %v1350_v32 = vadd.f32 %v4232_v31, %v1330_v22  ;;  %v1338_v33 = vsel %vm1328_vm4, %v1321_v49, %v1313_v35  ;;  %v1513_v34 = vsel %vm1511_vm5, %v1496_v39, %v1504_v50 }
 0x103   : > { %920 = vadd.xlane.f32.xlu1 %v901_v9  ;;  %v1084_v38 = vmul.f32 %v4266_v51, %v1068_v23  ;;  %vm1035_vm15 = vcmp.gt.f32.partialorder %v1019_v19, 0.0  ;;  %v1051_v43 = vmul.f32 0.1, %v1019_v19  ;;  %v1203_v44 = vadd.f32 %v4221_v27, %v1167_v20 }
 0x104   : > { %vm6223_vm7 = vcmp.lt.s32.totalorder %v4214_v25, 6  ;;  %916 = vadd.xlane.f32.xlu0 %v899_v15  ;;  %v1186_v35 = vsel %vm1162_vm6, %v1166_v21, 0.0  ;;  %v1386_v45 = vadd.f32 %v4221_v27, %v1350_v32  ;;  %v1349_v46 = vadd.f32 %v4216_v26, %v1338_v33  ;;  %v4332_v48 = vpop.f32.mrb[8].mxu0 }
 0x105   : > { %v1533_v47 = vadd.f32 %v4232_v31, %v1513_v34  ;;  %v1067_v49 = vsel %vm1035_vm15, %v1019_v19, %v1051_v43  ;;  %vm1219_vm8 = vcmp.gt.f32.partialorder %v1203_v44, 0.0  ;;  %v1235_v52 = vmul.f32 0.1, %v1203_v44  ;;  %v4337_v54 = vpop.f32.mrb[8].mxu1  ;;  %v4339_v55 = vpop.f32.mrb[9].mxu0 }
 0x106   : > { %v1202_v53 = vadd.f32 %v4221_v27, %v1186_v35  ;;  %vm1711_vm10 = vcmp.ge.s32.totalorder %v4214_v25, 5  ;;  %vm2060_vm11 = vcmp.lt.s32.totalorder %v4214_v25, 7  ;;  %v1083_v56 = vmul.f32 %v4266_v51, %v1067_v49  ;;  %v4345_v59 = vpop.f32.mrb[9].mxu1  ;;  %v4347_v60 = vpop.f32.mrb[10].mxu0 }
 0x107   : > { %vm1402_vm12 = vcmp.gt.f32.partialorder %v1386_v45, 0.0  ;;  %v1418_v57 = vmul.f32 0.1, %v1386_v45  ;;  %v1369_v58 = vsel %vm6222_vm9, %v1349_v46, 0.0  ;;  %vm1894_vm15 = vcmp.ge.s32.totalorder %v4214_v25, 6  ;;  %1103 = vadd.xlane.f32.xlu1 %v1084_v38  ;;  %v4350_v3 = vpop.f32.mrb[10].mxu1 }
 0x108   : > { %v1251_v62 = vsel %vm1219_vm8, %v1203_v44, %v1235_v52  ;;  %vm1218_vm0 = vcmp.gt.f32.partialorder %v1202_v53, 0.0  ;;  %v1234_v63 = vmul.f32 0.1, %v1202_v53  ;;  %v1385_v0 = vadd.f32 %v4221_v27, %v1369_v58  ;;  %v4352_v4 = vpop.f32.mrb[11].mxu0  ;;  %1101 = vadd.xlane.f32.xlu0 %v1083_v56  ;;  %v4362_v11 = vpop.f32.mrb[11].mxu1 }
 0x109   : > { %v1267_v5 = vmul.f32 %v4266_v51, %v1251_v62  ;;  %v1434_v6 = vsel %vm1402_vm12, %v1386_v45, %v1418_v57  ;;  %v1569_v9 = vadd.f32 %v4221_v27, %v1533_v47  ;;  %v1521_v10 = vsel %vm1511_vm5, %v1504_v50, %v1496_v39 }
 0x10a   : > { %v1250_v12 = vsel %vm1218_vm0, %v1202_v53, %v1234_v63  ;;  %v1450_v15 = vmul.f32 %v4266_v51, %v1434_v6  ;;  %vm1401_vm8 = vcmp.gt.f32.partialorder %v1385_v0, 0.0  ;;  %v1417_v16 = vmul.f32 0.1, %v1385_v0 }
 0x10b   : > { %v1266_v17 = vmul.f32 %v4266_v51, %v1250_v12  ;;  %vm1585_vm9 = vcmp.gt.f32.partialorder %v1569_v9, 0.0  ;;  %v1601_v19 = vmul.f32 0.1, %v1569_v9  ;;  %v1532_v20 = vadd.f32 %v4216_v26, %v1521_v10  ;;  %1286 = vadd.xlane.f32.xlu1 %v1267_v5 }
 0x10c   : > { %v1433_v21 = vsel %vm1401_vm8, %v1385_v0, %v1417_v16  ;;  %v1687_v22 = vrot.slane %v4240_v36, 3  ;;  %v1870_v23 = vrot.slane %v4240_v36, 2  ;;  %v2045_v39 = vrot.slane %v4223_v28, 1 }
 0x10d   : > { %1284 = vadd.xlane.f32.xlu0 %v1266_v17  ;;  %v1449_v50 = vmul.f32 %v4266_v51, %v1433_v21  ;;  %v1617_v32 = vsel %vm1585_vm9, %v1569_v9, %v1601_v19  ;;  %v1552_v33 = vsel %vm6224_vm13, %v1532_v20, 0.0  ;;  %v2053_v34 = vrot.slane %v4240_v36, 1 }
 0x10e   : > { %vm2077_vm0 = vcmp.ge.s32.totalorder %v4214_v25, 7  ;;  %v1633_v38 = vmul.f32 %v4266_v51, %v1617_v32  ;;  %v1568_v43 = vadd.f32 %v4221_v27, %v1552_v33  ;;  %v1696_v44 = vsel %vm6225_vm14, %v1679_v40, %v1687_v22 }
 0x10f   : > { %v1704_v35 = vsel %vm6225_vm14, %v1687_v22, %v1679_v40  ;;  %v1716_v45 = vadd.f32 %v4232_v31, %v1696_v44  ;;  %v1879_v46 = vsel %vm6223_vm7, %v1862_v41, %v1870_v23  ;;  %v1887_v47 = vsel %vm6223_vm7, %v1870_v23, %v1862_v41  ;;  %1469 = vadd.xlane.f32.xlu1 %v1450_v15 }
 0x110   : > { %v1715_v36 = vadd.f32 %v4216_v26, %v1704_v35  ;;  %vm1584_vm9 = vcmp.gt.f32.partialorder %v1568_v43, 0.0  ;;  %v1600_v49 = vmul.f32 0.1, %v1568_v43  ;;  %v1899_v52 = vadd.f32 %v4232_v31, %v1879_v46 }
 0x111   : > { %v1898_v40 = vadd.f32 %v4216_v26, %v1887_v47  ;;  %1467 = vadd.xlane.f32.xlu0 %v1449_v50  ;;  %v1752_v53 = vadd.f32 %v4221_v27, %v1716_v45  ;;  %v2062_v57 = vsel %vm2060_vm11, %v2045_v39, %v2053_v34  ;;  %v2070_v28 = vsel %vm2060_vm11, %v2053_v34, %v2045_v39 }
 0x112   : > { %v1735_v56 = vsel %vm1711_vm10, %v1715_v36, 0.0  ;;  %v1616_v41 = vsel %vm1584_vm9, %v1568_v43, %v1600_v49  ;;  %v1935_v62 = vadd.f32 %v4221_v27, %v1899_v52  ;;  %v2082_v16 = vadd.f32 %v4232_v31, %v2062_v57 }
 0x113   : > { %v1751_v58 = vadd.f32 %v4221_v27, %v1735_v56  ;;  %v1918_v63 = vsel %vm1894_vm15, %v1898_v40, 0.0  ;;  %v1632_v0 = vmul.f32 %v4266_v51, %v1616_v41  ;;  %vm1768_vm12 = vcmp.gt.f32.partialorder %v1752_v53, 0.0  ;;  %1652 = vadd.xlane.f32.xlu1 %v1633_v38 }
 0x114   : > { %v1784_v5 = vmul.f32 0.1, %v1752_v53  ;;  %v1934_v6 = vadd.f32 %v4221_v27, %v1918_v63  ;;  %vm1951_vm7 = vcmp.gt.f32.partialorder %v1935_v62, 0.0  ;;  %v1967_v10 = vmul.f32 0.1, %v1935_v62 }
 0x115   : > { %vm1767_vm8 = vcmp.gt.f32.partialorder %v1751_v58, 0.0  ;;  %v1783_v9 = vmul.f32 0.1, %v1751_v58  ;;  %1650 = vadd.xlane.f32.xlu0 %v1632_v0  ;;  %v2081_v21 = vadd.f32 %v4216_v26, %v2070_v28  ;;  %v2118_v50 = vadd.f32 %v4221_v27, %v2082_v16 }
 0x116   : > { %v1800_v12 = vsel %vm1768_vm12, %v1752_v53, %v1784_v5  ;;  %vm1950_vm9 = vcmp.gt.f32.partialorder %v1934_v6, 0.0  ;;  %v1966_v15 = vmul.f32 0.1, %v1934_v6  ;;  %v1983_v20 = vsel %vm1951_vm7, %v1935_v62, %v1967_v10 }
 0x117   : > { %v1816_v17 = vmul.f32 %v4266_v51, %v1800_v12  ;;  %v1799_v19 = vsel %vm1767_vm8, %v1751_v58, %v1783_v9  ;;  %v1999_v23 = vmul.f32 %v4266_v51, %v1983_v20  ;;  %v2101_v33 = vsel %vm2077_vm0, %v2081_v21, 0.0 }
 0x118   : > { %v1815_v22 = vmul.f32 %v4266_v51, %v1799_v19  ;;  %v1982_v39 = vsel %vm1950_vm9, %v1934_v6, %v1966_v15  ;;  %v946_v31 = vrot.slane %v4230_v30, 7  ;;  %v954_v34 = vrot.slane %v4250_v42, 7 }
 0x119   : > { %1835 = vadd.xlane.f32.xlu1 %v1816_v17  ;;  %v1998_v32 = vmul.f32 %v4266_v51, %v1982_v39  ;;  %vm2134_vm7 = vcmp.gt.f32.partialorder %v2118_v50, 0.0  ;;  %v2150_v26 = vmul.f32 0.1, %v2118_v50  ;;  %v2117_v38 = vadd.f32 %v4221_v27, %v2101_v33 }
 0x11a   : > { %1833 = vadd.xlane.f32.xlu0 %v1815_v22  ;;  %v1129_v43 = vrot.slane %v4230_v30, 6  ;;  %v963_v44 = vsel %vm962_vm1, %v946_v31, %v954_v34  ;;  %v971_v35 = vsel %vm962_vm1, %v954_v34, %v946_v31  ;;  %v1137_v45 = vrot.slane %v4250_v42, 6 }
 0x11b   : > { %v1312_v36 = vrot.slane %v4230_v30, 5  ;;  %v2166_v46 = vsel %vm2134_vm7, %v2118_v50, %v2150_v26  ;;  %vm2133_vm12 = vcmp.gt.f32.partialorder %v2117_v38, 0.0  ;;  %v2149_v47 = vmul.f32 0.1, %v2117_v38 }
 0x11c   : > { %v982_v49 = vadd.f32 %v963_v44, %v4242_v37  ;;  %v2182_v52 = vmul.f32 %v4266_v51, %v2166_v46  ;;  %v981_v40 = vadd.f32 %v971_v35, %v4225_v29  ;;  %v1146_v53 = vsel %vm1145_vm3, %v1129_v43, %v1137_v45 }
 0x11d   : > { %2018 = vadd.xlane.f32.xlu1 %v1999_v23  ;;  %v1154_v56 = vsel %vm1145_vm3, %v1137_v45, %v1129_v43  ;;  %v2165_v57 = vsel %vm2133_vm12, %v2117_v38, %v2149_v47  ;;  %v1165_v41 = vadd.f32 %v1146_v53, %v4242_v37  ;;  %v1320_v0 = vrot.slane %v4250_v42, 5 }
 0x11e   : > { %2016 = vadd.xlane.f32.xlu0 %v1998_v32  ;;  %v1018_v28 = vadd.f32 %v4221_v27, %v982_v49  ;;  %v1164_v58 = vadd.f32 %v1154_v56, %v4225_v29  ;;  %v2181_v62 = vmul.f32 %v4266_v51, %v2165_v57  ;;  %v1001_v63 = vsel %vm979_vm2, %v981_v40, 0.0 }
 0x11f   : > { %v1495_v5 = vrot.slane %v4230_v30, 4  ;;  %v1017_v9 = vadd.f32 %v4221_v27, %v1001_v63  ;;  %v1201_v10 = vadd.f32 %v4221_v27, %v1165_v41  ;;  %v1329_v15 = vsel %vm1328_vm4, %v1312_v36, %v1320_v0 }
 0x120   : > { %vm1034_vm8 = vcmp.gt.f32.partialorder %v1018_v28, 0.0  ;;  %v1050_v6 = vmul.f32 0.1, %v1018_v28  ;;  %v1184_v12 = vsel %vm1162_vm6, %v1164_v58, 0.0  ;;  %v1337_v16 = vsel %vm1328_vm4, %v1320_v0, %v1312_v36 }
 0x121   : > { %2201 = vadd.xlane.f32.xlu1 %v2182_v52  ;;  %v1503_v17 = vrot.slane %v4250_v42, 4  ;;  %vm1033_vm9 = vcmp.gt.f32.partialorder %v1017_v9, 0.0  ;;  %v1049_v20 = vmul.f32 0.1, %v1017_v9  ;;  %vm1217_vm7 = vcmp.gt.f32.partialorder %v1201_v10, 0.0 }
 0x122   : > { %2199 = vadd.xlane.f32.xlu0 %v2181_v62  ;;  %v1066_v19 = vsel %vm1034_vm8, %v1018_v28, %v1050_v6  ;;  %v1233_v22 = vmul.f32 0.1, %v1201_v10  ;;  %v1200_v23 = vadd.f32 %v4221_v27, %v1184_v12  ;;  %v1348_v39 = vadd.f32 %v1329_v15, %v4242_v37 }
 0x123   : > { %v1082_v21 = vmul.f32 %v4266_v51, %v1066_v19  ;;  %v1065_v50 = vsel %vm1033_vm9, %v1017_v9, %v1049_v20  ;;  %v1347_v32 = vadd.f32 %v1337_v16, %v4225_v29  ;;  %v1512_v33 = vsel %vm1511_vm5, %v1495_v5, %v1503_v17 }
 0x124   : > { %v1520_v31 = vsel %vm1511_vm5, %v1503_v17, %v1495_v5  ;;  %v1081_v34 = vmul.f32 %v4266_v51, %v1065_v50  ;;  %v1249_v26 = vsel %vm1217_vm7, %v1201_v10, %v1233_v22  ;;  %vm1216_vm12 = vcmp.gt.f32.partialorder %v1200_v23, 0.0 }
 0x125   : > { %1099 = vadd.xlane.f32.xlu1 %v1082_v21  ;;  %v1232_v38 = vmul.f32 0.1, %v1200_v23  ;;  %v1265_v43 = vmul.f32 %v4266_v51, %v1249_v26  ;;  %v1384_v44 = vadd.f32 %v4221_v27, %v1348_v39  ;;  %vm6227_vm8 = vcmp.ge.s32.totalorder %v4214_v25, 3 }
 0x126   : > { %v1367_v35 = vsel %vm6227_vm8, %v1347_v32, 0.0  ;;  %v1531_v45 = vadd.f32 %v1512_v33, %v4242_v37  ;;  %1097 = vadd.xlane.f32.xlu0 %v1081_v34  ;;  %v1530_v47 = vadd.f32 %v1520_v31, %v4225_v29  ;;  %v1678_v49 = vrot.slane %v4230_v30, 3 }
 0x127   : > { %v1248_v36 = vsel %vm1216_vm12, %v1200_v23, %v1232_v38  ;;  %v1383_v46 = vadd.f32 %v4221_v27, %v1367_v35  ;;  %vm1400_vm9 = vcmp.gt.f32.partialorder %v1384_v44, 0.0  ;;  %v1416_v40 = vmul.f32 0.1, %v1384_v44 }
 0x128   : > { %v1264_v52 = vmul.f32 %v4266_v51, %v1248_v36  ;;  %v1567_v53 = vadd.f32 %v4221_v27, %v1531_v45  ;;  %v1550_v57 = vsel %vm6224_vm13, %v1530_v47, 0.0  ;;  %v1686_v28 = vrot.slane %v4250_v42, 3  ;;  %v4507_v36 = vpop.f32.mrb[12].mxu1 }
 0x129   : > { %1282 = vadd.xlane.f32.xlu1 %v1265_v43  ;;  %vm1399_vm7 = vcmp.gt.f32.partialorder %v1383_v46, 0.0  ;;  %v1415_v56 = vmul.f32 0.1, %v1383_v46  ;;  %v1432_v41 = vsel %vm1400_vm9, %v1384_v44, %v1416_v40  ;;  %v1566_v62 = vadd.f32 %v4221_v27, %v1550_v57  ;;  %v4516_v57 = vpop.f32.mrb[13].mxu1 }
 0x12a   : > { %vm1583_vm12 = vcmp.gt.f32.partialorder %v1567_v53, 0.0  ;;  %v1599_v58 = vmul.f32 0.1, %v1567_v53  ;;  %1280 = vadd.xlane.f32.xlu0 %v1264_v52  ;;  %v1448_v63 = vmul.f32 %v4266_v51, %v1432_v41  ;;  %v1695_v5 = vsel %vm6225_vm14, %v1678_v49, %v1686_v28 }
 0x12b   : > { %v1431_v0 = vsel %vm1399_vm7, %v1383_v46, %v1415_v56  ;;  %v1703_v6 = vsel %vm6225_vm14, %v1686_v28, %v1678_v49  ;;  %vm1582_vm8 = vcmp.gt.f32.partialorder %v1566_v62, 0.0  ;;  %v1598_v12 = vmul.f32 0.1, %v1566_v62 }
 0x12c   : > { %v1447_v9 = vmul.f32 %v4266_v51, %v1431_v0  ;;  %v1615_v10 = vsel %vm1583_vm12, %v1567_v53, %v1599_v58  ;;  %v1714_v16 = vadd.f32 %v1695_v5, %v4242_v37  ;;  %v1713_v17 = vadd.f32 %v1703_v6, %v4225_v29 }
 0x12d   : > { %1465 = vadd.xlane.f32.xlu1 %v1448_v63  ;;  %v1631_v15 = vmul.f32 %v4266_v51, %v1615_v10  ;;  %v1861_v19 = vrot.slane %v4230_v30, 2  ;;  %v1614_v20 = vsel %vm1582_vm8, %v1566_v62, %v1598_v12  ;;  %v1869_v21 = vrot.slane %v4250_v42, 2  ;;  %v4527_v10 = vpop.f32.mrb[12].mxu0 }
 0x12e   : > { %v2044_v22 = vrot.slane %v4230_v30, 1  ;;  %v2052_v23 = vrot.slane %v4250_v42, 1  ;;  %1463 = vadd.xlane.f32.xlu0 %v1447_v9  ;;  %v1630_v39 = vmul.f32 %v4266_v51, %v1614_v20  ;;  %v1750_v50 = vadd.f32 %v4221_v27, %v1714_v16  ;;  %v4525_v9 = vpop.f32.mrb[14].mxu1 }
 0x12f   : > { %v1733_v32 = vsel %vm1711_vm10, %v1713_v17, 0.0  ;;  %v793_v33 = vadd.f32 %v4295_v13, %v4288_v8  ;;  %vm6228_vm9 = vcmp.lt.s32.totalorder %v4214_v25, 6  ;;  %v792_v6 = vadd.f32 %v4279_v1, %v4276_v61 }
 0x130   : > { %v1749_v31 = vadd.f32 %v4221_v27, %v1733_v32  ;;  %v1878_v34 = vsel %vm6228_vm9, %v1861_v19, %v1869_v21  ;;  %vm6229_vm7 = vmmov %vm6228_vm9  ;;  %v2061_v42 = vsel %vm2060_vm11, %v2044_v22, %v2052_v23  ;;  %vm1766_vm12 = vcmp.gt.f32.partialorder %v1750_v50, 0.0 }
 0x131   : > { %v1886_v30 = vsel %vm6229_vm7, %v1869_v21, %v1861_v19  ;;  %1648 = vadd.xlane.f32.xlu1 %v1631_v15  ;;  %v1782_v26 = vmul.f32 0.1, %v1750_v50  ;;  %v1897_v38 = vadd.f32 %v1878_v34, %v4242_v37  ;;  %v2080_v35 = vadd.f32 %v2061_v42, %v4242_v37  ;;  %v4532_v19 = vpop.f32.mrb[15].mxu1 }
 0x132   : > { %v1896_v43 = vadd.f32 %v1886_v30, %v4225_v29  ;;  %vm1765_vm8 = vcmp.gt.f32.partialorder %v1749_v31, 0.0  ;;  %v1781_v44 = vmul.f32 0.1, %v1749_v31  ;;  %v2069_v45 = vsel %vm2060_vm11, %v2052_v23, %v2044_v22  ;;  %1646 = vadd.xlane.f32.xlu0 %v1630_v39 }
 0x133   : > { %v1798_v46 = vsel %vm1766_vm12, %v1750_v50, %v1782_v26  ;;  %v1933_v47 = vadd.f32 %v4221_v27, %v1897_v38  ;;  %v2079_v52 = vadd.f32 %v2069_v45, %v4225_v29  ;;  %v2116_v37 = vadd.f32 %v4221_v27, %v2080_v35  ;;  %v4543_v38 = vpop.f32.mrb[13].mxu0 }
 0x134   : > { %v1916_v49 = vsel %vm1894_vm15, %v1896_v43, 0.0  ;;  %v1814_v40 = vmul.f32 %v4266_v51, %v1798_v46  ;;  %v1797_v53 = vsel %vm1765_vm8, %v1749_v31, %v1781_v44  ;;  %v835_v5 = vadd.f32 %v4221_v27, %v793_v33 }
 0x135   : > { %v1932_v56 = vadd.f32 %v4221_v27, %v1916_v49  ;;  %v1813_v28 = vmul.f32 %v4266_v51, %v1797_v53  ;;  %vm1949_vm9 = vcmp.gt.f32.partialorder %v1933_v47, 0.0  ;;  %v1965_v41 = vmul.f32 0.1, %v1933_v47 }
 0x136   : > { %v2099_v58 = vsel %vm2077_vm0, %v2079_v52, 0.0  ;;  %1831 = vadd.xlane.f32.xlu1 %v1814_v40  ;;  %vm2132_vm12 = vcmp.gt.f32.partialorder %v2116_v37, 0.0  ;;  %v2148_v29 = vmul.f32 0.1, %v2116_v37  ;;  %v791_v17 = vadd.f32 %v4302_v18, %v4297_v14  ;;  %v4552_v52 = vpop.f32.mrb[14].mxu0 }
 0x137   : > { %vm1948_vm7 = vcmp.gt.f32.partialorder %v1932_v56, 0.0  ;;  %v1964_v62 = vmul.f32 0.1, %v1932_v56  ;;  %1829 = vadd.xlane.f32.xlu0 %v1813_v28  ;;  %v1981_v63 = vsel %vm1949_vm9, %v1933_v47, %v1965_v41  ;;  %v2115_v0 = vadd.f32 %v4221_v27, %v2099_v58 }
 0x138   : > { %v1997_v12 = vmul.f32 %v4266_v51, %v1981_v63  ;;  %v2164_v16 = vsel %vm2132_vm12, %v2116_v37, %v2148_v29  ;;  %vm851_vm9 = vcmp.gt.f32.partialorder %v835_v5, 0.0  ;;  %v867_v23 = vmul.f32 0.1, %v835_v5  ;;  %v4555_v37 = vpop.f32.mrb[15].mxu0 }
 0x139   : > { %v1980_v15 = vsel %vm1948_vm7, %v1932_v56, %v1964_v62  ;;  %v2180_v21 = vmul.f32 %v4266_v51, %v2164_v16  ;;  %vm2131_vm8 = vcmp.gt.f32.partialorder %v2115_v0, 0.0  ;;  %v2147_v22 = vmul.f32 0.1, %v2115_v0 }
 0x13a   : > { %v1996_v20 = vmul.f32 %v4266_v51, %v1980_v15  ;;  %2014 = vadd.xlane.f32.xlu1 %v1997_v12  ;;  %v834_v39 = vadd.f32 %v4221_v27, %v792_v6  ;;  %v833_v50 = vadd.f32 %v4221_v27, %v791_v17  ;;  %v790_v33 = vadd.f32 %v4286_v7, %v4281_v2 }
 0x13b   : > { %v2163_v32 = vsel %vm2131_vm8, %v2115_v0, %v2147_v22  ;;  %v949_v31 = vrot.slane %v4279_v1, 7  ;;  %v957_v34 = vrot.slane %v4295_v13, 7  ;;  %v883_v42 = vsel %vm851_vm9, %v835_v5, %v867_v23 }
 0x13c   : > { %2012 = vadd.xlane.f32.xlu0 %v1996_v20  ;;  %v2179_v30 = vmul.f32 %v4266_v51, %v2163_v32  ;;  %vm850_vm7 = vcmp.gt.f32.partialorder %v834_v39, 0.0  ;;  %v866_v26 = vmul.f32 0.1, %v834_v39  ;;  %v905_v43 = vmul.f32 %v4266_v51, %v883_v42 }
 0x13d   : > { %vm849_vm12 = vcmp.gt.f32.partialorder %v833_v50, 0.0  ;;  %v865_v44 = vmul.f32 0.1, %v833_v50  ;;  %v832_v35 = vadd.f32 %v4221_v27, %v790_v33  ;;  %v966_v46 = vsel %vm962_vm1, %v949_v31, %v957_v34 }
 0x13e   : > { %2197 = vadd.xlane.f32.xlu1 %v2180_v21  ;;  %v882_v45 = vsel %vm850_vm7, %v834_v39, %v866_v26  ;;  %v974_v47 = vsel %vm962_vm1, %v957_v34, %v949_v31  ;;  %v1132_v49 = vrot.slane %v4279_v1, 6  ;;  %v988_v41 = vadd.f32 %v4288_v8, %v966_v46 }
 0x13f   : > { %v904_v40 = vmul.f32 %v4266_v51, %v882_v45  ;;  %v881_v53 = vsel %vm849_vm12, %v833_v50, %v865_v44  ;;  %vm848_vm8 = vcmp.gt.f32.partialorder %v832_v35, 0.0  ;;  %v864_v56 = vmul.f32 0.1, %v832_v35 }
 0x140   : > { %2195 = vadd.xlane.f32.xlu0 %v2179_v30  ;;  %v903_v28 = vmul.f32 %v4266_v51, %v881_v53  ;;  %v987_v58 = vadd.f32 %v4276_v61, %v974_v47  ;;  %v1140_v62 = vrot.slane %v4295_v13, 6  ;;  %v1315_v63 = vrot.slane %v4279_v1, 5 }
 0x141   : > { %v880_v29 = vsel %vm848_vm8, %v832_v35, %v864_v56  ;;  %v1323_v0 = vrot.slane %v4295_v13, 5  ;;  %v1498_v5 = vrot.slane %v4279_v1, 4  ;;  %v1024_v12 = vadd.f32 %v4221_v27, %v988_v41 }
 0x142   : > { %928 = vadd.xlane.f32.xlu1 %v905_v43  ;;  %v902_v6 = vmul.f32 %v4266_v51, %v880_v29  ;;  %v1007_v15 = vsel %vm979_vm2, %v987_v58, 0.0  ;;  %v1149_v16 = vsel %vm1145_vm3, %v1132_v49, %v1140_v62  ;;  %v1157_v21 = vsel %vm1145_vm3, %v1140_v62, %v1132_v49 }
 0x143   : > { %v1023_v17 = vadd.f32 %v4221_v27, %v1007_v15  ;;  %v1171_v20 = vadd.f32 %v4288_v8, %v1149_v16  ;;  %v1332_v22 = vsel %vm1328_vm4, %v1315_v63, %v1323_v0  ;;  %vm1040_vm9 = vcmp.gt.f32.partialorder %v1024_v12, 0.0 }
 0x144   : > { %926 = vadd.xlane.f32.xlu0 %v904_v40  ;;  %v1056_v23 = vmul.f32 0.1, %v1024_v12  ;;  %v1170_v39 = vadd.f32 %v4276_v61, %v1157_v21  ;;  %v1354_v50 = vadd.f32 %v4288_v8, %v1332_v22  ;;  %v1340_v31 = vsel %vm1328_vm4, %v1323_v0, %v1315_v63 }
 0x145   : > { %vm1039_vm7 = vcmp.gt.f32.partialorder %v1023_v17, 0.0  ;;  %v1055_v32 = vmul.f32 0.1, %v1023_v17  ;;  %v1207_v33 = vadd.f32 %v4221_v27, %v1171_v20  ;;  %v1353_v26 = vadd.f32 %v4276_v61, %v1340_v31 }
 0x146   : > { %924 = vadd.xlane.f32.xlu1 %v903_v28  ;;  %v1072_v34 = vsel %vm1040_vm9, %v1024_v12, %v1056_v23  ;;  %v1190_v30 = vsel %vm1162_vm6, %v1170_v39, 0.0  ;;  %v1390_v42 = vadd.f32 %v4221_v27, %v1354_v50  ;;  %vm6230_vm9 = vcmp.ge.s32.totalorder %v4214_v25, 3 }
 0x147   : > { %v1088_v43 = vmul.f32 %v4266_v51, %v1072_v34  ;;  %v1071_v44 = vsel %vm1039_vm7, %v1023_v17, %v1055_v32  ;;  %vm1223_vm12 = vcmp.gt.f32.partialorder %v1207_v33, 0.0  ;;  %v1239_v35 = vmul.f32 0.1, %v1207_v33 }
 0x148   : > { %922 = vadd.xlane.f32.xlu0 %v902_v6  ;;  %v1087_v45 = vmul.f32 %v4266_v51, %v1071_v44  ;;  %v1206_v46 = vadd.f32 %v4221_v27, %v1190_v30  ;;  %vm1406_vm8 = vcmp.gt.f32.partialorder %v1390_v42, 0.0  ;;  %v1422_v47 = vmul.f32 0.1, %v1390_v42 }
 0x149   : > { %v1255_v49 = vsel %vm1223_vm12, %v1207_v33, %v1239_v35  ;;  %v1373_v40 = vsel %vm6230_vm9, %v1353_v26, 0.0  ;;  %v1506_v53 = vrot.slane %v4295_v13, 4  ;;  %v1681_v56 = vrot.slane %v4279_v1, 3 }
 0x14a   : > { %1111 = vadd.xlane.f32.xlu1 %v1088_v43  ;;  %v1271_v28 = vmul.f32 %v4266_v51, %v1255_v49  ;;  %vm1222_vm7 = vcmp.gt.f32.partialorder %v1206_v46, 0.0  ;;  %v1238_v41 = vmul.f32 0.1, %v1206_v46  ;;  %v1438_v58 = vsel %vm1406_vm8, %v1390_v42, %v1422_v47 }
 0x14b   : > { %v1454_v62 = vmul.f32 %v4266_v51, %v1438_v58  ;;  %v1389_v29 = vadd.f32 %v4221_v27, %v1373_v40  ;;  %v1515_v63 = vsel %vm1511_vm5, %v1498_v5, %v1506_v53  ;;  %v1523_v0 = vsel %vm1511_vm5, %v1506_v53, %v1498_v5 }
 0x14c   : > { %1109 = vadd.xlane.f32.xlu0 %v1087_v45  ;;  %v1254_v6 = vsel %vm1222_vm7, %v1206_v46, %v1238_v41  ;;  %v1537_v12 = vadd.f32 %v4288_v8, %v1515_v63  ;;  %v1536_v15 = vadd.f32 %v4276_v61, %v1523_v0  ;;  %v1689_v16 = vrot.slane %v4295_v13, 3 }
 0x14d   : > { %v1270_v17 = vmul.f32 %v4266_v51, %v1254_v6  ;;  %vm1405_vm12 = vcmp.gt.f32.partialorder %v1389_v29, 0.0  ;;  %v1421_v20 = vmul.f32 0.1, %v1389_v29  ;;  %v1864_v21 = vrot.slane %v4279_v1, 2 }
 0x14e   : > { %1294 = vadd.xlane.f32.xlu1 %v1271_v28  ;;  %v1573_v22 = vadd.f32 %v4221_v27, %v1537_v12  ;;  %v1556_v23 = vsel %vm6224_vm13, %v1536_v15, 0.0  ;;  %v1698_v5 = vsel %vm6225_vm14, %v1681_v56, %v1689_v16  ;;  %v1706_v39 = vsel %vm6225_vm14, %v1689_v16, %v1681_v56 }
 0x14f   : > { %v1437_v50 = vsel %vm1405_vm12, %v1389_v29, %v1421_v20  ;;  %v1572_v32 = vadd.f32 %v4221_v27, %v1556_v23  ;;  %v1720_v33 = vadd.f32 %v4288_v8, %v1698_v5  ;;  %v1719_v31 = vadd.f32 %v4276_v61, %v1706_v39 }
 0x150   : > { %1292 = vadd.xlane.f32.xlu0 %v1270_v17  ;;  %v1453_v34 = vmul.f32 %v4266_v51, %v1437_v50  ;;  %vm1589_vm8 = vcmp.gt.f32.partialorder %v1573_v22, 0.0  ;;  %v1605_v30 = vmul.f32 0.1, %v1573_v22  ;;  %v1872_v42 = vrot.slane %v4295_v13, 2 }
 0x151   : > { %vm1588_vm9 = vcmp.gt.f32.partialorder %v1572_v32, 0.0  ;;  %v1604_v26 = vmul.f32 0.1, %v1572_v32  ;;  %v1756_v43 = vadd.f32 %v4221_v27, %v1720_v33  ;;  %v1739_v44 = vsel %vm1711_vm10, %v1719_v31, 0.0 }
 0x152   : > { %1477 = vadd.xlane.f32.xlu1 %v1454_v62  ;;  %v1621_v35 = vsel %vm1589_vm8, %v1573_v22, %v1605_v30  ;;  %v1755_v45 = vadd.f32 %v4221_v27, %v1739_v44  ;;  %vm6231_vm7 = vcmp.lt.s32.totalorder %v4214_v25, 6  ;;  %v2047_v29 = vrot.slane %v4279_v1, 1 }
 0x153   : > { %v1881_v46 = vsel %vm6231_vm7, %v1864_v21, %v1872_v42  ;;  %vm6232_vm12 = vmmov %vm6231_vm7  ;;  %v1637_v49 = vmul.f32 %v4266_v51, %v1621_v35  ;;  %v1620_v40 = vsel %vm1588_vm9, %v1572_v32, %v1604_v26  ;;  %vm1772_vm13 = vcmp.gt.f32.partialorder %v1756_v43, 0.0 }
 0x154   : > { %v1889_v47 = vsel %vm6232_vm12, %v1872_v42, %v1864_v21  ;;  %1475 = vadd.xlane.f32.xlu0 %v1453_v34  ;;  %v1788_v53 = vmul.f32 0.1, %v1756_v43  ;;  %v1636_v56 = vmul.f32 %v4266_v51, %v1620_v40  ;;  %vm1771_vm14 = vcmp.gt.f32.partialorder %v1755_v45, 0.0 }
 0x155   : > { %v1787_v28 = vmul.f32 0.1, %v1755_v45  ;;  %v1903_v41 = vadd.f32 %v4288_v8, %v1881_v46  ;;  %v1902_v62 = vadd.f32 %v4276_v61, %v1889_v47  ;;  %v2055_v63 = vrot.slane %v4295_v13, 1 }
 0x156   : > { %v1804_v58 = vsel %vm1772_vm13, %v1756_v43, %v1788_v53  ;;  %1660 = vadd.xlane.f32.xlu1 %v1637_v49  ;;  %v948_v15 = vrot.slane %v4286_v7, 7  ;;  %v956_v5 = vrot.slane %v4302_v18, 7  ;;  %v1131_v39 = vrot.slane %v4286_v7, 6 }
 0x157   : > { %v1820_v0 = vmul.f32 %v4266_v51, %v1804_v58  ;;  %v1803_v6 = vsel %vm1771_vm14, %v1755_v45, %v1787_v28  ;;  %v1939_v12 = vadd.f32 %v4221_v27, %v1903_v41  ;;  %v1922_v17 = vsel %vm1894_vm15, %v1902_v62, 0.0  ;;  %v4670_v62 = vld [vmem:[%s6217_s4] ss:$0 sm:$0xff] }
 0x158   : > { %1658 = vadd.xlane.f32.xlu0 %v1636_v56  ;;  %v1819_v16 = vmul.f32 %v4266_v51, %v1803_v6  ;;  %v2064_v20 = vsel %vm2060_vm11, %v2047_v29, %v2055_v63  ;;  %v2072_v1 = vsel %vm2060_vm11, %v2055_v63, %v2047_v29  ;;  %v1938_v21 = vadd.f32 %v4221_v27, %v1922_v17 }
 0x159   : > { %vm1955_vm13 = vcmp.gt.f32.partialorder %v1939_v12, 0.0  ;;  %v1971_v13 = vmul.f32 0.1, %v1939_v12  ;;  %v2086_v22 = vadd.f32 %v4288_v8, %v2064_v20  ;;  %v2085_v23 = vadd.f32 %v4276_v61, %v2072_v1 }
 0x15a   : > { %v1139_v50 = vrot.slane %v4302_v18, 6  ;;  %1843 = vadd.xlane.f32.xlu1 %v1820_v0  ;;  %vm1954_vm14 = vcmp.gt.f32.partialorder %v1938_v21, 0.0  ;;  %v1970_v33 = vmul.f32 0.1, %v1938_v21  ;;  %v965_v61 = vsel %vm962_vm1, %v948_v15, %v956_v5 }
 0x15b   : > { %v1987_v32 = vsel %vm1955_vm13, %v1939_v12, %v1971_v13  ;;  %v2122_v31 = vadd.f32 %v4221_v27, %v2086_v22  ;;  %v2105_v8 = vsel %vm2077_vm0, %v2085_v23, 0.0  ;;  %v973_v30 = vsel %vm962_vm1, %v956_v5, %v948_v15 }
 0x15c   : > { %1841 = vadd.xlane.f32.xlu0 %v1819_v16  ;;  %v2003_v34 = vmul.f32 %v4266_v51, %v1987_v32  ;;  %v1986_v42 = vsel %vm1954_vm14, %v1938_v21, %v1970_v33  ;;  %v2121_v43 = vadd.f32 %v4221_v27, %v2105_v8  ;;  %v986_v35 = vadd.f32 %v965_v61, %v4297_v14 }
 0x15d   : > { %vm2138_vm8 = vcmp.gt.f32.partialorder %v2122_v31, 0.0  ;;  %v2154_v26 = vmul.f32 0.1, %v2122_v31  ;;  %v2002_v44 = vmul.f32 %v4266_v51, %v1986_v42  ;;  %v985_v45 = vadd.f32 %v973_v30, %v4281_v2 }
 0x15e   : > { %v1148_v46 = vsel %vm1145_vm3, %v1131_v39, %v1139_v50  ;;  %2026 = vadd.xlane.f32.xlu1 %v2003_v34  ;;  %vm2137_vm9 = vcmp.gt.f32.partialorder %v2121_v43, 0.0  ;;  %v2153_v49 = vmul.f32 0.1, %v2121_v43  ;;  %v1022_v56 = vadd.f32 %v4221_v27, %v986_v35 }
 0x15f   : > { %v2170_v47 = vsel %vm2138_vm8, %v2122_v31, %v2154_v26  ;;  %v1169_v40 = vadd.f32 %v1148_v46, %v4297_v14  ;;  %v1005_v28 = vsel %vm979_vm2, %v985_v45, 0.0  ;;  %v1156_v41 = vsel %vm1145_vm3, %v1139_v50, %v1131_v39  ;;  %v4702_v45 = vld [vmem:[%s6218_s5] ss:$0 sm:$0xff] }
 0x160   : > { %2024 = vadd.xlane.f32.xlu0 %v2002_v44  ;;  %v2186_v53 = vmul.f32 %v4266_v51, %v2170_v47  ;;  %v2169_v58 = vsel %vm2137_vm9, %v2121_v43, %v2153_v49  ;;  %v1021_v29 = vadd.f32 %v4670_v62, %v1005_v28  ;;  %v1168_v0 = vadd.f32 %v1156_v41, %v4281_v2 }
 0x161   : > { %v1205_v63 = vadd.f32 %v4670_v62, %v1169_v40  ;;  %v2185_v27 = vmul.f32 %v4266_v51, %v2169_v58  ;;  %vm1038_vm7 = vcmp.gt.f32.partialorder %v1022_v56, 0.0  ;;  %v1054_v6 = vmul.f32 0.1, %v1022_v56 }
 0x162   : > { %v1314_v12 = vrot.slane %v4286_v7, 5  ;;  %2209 = vadd.xlane.f32.xlu1 %v2186_v53  ;;  %vm1037_vm12 = vcmp.gt.f32.partialorder %v1021_v29, 0.0  ;;  %v1053_v15 = vmul.f32 0.1, %v1021_v29  ;;  %v1188_v20 = vsel %vm1162_vm6, %v1168_v0, 0.0 }
 0x163   : > { %vm1221_vm13 = vcmp.gt.f32.partialorder %v1205_v63, 0.0  ;;  %v1237_v16 = vmul.f32 0.1, %v1205_v63  ;;  %v1070_v17 = vsel %vm1038_vm7, %v1022_v56, %v1054_v6  ;;  %v1322_v1 = vrot.slane %v4302_v18, 5 }
 0x164   : > { %2207 = vadd.xlane.f32.xlu0 %v2185_v27  ;;  %v1497_v13 = vrot.slane %v4286_v7, 4  ;;  %v1086_v21 = vmul.f32 %v4266_v51, %v1070_v17  ;;  %v1069_v22 = vsel %vm1037_vm12, %v1021_v29, %v1053_v15  ;;  %v1204_v5 = vadd.f32 %v4670_v62, %v1188_v20 }
 0x165   : > { %v1253_v23 = vsel %vm1221_vm13, %v1205_v63, %v1237_v16  ;;  %v1085_v39 = vmul.f32 %v4266_v51, %v1069_v22  ;;  %v1331_v32 = vsel %vm1328_vm4, %v1314_v12, %v1322_v1  ;;  %v1339_v33 = vsel %vm1328_vm4, %v1322_v1, %v1314_v12 }
 0x166   : > { %v1269_v50 = vmul.f32 %v4266_v51, %v1253_v23  ;;  %1107 = vadd.xlane.f32.xlu1 %v1086_v21  ;;  %vm1220_vm14 = vcmp.gt.f32.partialorder %v1204_v5, 0.0  ;;  %v1236_v31 = vmul.f32 0.1, %v1204_v5  ;;  %v1352_v34 = vadd.f32 %v1331_v32, %v4297_v14 }
 0x167   : > { %v1351_v8 = vadd.f32 %v1339_v33, %v4281_v2  ;;  %v1505_v61 = vrot.slane %v4302_v18, 4  ;;  %v1680_v30 = vrot.slane %v4286_v7, 3  ;;  %v1688_v51 = vrot.slane %v4302_v18, 3 }
 0x168   : > { %1105 = vadd.xlane.f32.xlu0 %v1085_v39  ;;  %v1863_v42 = vrot.slane %v4286_v7, 2  ;;  %v1252_v26 = vsel %vm1220_vm14, %v1204_v5, %v1236_v31  ;;  %v1388_v43 = vadd.f32 %v4670_v62, %v1352_v34  ;;  %vm6233_vm8 = vcmp.ge.s32.totalorder %v4214_v25, 3 }
 0x169   : > { %v1371_v44 = vsel %vm6233_vm8, %v1351_v8, 0.0  ;;  %v1871_v35 = vrot.slane %v4302_v18, 2  ;;  %v1268_v46 = vmul.f32 %v4702_v45, %v1252_v26  ;;  %v1514_v49 = vsel %vm1511_vm5, %v1497_v13, %v1505_v61 }
 0x16a   : > { %v1387_v47 = vadd.f32 %v4670_v62, %v1371_v44  ;;  %v1522_v40 = vsel %vm1511_vm5, %v1505_v61, %v1497_v13  ;;  %1290 = vadd.xlane.f32.xlu1 %v1269_v50  ;;  %vm1404_vm9 = vcmp.gt.f32.partialorder %v1388_v43, 0.0  ;;  %v1420_v53 = vmul.f32 0.1, %v1388_v43 }
 0x16b   : > { %v1535_v56 = vadd.f32 %v1514_v49, %v4297_v14  ;;  %v1534_v28 = vadd.f32 %v1522_v40, %v4281_v2  ;;  %vm6234_vm12 = vcmp.lt.s32.totalorder %v4214_v25, 5  ;;  %vm6236_vm14 = vcmp.ge.s32.totalorder %v4214_v25, 4 }
 0x16c   : > { %1288 = vadd.xlane.f32.xlu0 %v1268_v46  ;;  %vm1403_vm7 = vcmp.gt.f32.partialorder %v1387_v47, 0.0  ;;  %v1419_v41 = vmul.f32 0.1, %v1387_v47  ;;  %v1697_v58 = vsel %vm6234_vm12, %v1680_v30, %v1688_v51  ;;  %vm6235_vm13 = vmmov %vm6234_vm12  ;;  %v1436_v63 = vsel %vm1404_vm9, %v1388_v43, %v1420_v53 }
 0x16d   : > { %v1705_v29 = vsel %vm6235_vm13, %v1688_v51, %v1680_v30  ;;  %v1571_v0 = vadd.f32 %v4670_v62, %v1535_v56  ;;  %v1554_v27 = vsel %vm6236_vm14, %v1534_v28, 0.0  ;;  %v1718_v6 = vadd.f32 %v1697_v58, %v4297_v14 }
 0x16e   : > { %v1452_v12 = vmul.f32 %v4702_v45, %v1436_v63  ;;  %v1435_v15 = vsel %vm1403_vm7, %v1387_v47, %v1419_v41  ;;  %v1570_v16 = vadd.f32 %v4670_v62, %v1554_v27  ;;  %v1717_v17 = vadd.f32 %v1705_v29, %v4281_v2 }
 0x16f   : > { %v1451_v20 = vmul.f32 %v4702_v45, %v1435_v15  ;;  %vm1587_vm8 = vcmp.gt.f32.partialorder %v1571_v0, 0.0  ;;  %v1603_v1 = vmul.f32 0.1, %v1571_v0  ;;  %v1754_v13 = vadd.f32 %v4670_v62, %v1718_v6 }
 0x170   : > { %1473 = vadd.xlane.f32.xlu1 %v1452_v12  ;;  %vm1586_vm9 = vcmp.gt.f32.partialorder %v1570_v16, 0.0  ;;  %v1602_v21 = vmul.f32 0.1, %v1570_v16  ;;  %v1737_v22 = vsel %vm1711_vm10, %v1717_v17, 0.0  ;;  %vm6237_vm12 = vcmp.lt.s32.totalorder %v4214_v25, 6 }
 0x171   : > { %v1880_v23 = vsel %vm6237_vm12, %v1863_v42, %v1871_v35  ;;  %1471 = vadd.xlane.f32.xlu0 %v1451_v20  ;;  %v1619_v5 = vsel %vm1587_vm8, %v1571_v0, %v1603_v1  ;;  %vm1770_vm7 = vcmp.gt.f32.partialorder %v1754_v13, 0.0  ;;  %v1786_v39 = vmul.f32 0.1, %v1754_v13  ;;  %vm6238_vm13 = vmmov %vm6237_vm12 }
 0x172   : > { %v1753_v50 = vadd.f32 %v4670_v62, %v1737_v22  ;;  %v1635_v32 = vmul.f32 %v4702_v45, %v1619_v5  ;;  %v1618_v33 = vsel %vm1586_vm9, %v1570_v16, %v1602_v21  ;;  %v1901_v31 = vadd.f32 %v1880_v23, %v4297_v14 }
 0x173   : > { %v1888_v34 = vsel %vm6238_vm13, %v1871_v35, %v1863_v42  ;;  %v1634_v8 = vmul.f32 %v4702_v45, %v1618_v33  ;;  %v1802_v61 = vsel %vm1770_vm7, %v1754_v13, %v1786_v39  ;;  %v2046_v44 = vrot.slane %v4286_v7, 1 }
 0x174   : > { %vm1769_vm14 = vcmp.gt.f32.partialorder %v1753_v50, 0.0  ;;  %v1785_v30 = vmul.f32 0.1, %v1753_v50  ;;  %1656 = vadd.xlane.f32.xlu1 %v1635_v32  ;;  %v1818_v51 = vmul.f32 %v4702_v45, %v1802_v61  ;;  %v1937_v26 = vadd.f32 %v4670_v62, %v1901_v31 }
 0x175   : > { %v1900_v43 = vadd.f32 %v1888_v34, %v4281_v2  ;;  %1654 = vadd.xlane.f32.xlu0 %v1634_v8  ;;  %v2054_v47 = vrot.slane %v4302_v18, 1  ;;  %v797_v42 = vadd.f32 %v4350_v3, %v4347_v60  ;;  %v796_v35 = vadd.f32 %v4337_v54, %v4332_v48 }
 0x176   : > { %v1801_v46 = vsel %vm1769_vm14, %v1753_v50, %v1785_v30  ;;  %vm1953_vm8 = vcmp.gt.f32.partialorder %v1937_v26, 0.0  ;;  %v1969_v40 = vmul.f32 0.1, %v1937_v26  ;;  %v794_v50 = vadd.f32 %v4345_v59, %v4339_v55 }
 0x177   : > { %v1817_v49 = vmul.f32 %v4702_v45, %v1801_v46  ;;  %v1920_v53 = vsel %vm1894_vm15, %v1900_v43, 0.0  ;;  %v2063_v7 = vsel %vm2060_vm11, %v2046_v44, %v2054_v47  ;;  %v2071_v18 = vsel %vm2060_vm11, %v2054_v47, %v2046_v44 }
 0x178   : > { %v1936_v56 = vadd.f32 %v4670_v62, %v1920_v53  ;;  %v839_v28 = vadd.f32 %v4670_v62, %v797_v42  ;;  %1839 = vadd.xlane.f32.xlu1 %v1818_v51  ;;  %v1985_v41 = vsel %vm1953_vm8, %v1937_v26, %v1969_v40  ;;  %v2084_v58 = vadd.f32 %v2063_v7, %v4297_v14 }
 0x179   : > { %v2083_v29 = vadd.f32 %v2071_v18, %v4281_v2  ;;  %v838_v63 = vadd.f32 %v4670_v62, %v796_v35  ;;  %1837 = vadd.xlane.f32.xlu0 %v1817_v49  ;;  %v2001_v0 = vmul.f32 %v4702_v45, %v1985_v41  ;;  %v795_v2 = vadd.f32 %v4362_v11, %v4352_v4 }
 0x17a   : > { %vm1952_vm9 = vcmp.gt.f32.partialorder %v1936_v56, 0.0  ;;  %v1968_v27 = vmul.f32 0.1, %v1936_v56  ;;  %vm855_vm12 = vcmp.gt.f32.partialorder %v839_v28, 0.0  ;;  %v2120_v6 = vadd.f32 %v4670_v62, %v2084_v58 }
 0x17b   : > { %v2103_v12 = vsel %vm2077_vm0, %v2083_v29, 0.0  ;;  %v871_v15 = vmul.f32 0.1, %v839_v28  ;;  %vm854_vm7 = vcmp.gt.f32.partialorder %v838_v63, 0.0  ;;  %v870_v17 = vmul.f32 0.1, %v838_v63 }
 0x17c   : > { %v1984_v16 = vsel %vm1952_vm9, %v1936_v56, %v1968_v27  ;;  %v2119_v14 = vadd.f32 %v4670_v62, %v2103_v12  ;;  %2022 = vadd.xlane.f32.xlu1 %v2001_v0  ;;  %vm2136_vm13 = vcmp.gt.f32.partialorder %v2120_v6, 0.0  ;;  %v2152_v1 = vmul.f32 0.1, %v2120_v6 }
 0x17d   : > { %v2000_v20 = vmul.f32 %v4702_v45, %v1984_v16  ;;  %v887_v13 = vsel %vm855_vm12, %v839_v28, %v871_v15  ;;  %v886_v5 = vsel %vm854_vm7, %v838_v63, %v870_v17  ;;  %v837_v39 = vadd.f32 %v4670_v62, %v795_v2 }
 0x17e   : > { %vm2135_vm14 = vcmp.gt.f32.partialorder %v2119_v14, 0.0  ;;  %v2151_v21 = vmul.f32 0.1, %v2119_v14  ;;  %v909_v22 = vmul.f32 %v4702_v45, %v887_v13  ;;  %v2168_v23 = vsel %vm2136_vm13, %v2120_v6, %v2152_v1 }
 0x17f   : > { %2020 = vadd.xlane.f32.xlu0 %v2000_v20  ;;  %v2184_v32 = vmul.f32 %v4702_v45, %v2168_v23  ;;  %v951_v31 = vrot.slane %v4337_v54, 7  ;;  %v959_v34 = vrot.slane %v4350_v3, 7  ;;  %vm853_vm8 = vcmp.gt.f32.partialorder %v837_v39, 0.0 }
 0x180   : > { %v2167_v33 = vsel %vm2135_vm14, %v2119_v14, %v2151_v21  ;;  %v869_v61 = vmul.f32 0.1, %v837_v39  ;;  %v836_v30 = vadd.f32 %v4670_v62, %v794_v50  ;;  %v1134_v43 = vrot.slane %v4337_v54, 6 }
 0x181   : > { %v2183_v8 = vmul.f32 %v4702_v45, %v2167_v33  ;;  %2205 = vadd.xlane.f32.xlu1 %v2184_v32  ;;  %v968_v51 = vsel %vm962_vm1, %v951_v31, %v959_v34  ;;  %v976_v26 = vsel %vm962_vm1, %v959_v34, %v951_v31  ;;  %v1142_v44 = vrot.slane %v4350_v3, 6 }
 0x182   : > { %v885_v46 = vsel %vm853_vm8, %v837_v39, %v869_v61  ;;  %vm852_vm9 = vcmp.gt.f32.partialorder %v836_v30, 0.0  ;;  %v868_v47 = vmul.f32 0.1, %v836_v30  ;;  %v992_v42 = vadd.f32 %v4347_v60, %v968_v51 }
 0x183   : > { %2203 = vadd.xlane.f32.xlu0 %v2183_v8  ;;  %v908_v35 = vmul.f32 %v4702_v45, %v886_v5  ;;  %v907_v49 = vmul.f32 %v4702_v45, %v885_v46  ;;  %v991_v40 = vadd.f32 %v4332_v48, %v976_v26  ;;  %v1151_v53 = vsel %vm1145_vm3, %v1134_v43, %v1142_v44 }
 0x184   : > { %v884_v56 = vsel %vm852_vm9, %v836_v30, %v868_v47  ;;  %v1028_v7 = vadd.f32 %v4670_v62, %v992_v42  ;;  %v1175_v18 = vadd.f32 %v4347_v60, %v1151_v53  ;;  %v1159_v28 = vsel %vm1145_vm3, %v1142_v44, %v1134_v43 }
 0x185   : > { %936 = vadd.xlane.f32.xlu1 %v909_v22  ;;  %v906_v41 = vmul.f32 %v4702_v45, %v884_v56  ;;  %v1011_v58 = vsel %vm979_vm2, %v991_v40, 0.0  ;;  %v1174_v29 = vadd.f32 %v4332_v48, %v1159_v28  ;;  %v1317_v63 = vrot.slane %v4337_v54, 5 }
 0x186   : > { %vm1044_vm12 = vcmp.gt.f32.partialorder %v1028_v7, 0.0  ;;  %v1060_v0 = vmul.f32 0.1, %v1028_v7  ;;  %v1027_v27 = vadd.f32 %v4670_v62, %v1011_v58  ;;  %v1211_v6 = vadd.f32 %v4670_v62, %v1175_v18 }
 0x187   : > { %934 = vadd.xlane.f32.xlu0 %v908_v35  ;;  %v1194_v12 = vsel %vm1162_vm6, %v1174_v29, 0.0  ;;  %v1325_v15 = vrot.slane %v4350_v3, 5  ;;  %v1500_v16 = vrot.slane %v4337_v54, 4  ;;  %v1508_v14 = vrot.slane %v4350_v3, 4 }
 0x188   : > { %v1076_v17 = vsel %vm1044_vm12, %v1028_v7, %v1060_v0  ;;  %vm1043_vm7 = vcmp.gt.f32.partialorder %v1027_v27, 0.0  ;;  %v1059_v2 = vmul.f32 0.1, %v1027_v27  ;;  %vm1227_vm13 = vcmp.gt.f32.partialorder %v1211_v6, 0.0 }
 0x189   : > { %932 = vadd.xlane.f32.xlu1 %v907_v49  ;;  %v1243_v20 = vmul.f32 0.1, %v1211_v6  ;;  %v1210_v1 = vadd.f32 %v4670_v62, %v1194_v12  ;;  %v1334_v13 = vsel %vm1328_vm4, %v1317_v63, %v1325_v15  ;;  %v1342_v23 = vsel %vm1328_vm4, %v1325_v15, %v1317_v63 }
 0x18a   : > { %v1075_v21 = vsel %vm1043_vm7, %v1027_v27, %v1059_v2  ;;  %v1358_v22 = vadd.f32 %v4347_v60, %v1334_v13  ;;  %v1517_v5 = vsel %vm1511_vm5, %v1500_v16, %v1508_v14  ;;  %v1092_v39 = vmul.f32 %v4702_v45, %v1076_v17 }
 0x18b   : > { %930 = vadd.xlane.f32.xlu0 %v906_v41  ;;  %v1259_v50 = vsel %vm1227_vm13, %v1211_v6, %v1243_v20  ;;  %vm1226_vm14 = vcmp.gt.f32.partialorder %v1210_v1, 0.0  ;;  %v1242_v32 = vmul.f32 0.1, %v1210_v1  ;;  %v1091_v33 = vmul.f32 %v4702_v45, %v1075_v21 }
 0x18c   : > { %v1394_v31 = vadd.f32 %v4670_v62, %v1358_v22  ;;  %v1357_v34 = vadd.f32 %v4332_v48, %v1342_v23  ;;  %v1541_v8 = vadd.f32 %v4347_v60, %v1517_v5  ;;  %v1525_v30 = vsel %vm1511_vm5, %v1508_v14, %v1500_v16  ;;  %v4821_v47 = vpop.xlane.xlu1 %918 }
 0x18d   : > { %1119 = vadd.xlane.f32.xlu1 %v1092_v39  ;;  %v1258_v61 = vsel %vm1226_vm14, %v1210_v1, %v1242_v32  ;;  %v1683_v51 = vrot.slane %v4337_v54, 3  ;;  %v1691_v26 = vrot.slane %v4350_v3, 3  ;;  %v1275_v43 = vmul.f32 %v4702_v45, %v1259_v50  ;;  %v4829_v56 = vpop.xlane.xlu0 %914 }
 0x18e   : > { %vm1410_vm8 = vcmp.gt.f32.partialorder %v1394_v31, 0.0  ;;  %v1426_v44 = vmul.f32 0.1, %v1394_v31  ;;  %vm6239_vm9 = vcmp.ge.s32.totalorder %v4214_v25, 3  ;;  %v1577_v35 = vadd.f32 %v4670_v62, %v1541_v8 }
 0x18f   : > { %1117 = vadd.xlane.f32.xlu0 %v1091_v33  ;;  %v1377_v46 = vsel %vm6239_vm9, %v1357_v34, 0.0  ;;  %v1540_v49 = vadd.f32 %v4332_v48, %v1525_v30  ;;  %vm6240_vm12 = vcmp.lt.s32.totalorder %v4214_v25, 5  ;;  %v1274_v53 = vmul.f32 %v4702_v45, %v1258_v61 }
 0x190   : > { %v1393_v42 = vadd.f32 %v4670_v62, %v1377_v46  ;;  %v1700_v40 = vsel %vm6240_vm12, %v1683_v51, %v1691_v26  ;;  %v1442_v7 = vsel %vm1410_vm8, %v1394_v31, %v1426_v44  ;;  %vm6241_vm7 = vmmov %vm6240_vm12  ;;  %vm1593_vm14 = vcmp.gt.f32.partialorder %v1577_v35, 0.0  ;;  %v4838_v27 = vpop.xlane.xlu1 %920 }
 0x191   : > { %v1724_v18 = vadd.f32 %v4347_v60, %v1700_v40  ;;  %v1708_v28 = vsel %vm6241_vm7, %v1691_v26, %v1683_v51  ;;  %1302 = vadd.xlane.f32.xlu1 %v1275_v43  ;;  %v1609_v58 = vmul.f32 0.1, %v1577_v35  ;;  %vm6242_vm9 = vcmp.ge.s32.totalorder %v4214_v25, 4  ;;  %v4843_v14 = vpop.xlane.xlu0 %916 }
 0x192   : > { %vm1409_vm13 = vcmp.gt.f32.partialorder %v1393_v42, 0.0  ;;  %v1425_v41 = vmul.f32 0.1, %v1393_v42  ;;  %v1560_v29 = vsel %vm6242_vm9, %v1540_v49, 0.0  ;;  %v1458_v0 = vmul.f32 %v4702_v45, %v1442_v7 }
 0x193   : > { %1300 = vadd.xlane.f32.xlu0 %v1274_v53  ;;  %v1760_v63 = vadd.f32 %v4670_v62, %v1724_v18  ;;  %v1576_v12 = vadd.f32 %v4670_v62, %v1560_v29  ;;  %v1723_v15 = vadd.f32 %v4332_v48, %v1708_v28  ;;  %v1625_v17 = vsel %vm1593_vm14, %v1577_v35, %v1609_v58 }
 0x194   : > { %v1441_v6 = vsel %vm1409_vm13, %v1393_v42, %v1425_v41  ;;  %v1866_v2 = vrot.slane %v4337_v54, 2  ;;  %v1874_v21 = vrot.slane %v4350_v3, 2  ;;  %v2049_v22 = vrot.slane %v4337_v54, 1  ;;  %v4851_v5 = vpop.xlane.xlu1 %1103 }
 0x195   : > { %v1457_v16 = vmul.f32 %v4702_v45, %v1441_v6  ;;  %1485 = vadd.xlane.f32.xlu1 %v1458_v0  ;;  %vm1592_vm8 = vcmp.gt.f32.partialorder %v1576_v12, 0.0  ;;  %v1608_v20 = vmul.f32 0.1, %v1576_v12  ;;  %vm1776_vm12 = vcmp.gt.f32.partialorder %v1760_v63, 0.0  ;;  %v4856_v31 = vpop.xlane.xlu0 %1101 }
 0x196   : > { %v1792_v1 = vmul.f32 0.1, %v1760_v63  ;;  %v1743_v13 = vsel %vm1711_vm10, %v1723_v15, 0.0  ;;  %v1641_v23 = vmul.f32 %v4702_v45, %v1625_v17  ;;  %v2057_v32 = vrot.slane %v4350_v3, 1 }
 0x197   : > { %1483 = vadd.xlane.f32.xlu0 %v1457_v16  ;;  %v1624_v39 = vsel %vm1592_vm8, %v1576_v12, %v1608_v20  ;;  %v1759_v50 = vadd.f32 %v4670_v62, %v1743_v13  ;;  %vm6243_vm7 = vcmp.lt.s32.totalorder %v4214_v25, 6  ;;  %v950_v30 = vrot.slane %v4345_v59, 7 }
 0x198   : > { %v1640_v33 = vmul.f32 %v4702_v45, %v1624_v39  ;;  %v1808_v34 = vsel %vm1776_vm12, %v1760_v63, %v1792_v1  ;;  %v1883_v8 = vsel %vm6243_vm7, %v1866_v2, %v1874_v21  ;;  %vm6244_vm14 = vmmov %vm6243_vm7  ;;  %v2066_v26 = vsel %vm2060_vm11, %v2049_v22, %v2057_v32  ;;  %v4869_v44 = vpop.xlane.xlu1 %1286 }
 0x199   : > { %1668 = vadd.xlane.f32.xlu1 %v1641_v23  ;;  %v1824_v54 = vmul.f32 %v4702_v45, %v1808_v34  ;;  %vm1775_vm13 = vcmp.gt.f32.partialorder %v1759_v50, 0.0  ;;  %v1791_v61 = vmul.f32 0.1, %v1759_v50  ;;  %v1907_v51 = vadd.f32 %v4347_v60, %v1883_v8 }
 0x19a   : > { %v1891_v3 = vsel %vm6244_vm14, %v1874_v21, %v1866_v2  ;;  %v2074_v43 = vsel %vm2060_vm11, %v2057_v32, %v2049_v22  ;;  %v2090_v35 = vadd.f32 %v4347_v60, %v2066_v26  ;;  %v4875_v53 = vpop.xlane.xlu0 %1284  ;;  %v958_v18 = vrot.slane %v4362_v11, 7 }
 0x19b   : > { %1666 = vadd.xlane.f32.xlu0 %v1640_v33  ;;  %v1807_v46 = vsel %vm1775_vm13, %v1759_v50, %v1791_v61  ;;  %v1906_v42 = vadd.f32 %v4332_v48, %v1891_v3  ;;  %v2089_v49 = vadd.f32 %v4332_v48, %v2074_v43  ;;  %v1943_v7 = vadd.f32 %v4670_v62, %v1907_v51 }
 0x19c   : > { %v1823_v40 = vmul.f32 %v4702_v45, %v1807_v46  ;;  %v2126_v41 = vadd.f32 %v4670_v62, %v2090_v35  ;;  %v4886_v63 = vpop.xlane.xlu1 %1469  ;;  %v967_v6 = vsel %vm962_vm1, %v950_v30, %v958_v18  ;;  %v975_v12 = vsel %vm962_vm1, %v958_v18, %v950_v30 }
 0x19d   : > { %1851 = vadd.xlane.f32.xlu1 %v1824_v54  ;;  %v1926_v28 = vsel %vm1894_vm15, %v1906_v42, 0.0  ;;  %v2109_v58 = vsel %vm2077_vm0, %v2089_v49, 0.0  ;;  %vm1959_vm9 = vcmp.gt.f32.partialorder %v1943_v7, 0.0  ;;  %v1975_v48 = vmul.f32 0.1, %v1943_v7 }
 0x19e   : > { %v1942_v60 = vadd.f32 %v4670_v62, %v1926_v28  ;;  %v2125_v29 = vadd.f32 %v4670_v62, %v2109_v58  ;;  %vm2142_vm8 = vcmp.gt.f32.partialorder %v2126_v41, 0.0  ;;  %v2158_v0 = vmul.f32 0.1, %v2126_v41  ;;  %v4892_v17 = vpop.xlane.xlu0 %1467 }
 0x19f   : > { %1849 = vadd.xlane.f32.xlu0 %v1823_v40  ;;  %v1991_v15 = vsel %vm1959_vm9, %v1943_v7, %v1975_v48  ;;  %v990_v21 = vadd.f32 %v967_v6, %v4352_v4  ;;  %v989_v39 = vadd.f32 %v975_v12, %v4339_v55  ;;  %v1133_v50 = vrot.slane %v4345_v59, 6 }
 0x1a0   : > { %vm1958_vm12 = vcmp.gt.f32.partialorder %v1942_v60, 0.0  ;;  %v1974_v16 = vmul.f32 0.1, %v1942_v60  ;;  %v2007_v2 = vmul.f32 %v4702_v45, %v1991_v15  ;;  %vm2141_vm7 = vcmp.gt.f32.partialorder %v2125_v29, 0.0  ;;  %v4897_v23 = vpop.xlane.xlu1 %1652 }
 0x1a1   : > { %v2174_v1 = vsel %vm2142_vm8, %v2126_v41, %v2158_v0  ;;  %v2157_v13 = vmul.f32 0.1, %v2125_v29  ;;  %v1141_v32 = vrot.slane %v4362_v11, 6  ;;  %v1026_v8 = vadd.f32 %v4670_v62, %v990_v21 }
 0x1a2   : > { %v1990_v20 = vsel %vm1958_vm12, %v1942_v60, %v1974_v16  ;;  %2034 = vadd.xlane.f32.xlu1 %v2007_v2  ;;  %v4902_v34 = vpop.xlane.xlu0 %1650  ;;  %v2190_v54 = vmul.f32 %v4702_v45, %v2174_v1  ;;  %v1009_v61 = vsel %vm979_vm2, %v989_v39, 0.0  ;;  %v1316_v51 = vrot.slane %v4345_v59, 5 }
 0x1a3   : > { %v2006_v22 = vmul.f32 %v4702_v45, %v1990_v20  ;;  %v2173_v33 = vsel %vm2141_vm7, %v2125_v29, %v2157_v13  ;;  %v1150_v30 = vsel %vm1145_vm3, %v1133_v50, %v1141_v32  ;;  %vm1042_vm13 = vcmp.gt.f32.partialorder %v1026_v8, 0.0 }
 0x1a4   : > { %v1058_v3 = vmul.f32 0.1, %v1026_v8  ;;  %v1025_v26 = vadd.f32 %v4670_v62, %v1009_v61  ;;  %v1173_v43 = vadd.f32 %v1150_v30, %v4352_v4  ;;  %v2189_v46 = vmul.f32 %v4702_v45, %v2173_v33 }
 0x1a5   : > { %2032 = vadd.xlane.f32.xlu0 %v2006_v22  ;;  %v1158_v35 = vsel %vm1145_vm3, %v1141_v32, %v1133_v50  ;;  %v1324_v49 = vrot.slane %v4362_v11, 5  ;;  %vm6250_vm12 = vcmp.ge.s32.totalorder %v4214_v25, 3  ;;  %v1499_v33 = vrot.slane %v4345_v59, 4 }
 0x1a6   : > { %2217 = vadd.xlane.f32.xlu1 %v2190_v54  ;;  %v4914_v42 = vpop.xlane.xlu1 %1835  ;;  %v1074_v40 = vsel %vm1042_vm13, %v1026_v8, %v1058_v3  ;;  %vm1041_vm14 = vcmp.gt.f32.partialorder %v1025_v26, 0.0  ;;  %v1057_v7 = vmul.f32 0.1, %v1025_v26  ;;  %v1209_v41 = vadd.f32 %v4670_v62, %v1173_v43 }
 0x1a7   : > { %6245 = vst [vmem:[#allocation3_spill] sm:$0xff] %v4914_v42  ;;  %v4919_v18 = vpop.xlane.xlu0 %1833  ;;  %v1090_v28 = vmul.f32 %v4702_v45, %v1074_v40  ;;  %v1172_v58 = vadd.f32 %v1158_v35, %v4339_v55  ;;  %v1333_v60 = vsel %vm1328_vm4, %v1316_v51, %v1324_v49  ;;  %v1341_v29 = vsel %vm1328_vm4, %v1324_v49, %v1316_v51 }
 0x1a8   : > { %6246 = vst [vmem:[#allocation4_spill] sm:$0xff] %v4919_v18  ;;  %v1073_v48 = vsel %vm1041_vm14, %v1025_v26, %v1057_v7  ;;  %vm1225_vm9 = vcmp.gt.f32.partialorder %v1209_v41, 0.0  ;;  %v1241_v6 = vmul.f32 0.1, %v1209_v41  ;;  %v1356_v20 = vadd.f32 %v1333_v60, %v4352_v4 }
 0x1a9   : > { %2215 = vadd.xlane.f32.xlu0 %v2189_v46  ;;  %v1089_v0 = vmul.f32 %v4702_v45, %v1073_v48  ;;  %v1192_v15 = vsel %vm1162_vm6, %v1172_v58, 0.0  ;;  %v1355_v1 = vadd.f32 %v1341_v29, %v4339_v55  ;;  %v1507_v3 = vrot.slane %v4362_v11, 4 }
 0x1aa   : > { %1115 = vadd.xlane.f32.xlu1 %v1090_v28  ;;  %v4929_v12 = vpop.xlane.xlu1 %2018  ;;  %v1208_v16 = vadd.f32 %v4670_v62, %v1192_v15  ;;  %v1257_v13 = vsel %vm1225_vm9, %v1209_v41, %v1241_v6  ;;  %v1392_v39 = vadd.f32 %v4670_v62, %v1356_v20  ;;  %v1682_v43 = vrot.slane %v4345_v59, 3 }
 0x1ab   : > { %6247 = vst [vmem:[#allocation5_spill] sm:$0xff] %v4929_v12  ;;  %v4934_v2 = vpop.xlane.xlu0 %2016  ;;  %v1273_v21 = vmul.f32 %v4702_v45, %v1257_v13  ;;  %v1375_v32 = vsel %vm6250_vm12, %v1355_v1, 0.0  ;;  %v1690_v46 = vrot.slane %v4362_v11, 3  ;;  %v1516_v40 = vsel %vm1511_vm5, %v1499_v33, %v1507_v3 }
 0x1ac   : > { %6248 = vst [vmem:[#allocation6_spill] sm:$0xff] %v4934_v2  ;;  %vm1224_vm8 = vcmp.gt.f32.partialorder %v1208_v16, 0.0  ;;  %v1240_v22 = vmul.f32 0.1, %v1208_v16  ;;  %vm1408_vm7 = vcmp.gt.f32.partialorder %v1392_v39, 0.0  ;;  %v1391_v51 = vadd.f32 %v4670_v62, %v1375_v32 }
 0x1ad   : > { %1113 = vadd.xlane.f32.xlu0 %v1089_v0  ;;  %v1424_v54 = vmul.f32 0.1, %v1392_v39  ;;  %v1539_v28 = vadd.f32 %v1516_v40, %v4352_v4  ;;  %v1524_v41 = vsel %vm1511_vm5, %v1507_v3, %v1499_v33  ;;  %vm6252_vm14 = vcmp.lt.s32.totalorder %v4214_v25, 5 }
 0x1ae   : > { %v4940_v50 = vpop.xlane.xlu1 %2201  ;;  %1298 = vadd.xlane.f32.xlu1 %v1273_v21  ;;  %v1256_v8 = vsel %vm1224_vm8, %v1208_v16, %v1240_v22  ;;  %vm1407_vm13 = vcmp.gt.f32.partialorder %v1391_v51, 0.0  ;;  %v1423_v49 = vmul.f32 0.1, %v1391_v51  ;;  %v1699_v58 = vsel %vm6252_vm14, %v1682_v43, %v1690_v46  ;;  %vm6253_vm9 = vmmov %vm6252_vm14 }
 0x1af   : > { %6249 = vst [vmem:[#allocation7_spill] sm:$0xff] %v4940_v50  ;;  %v4945_v61 = vpop.xlane.xlu0 %2199  ;;  %v1272_v30 = vmul.f32 %v4702_v45, %v1256_v8  ;;  %v1440_v26 = vsel %vm1408_vm7, %v1392_v39, %v1424_v54  ;;  %v1865_v48 = vrot.slane %v4345_v59, 2  ;;  %v1538_v29 = vadd.f32 %v1524_v41, %v4339_v55 }
 0x1b0   : > { %6251 = vst [vmem:[#allocation8_spill] sm:$0xff] %v4945_v61  ;;  %v1456_v35 = vmul.f32 %v4702_v45, %v1440_v26  ;;  %v1439_v60 = vsel %vm1407_vm13, %v1391_v51, %v1423_v49  ;;  %v1722_v6 = vadd.f32 %v1699_v58, %v4352_v4  ;;  %v1707_v15 = vsel %vm6253_vm9, %v1690_v46, %v1682_v43 }
 0x1b1   : > { %1296 = vadd.xlane.f32.xlu0 %v1272_v30  ;;  %v1455_v16 = vmul.f32 %v4702_v45, %v1439_v60  ;;  %v1575_v20 = vadd.f32 %v4670_v62, %v1539_v28  ;;  %v1721_v1 = vadd.f32 %v1707_v15, %v4339_v55  ;;  %vm6254_vm8 = vcmp.ge.s32.totalorder %v4214_v25, 4 }
 0x1b2   : > { %v4955_v7 = vpop.xlane.xlu1 %1099  ;;  %1481 = vadd.xlane.f32.xlu1 %v1456_v35  ;;  %v1558_v13 = vsel %vm6254_vm8, %v1538_v29, 0.0  ;;  %v1758_v21 = vadd.f32 %v4670_v62, %v1722_v6  ;;  %v1873_v39 = vrot.slane %v4362_v11, 2  ;;  %vm6255_vm13 = vcmp.lt.s32.totalorder %v4214_v25, 6 }
 0x1b3   : > { %v4964_v0 = vpop.xlane.xlu0 %1097  ;;  %vm1591_vm12 = vcmp.gt.f32.partialorder %v1575_v20, 0.0  ;;  %v1607_v32 = vmul.f32 0.1, %v1575_v20  ;;  %v1574_v33 = vadd.f32 %v4670_v62, %v1558_v13  ;;  %v1741_v54 = vsel %vm1711_vm10, %v1721_v1, 0.0  ;;  %vm6256_vm8 = vmmov %vm6255_vm13 }
 0x1b4   : > { %vm1774_vm7 = vcmp.gt.f32.partialorder %v1758_v21, 0.0  ;;  %v1790_v8 = vmul.f32 0.1, %v1758_v21  ;;  %v1882_v51 = vsel %vm6255_vm13, %v1865_v48, %v1873_v39  ;;  %v1757_v43 = vadd.f32 %v4670_v62, %v1741_v54 }
 0x1b5   : > { %1479 = vadd.xlane.f32.xlu0 %v1455_v16  ;;  %v1623_v3 = vsel %vm1591_vm12, %v1575_v20, %v1607_v32  ;;  %vm1590_vm14 = vcmp.gt.f32.partialorder %v1574_v33, 0.0  ;;  %v1606_v26 = vmul.f32 0.1, %v1574_v33  ;;  %v1905_v35 = vadd.f32 %v1882_v51, %v4352_v4 }
 0x1b6   : > { %v4975_v22 = vpop.xlane.xlu1 %1282  ;;  %v1639_v46 = vmul.f32 %v4702_v45, %v1623_v3  ;;  %v2048_v40 = vrot.slane %v4345_v59, 1  ;;  %v1806_v41 = vsel %vm1774_vm7, %v1758_v21, %v1790_v8  ;;  %vm1773_vm9 = vcmp.gt.f32.partialorder %v1757_v43, 0.0 }
 0x1b7   : > { %v4981_v30 = vpop.xlane.xlu0 %1280  ;;  %v1622_v28 = vsel %vm1590_vm14, %v1574_v33, %v1606_v26  ;;  %v1789_v58 = vmul.f32 0.1, %v1757_v43  ;;  %v1941_v29 = vadd.f32 %v4670_v62, %v1905_v35  ;;  %v1890_v6 = vsel %vm6256_vm8, %v1873_v39, %v1865_v48 }
 0x1b8   : > { %1664 = vadd.xlane.f32.xlu1 %v1639_v46  ;;  %v1638_v60 = vmul.f32 %v4702_v45, %v1622_v28  ;;  %v1904_v20 = vadd.f32 %v1890_v6, %v4339_v55  ;;  %v2056_v1 = vrot.slane %v4362_v11, 1  ;;  %v1822_v59 = vmul.f32 %v4702_v45, %v1806_v41 }
 0x1b9   : > { %v1805_v16 = vsel %vm1773_vm9, %v1757_v43, %v1789_v58  ;;  %vm1957_vm12 = vcmp.gt.f32.partialorder %v1941_v29, 0.0  ;;  %v1973_v13 = vmul.f32 0.1, %v1941_v29  ;;  %v801_v32 = vadd.f32 %v4525_v9, %v4552_v52 }
 0x1ba   : > { %v4988_v49 = vpop.xlane.xlu1 %1465  ;;  %1662 = vadd.xlane.f32.xlu0 %v1638_v60  ;;  %v1821_v33 = vmul.f32 %v4702_v45, %v1805_v16  ;;  %v1924_v48 = vsel %vm1894_vm15, %v1904_v20, 0.0  ;;  %v2065_v39 = vsel %vm2060_vm11, %v2048_v40, %v2056_v1  ;;  %v2073_v11 = vsel %vm2060_vm11, %v2056_v1, %v2048_v40 }
 0x1bb   : > { %v4995_v15 = vpop.xlane.xlu0 %1463  ;;  %v1989_v8 = vsel %vm1957_vm12, %v1941_v29, %v1973_v13  ;;  %v1940_v54 = vadd.f32 %v4670_v62, %v1924_v48  ;;  %v2088_v51 = vadd.f32 %v2065_v39, %v4352_v4  ;;  %v2087_v3 = vadd.f32 %v2073_v11, %v4339_v55 }
 0x1bc   : > { %1847 = vadd.xlane.f32.xlu1 %v1822_v59  ;;  %v2005_v43 = vmul.f32 %v4702_v45, %v1989_v8  ;;  %v843_v46 = vadd.f32 %v4670_v62, %v801_v32  ;;  %v800_v35 = vadd.f32 %v4507_v36, %v4527_v10  ;;  %v799_v48 = vadd.f32 %v4532_v19, %v4555_v37 }
 0x1bd   : > { %vm1956_vm7 = vcmp.gt.f32.partialorder %v1940_v54, 0.0  ;;  %v1972_v40 = vmul.f32 0.1, %v1940_v54  ;;  %v2124_v28 = vadd.f32 %v4670_v62, %v2088_v51  ;;  %v2107_v41 = vsel %vm2077_vm0, %v2087_v3, 0.0 }
 0x1be   : > { %v5000_v21 = vpop.xlane.xlu1 %1648  ;;  %1845 = vadd.xlane.f32.xlu0 %v1821_v33  ;;  %v2123_v4 = vadd.f32 %v4670_v62, %v2107_v41  ;;  %v842_v58 = vadd.f32 %v4670_v62, %v800_v35  ;;  %v875_v6 = vmul.f32 0.1, %v843_v46  ;;  %vm859_vm9 = vcmp.gt.f32.partialorder %v843_v46, 0.0 }
 0x1bf   : > { %v5014_v26 = vpop.xlane.xlu0 %1646  ;;  %v1988_v60 = vsel %vm1956_vm7, %v1940_v54, %v1972_v40  ;;  %vm2140_vm13 = vcmp.gt.f32.partialorder %v2124_v28, 0.0  ;;  %v2156_v29 = vmul.f32 0.1, %v2124_v28  ;;  %v798_v8 = vadd.f32 %v4516_v57, %v4543_v38 }
 0x1c0   : > { %2030 = vadd.xlane.f32.xlu1 %v2005_v43  ;;  %v2004_v20 = vmul.f32 %v4702_v45, %v1988_v60  ;;  %vm2139_vm14 = vcmp.gt.f32.partialorder %v2123_v4, 0.0  ;;  %v2155_v1 = vmul.f32 0.1, %v2123_v4  ;;  %vm858_vm8 = vcmp.gt.f32.partialorder %v842_v58, 0.0 }
 0x1c1   : > { %v2172_v59 = vsel %vm2140_vm13, %v2124_v28, %v2156_v29  ;;  %v874_v13 = vmul.f32 0.1, %v842_v58  ;;  %v891_v11 = vsel %vm859_vm9, %v843_v46, %v875_v6  ;;  %v841_v43 = vadd.f32 %v4670_v62, %v799_v48 }
 0x1c2   : > { %2028 = vadd.xlane.f32.xlu0 %v2004_v20  ;;  %v2188_v32 = vmul.f32 %v4702_v45, %v2172_v59  ;;  %v2171_v33 = vsel %vm2139_vm14, %v2123_v4, %v2155_v1  ;;  %v953_v35 = vrot.slane %v4507_v36, 7  ;;  %v840_v40 = vadd.f32 %v4670_v62, %v798_v8 }
 0x1c3   : > { %v5024_v55 = vpop.xlane.xlu1 %1831  ;;  %v2187_v51 = vmul.f32 %v4702_v45, %v2171_v33  ;;  %v890_v3 = vsel %vm858_vm8, %v842_v58, %v874_v13  ;;  %v961_v28 = vrot.slane %v4525_v9, 7  ;;  %v1136_v41 = vrot.slane %v4507_v36, 6 }
 0x1c4   : > { %6257 = vst [vmem:[#allocation9_spill] sm:$0xff] %v5024_v55  ;;  %v5027_v16 = vpop.xlane.xlu0 %1829  ;;  %2213 = vadd.xlane.f32.xlu1 %v2188_v32  ;;  %v1144_v46 = vrot.slane %v4525_v9, 6  ;;  %v913_v4 = vmul.f32 %v4702_v45, %v891_v11  ;;  %vm857_vm12 = vcmp.gt.f32.partialorder %v841_v43, 0.0  ;;  %v873_v60 = vmul.f32 0.1, %v841_v43 }
 0x1c5   : > { %6258 = vst [vmem:[#allocation10_spill] sm:$0xff] %v5027_v16  ;;  %v1319_v58 = vrot.slane %v4507_v36, 5  ;;  %vm856_vm7 = vcmp.gt.f32.partialorder %v840_v40, 0.0  ;;  %v872_v6 = vmul.f32 0.1, %v840_v40  ;;  %v970_v20 = vsel %vm962_vm1, %v953_v35, %v961_v28 }
 0x1c6   : > { %2211 = vadd.xlane.f32.xlu0 %v2187_v51  ;;  %v1327_v59 = vrot.slane %v4525_v9, 5  ;;  %v912_v13 = vmul.f32 %v4702_v45, %v890_v3  ;;  %v889_v32 = vsel %vm857_vm12, %v841_v43, %v873_v60  ;;  %v996_v33 = vadd.f32 %v4552_v52, %v970_v20 }
 0x1c7   : > { %v5033_v39 = vpop.xlane.xlu1 %2014  ;;  %v978_v48 = vsel %vm962_vm1, %v961_v28, %v953_v35  ;;  %v888_v11 = vsel %vm856_vm7, %v840_v40, %v872_v6  ;;  %v1153_v51 = vsel %vm1145_vm3, %v1136_v41, %v1144_v46  ;;  %v911_v24 = vmul.f32 %v4702_v45, %v889_v32 }
 0x1c8   : > { %6259 = vst [vmem:[#allocation11_spill] sm:$0xff] %v5033_v39  ;;  %944 = vadd.xlane.f32.xlu1 %v913_v4  ;;  %v995_v8 = vadd.f32 %v4527_v10, %v978_v48  ;;  %v1032_v61 = vadd.f32 %v4670_v62, %v996_v33  ;;  %v1179_v4 = vadd.f32 %v4552_v52, %v1153_v51  ;;  %vm6263_vm7 = vcmp.ge.s32.totalorder %v4214_v25, 3 }
 0x1c9   : > { %v5037_v54 = vpop.xlane.xlu0 %2012  ;;  %v1161_v43 = vsel %vm1145_vm3, %v1144_v46, %v1136_v41  ;;  %v910_v35 = vmul.f32 %v4702_v45, %v888_v11  ;;  %v1336_v6 = vsel %vm1328_vm4, %v1319_v58, %v1327_v59  ;;  %v1344_v33 = vsel %vm1328_vm4, %v1327_v59, %v1319_v58 }
 0x1ca   : > { %6260 = vst [vmem:[#allocation12_spill] sm:$0xff] %v5037_v54  ;;  %942 = vadd.xlane.f32.xlu0 %v912_v13  ;;  %v1015_v40 = vsel %vm979_vm2, %v995_v8, 0.0  ;;  %v1178_v28 = vadd.f32 %v4527_v10, %v1161_v43  ;;  %vm1048_vm13 = vcmp.gt.f32.partialorder %v1032_v61, 0.0  ;;  %v1064_v20 = vmul.f32 0.1, %v1032_v61 }
 0x1cb   : > { %v5047_v29 = vpop.xlane.xlu1 %2197  ;;  %v1031_v13 = vadd.f32 %v4670_v62, %v1015_v40  ;;  %v1215_v32 = vadd.f32 %v4670_v62, %v1179_v4  ;;  %v1362_v46 = vadd.f32 %v4552_v52, %v1336_v6  ;;  %v1361_v6 = vadd.f32 %v4527_v10, %v1344_v33 }
 0x1cc   : > { %6261 = vst [vmem:[#allocation13_spill] sm:$0xff] %v5047_v29  ;;  %940 = vadd.xlane.f32.xlu1 %v911_v24  ;;  %v1198_v41 = vsel %vm1162_vm6, %v1178_v28, 0.0  ;;  %v1080_v48 = vsel %vm1048_vm13, %v1032_v61, %v1064_v20  ;;  %v1510_v33 = vrot.slane %v4525_v9, 4  ;;  %v960_v39 = vrot.slane %v4532_v19, 7 }
 0x1cd   : > { %v5052_v1 = vpop.xlane.xlu0 %2195  ;;  %vm1047_vm14 = vcmp.gt.f32.partialorder %v1031_v13, 0.0  ;;  %v1063_v11 = vmul.f32 0.1, %v1031_v13  ;;  %vm1231_vm9 = vcmp.gt.f32.partialorder %v1215_v32, 0.0  ;;  %v1096_v8 = vmul.f32 %v4702_v45, %v1080_v48 }
 0x1ce   : > { %6262 = vst [vmem:[#allocation14_spill] sm:$0xff] %v5052_v1  ;;  %938 = vadd.xlane.f32.xlu0 %v910_v35  ;;  %v1247_v51 = vmul.f32 0.1, %v1215_v32  ;;  %v1214_v4 = vadd.f32 %v4670_v62, %v1198_v41  ;;  %v1398_v43 = vadd.f32 %v4670_v62, %v1362_v46  ;;  %v1381_v41 = vsel %vm6263_vm7, %v1361_v6, 0.0 }
 0x1cf   : > { %v5065_v3 = vpop.xlane.xlu1 %928  ;;  %v1079_v28 = vsel %vm1047_vm14, %v1031_v13, %v1063_v11  ;;  %v5101_v13 = vld [vmem:[%s6217_s4] ss:$0 sm:$0xff]  ;;  %v1502_v46 = vrot.slane %v4507_v36, 4  ;;  %vm6264_vm14 = vcmp.lt.s32.totalorder %v4214_v25, 5  ;;  %v1143_v18 = vrot.slane %v4532_v19, 6 }
 0x1d0   : > { %1127 = vadd.xlane.f32.xlu1 %v1096_v8  ;;  %v1095_v61 = vmul.f32 %v4702_v45, %v1079_v28  ;;  %v1263_v58 = vsel %vm1231_vm9, %v1215_v32, %v1247_v51  ;;  %vm1230_vm8 = vcmp.gt.f32.partialorder %v1214_v4, 0.0  ;;  %v1246_v59 = vmul.f32 0.1, %v1214_v4  ;;  %vm6265_vm9 = vmmov %vm6264_vm14 }
 0x1d1   : > { %v5073_v60 = vpop.xlane.xlu0 %926  ;;  %v1279_v35 = vmul.f32 %v4702_v45, %v1263_v58  ;;  %vm1414_vm12 = vcmp.gt.f32.partialorder %v1398_v43, 0.0  ;;  %v1430_v20 = vmul.f32 0.1, %v1398_v43  ;;  %v1397_v32 = vadd.f32 %v5101_v13, %v1381_v41 }
 0x1d2   : > { %1125 = vadd.xlane.f32.xlu0 %v1095_v61  ;;  %v1262_v62 = vsel %vm1230_vm8, %v1214_v4, %v1246_v59  ;;  %v1519_v4 = vsel %vm1511_vm5, %v1502_v46, %v1510_v33  ;;  %v1527_v61 = vsel %vm1511_vm5, %v1510_v33, %v1502_v46  ;;  %v1685_v58 = vrot.slane %v4507_v36, 3 }
 0x1d3   : > { %v5084_v24 = vpop.xlane.xlu1 %924  ;;  %v1446_v8 = vsel %vm1414_vm12, %v1398_v43, %v1430_v20  ;;  %v1278_v51 = vmul.f32 %v4702_v45, %v1262_v62  ;;  %vm1413_vm13 = vcmp.gt.f32.partialorder %v1397_v32, 0.0  ;;  %v1429_v28 = vmul.f32 0.1, %v1397_v32 }
 0x1d4   : > { %1310 = vadd.xlane.f32.xlu1 %v1279_v35  ;;  %v1545_v6 = vadd.f32 %v4552_v52, %v1519_v4  ;;  %v1693_v59 = vrot.slane %v4525_v9, 3  ;;  %v1462_v43 = vmul.f32 %v4702_v45, %v1446_v8  ;;  %v1544_v20 = vadd.f32 %v4527_v10, %v1527_v61  ;;  %v5131_v45 = vld [vmem:[%s6218_s5] ss:$0 sm:$0xff] }
 0x1d5   : > { %v5089_v40 = vpop.xlane.xlu0 %922  ;;  %v1445_v35 = vsel %vm1413_vm13, %v1397_v32, %v1429_v28  ;;  %v1868_v33 = vrot.slane %v4507_v36, 2  ;;  %vm6266_vm8 = vcmp.ge.s32.totalorder %v4214_v25, 4 }
 0x1d6   : > { %1308 = vadd.xlane.f32.xlu0 %v1278_v51  ;;  %v1581_v1 = vadd.f32 %v5101_v13, %v1545_v6  ;;  %v1702_v4 = vsel %vm6264_vm14, %v1685_v58, %v1693_v59  ;;  %v1710_v46 = vsel %vm6265_vm9, %v1693_v59, %v1685_v58  ;;  %v1461_v32 = vmul.f32 %v5131_v45, %v1445_v35 }
 0x1d7   : > { %v5096_v48 = vpop.xlane.xlu1 %1111  ;;  %v1564_v8 = vsel %vm6266_vm8, %v1544_v20, 0.0  ;;  %v1728_v51 = vadd.f32 %v4552_v52, %v1702_v4  ;;  %v1727_v28 = vadd.f32 %v4527_v10, %v1710_v46  ;;  %v1876_v58 = vrot.slane %v4525_v9, 2 }
 0x1d8   : > { %1493 = vadd.xlane.f32.xlu1 %v1462_v43  ;;  %vm1597_vm12 = vcmp.gt.f32.partialorder %v1581_v1, 0.0  ;;  %v1613_v6 = vmul.f32 0.1, %v1581_v1  ;;  %v1580_v61 = vadd.f32 %v5101_v13, %v1564_v8  ;;  %vm6267_vm14 = vcmp.lt.s32.totalorder %v4214_v25, 6 }
 0x1d9   : > { %v5106_v11 = vpop.xlane.xlu0 %1109  ;;  %v1764_v43 = vadd.f32 %v5101_v13, %v1728_v51  ;;  %v1747_v35 = vsel %vm1711_vm10, %v1727_v28, 0.0  ;;  %v1885_v50 = vsel %vm6267_vm14, %v1868_v33, %v1876_v58  ;;  %vm6269_vm8 = vmmov %vm6267_vm14 }
 0x1da   : > { %1491 = vadd.xlane.f32.xlu0 %v1461_v32  ;;  %v1629_v20 = vsel %vm1597_vm12, %v1581_v1, %v1613_v6  ;;  %vm1596_vm7 = vcmp.gt.f32.partialorder %v1580_v61, 0.0  ;;  %v1612_v4 = vmul.f32 0.1, %v1580_v61  ;;  %v1763_v46 = vadd.f32 %v5101_v13, %v1747_v35 }
 0x1db   : > { %v5116_v41 = vpop.xlane.xlu1 %1294  ;;  %v1645_v54 = vmul.f32 %v5131_v45, %v1629_v20  ;;  %vm1780_vm13 = vcmp.gt.f32.partialorder %v1764_v43, 0.0  ;;  %v1796_v8 = vmul.f32 0.1, %v1764_v43  ;;  %v1911_v29 = vadd.f32 %v4552_v52, %v1885_v50 }
 0x1dc   : > { %v1628_v32 = vsel %vm1596_vm7, %v1580_v61, %v1612_v4  ;;  %vm1779_vm9 = vcmp.gt.f32.partialorder %v1763_v46, 0.0  ;;  %v1795_v51 = vmul.f32 0.1, %v1763_v46  ;;  %v1893_v35 = vsel %vm6269_vm8, %v1876_v58, %v1868_v33 }
 0x1dd   : > { %v5120_v62 = vpop.xlane.xlu0 %1292  ;;  %1676 = vadd.xlane.f32.xlu1 %v1645_v54  ;;  %v1644_v1 = vmul.f32 %v5131_v45, %v1628_v32  ;;  %v1812_v6 = vsel %vm1780_vm13, %v1764_v43, %v1796_v8  ;;  %v2051_v20 = vrot.slane %v4507_v36, 1  ;;  %v1947_v4 = vadd.f32 %v5101_v13, %v1911_v29 }
 0x1de   : > { %v1811_v61 = vsel %vm1779_vm9, %v1763_v46, %v1795_v51  ;;  %v1910_v50 = vadd.f32 %v4527_v10, %v1893_v35  ;;  %v1828_v54 = vmul.f32 %v5131_v45, %v1812_v6  ;;  %v2059_v32 = vrot.slane %v4525_v9, 1 }
 0x1df   : > { %v5140_v59 = vpop.xlane.xlu1 %1477  ;;  %1674 = vadd.xlane.f32.xlu0 %v1644_v1  ;;  %vm1963_vm12 = vcmp.gt.f32.partialorder %v1947_v4, 0.0  ;;  %v1979_v43 = vmul.f32 0.1, %v1947_v4  ;;  %v952_v36 = vrot.slane %v4516_v57, 7  ;;  %v1827_v46 = vmul.f32 %v5131_v45, %v1811_v61 }
 0x1e0   : > { %v1930_v33 = vsel %vm1894_vm15, %v1910_v50, 0.0  ;;  %v2068_v8 = vsel %vm2060_vm11, %v2051_v20, %v2059_v32  ;;  %v2076_v9 = vsel %vm2060_vm11, %v2059_v32, %v2051_v20 }
 0x1e1   : > { %v5145_v2 = vpop.xlane.xlu0 %1475  ;;  %1859 = vadd.xlane.f32.xlu1 %v1828_v54  ;;  %v1946_v29 = vadd.f32 %v5101_v13, %v1930_v33  ;;  %v1995_v1 = vsel %vm1963_vm12, %v1947_v4, %v1979_v43  ;;  %v2094_v6 = vadd.f32 %v4552_v52, %v2068_v8  ;;  %v2093_v35 = vadd.f32 %v4527_v10, %v2076_v9 }
 0x1e2   : > { %v969_v50 = vsel %vm962_vm1, %v952_v36, %v960_v39  ;;  %v2011_v61 = vmul.f32 %v5131_v45, %v1995_v1  ;;  %v977_v10 = vsel %vm962_vm1, %v960_v39, %v952_v36  ;;  %vm6279_vm12 = vcmp.lt.s32.totalorder %v4214_v25, 5 }
 0x1e3   : > { %v5152_v28 = vpop.xlane.xlu1 %1660  ;;  %1857 = vadd.xlane.f32.xlu0 %v1827_v46  ;;  %vm1962_vm7 = vcmp.gt.f32.partialorder %v1946_v29, 0.0  ;;  %v1978_v54 = vmul.f32 0.1, %v1946_v29  ;;  %v994_v33 = vadd.f32 %v969_v50, %v4555_v37  ;;  %v2130_v20 = vadd.f32 %v5101_v13, %v2094_v6 }
 0x1e4   : > { %6268 = vst [vmem:[#allocation15_spill] sm:$0xff] %v5152_v28  ;;  %v2113_v4 = vsel %vm2077_vm0, %v2093_v35, 0.0  ;;  %v993_v8 = vadd.f32 %v977_v10, %v4543_v38  ;;  %v1135_v35 = vrot.slane %v4516_v57, 6 }
 0x1e5   : > { %v5158_v12 = vpop.xlane.xlu0 %1658  ;;  %2042 = vadd.xlane.f32.xlu1 %v2011_v61  ;;  %v1994_v32 = vsel %vm1962_vm7, %v1946_v29, %v1978_v54  ;;  %v2129_v43 = vadd.f32 %v5101_v13, %v2113_v4  ;;  %v1030_v46 = vadd.f32 %v5101_v13, %v994_v33  ;;  %vm2146_vm13 = vcmp.gt.f32.partialorder %v2130_v20, 0.0 }
 0x1e6   : > { %6270 = vst [vmem:[#allocation16_spill] sm:$0xff] %v5158_v12  ;;  %v2010_v1 = vmul.f32 %v5131_v45, %v1994_v32  ;;  %v2162_v6 = vmul.f32 0.1, %v2130_v20  ;;  %v1013_v50 = vsel %vm979_vm2, %v993_v8, 0.0  ;;  %v1152_v61 = vsel %vm1145_vm3, %v1135_v35, %v1143_v18 }
 0x1e7   : > { %v5168_v58 = vpop.xlane.xlu1 %1843  ;;  %vm2145_vm14 = vcmp.gt.f32.partialorder %v2129_v43, 0.0  ;;  %v2161_v39 = vmul.f32 0.1, %v2129_v43  ;;  %vm1046_vm1 = vcmp.gt.f32.partialorder %v1030_v46, 0.0  ;;  %v1062_v36 = vmul.f32 0.1, %v1030_v46 }
 0x1e8   : > { %6271 = vst [vmem:[#allocation17_spill] sm:$0xff] %v5168_v58  ;;  %2040 = vadd.xlane.f32.xlu0 %v2010_v1  ;;  %v2178_v29 = vsel %vm2146_vm13, %v2130_v20, %v2162_v6  ;;  %v1326_v33 = vrot.slane %v4532_v19, 5  ;;  %v1029_v32 = vadd.f32 %v5101_v13, %v1013_v50  ;;  %v1177_v6 = vadd.f32 %v1152_v61, %v4555_v37 }
 0x1e9   : > { %v5176_v51 = vpop.xlane.xlu0 %1841  ;;  %v2194_v4 = vmul.f32 %v5131_v45, %v2178_v29  ;;  %v2177_v10 = vsel %vm2145_vm14, %v2129_v43, %v2161_v39  ;;  %v1078_v20 = vsel %vm1046_vm1, %v1030_v46, %v1062_v36  ;;  %v1160_v8 = vsel %vm1145_vm3, %v1143_v18, %v1135_v35  ;;  %vm6280_vm14 = vmmov %vm6279_vm12 }
 0x1ea   : > { %6272 = vst [vmem:[#allocation18_spill] sm:$0xff] %v5176_v51  ;;  %v2193_v1 = vmul.f32 %v5131_v45, %v2177_v10  ;;  %vm1045_vm2 = vcmp.gt.f32.partialorder %v1029_v32, 0.0  ;;  %v1176_v29 = vadd.f32 %v1160_v8, %v4543_v38  ;;  %v1692_v43 = vrot.slane %v4532_v19, 3 }
 0x1eb   : > { %v5190_v52 = vpop.xlane.xlu1 %2026  ;;  %2225 = vadd.xlane.f32.xlu1 %v2194_v4  ;;  %v1213_v39 = vadd.f32 %v5101_v13, %v1177_v6  ;;  %v1318_v50 = vrot.slane %v4516_v57, 5  ;;  %v1094_v36 = vmul.f32 %v5131_v45, %v1078_v20  ;;  %v1501_v35 = vrot.slane %v4516_v57, 4 }
 0x1ec   : > { %6273 = vst [vmem:[#allocation19_spill] sm:$0xff] %v5190_v52  ;;  %v1509_v52 = vrot.slane %v4532_v19, 4  ;;  %2223 = vadd.xlane.f32.xlu0 %v2193_v1  ;;  %v1196_v18 = vsel %vm1162_vm6, %v1176_v29, 0.0 }
 0x1ed   : > { %v5195_v9 = vpop.xlane.xlu0 %2024  ;;  %vm1229_vm3 = vcmp.gt.f32.partialorder %v1213_v39, 0.0  ;;  %v1245_v1 = vmul.f32 0.1, %v1213_v39  ;;  %v1212_v6 = vadd.f32 %v5101_v13, %v1196_v18  ;;  %v1335_v8 = vsel %vm1328_vm4, %v1318_v50, %v1326_v33 }
 0x1ee   : > { %6274 = vst [vmem:[#allocation20_spill] sm:$0xff] %v5195_v9  ;;  %v1526_v20 = vsel %vm1511_vm5, %v1509_v52, %v1501_v35 }
 0x1ef   : > { %v5203_v54 = vpop.xlane.xlu1 %2209  ;;  %1123 = vadd.xlane.f32.xlu1 %v1094_v36  ;;  %v1261_v29 = vsel %vm1229_vm3, %v1213_v39, %v1245_v1  ;;  %vm1228_vm6 = vcmp.gt.f32.partialorder %v1212_v6, 0.0  ;;  %v1684_v39 = vrot.slane %v4516_v57, 3 }
 0x1f0   : > { %6275 = vst [vmem:[#allocation21_spill] sm:$0xff] %v5203_v54  ;;  %v1061_v54 = vmul.f32 0.1, %v1029_v32  ;;  %v1277_v36 = vmul.f32 %v5131_v45, %v1261_v29 }
 0x1f1   : > { %v5208_v9 = vpop.xlane.xlu0 %2207  ;;  %v1709_v55 = vsel %vm6280_vm14, %v1692_v43, %v1684_v39  ;;  %vm3460_vm14 = vcmask 1047559  }
 0x1f2   : > { %6276 = vst [vmem:[#allocation22_spill] sm:$0xff] %v5208_v9  ;;  %v1077_v61 = vsel %vm1045_vm2, %v1029_v32, %v1061_v54  ;;  %v1343_v54 = vsel %vm1328_vm4, %v1326_v33, %v1318_v50  ;;  %v1518_v32 = vsel %vm1511_vm5, %v1501_v35, %v1509_v52  ;;  %v1360_v9 = vadd.f32 %v1335_v8, %v4555_v37 }
 0x1f3   : > { %v5219_v46 = vpop.xlane.xlu1 %1107  ;;  %v1093_v10 = vmul.f32 %v5131_v45, %v1077_v61  ;;  %v1244_v61 = vmul.f32 0.1, %v1212_v6  ;;  %v1359_v51 = vadd.f32 %v1343_v54, %v4543_v38  ;;  %v1543_v33 = vadd.f32 %v1518_v32, %v4555_v37  ;;  %1306 = vadd.xlane.f32.xlu1 %v1277_v36 }
 0x1f4   : > { %v1542_v50 = vadd.f32 %v1526_v20, %v4543_v38  ;;  %v1396_v52 = vadd.f32 %v5101_v13, %v1360_v9  ;;  %vm6277_vm4 = vcmp.ge.s32.totalorder %v4214_v25, 3  ;;  %vm6278_vm5 = vcmp.ge.s32.totalorder %v4214_v25, 4 }
 0x1f5   : > { %v5225_v4 = vpop.xlane.xlu0 %1105  ;;  %1121 = vadd.xlane.f32.xlu0 %v1093_v10  ;;  %v1260_v58 = vsel %vm1228_vm6, %v1212_v6, %v1244_v61  ;;  %v1379_v10 = vsel %vm6277_vm4, %v1359_v51, 0.0  ;;  %v1579_v1 = vadd.f32 %v5101_v13, %v1543_v33  ;;  %vm6281_vm2 = vcmp.lt.s32.totalorder %v4214_v25, 6 }
 0x1f6   : > { %v1276_v35 = vmul.f32 %v5131_v45, %v1260_v58  ;;  %v1562_v8 = vsel %vm6278_vm5, %v1542_v50, 0.0  ;;  %vm1412_vm9 = vcmp.gt.f32.partialorder %v1396_v52, 0.0  ;;  %v1428_v54 = vmul.f32 0.1, %v1396_v52  ;;  %vm6282_vm3 = vmmov %vm6281_vm2 }
 0x1f7   : > { %v5238_v18 = vpop.xlane.xlu1 %1290  ;;  %v1395_v32 = vadd.f32 %v5101_v13, %v1379_v10  ;;  %v1578_v6 = vadd.f32 %v5101_v13, %v1562_v8  ;;  %vm1595_vm8 = vcmp.gt.f32.partialorder %v1579_v1, 0.0  ;;  %v1611_v9 = vmul.f32 0.1, %v1579_v1 }
 0x1f8   : > { %v1701_v58 = vsel %vm6279_vm12, %v1684_v39, %v1692_v43  ;;  %v1444_v51 = vsel %vm1412_vm9, %v1396_v52, %v1428_v54  ;;  %v2058_v8 = vrot.slane %v4532_v19, 1  ;;  %vm3448_vm5 = vcmask 1041409  }
 0x1f9   : > { %v5244_v16 = vpop.xlane.xlu0 %1288  ;;  %1304 = vadd.xlane.f32.xlu0 %v1276_v35  ;;  %vm1411_vm7 = vcmp.gt.f32.partialorder %v1395_v32, 0.0  ;;  %v1427_v29 = vmul.f32 0.1, %v1395_v32  ;;  %vm1594_vm13 = vcmp.gt.f32.partialorder %v1578_v6, 0.0  ;;  %v1460_v36 = vmul.f32 %v5131_v45, %v1444_v51 }
 0x1fa   : > { %v1627_v33 = vsel %vm1595_vm8, %v1579_v1, %v1611_v9  ;;  %v1610_v50 = vmul.f32 0.1, %v1578_v6  ;;  %v1726_v10 = vadd.f32 %v1701_v58, %v4555_v37  ;;  %v1875_v35 = vrot.slane %v4532_v19, 2 }
 0x1fb   : > { %v1443_v42 = vsel %vm1411_vm7, %v1395_v32, %v1427_v29  ;;  %1489 = vadd.xlane.f32.xlu1 %v1460_v36  ;;  %v1725_v51 = vadd.f32 %v1709_v55, %v4543_v38  ;;  %v1643_v9 = vmul.f32 %v5131_v45, %v1627_v33  ;;  %v1867_v58 = vrot.slane %v4516_v57, 2 }
 0x1fc   : > { %v1459_v52 = vmul.f32 %v5131_v45, %v1443_v42  ;;  %v1626_v54 = vsel %vm1594_vm13, %v1578_v6, %v1610_v50  ;;  %v1762_v12 = vadd.f32 %v5101_v13, %v1726_v10  ;;  %v2050_v42 = vrot.slane %v4516_v57, 1 }
 0x1fd   : > { %v5258_v20 = vpop.xlane.xlu1 %1473  ;;  %v1745_v43 = vsel %vm1711_vm10, %v1725_v51, 0.0  ;;  %v1642_v39 = vmul.f32 %v5131_v45, %v1626_v54  ;;  %v1884_v32 = vsel %vm6281_vm2, %v1867_v58, %v1875_v35  ;;  %v1892_v6 = vsel %vm6282_vm3, %v1875_v35, %v1867_v58 }
 0x1fe   : > { %v5260_v61 = vpop.xlane.xlu0 %1471  ;;  %1487 = vadd.xlane.f32.xlu0 %v1459_v52  ;;  %vm1778_vm1 = vcmp.gt.f32.partialorder %v1762_v12, 0.0  ;;  %v1794_v19 = vmul.f32 0.1, %v1762_v12  ;;  %v1761_v55 = vadd.f32 %v5101_v13, %v1745_v43  ;;  %v1909_v36 = vadd.f32 %v1884_v32, %v4555_v37 }
 0x1ff   : > { %1672 = vadd.xlane.f32.xlu1 %v1643_v9  ;;  %v1908_v33 = vadd.f32 %v1892_v6, %v4543_v38  ;;  %v2067_v50 = vsel %vm2060_vm11, %v2050_v42, %v2058_v8  ;;  %v2075_v9 = vsel %vm2060_vm11, %v2058_v8, %v2050_v42  ;;  %vm3450_vm9 = vcmask 1042434  }
 0x200   : > { %v1810_v29 = vsel %vm1778_vm1, %v1762_v12, %v1794_v19  ;;  %vm1777_vm10 = vcmp.gt.f32.partialorder %v1761_v55, 0.0  ;;  %v1793_v10 = vmul.f32 0.1, %v1761_v55  ;;  %v2092_v52 = vadd.f32 %v2067_v50, %v4555_v37 }
 0x201   : > { %v5271_v1 = vpop.xlane.xlu1 %1656  ;;  %v1826_v35 = vmul.f32 %v5131_v45, %v1810_v29  ;;  %v1945_v12 = vadd.f32 %v5101_v13, %v1909_v36  ;;  %v1928_v51 = vsel %vm1894_vm15, %v1908_v33, 0.0  ;;  %v2091_v37 = vadd.f32 %v2075_v9, %v4543_v38 }
 0x202   : > { %v5275_v28 = vpop.xlane.xlu0 %1654  ;;  %1670 = vadd.xlane.f32.xlu0 %v1642_v39  ;;  %v1809_v58 = vsel %vm1777_vm10, %v1761_v55, %v1793_v10  ;;  %v1944_v19 = vadd.f32 %v5101_v13, %v1928_v51  ;;  %v2128_v43 = vadd.f32 %v5101_v13, %v2092_v52  ;;  %v4058_v9 = vmov 0  }
 0x203   : > { %1855 = vadd.xlane.f32.xlu1 %v1826_v35  ;;  %v1825_v39 = vmul.f32 %v5131_v45, %v1809_v58  ;;  %vm1961_vm6 = vcmp.gt.f32.partialorder %v1945_v12, 0.0  ;;  %v1977_v32 = vmul.f32 0.1, %v1945_v12  ;;  %v2111_v42 = vsel %vm2077_vm0, %v2091_v37, 0.0  ;;  %3989 = vset.pattern.permute.xlu0 %v4058_v9 }
 0x204   : > { %vm1960_vm4 = vcmp.gt.f32.partialorder %v1944_v19, 0.0  ;;  %v1976_v29 = vmul.f32 0.1, %v1944_v19  ;;  %vm2144_vm15 = vcmp.gt.f32.partialorder %v2128_v43, 0.0  ;;  %v2160_v36 = vmul.f32 0.1, %v2128_v43  ;;  %3988 = vset.pattern.permute.xlu1 %v4058_v9 }
 0x205   : > { %v5290_v57 = vpop.xlane.xlu1 %1839  ;;  %v1993_v8 = vsel %vm1961_vm6, %v1945_v12, %v1977_v32  ;;  %v2127_v50 = vadd.f32 %v5101_v13, %v2111_v42  ;;  %vm2879_vm0 = vcmask 130112   ;;  %vm3452_vm8 = vcmask 1043459  }
 0x206   : > { %v5293_v54 = vpop.xlane.xlu0 %1837  ;;  %1853 = vadd.xlane.f32.xlu0 %v1825_v39  ;;  %v2009_v38 = vmul.f32 %v5131_v45, %v1993_v8  ;;  %v1992_v33 = vsel %vm1960_vm4, %v1944_v19, %v1976_v29  ;;  %v2176_v52 = vsel %vm2144_vm15, %v2128_v43, %v2160_v36  ;;  %v5332_v8 = vstv %s780_s15 }
 0x207   : > { %v2008_v10 = vmul.f32 %v5131_v45, %v1992_v33  ;;  %vm2143_vm11 = vcmp.gt.f32.partialorder %v2127_v50, 0.0  ;;  %v2159_v35 = vmul.f32 0.1, %v2127_v50  ;;  %v2192_v58 = vmul.f32 %v5131_v45, %v2176_v52 }
 0x208   : > { %2038 = vadd.xlane.f32.xlu1 %v2009_v38  ;;  %v2230_v38 = vadd.f32 %v5332_v8, %v4821_v47  ;;  %vm3454_vm12 = vcmask 1044484   ;;  %vm3456_vm7 = vcmask 1045509   ;;  %vm3458_vm13 = vcmask 1046534  }
 0x209   : > { %v5305_v6 = vpop.xlane.xlu1 %2022  ;;  %v2175_v37 = vsel %vm2143_vm11, %v2127_v50, %v2159_v35  ;;  %v2228_v35 = vadd.f32 %v5332_v8, %v4829_v56  ;;  %v2263_v56 = vadd.f32 %v5332_v8, %v4869_v44  ;;  %vm3683_vm1 = vcmask 130048  }
 0x20a   : > { %2036 = vadd.xlane.f32.xlu0 %v2008_v10  ;;  %v2191_v19 = vmul.f32 %v5131_v45, %v2175_v37  ;;  %v2231_v10 = vadd.f32 %v5332_v8, %v4838_v27  ;;  %v2247_v37 = vadd.f32 %v5332_v8, %v4851_v5  ;;  %v2246_v27 = vadd.f32 %v5332_v8, %v4856_v31 }
 0x20b   : > { %v2279_v5 = vadd.f32 %v5332_v8, %v4886_v63  ;;  %v2278_v31 = vadd.f32 %v5332_v8, %v4892_v17  ;;  %v2244_v17 = vadd.f32 %v5332_v8, %v4964_v0  ;;  %v2276_v0 = vadd.f32 %v5332_v8, %v4995_v15 }
 0x20c   : > { %v5309_v55 = vpop.xlane.xlu0 %2020  ;;  %2221 = vadd.xlane.f32.xlu1 %v2192_v58  ;;  %v2229_v58 = vadd.f32 %v5332_v8, %v4843_v14  ;;  %v2262_v14 = vadd.f32 %v5332_v8, %v4875_v53  ;;  %v2234_v15 = vadd.f32 %v5332_v8, %v5073_v60  ;;  %v2235_v60 = vadd.f32 %v5332_v8, %v5065_v3 }
 0x20d   : > { %vm3685_vm2 = vcmask 261120   ;;  %vm3687_vm3 = vcmask 392192   ;;  %vm3690_vm10 = vcmask 654336   ;;  %vm6329_vm6 = vcmask 523264  }
 0x20e   : > { %v5314_v51 = vpop.xlane.xlu1 %2205  ;;  %2219 = vadd.xlane.f32.xlu0 %v2191_v19  ;;  %vm3692_vm4 = vcmask 785408   ;;  %vm3694_vm15 = vcmask 916480  }
 0x210   : > { %v5316_v12 = vpop.xlane.xlu0 %2203 }
 0x212   : > { %v5320_v13 = vpop.xlane.xlu1 %936 }
 0x214   : > { %v5322_v43 = vpop.xlane.xlu0 %934 }
 0x216   : > { %v5324_v39 = vpop.xlane.xlu1 %932 }
 0x218   : > { %v5326_v32 = vpop.xlane.xlu0 %930 }
 0x21a   : > { %v5328_v29 = vpop.xlane.xlu1 %1119 }
 0x21c   : > { %v5330_v36 = vpop.xlane.xlu0 %1117 }
 0x21d   : > { %2491 = vperm.xlu1 %3988, %v2230_v38  }
 0x21e   : > { %v5334_v42 = vpop.xlane.xlu1 %1302 }
 0x220   : > { %v5336_v45 = vpop.xlane.xlu0 %1300 }
 0x221   : > { %2494 = vperm.xlu1 %3988, %v2231_v10  }
 0x222   : > { %v5340_v33 = vpop.xlane.xlu1 %1485 }
 0x224   : > { %v5342_v50 = vpop.xlane.xlu0 %1483  ;;  %2485 = vperm.xlu0 %3989, %v2228_v35  }
 0x225   : > { %2488 = vperm.xlu1 %3988, %v2229_v58   ;;  %v2245_v58 = vadd.f32 %v5332_v8, %v4955_v7  ;;  %v2277_v7 = vadd.f32 %v5332_v8, %v4988_v49  ;;  %v2251_v49 = vadd.f32 %v5332_v8, %v5096_v48  ;;  %v2283_v48 = vadd.f32 %v5332_v8, %v5140_v59 }
 0x226   : > { %v5346_v52 = vpop.xlane.xlu1 %1668  ;;  %v2265_v59 = vadd.f32 %v5332_v8, %v5238_v18  ;;  %v2239_v18 = vadd.f32 %v5332_v8, %v5320_v13  ;;  %v2255_v13 = vadd.f32 %v5332_v8, %v5328_v29  ;;  %v2287_v29 = vadd.f32 %v5332_v8, %v5340_v33 }
 0x228   : > { %v5350_v9 = vpop.xlane.xlu0 %1666  ;;  %2542 = vperm.xlu0 %3989, %v2247_v37   ;;  %v2294_v37 = vadd.f32 %v5332_v8, %v4902_v34  ;;  %v2260_v34 = vadd.f32 %v5332_v8, %v4981_v30  ;;  %v2292_v30 = vadd.f32 %v5332_v8, %v5014_v26 }
 0x229   : > { %2539 = vperm.xlu1 %3988, %v2246_v27   ;;  %v2261_v27 = vadd.f32 %v5332_v8, %v4975_v22  ;;  %v2293_v22 = vadd.f32 %v5332_v8, %v5000_v21  ;;  %v2267_v21 = vadd.f32 %v5332_v8, %v5116_v41 }
 0x22a   : > { %v5354_v47 = vpop.xlane.xlu1 %1851 }
 0x22c   : > { %v5358_v19 = vpop.xlane.xlu0 %1849  ;;  %2590 = vperm.xlu0 %3989, %v2263_v56  }
 0x22d   : > { %2587 = vperm.xlu1 %3988, %v2262_v14  }
 0x22f   : > { %v5364_v38 = vpop.xlane.xlu1 %2034 }
 0x230   : > { %2638 = vperm.xlu0 %3989, %v2279_v5  }
 0x231   : > { %2635 = vperm.xlu1 %3988, %v2278_v31  }
 0x232   : > { %v5368_v10 = vpop.xlane.xlu0 %2032 }
 0x233   : > { %v5372_v35 = vpop.xlane.xlu1 %2217 }
 0x234   : > { %2536 = vperm.xlu0 %3989, %v2245_v58  }
 0x235   : > { %2683 = vperm.xlu1 %3988, %v2294_v37  }
 0x236   : > { %v5376_v44 = vpop.xlane.xlu0 %2215 }
 0x237   : > { %6283 = vst [vmem:[#allocation23_spill] sm:$0xff] %v5376_v44  ;;  %v5380_v53 = vpop.xlane.xlu1 %1115  ;;  %v6311_v44 = vld [vmem:[#allocation8_spill] sm:$0xff] }
 0x238   : > { %2584 = vperm.xlu0 %3989, %v2261_v27  }
 0x239   : > { %2533 = vperm.xlu1 %3988, %v2244_v17   ;;  %v2232_v17 = vadd.f32 %v5332_v8, %v5089_v40  ;;  %v2233_v40 = vadd.f32 %v5332_v8, %v5084_v24  ;;  %v2266_v24 = vadd.f32 %v5332_v8, %v5120_v62  ;;  %v2248_v62 = vadd.f32 %v5332_v8, %v5225_v4 }
 0x23a   : > { %v5384_v63 = vpop.xlane.xlu0 %1113  ;;  %v2280_v4 = vadd.f32 %v5332_v8, %v5260_v61 }
 0x23b   : > { %v5390_v56 = vpop.xlane.xlu1 %1298 }
 0x23c   : > { %2632 = vperm.xlu0 %3989, %v2277_v7   ;;  %v2249_v7 = vadd.f32 %v5332_v8, %v5219_v46  ;;  %v2281_v46 = vadd.f32 %v5332_v8, %v5258_v20  ;;  %v2237_v20 = vadd.f32 %v5332_v8, %v5324_v39  ;;  %v2271_v39 = vadd.f32 %v5332_v8, %v5334_v42 }
 0x23d   : > { %2581 = vperm.xlu1 %3988, %v2260_v34   ;;  %v2253_v42 = vadd.f32 %v5332_v8, %v5380_v53  ;;  %v2269_v33 = vadd.f32 %v5332_v8, %v5390_v56 }
 0x23e   : > { %v5394_v14 = vpop.xlane.xlu0 %1296 }
 0x23f   : > { %v5400_v5 = vpop.xlane.xlu1 %1481 }
 0x240   : > { %2680 = vperm.xlu0 %3989, %v2293_v22  }
 0x241   : > { %2629 = vperm.xlu1 %3988, %v2276_v0  }
 0x242   : > { %v5404_v31 = vpop.xlane.xlu0 %1479 }
 0x244   : > { %2554 = vperm.xlu0 %3989, %v2251_v49   ;;  %v2250_v49 = vadd.f32 %v5332_v8, %v5106_v11  ;;  %v2282_v11 = vadd.f32 %v5332_v8, %v5145_v2  ;;  %v2264_v2 = vadd.f32 %v5332_v8, %v5244_v16  ;;  %v2238_v16 = vadd.f32 %v5332_v8, %v5322_v43 }
 0x245   : > { %v5410_v58 = vpop.xlane.xlu1 %1664  ;;  %2677 = vperm.xlu1 %3988, %v2292_v30   ;;  %v2254_v43 = vadd.f32 %v5332_v8, %v5330_v36  ;;  %v2286_v36 = vadd.f32 %v5332_v8, %v5342_v50 }
 0x247   : > { %v5414_v37 = vpop.xlane.xlu0 %1662 }
 0x248   : > { %2602 = vperm.xlu0 %3989, %v2267_v21  }
 0x249   : > { %v5418_v27 = vpop.xlane.xlu1 %1847  ;;  %2503 = vperm.xlu1 %3988, %v2234_v15  }
 0x24b   : > { %v5422_v26 = vpop.xlane.xlu0 %1845 }
 0x24c   : > { %2650 = vperm.xlu0 %3989, %v2283_v48  }
 0x24d   : > { %v5426_v41 = vpop.xlane.xlu1 %2030  ;;  %2497 = vperm.xlu1 %3988, %v2232_v17  }
 0x24f   : > { %v5432_v34 = vpop.xlane.xlu0 %2028 }
 0x250   : > { %2548 = vperm.xlu0 %3989, %v2249_v7  }
 0x251   : > { %2506 = vperm.xlu1 %3988, %v2235_v60   ;;  %v5436_v22 = vpop.xlane.xlu1 %2213 }
 0x253   : > { %v5440_v0 = vpop.xlane.xlu0 %2211 }
 0x254   : > { %2596 = vperm.xlu0 %3989, %v2265_v59  }
 0x255   : > { %2500 = vperm.xlu1 %3988, %v2233_v40   ;;  %v945_v3 = vpop.xlane.xlu1 %944 }
 0x256   : > { %v2243_v56 = vadd.f32 %v5332_v8, %v945_v3 }
 0x257   : > { %v5446_v30 = vpop.xlane.xlu0 %942 }
 0x258   : > { %2644 = vperm.xlu0 %3989, %v2281_v46  }
 0x259   : > { %2551 = vperm.xlu1 %3988, %v2250_v49   ;;  %v941_v21 = vpop.xlane.xlu1 %940 }
 0x25b   : > { %v5452_v15 = vpop.xlane.xlu0 %938 }
 0x25c   : > { %2518 = vperm.xlu0 %3989, %v2239_v18  }
 0x25d   : > { %2599 = vperm.xlu1 %3988, %v2266_v24   ;;  %v1128_v48 = vpop.xlane.xlu1 %1127  ;;  %v2236_v24 = vadd.f32 %v5332_v8, %v5326_v32  ;;  %v2270_v32 = vadd.f32 %v5332_v8, %v5336_v45 }
 0x25e   : > { %v2259_v3 = vadd.f32 %v5332_v8, %v1128_v48  ;;  %v2284_v48 = vadd.f32 %v5332_v8, %v5404_v31  ;;  %v2240_v31 = vadd.f32 %v5332_v8, %v5452_v15 }
 0x25f   : > { %v5458_v17 = vpop.xlane.xlu0 %1125 }
 0x260   : > { %2512 = vperm.xlu0 %3989, %v2237_v20   ;;  %v2285_v20 = vadd.f32 %v5332_v8, %v5400_v5  ;;  %v2241_v5 = vadd.f32 %v5332_v8, %v941_v21  ;;  %v2268_v21 = vadd.f32 %v5332_v8, %v5394_v14 }
 0x261   : > { %2647 = vperm.xlu1 %3988, %v2282_v11   ;;  %v1311_v7 = vpop.xlane.xlu1 %1310 }
 0x263   : > { %v5464_v60 = vpop.xlane.xlu0 %1308 }
 0x264   : > { %2566 = vperm.xlu0 %3989, %v2255_v13   ;;  %v2274_v15 = vadd.f32 %v5332_v8, %v5464_v60 }
 0x265   : > { %2545 = vperm.xlu1 %3988, %v2248_v62   ;;  %v1494_v59 = vpop.xlane.xlu1 %1493 }
 0x266   : > { %v2291_v50 = vadd.f32 %v5332_v8, %v1494_v59 }
 0x267   : > { %v5470_v40 = vpop.xlane.xlu0 %1491 }
 0x268   : > { %2614 = vperm.xlu0 %3989, %v2271_v39  }
 0x269   : > { %2593 = vperm.xlu1 %3988, %v2264_v2  }
 0x26a   : > { %v5476_v46 = vpop.xlane.xlu1 %1676 }
 0x26c   : > { %2662 = vperm.xlu0 %3989, %v2287_v29   ;;  %v5480_v49 = vpop.xlane.xlu0 %1674 }
 0x26d   : > { %2641 = vperm.xlu1 %3988, %v2280_v4   ;;  %v2252_v4 = vadd.f32 %v5332_v8, %v5384_v63 }
 0x26e   : > { %v5484_v18 = vpop.xlane.xlu1 %1859 }
 0x270   : > { %2560 = vperm.xlu0 %3989, %v2253_v42   ;;  %v5488_v61 = vpop.xlane.xlu0 %1857  ;;  %v2275_v42 = vadd.f32 %v5332_v8, %v1311_v7  ;;  %v2242_v7 = vadd.f32 %v5332_v8, %v5446_v30  ;;  %v2258_v30 = vadd.f32 %v5332_v8, %v5458_v17 }
 0x271   : > { %2515 = vperm.xlu1 %3988, %v2238_v16   ;;  %6284 = vst [vmem:[#allocation24_spill] sm:$0xff] %v5488_v61 }
 0x272   : > { %v5492_v53 = vpop.xlane.xlu1 %2042 }
 0x274   : > { %2608 = vperm.xlu0 %3989, %v2269_v33  }
 0x275   : > { %2509 = vperm.xlu1 %3988, %v2236_v24   ;;  %v5498_v11 = vpop.xlane.xlu0 %2040 }
 0x276   : > { %6285 = vst [vmem:[#allocation25_spill] sm:$0xff] %v5498_v11  ;;  %v6304_v11 = vld [vmem:[#allocation13_spill] sm:$0xff] }
 0x278   : > { %2656 = vperm.xlu0 %3989, %v2285_v20   ;;  %v5501_v13 = vpop.xlane.xlu1 %2225 }
 0x279   : > { %2563 = vperm.xlu1 %3988, %v2254_v43   ;;  %6286 = vst [vmem:[#allocation26_spill] sm:$0xff] %v5501_v13  ;;  %v5505_v62 = vpop.xlane.xlu0 %2223 }
 0x27a   : > { %6287 = vst [vmem:[#allocation27_spill] sm:$0xff] %v5505_v62 }
 0x27c   : > { %2530 = vperm.xlu0 %3989, %v2243_v56   ;;  %v1124_v39 = vpop.xlane.xlu1 %1123 }
 0x27d   : > { %2611 = vperm.xlu1 %3988, %v2270_v32   ;;  %v2257_v63 = vadd.f32 %v5332_v8, %v1124_v39  ;;  %v2295_v39 = vadd.f32 %v5332_v8, %v4897_v23  ;;  %v6290_v23 = vld [vmem:[#allocation15_spill] sm:$0xff] }
 0x280   : > { %2524 = vperm.xlu0 %3989, %v2241_v5   ;;  %v1307_v29 = vpop.xlane.xlu1 %1306 }
 0x281   : > { %2659 = vperm.xlu1 %3988, %v2286_v36   ;;  %v2273_v59 = vadd.f32 %v5332_v8, %v1307_v29 }
 0x282   : > { %v1122_v2 = vpop.xlane.xlu0 %1121 }
 0x284   : > { %2578 = vperm.xlu0 %3989, %v2259_v3   ;;  %v2297_v3 = vadd.f32 %v5332_v8, %v5271_v1  ;;  %v2301_v1 = vadd.f32 %v5332_v8, %v5410_v58 }
 0x285   : > { %2557 = vperm.xlu1 %3988, %v2252_v4   ;;  %v2290_v4 = vadd.f32 %v5332_v8, %v5470_v40 }
 0x286   : > { %v1305_v45 = vpop.xlane.xlu0 %1304 }
 0x287   : > { %v2272_v40 = vadd.f32 %v5332_v8, %v1305_v45  ;;  %v2296_v45 = vadd.f32 %v5332_v8, %v5275_v28 }
 0x288   : > { %2626 = vperm.xlu0 %3989, %v2275_v42   ;;  %v1490_v16 = vpop.xlane.xlu1 %1489  ;;  %v2299_v42 = vadd.f32 %v5332_v8, %v6290_v23  ;;  %v6294_v23 = vld [vmem:[#allocation3_spill] sm:$0xff] }
 0x289   : > { %2605 = vperm.xlu1 %3988, %v2268_v21   ;;  %v2289_v56 = vadd.f32 %v5332_v8, %v1490_v16  ;;  %v2256_v16 = vadd.f32 %v5332_v8, %v1122_v2 }
 0x28b   : > { %v1488_v33 = vpop.xlane.xlu0 %1487 }
 0x28c   : > { %2674 = vperm.xlu0 %3989, %v2291_v50   ;;  %v1673_v24 = vpop.xlane.xlu1 %1672  ;;  %v2288_v2 = vadd.f32 %v5332_v8, %v1488_v33  ;;  %v6291_v33 = vld [vmem:[#allocation16_spill] sm:$0xff] }
 0x28d   : > { %2653 = vperm.xlu1 %3988, %v2284_v48   ;;  %v2305_v58 = vadd.f32 %v5332_v8, %v1673_v24  ;;  %v2298_v24 = vadd.f32 %v5332_v8, %v6291_v33 }
 0x28f   : > { %v5520_v20 = vpop.xlane.xlu0 %1670 }
 0x290   : > { %2572 = vperm.xlu0 %3989, %v2257_v63   ;;  %v5524_v14 = vpop.xlane.xlu1 %1855  ;;  %v2303_v63 = vadd.f32 %v5332_v8, %v5346_v52  ;;  %v2307_v52 = vadd.f32 %v5332_v8, %v5476_v46  ;;  %v2300_v46 = vadd.f32 %v5332_v8, %v5414_v37 }
 0x291   : > { %2527 = vperm.xlu1 %3988, %v2242_v7  }
 0x293   : > { %v5527_v43 = vpop.xlane.xlu0 %1853 }
 0x294   : > { %2620 = vperm.xlu0 %3989, %v2273_v59  }
 0x295   : > { %2521 = vperm.xlu1 %3988, %v2240_v31   ;;  %v5532_v32 = vpop.xlane.xlu1 %2038 }
 0x297   : > { %v5536_v5 = vpop.xlane.xlu0 %2036 }
 0x298   : > { %2668 = vperm.xlu0 %3989, %v2289_v56   ;;  %6288 = vst [vmem:[#allocation28_spill] sm:$0xff] %v5536_v5 }
 0x299   : > { %2575 = vperm.xlu1 %3988, %v2258_v30   ;;  %v5540_v36 = vpop.xlane.xlu1 %2221 }
 0x29b   : > { %v5548_v17 = vpop.xlane.xlu0 %2219 }
 0x29c   : > { %2686 = vperm.xlu0 %3989, %v2295_v39   ;;  %6289 = vst [vmem:[#allocation29_spill] sm:$0xff] %v5548_v17 }
 0x29d   : > { %2623 = vperm.xlu1 %3988, %v2274_v15   ;;  %v5546_v29 = vpop.permute.xlu1 %2491  ;;  %v6292_v15 = vld [vmem:[#allocation9_spill] sm:$0xff] }
 0x2a0   : > { %2692 = vperm.xlu0 %3989, %v2297_v3   ;;  %v2309_v3 = vadd.f32 %v5332_v8, %v6292_v15 }
 0x2a1   : > { %2671 = vperm.xlu1 %3988, %v2290_v4   ;;  %v5554_v21 = vpop.permute.xlu1 %2494 }
 0x2a3   : > { %v5556_v60 = vpop.permute.xlu0 %2485 }
 0x2a4   : > { %2698 = vperm.xlu0 %3989, %v2299_v42   ;;  %v2311_v42 = vadd.f32 %v5332_v8, %v6294_v23  ;;  %v2319_v23 = vadd.f32 %v5332_v8, %v5354_v47  ;;  %v2312_v47 = vadd.f32 %v5332_v8, %v5293_v54 }
 0x2a5   : > { %2569 = vperm.xlu1 %3988, %v2256_v16   ;;  %v5561_v50 = vpop.permute.xlu1 %2488 }
 0x2a7   : > { %v5563_v48 = vpop.permute.xlu0 %2542 }
 0x2a8   : > { %2704 = vperm.xlu0 %3989, %v2301_v1  }
 0x2a9   : > { %2617 = vperm.xlu1 %3988, %v2272_v40   ;;  %v5568_v7 = vpop.permute.xlu1 %2539  ;;  %v2302_v40 = vadd.f32 %v5332_v8, %v5350_v9 }
 0x2ab   : > { %v5570_v59 = vpop.permute.xlu0 %2590 }
 0x2ac   : > { %2710 = vperm.xlu0 %3989, %v2303_v63   ;;  %v2313_v63 = vadd.f32 %v5332_v8, %v5290_v57  ;;  %v2306_v57 = vadd.f32 %v5332_v8, %v5480_v49 }
 0x2ad   : > { %2665 = vperm.xlu1 %3988, %v2288_v2   ;;  %v5574_v31 = vpop.permute.xlu1 %2587 }
 0x2af   : > { %v5576_v56 = vpop.permute.xlu0 %2638 }
 0x2b0   : > { %2716 = vperm.xlu0 %3989, %v2305_v58   ;;  %v2304_v58 = vadd.f32 %v5332_v8, %v5520_v20 }
 0x2b1   : > { %2689 = vperm.xlu1 %3988, %v2296_v45   ;;  %v5582_v30 = vpop.permute.xlu1 %2635  ;;  %v6296_v45 = vld [vmem:[#allocation17_spill] sm:$0xff] }
 0x2b3   : > { %v5584_v39 = vpop.permute.xlu0 %2536 }
 0x2b4   : > { %2722 = vperm.xlu0 %3989, %v2307_v52   ;;  %v2315_v52 = vadd.f32 %v5332_v8, %v6296_v45 }
 0x2b5   : > { %2695 = vperm.xlu1 %3988, %v2298_v24   ;;  %v5590_v4 = vpop.permute.xlu1 %2683  ;;  %v2317_v24 = vadd.f32 %v5332_v8, %v5418_v27 }
 0x2b6   : > { %6293 = vst [vmem:[#allocation15_spill] sm:$0xff] %v5590_v4 }
 0x2b7   : > { %v5592_v28 = vpop.permute.xlu0 %2584 }
 0x2b8   : > { %2728 = vperm.xlu0 %3989, %v2309_v3   ;;  %v6298_v3 = vld [vmem:[#allocation10_spill] sm:$0xff] }
 0x2b9   : > { %2701 = vperm.xlu1 %3988, %v2300_v46   ;;  %v5598_v16 = vpop.permute.xlu1 %2533  ;;  %v2308_v46 = vadd.f32 %v5332_v8, %v6298_v3 }
 0x2bb   : > { %v5600_v1 = vpop.permute.xlu0 %2632 }
 0x2bc   : > { %2734 = vperm.xlu0 %3989, %v2311_v42  }
 0x2bd   : > { %2707 = vperm.xlu1 %3988, %v2302_v40   ;;  %v5606_v2 = vpop.permute.xlu1 %2581  ;;  %v6299_v40 = vld [vmem:[#allocation4_spill] sm:$0xff] }
 0x2be   : > { %v2310_v27 = vadd.f32 %v5332_v8, %v6299_v40 }
 0x2bf   : > { %v5608_v37 = vpop.permute.xlu0 %2680 }
 0x2c0   : > { %6295 = vst [vmem:[#allocation16_spill] sm:$0xff] %v5608_v37  ;;  %2740 = vperm.xlu0 %3989, %v2313_v63   ;;  %v2321_v63 = vadd.f32 %v5332_v8, %v5524_v14  ;;  %v2341_v37 = vadd.f32 %v5332_v8, %v6304_v11  ;;  %v2320_v11 = vadd.f32 %v5332_v8, %v5527_v43 }
 0x2c1   : > { %2713 = vperm.xlu1 %3988, %v2304_v58   ;;  %v5614_v33 = vpop.permute.xlu1 %2629  ;;  %v2345_v43 = vadd.f32 %v5332_v8, %v5314_v51  ;;  %v6309_v51 = vld [vmem:[#allocation14_spill] sm:$0xff] }
 0x2c3   : > { %v5616_v9 = vpop.permute.xlu0 %2554 }
 0x2c4   : > { %2746 = vperm.xlu0 %3989, %v2315_v52   ;;  %v6300_v52 = vld [vmem:[#allocation11_spill] sm:$0xff] }
 0x2c5   : > { %2719 = vperm.xlu1 %3988, %v2306_v57   ;;  %v5622_v15 = vpop.permute.xlu1 %2677  ;;  %v2325_v57 = vadd.f32 %v5332_v8, %v6300_v52 }
 0x2c6   : > { %6297 = vst [vmem:[#allocation9_spill] sm:$0xff] %v5622_v15  ;;  %v6310_v15 = vld [vmem:[#allocation21_spill] sm:$0xff] }
 0x2c7   : > { %v5624_v20 = vpop.permute.xlu0 %2602 }
 0x2c8   : > { %2752 = vperm.xlu0 %3989, %v2317_v24  }
 0x2c9   : > { %2725 = vperm.xlu1 %3988, %v2308_v46   ;;  %v5630_v42 = vpop.permute.xlu1 %2503  ;;  %v6301_v46 = vld [vmem:[#allocation18_spill] sm:$0xff] }
 0x2ca   : > { %v2314_v14 = vadd.f32 %v5332_v8, %v6301_v46 }
 0x2cb   : > { %v5632_v49 = vpop.permute.xlu0 %2650 }
 0x2cc   : > { %2758 = vperm.xlu0 %3989, %v2319_v23   ;;  %v6302_v23 = vld [vmem:[#allocation5_spill] sm:$0xff] }
 0x2cd   : > { %2731 = vperm.xlu1 %3988, %v2310_v27   ;;  %v5638_v58 = vpop.permute.xlu1 %2497  ;;  %v2327_v40 = vadd.f32 %v5332_v8, %v6302_v23 }
 0x2cf   : > { %v5640_v45 = vpop.permute.xlu0 %2548 }
 0x2d0   : > { %2764 = vperm.xlu0 %3989, %v2321_v63   ;;  %v6303_v63 = vlaneseq }
 0x2d1   : > { %2737 = vperm.xlu1 %3988, %v2312_v47   ;;  %v5646_v24 = vpop.permute.xlu1 %2506  ;;  %v2316_v47 = vadd.f32 %v5332_v8, %v5422_v26 }
 0x2d2   : > { %v2869_v62 = vand.u32 127, %v6303_v63  ;;  %v6305_v63 = vld [vmem:[#allocation7_spill] sm:$0xff] }
 0x2d3   : > { %v5648_v3 = vpop.permute.xlu0 %2596  ;;  %v2343_v26 = vadd.f32 %v5332_v8, %v6305_v63 }
 0x2d4   : > { %2776 = vperm.xlu0 %3989, %v2325_v57   ;;  %v2874_v52 = vadd.s32 4294967288, %v2869_v62 }
 0x2d5   : > { %2743 = vperm.xlu1 %3988, %v2314_v14   ;;  %v5654_v27 = vpop.permute.xlu1 %2500  ;;  %v2318_v14 = vadd.f32 %v5332_v8, %v5358_v19  ;;  %v2329_v19 = vadd.f32 %v5332_v8, %v5305_v6  ;;  %v6307_v6 = vld [vmem:[#allocation6_spill] sm:$0xff] }
 0x2d6   : > { %v5670_v23 = vsub.s32 %v2874_v52, %v4214_v25 }
 0x2d7   : > { %v5656_v54 = vpop.permute.xlu0 %2644 }
 0x2d8   : > { %2782 = vperm.xlu0 %3989, %v2327_v40   ;;  %v2897_v13 = vrot.slane %v5654_v27, %v5670_v23  ;;  %v2333_v27 = vadd.f32 %v5332_v8, %v5426_v41  ;;  %v2906_v41 = vrot.slane %v5646_v24, %v5670_v23  ;;  %v2344_v24 = vadd.f32 %v5332_v8, %v5316_v12 }
 0x2d9   : > { %2749 = vperm.xlu1 %3988, %v2316_v47   ;;  %v5663_v57 = vpop.permute.xlu1 %2551 }
 0x2db   : > { %v5665_v46 = vpop.permute.xlu0 %2518 }
 0x2dc   : > { %2824 = vperm.xlu0 %3989, %v2341_v37  }
 0x2dd   : > { %2755 = vperm.xlu1 %3988, %v2318_v14   ;;  %v5674_v40 = vpop.permute.xlu1 %2599  ;;  %v6306_v14 = vld [vmem:[#allocation12_spill] sm:$0xff] }
 0x2de   : > { %v2324_v63 = vadd.f32 %v5332_v8, %v6306_v14  ;;  %v6308_v14 = vld [vmem:[#allocation19_spill] sm:$0xff] }
 0x2df   : > { %v5676_v4 = vpop.permute.xlu0 %2512  ;;  %v2331_v17 = vadd.f32 %v5332_v8, %v6308_v14 }
 0x2e0   : > { %2830 = vperm.xlu0 %3989, %v2343_v26   ;;  %v6312_v12 = vrot.slane %v5676_v4, %v5670_v23 }
 0x2e1   : > { %2761 = vperm.xlu1 %3988, %v2320_v11   ;;  %v5684_v37 = vpop.permute.xlu1 %2647  ;;  %v2326_v11 = vadd.f32 %v5332_v8, %v6307_v6  ;;  %v5713_v6 = vsub.s32 %v2869_v62, %v4214_v25  ;;  %v2888_v62 = vrot.slane %v5554_v21, %v5670_v23 }
 0x2e3   : > { %v5686_v52 = vpop.permute.xlu0 %2566 }
 0x2e4   : > { %2788 = vperm.xlu0 %3989, %v2329_v19  }
 0x2e5   : > { %2773 = vperm.xlu1 %3988, %v2324_v63   ;;  %v5694_v26 = vpop.permute.xlu1 %2545  ;;  %v2340_v63 = vadd.f32 %v5332_v8, %v6309_v51 }
 0x2e7   : > { %v5696_v47 = vpop.permute.xlu0 %2614 }
 0x2e8   : > { %2836 = vperm.xlu0 %3989, %v2345_v43   ;;  %v2347_v43 = vadd.f32 %v5332_v8, %v6310_v15  ;;  %v2873_v15 = vrot.slane %v5556_v60, %v5713_v6 }
 0x2e9   : > { %2779 = vperm.xlu1 %3988, %v2326_v11   ;;  %v5704_v19 = vpop.permute.xlu1 %2593  ;;  %v2878_v11 = vrot.slane %v5561_v50, %v5670_v23 }
 0x2eb   : > { %v5706_v61 = vpop.permute.xlu0 %2662  ;;  %v2880_v21 = vsel %vm2879_vm0, %v2878_v11, %v2873_v15  ;;  %v2349_v11 = vadd.f32 %v5332_v8, %v5436_v22 }
 0x2ec   : > { %2794 = vperm.xlu0 %3989, %v2331_v17   ;;  %v2342_v17 = vadd.f32 %v5332_v8, %v6311_v44  ;;  %v2884_v44 = vrot.slane %v5546_v29, %v5713_v6 }
 0x2ed   : > { %2821 = vperm.xlu1 %3988, %v2340_v63   ;;  %v5719_v14 = vpop.permute.xlu1 %2641  ;;  %v2893_v63 = vrot.slane %v5638_v58, %v5713_v6 }
 0x2ee   : > { %v2889_v58 = vsel %vm2879_vm0, %v2888_v62, %v2884_v44 }
 0x2ef   : > { %v5723_v51 = vpop.permute.xlu0 %2560  ;;  %v2898_v60 = vsel %vm2879_vm0, %v2897_v13, %v2893_v63  ;;  %v2902_v13 = vrot.slane %v5630_v42, %v5713_v6  ;;  %v2924_v42 = vrot.slane %v5665_v46, %v5670_v23 }
 0x2f0   : > { %2842 = vperm.xlu0 %3989, %v2347_v43   ;;  %v2328_v43 = vadd.f32 %v5332_v8, %v5309_v55 }
 0x2f1   : > { %2827 = vperm.xlu1 %3988, %v2342_v17   ;;  %v2516_v5 = vpop.permute.xlu1 %2515  ;;  %v3449_v17 = vsel %vm3448_vm5, %v2889_v58, %v2880_v21  ;;  %v2907_v22 = vsel %vm2879_vm0, %v2906_v41, %v2902_v13  ;;  %v6313_v13 = vld [vmem:[#allocation20_spill] sm:$0xff] }
 0x2f2   : > { %v3451_v15 = vsel %vm3450_vm9, %v2898_v60, %v3449_v17  ;;  %v2920_v55 = vrot.slane %v2516_v5, %v5713_v6  ;;  %v2335_v60 = vadd.f32 %v5332_v8, %v5364_v38  ;;  %v2330_v4 = vadd.f32 %v5332_v8, %v6313_v13 }
 0x2f3   : > { %v5741_v50 = vpop.permute.xlu0 %2608  ;;  %v3453_v5 = vsel %vm3452_vm8, %v2907_v22, %v3451_v15  ;;  %v6314_v38 = vrot.slane %v5686_v52, %v5670_v23  ;;  %v2332_v22 = vadd.f32 %v5332_v8, %v5432_v34  ;;  %v2348_v52 = vadd.f32 %v5332_v8, %v5440_v0 }
 0x2f4   : > { %v3059_v29 = vrot.slane %v5741_v50, %v5670_v23  ;;  %2800 = vperm.xlu0 %3989, %v2333_v27   ;;  %v5811_v34 = vadd.f32 %v5332_v8, %v5484_v18  ;;  %v2951_v0 = vrot.slane %v5584_v39, %v5670_v23  ;;  %v2969_v18 = vrot.slane %v5640_v45, %v5670_v23 }
 0x2f5   : > { %2785 = vperm.xlu1 %3988, %v2328_v43   ;;  %v2510_v62 = vpop.permute.xlu1 %2509  ;;  %v2925_v43 = vsel %vm2879_vm0, %v2924_v42, %v2920_v55  ;;  %v2947_v42 = vrot.slane %v5598_v16, %v5713_v6  ;;  %v2337_v16 = vadd.f32 %v5332_v8, %v5532_v32  ;;  %v2353_v39 = vadd.f32 %v5332_v8, %v5540_v36 }
 0x2f6   : > { %v2911_v63 = vrot.slane %v2510_v62, %v5713_v6  ;;  %v6315_v62 = vld [vmem:[#allocation22_spill] sm:$0xff]  ;;  %v3037_v13 = vrot.slane %v5704_v19, %v5713_v6 }
 0x2f7   : > { %v5760_v27 = vpop.permute.xlu0 %2656 }
 0x2f8   : > { %v3131_v44 = vrot.slane %v5760_v27, %v5670_v23  ;;  %2848 = vperm.xlu0 %3989, %v2349_v11   ;;  %v2916_v21 = vsel %vm2879_vm0, %v6312_v12, %v2911_v63  ;;  %v2351_v63 = vadd.f32 %v5332_v8, %v5372_v35  ;;  %v2956_v12 = vrot.slane %v5568_v7, %v5713_v6 }
 0x2f9   : > { %v3455_v58 = vsel %vm3454_vm12, %v2916_v21, %v3453_v5  ;;  %2833 = vperm.xlu1 %3988, %v2344_v24   ;;  %v2564_v46 = vpop.permute.xlu1 %2563  ;;  %v2346_v24 = vadd.f32 %v5332_v8, %v6315_v62  ;;  %v2965_v21 = vrot.slane %v5694_v26, %v5713_v6  ;;  %v2960_v26 = vrot.slane %v5563_v48, %v5670_v23 }
 0x2fa   : > { %v2992_v41 = vrot.slane %v2564_v46, %v5713_v6  ;;  %v5780_v17 = vsel %vm3456_vm7, %v2925_v43, %v3455_v58  ;;  %v3028_v43 = vrot.slane %v5574_v31, %v5713_v6  ;;  %v6316_v58 = vrot.slane %v5696_v47, %v5670_v23 }
 0x2fb   : > { %v5777_v11 = vpop.permute.xlu0 %2530  ;;  %v3032_v46 = vrot.slane %v5570_v59, %v5670_v23  ;;  %v2952_v48 = vsel %vm2879_vm0, %v2951_v0, %v2947_v42  ;;  %v3019_v31 = vrot.slane %v5606_v2, %v5713_v6  ;;  %v2961_v45 = vsel %vm2879_vm0, %v2960_v26, %v2956_v12 }
 0x2fc   : > { %v2942_v15 = vrot.slane %v5777_v11, %v5670_v23  ;;  %2806 = vperm.xlu0 %3989, %v2335_v60   ;;  %v5790_v55 = vsel %vm2879_vm0, %v6314_v38, %v2992_v41  ;;  %v2970_v47 = vsel %vm2879_vm0, %v2969_v18, %v2965_v21  ;;  %v3104_v59 = vrot.slane %v5576_v56, %v5670_v23  ;;  %v6323_v11 = vld [vmem:[#allocation9_spill] sm:$0xff] }
 0x2fd   : > { %2791 = vperm.xlu1 %3988, %v2330_v4   ;;  %v2612_v5 = vpop.permute.xlu1 %2611  ;;  %v3023_v38 = vrot.slane %v5592_v28, %v5670_v23  ;;  %v2974_v2 = vrot.slane %v5663_v57, %v5713_v6  ;;  %v3462_v19 = vsel %vm3448_vm5, %v2961_v45, %v2952_v48  ;;  %v6317_v56 = vrot.slane %v5706_v61, %v5670_v23 }
 0x2fe   : > { %v3064_v60 = vrot.slane %v2612_v5, %v5713_v6  ;;  %v3091_v57 = vrot.slane %v5614_v33, %v5713_v6  ;;  %v2978_v5 = vrot.slane %v5616_v9, %v5670_v23  ;;  %v3463_v12 = vsel %vm3450_vm9, %v2970_v47, %v3462_v19 }
 0x2ff   : > { %v5807_v35 = vpop.permute.xlu0 %2524  ;;  %v3024_v28 = vsel %vm2879_vm0, %v3023_v38, %v3019_v31  ;;  %v3109_v61 = vrot.slane %v5719_v14, %v5713_v6  ;;  %v3095_v33 = vrot.slane %v5600_v1, %v5670_v23  ;;  %v3113_v14 = vrot.slane %v5656_v54, %v5670_v23 }
 0x300   : > { %v2933_v7 = vrot.slane %v5807_v35, %v5670_v23  ;;  %2854 = vperm.xlu0 %3989, %v2351_v63   ;;  %v5829_v32 = vsel %vm2879_vm0, %v6316_v58, %v3064_v60  ;;  %v3041_v63 = vrot.slane %v5648_v3, %v5670_v23  ;;  %v3100_v3 = vrot.slane %v5582_v30, %v5713_v6  ;;  %v6325_v35 = vld [vmem:[#allocation15_spill] sm:$0xff] }
 0x301   : > { %2839 = vperm.xlu1 %3988, %v2346_v24   ;;  %v2660_v41 = vpop.permute.xlu1 %2659  ;;  %v3033_v24 = vsel %vm2879_vm0, %v3032_v46, %v3028_v43  ;;  %v2979_v9 = vsel %vm2879_vm0, %v2978_v5, %v2974_v2  ;;  %v6318_v18 = vrot.slane %v5723_v51, %v5670_v23  ;;  %v3096_v58 = vsel %vm2879_vm0, %v3095_v33, %v3091_v57  ;;  %v6320_v57 = vld [vmem:[#allocation26_spill] sm:$0xff] }
 0x302   : > { %v3136_v4 = vrot.slane %v2660_v41, %v5713_v6  ;;  %v3042_v60 = vsel %vm2879_vm0, %v3041_v63, %v3037_v13  ;;  %v3469_v26 = vsel %vm3448_vm5, %v3033_v24, %v3024_v28  ;;  %v3464_v43 = vsel %vm3452_vm8, %v2979_v9, %v3463_v12 }
 0x303   : > { %v5843_v36 = vpop.permute.xlu0 %2578  ;;  %v3470_v46 = vsel %vm3450_vm9, %v3042_v60, %v3469_v26  ;;  %v2334_v54 = vadd.f32 %v5332_v8, %v5368_v10  ;;  %v3114_v31 = vsel %vm2879_vm0, %v3113_v14, %v3109_v61  ;;  %v6321_v61 = vld [vmem:[#allocation28_spill] sm:$0xff]  ;;  %v6322_v26 = vld [vmem:[#allocation29_spill] sm:$0xff] }
 0x304   : > { %v3014_v62 = vrot.slane %v5843_v36, %v5670_v23  ;;  %2812 = vperm.xlu0 %3989, %v2337_v16   ;;  %v3141_v42 = vsel %vm2879_vm0, %v6317_v56, %v3136_v4 }
 0x305   : > { %2797 = vperm.xlu1 %3988, %v2332_v22   ;;  %v2558_v21 = vpop.permute.xlu1 %2557  ;;  %v3046_v22 = vrot.slane %v5674_v40, %v5713_v6  ;;  %v3050_v40 = vrot.slane %v5624_v20, %v5670_v23  ;;  %v3105_v20 = vsel %vm2879_vm0, %v3104_v59, %v3100_v3  ;;  %v2339_v59 = vadd.f32 %v5332_v8, %v5492_v53 }
 0x306   : > { %v2983_v16 = vrot.slane %v2558_v21, %v5713_v6  ;;  %v3476_v13 = vsel %vm3448_vm5, %v3105_v20, %v3096_v58 }
 0x307   : > { %v5873_v0 = vpop.permute.xlu0 %2626  ;;  %v3051_v47 = vsel %vm2879_vm0, %v3050_v40, %v3046_v22  ;;  %v3477_v38 = vsel %vm3450_vm9, %v3114_v31, %v3476_v13 }
 0x308   : > { %v3086_v30 = vrot.slane %v5873_v0, %v5670_v23  ;;  %2860 = vperm.xlu0 %3989, %v2353_v39   ;;  %v2988_v1 = vsel %vm2879_vm0, %v6318_v18, %v2983_v16  ;;  %v3471_v4 = vsel %vm3452_vm8, %v3051_v47, %v3470_v46  ;;  %v2336_v16 = vadd.f32 %v5332_v8, %v6321_v61 }
 0x309   : > { %v3465_v39 = vsel %vm3454_vm12, %v2988_v1, %v3464_v43  ;;  %2845 = vperm.xlu1 %3988, %v2348_v52   ;;  %v2606_v48 = vpop.permute.xlu1 %2605  ;;  %v3118_v52 = vrot.slane %v5684_v37, %v5713_v6  ;;  %v3122_v37 = vrot.slane %v5632_v49, %v5670_v23 }
 0x30a   : > { %v3055_v51 = vrot.slane %v2606_v48, %v5713_v6  ;;  %v5903_v45 = vsel %vm3456_vm7, %v5790_v55, %v3465_v39  ;;  %v6324_v39 = vld [vmem:[#allocation24_spill] sm:$0xff] }
 0x30b   : > { %v5899_v41 = vpop.permute.xlu0 %2674  ;;  %v3123_v63 = vsel %vm2879_vm0, %v3122_v37, %v3118_v52  ;;  %v2322_v48 = vadd.f32 %v5332_v8, %v6324_v39 }
 0x30c   : > { %v3158_v10 = vrot.slane %v5899_v41, %v5670_v23  ;;  %2770 = vperm.xlu0 %3989, %v5811_v34   ;;  %v3060_v55 = vsel %vm2879_vm0, %v3059_v29, %v3055_v51  ;;  %v6319_v29 = vld [vmem:[#allocation23_spill] sm:$0xff]  ;;  %v3478_v56 = vsel %vm3452_vm8, %v3123_v63, %v3477_v38 }
 0x30d   : > { %v3472_v2 = vsel %vm3454_vm12, %v3060_v55, %v3471_v4  ;;  %2803 = vperm.xlu1 %3988, %v2334_v54   ;;  %v2654_v34 = vpop.permute.xlu1 %2653  ;;  %v2350_v53 = vadd.f32 %v5332_v8, %v6319_v29  ;;  %v3172_v54 = vrot.slane %v6325_v35, %v5713_v6 }
 0x30e   : > { %v3127_v24 = vrot.slane %v2654_v34, %v5713_v6  ;;  %v5929_v50 = vsel %vm3456_vm7, %v5829_v32, %v3472_v2  ;;  %v2355_v32 = vadd.f32 %v5332_v8, %v6320_v57  ;;  %v4059_v57 = vmov 1983009808  }
 0x30f   : > { %v5925_v19 = vpop.permute.xlu0 %2572 }
 0x310   : > { %v3005_v49 = vrot.slane %v5925_v19, %v5670_v23  ;;  %2818 = vperm.xlu0 %3989, %v2339_v59   ;;  %v3132_v28 = vsel %vm2879_vm0, %v3131_v44, %v3127_v24  ;;  %v6327_v59 = vld [vmem:[#allocation25_spill] sm:$0xff]  ;;  %v6328_v24 = vld [vmem:[#allocation27_spill] sm:$0xff] }
 0x311   : > { %v3479_v5 = vsel %vm3454_vm12, %v3132_v28, %v3478_v56  ;;  %2851 = vperm.xlu1 %3988, %v2350_v53   ;;  %v2528_v12 = vpop.permute.xlu1 %2527  ;;  %v2338_v37 = vadd.f32 %v5332_v8, %v6327_v59  ;;  %v2354_v19 = vadd.f32 %v5332_v8, %v6328_v24 }
 0x312   : > { %v2938_v21 = vrot.slane %v2528_v12, %v5713_v6  ;;  %v5946_v60 = vsel %vm3456_vm7, %v3141_v42, %v3479_v5  ;;  %v2352_v42 = vadd.f32 %v5332_v8, %v6322_v26 }
 0x313   : > { %v2621_v3 = vpop.permute.xlu0 %2620 }
 0x314   : > { %v3077_v27 = vrot.slane %v2621_v3, %v5670_v23  ;;  %2866 = vperm.xlu0 %3989, %v2355_v32   ;;  %v2943_v44 = vsel %vm2879_vm0, %v2942_v15, %v2938_v21  ;;  %v3163_v15 = vrot.slane %v6323_v11, %v5713_v6  ;;  %v3522_v32 = vunpack.c.l.s4 %v4059_v57 }
 0x315   : > { %2809 = vperm.xlu1 %3988, %v2336_v16   ;;  %v2522_v33 = vpop.permute.xlu1 %2521 }
 0x316   : > { %v2929_v9 = vrot.slane %v2522_v33, %v5713_v6  ;;  %v3523_v3 = vunpack.c.0.s8 %v3522_v32 }
 0x317   : > { %v2669_v22 = vpop.permute.xlu0 %2668 }
 0x318   : > { %v3149_v14 = vrot.slane %v2669_v22, %v5670_v23  ;;  %v2934_v43 = vsel %vm2879_vm0, %v2933_v7, %v2929_v9  ;;  %v6326_v7 = vld [vmem:[#allocation16_spill] sm:$0xff] }
 0x319   : > { %v3459_v18 = vsel %vm3458_vm13, %v2934_v43, %v5780_v17  ;;  %2857 = vperm.xlu1 %3988, %v2352_v42   ;;  %v2576_v1 = vpop.permute.xlu1 %2575  ;;  %v3167_v31 = vrot.slane %v6326_v7, %v5670_v23  ;;  %v6014_v42 = vsub.s32 %v3523_v3, %v4214_v25 }
 0x31a   : > { %v3461_v58 = vsel %vm3460_vm14, %v2943_v44, %v3459_v18  ;;  %v3010_v40 = vrot.slane %v2576_v1, %v5713_v6 }
 0x31b   : > { %v2687_v46 = vpop.permute.xlu0 %2686  ;;  %v3168_v20 = vsel %vm2879_vm0, %v3167_v31, %v3163_v15 }
 0x31c   : > { %v3176_v51 = vrot.slane %v2687_v46, %v5670_v23  ;;  %v3015_v17 = vsel %vm2879_vm0, %v3014_v62, %v3010_v40 }
 0x31d   : > { %2767 = vperm.xlu1 %3988, %v2322_v48   ;;  %v2624_v52 = vpop.permute.xlu1 %2623 }
 0x31e   : > { %v3177_v47 = vsel %vm2879_vm0, %v3176_v51, %v3172_v54  ;;  %v3082_v4 = vrot.slane %v2624_v52, %v5713_v6 }
 0x31f   : > { %v3483_v13 = vsel %vm3448_vm5, %v3177_v47, %v3168_v20  ;;  %v2693_v55 = vpop.permute.xlu0 %2692 }
 0x320   : > { %v3185_v38 = vrot.slane %v2693_v55, %v5670_v23  ;;  %v3087_v36 = vsel %vm2879_vm0, %v3086_v30, %v3082_v4 }
 0x321   : > { %2815 = vperm.xlu1 %3988, %v2338_v37   ;;  %v2672_v62 = vpop.permute.xlu1 %2671 }
 0x322   : > { %v3154_v2 = vrot.slane %v2672_v62, %v5713_v6 }
 0x323   : > { %v2699_v34 = vpop.permute.xlu0 %2698 }
 0x324   : > { %v3194_v29 = vrot.slane %v2699_v34, %v5670_v23  ;;  %v3159_v53 = vsel %vm2879_vm0, %v3158_v10, %v3154_v2 }
 0x325   : > { %2863 = vperm.xlu1 %3988, %v2354_v19   ;;  %v2570_v63 = vpop.permute.xlu1 %2569 }
 0x326   : > { %v3001_v0 = vrot.slane %v2570_v63, %v5713_v6 }
 0x327   : > { %v2705_v30 = vpop.permute.xlu0 %2704 }
 0x328   : > { %v3203_v56 = vrot.slane %v2705_v30, %v5670_v23  ;;  %v3006_v28 = vsel %vm2879_vm0, %v3005_v49, %v3001_v0 }
 0x329   : > { %v3467_v8 = vsel %vm3458_vm13, %v3006_v28, %v5903_v45  ;;  %v2618_v5 = vpop.permute.xlu1 %2617 }
 0x32a   : > { %v3468_v12 = vsel %vm3460_vm14, %v3015_v17, %v3467_v8  ;;  %v3073_v41 = vrot.slane %v2618_v5, %v5713_v6 }
 0x32b   : > { %v2711_v10 = vpop.permute.xlu0 %2710 }
 0x32c   : > { %v3212_v21 = vrot.slane %v2711_v10, %v5670_v23  ;;  %v3078_v61 = vsel %vm2879_vm0, %v3077_v27, %v3073_v41 }
 0x32d   : > { %v3474_v16 = vsel %vm3458_vm13, %v3078_v61, %v5929_v50  ;;  %v2666_v49 = vpop.permute.xlu1 %2665 }
 0x32e   : > { %v3475_v44 = vsel %vm3460_vm14, %v3087_v36, %v3474_v16  ;;  %v3145_v33 = vrot.slane %v2666_v49, %v5713_v6 }
 0x32f   : > { %v2717_v45 = vpop.permute.xlu0 %2716  ;;  %v3519_v9 = vcombine.low %v3461_v58, %v3475_v44  ;;  %v3520_v22 = vcombine.high %v3461_v58, %v3475_v44 }
 0x330   : > { %v3221_v26 = vrot.slane %v2717_v45, %v5670_v23  ;;  %v3150_v43 = vsel %vm2879_vm0, %v3149_v14, %v3145_v33 }
 0x331   : > { %v3481_v27 = vsel %vm3458_vm13, %v3150_v43, %v5946_v60  ;;  %v2690_v11 = vpop.permute.xlu1 %2689  ;;  %v6023_v46 = vrot.slane %v3519_v9, %v6014_v42  ;;  %v6027_v14 = vrot.slane %v3520_v22, %v6014_v42 }
 0x332   : > { %v3482_v50 = vsel %vm3460_vm14, %v3159_v53, %v3481_v27  ;;  %v3181_v15 = vrot.slane %v2690_v11, %v5713_v6 }
 0x333   : > { %v2723_v18 = vpop.permute.xlu0 %2722  ;;  %v3535_v1 = vcombine.low %v3468_v12, %v3482_v50  ;;  %v3536_v40 = vcombine.high %v3468_v12, %v3482_v50 }
 0x334   : > { %v3230_v58 = vrot.slane %v2723_v18, %v5670_v23  ;;  %v3186_v39 = vsel %vm2879_vm0, %v3185_v38, %v3181_v15 }
 0x335   : > { %v6030_v60 = vrot.slane %v3535_v1, %v6014_v42  ;;  %v6033_v48 = vrot.slane %v3536_v40, %v6014_v42  ;;  %v3484_v35 = vsel %vm3450_vm9, %v3186_v39, %v3483_v13  ;;  %v2696_v54 = vpop.permute.xlu1 %2695 }
 0x336   : > { %v3190_v7 = vrot.slane %v2696_v54, %v5713_v6 }
 0x337   : > { %v2729_v31 = vpop.permute.xlu0 %2728  ;;  %v3584_v17 = vcombine.high %v6023_v46, %v6030_v60  ;;  %v3583_v20 = vcombine.low %v6023_v46, %v6030_v60  ;;  %v3599_v47 = vcombine.low %v6027_v14, %v6033_v48  ;;  %v3600_v13 = vcombine.high %v6027_v14, %v6033_v48 }
 0x338   : > { %v3239_v51 = vrot.slane %v2729_v31, %v5670_v23  ;;  %v3195_v52 = vsel %vm2879_vm0, %v3194_v29, %v3190_v7 }
 0x339   : > { %v3485_v4 = vsel %vm3452_vm8, %v3195_v52, %v3484_v35  ;;  %v2702_v55 = vpop.permute.xlu1 %2701 }
 0x33a   : > { %v3199_v59 = vrot.slane %v2702_v55, %v5713_v6 }
 0x33b   : > { %v2735_v37 = vpop.permute.xlu0 %2734 }
 0x33c   : > { %v3248_v38 = vrot.slane %v2735_v37, %v5670_v23  ;;  %v3204_v36 = vsel %vm2879_vm0, %v3203_v56, %v3199_v59 }
 0x33d   : > { %v3486_v62 = vsel %vm3454_vm12, %v3204_v36, %v3485_v4  ;;  %v2708_v2 = vpop.permute.xlu1 %2707 }
 0x33e   : > { %v3208_v34 = vrot.slane %v2708_v2, %v5713_v6 }
 0x33f   : > { %v2741_v24 = vpop.permute.xlu0 %2740 }
 0x340   : > { %v3257_v19 = vrot.slane %v2741_v24, %v5670_v23  ;;  %v3213_v29 = vsel %vm2879_vm0, %v3212_v21, %v3208_v34 }
 0x341   : > { %v3487_v53 = vsel %vm3456_vm7, %v3213_v29, %v3486_v62  ;;  %v2714_v63 = vpop.permute.xlu1 %2713 }
 0x342   : > { %v3217_v0 = vrot.slane %v2714_v63, %v5713_v6 }
 0x343   : > { %v2747_v30 = vpop.permute.xlu0 %2746 }
 0x344   : > { %v3266_v28 = vrot.slane %v2747_v30, %v5670_v23  ;;  %v3222_v56 = vsel %vm2879_vm0, %v3221_v26, %v3217_v0 }
 0x345   : > { %v3488_v57 = vsel %vm3458_vm13, %v3222_v56, %v3487_v53  ;;  %v2720_v32 = vpop.permute.xlu1 %2719 }
 0x346   : > { %v3226_v8 = vrot.slane %v2720_v32, %v5713_v6 }
 0x347   : > { %v2753_v5 = vpop.permute.xlu0 %2752 }
 0x348   : > { %v3275_v12 = vrot.slane %v2753_v5, %v5670_v23  ;;  %v3231_v41 = vsel %vm2879_vm0, %v3230_v58, %v3226_v8 }
 0x349   : > { %v6064_v10 = vsel %vm3460_vm14, %v3231_v41, %v3488_v57  ;;  %v2726_v21 = vpop.permute.xlu1 %2725 }
 0x34a   : > { %v3235_v3 = vrot.slane %v2726_v21, %v5713_v6 }
 0x34b   : > { %v2759_v61 = vpop.permute.xlu0 %2758 }
 0x34c   : > { %v3284_v16 = vrot.slane %v2759_v61, %v5670_v23  ;;  %v3240_v49 = vsel %vm2879_vm0, %v3239_v51, %v3235_v3 }
 0x34d   : > { %v2732_v44 = vpop.permute.xlu1 %2731 }
 0x34e   : > { %v3244_v33 = vrot.slane %v2732_v44, %v5713_v6 }
 0x34f   : > { %v2765_v45 = vpop.permute.xlu0 %2764 }
 0x350   : > { %v3293_v9 = vrot.slane %v2765_v45, %v5670_v23  ;;  %v3249_v22 = vsel %vm2879_vm0, %v3248_v38, %v3244_v33 }
 0x351   : > { %v3490_v26 = vsel %vm3448_vm5, %v3249_v22, %v3240_v49  ;;  %v2738_v43 = vpop.permute.xlu1 %2737 }
 0x352   : > { %v3253_v27 = vrot.slane %v2738_v43, %v5713_v6 }
 0x353   : > { %v2777_v11 = vpop.permute.xlu0 %2776 }
 0x354   : > { %v3258_v50 = vsel %vm2879_vm0, %v3257_v19, %v3253_v27  ;;  %v3311_v27 = vrot.slane %v2777_v11, %v5670_v23 }
 0x355   : > { %v3491_v15 = vsel %vm3450_vm9, %v3258_v50, %v3490_v26  ;;  %v2744_v18 = vpop.permute.xlu1 %2743 }
 0x356   : > { %v3262_v1 = vrot.slane %v2744_v18, %v5713_v6 }
 0x357   : > { %v2783_v40 = vpop.permute.xlu0 %2782 }
 0x358   : > { %v3267_v58 = vsel %vm2879_vm0, %v3266_v28, %v3262_v1  ;;  %v3320_v45 = vrot.slane %v2783_v40, %v5670_v23 }
 0x359   : > { %v3492_v39 = vsel %vm3452_vm8, %v3267_v58, %v3491_v15  ;;  %v2750_v35 = vpop.permute.xlu1 %2749 }
 0x35a   : > { %v3271_v54 = vrot.slane %v2750_v35, %v5713_v6 }
 0x35b   : > { %v2825_v7 = vpop.permute.xlu0 %2824 }
 0x35c   : > { %v3276_v31 = vsel %vm2879_vm0, %v3275_v12, %v3271_v54  ;;  %v3383_v40 = vrot.slane %v2825_v7, %v5670_v23 }
 0x35d   : > { %v3493_v51 = vsel %vm3454_vm12, %v3276_v31, %v3492_v39  ;;  %v2756_v52 = vpop.permute.xlu1 %2755 }
 0x35e   : > { %v3280_v4 = vrot.slane %v2756_v52, %v5713_v6 }
 0x35f   : > { %v2831_v55 = vpop.permute.xlu0 %2830 }
 0x360   : > { %v3285_v59 = vsel %vm2879_vm0, %v3284_v16, %v3280_v4  ;;  %v3392_v50 = vrot.slane %v2831_v55, %v5670_v23 }
 0x361   : > { %v3494_v37 = vsel %vm3456_vm7, %v3285_v59, %v3493_v51  ;;  %v2762_v38 = vpop.permute.xlu1 %2761 }
 0x362   : > { %v3289_v36 = vrot.slane %v2762_v38, %v5713_v6 }
 0x363   : > { %v2789_v62 = vpop.permute.xlu0 %2788 }
 0x364   : > { %v3294_v2 = vsel %vm2879_vm0, %v3293_v9, %v3289_v36  ;;  %v3329_v58 = vrot.slane %v2789_v62, %v5670_v23 }
 0x365   : > { %v6088_v34 = vsel %vm3458_vm13, %v3294_v2, %v3494_v37  ;;  %v2774_v24 = vpop.permute.xlu1 %2773 }
 0x366   : > { %v3307_v9 = vrot.slane %v2774_v24, %v5713_v6 }
 0x367   : > { %v2837_v19 = vpop.permute.xlu0 %2836 }
 0x368   : > { %v3312_v39 = vsel %vm2879_vm0, %v3311_v27, %v3307_v9  ;;  %v3401_v11 = vrot.slane %v2837_v19, %v5670_v23 }
 0x369   : > { %v2780_v29 = vpop.permute.xlu1 %2779 }
 0x36a   : > { %v3316_v33 = vrot.slane %v2780_v29, %v5713_v6 }
 0x36b   : > { %v2795_v53 = vpop.permute.xlu0 %2794 }
 0x36c   : > { %v3321_v15 = vsel %vm2879_vm0, %v3320_v45, %v3316_v33  ;;  %v3338_v52 = vrot.slane %v2795_v53, %v5670_v23 }
 0x36d   : > { %v2822_v63 = vpop.permute.xlu1 %2821  ;;  %v3497_v51 = vsel %vm3448_vm5, %v3321_v15, %v3312_v39 }
 0x36e   : > { %v3379_v18 = vrot.slane %v2822_v63, %v5713_v6 }
 0x36f   : > { %v6090_v0 = vpop.permute.xlu0 %2842 }
 0x370   : > { %v3384_v55 = vsel %vm2879_vm0, %v3383_v40, %v3379_v18  ;;  %v3410_v7 = vrot.slane %v6090_v0, %v5670_v23 }
 0x371   : > { %v2828_v30 = vpop.permute.xlu1 %2827 }
 0x372   : > { %v3388_v22 = vrot.slane %v2828_v30, %v5713_v6 }
 0x373   : > { %v2801_v28 = vpop.permute.xlu0 %2800 }
 0x374   : > { %v3393_v35 = vsel %vm2879_vm0, %v3392_v50, %v3388_v22  ;;  %v3347_v36 = vrot.slane %v2801_v28, %v5670_v23 }
 0x375   : > { %v2786_v56 = vpop.permute.xlu1 %2785  ;;  %v3504_v38 = vsel %vm3448_vm5, %v3393_v35, %v3384_v55 }
 0x376   : > { %v3325_v43 = vrot.slane %v2786_v56, %v5713_v6 }
 0x377   : > { %v6092_v57 = vpop.permute.xlu0 %2848 }
 0x378   : > { %v3330_v4 = vsel %vm2879_vm0, %v3329_v58, %v3325_v43  ;;  %v3419_v62 = vrot.slane %v6092_v57, %v5670_v23  ;;  %v4060_v58 = vmov 1934713408  }
 0x379   : > { %v2834_v32 = vpop.permute.xlu1 %2833  ;;  %v3498_v24 = vsel %vm3450_vm9, %v3330_v4, %v3497_v51  ;;  %v3586_v40 = vunpack.c.l.s4 %v4060_v58 }
 0x37a   : > { %v3397_v59 = vrot.slane %v2834_v32, %v5713_v6 }
 0x37b   : > { %v2807_v5 = vpop.permute.xlu0 %2806 }
 0x37c   : > { %v3356_v30 = vrot.slane %v2807_v5, %v5670_v23  ;;  %v3402_v32 = vsel %vm2879_vm0, %v3401_v11, %v3397_v59 }
 0x37d   : > { %v2792_v8 = vpop.permute.xlu1 %2791  ;;  %v3505_v50 = vsel %vm3450_vm9, %v3402_v32, %v3504_v38 }
 0x37e   : > { %v3334_v54 = vrot.slane %v2792_v8, %v5713_v6 }
 0x37f   : > { %v6094_v41 = vpop.permute.xlu0 %2854 }
 0x380   : > { %v3339_v19 = vsel %vm2879_vm0, %v3338_v52, %v3334_v54  ;;  %v3428_v8 = vrot.slane %v6094_v41, %v5670_v23 }
 0x381   : > { %v2840_v12 = vpop.permute.xlu1 %2839 }
 0x382   : > { %v3406_v29 = vrot.slane %v2840_v12, %v5713_v6 }
 0x383   : > { %v2813_v61 = vpop.permute.xlu0 %2812 }
 0x384   : > { %v3411_v45 = vsel %vm2879_vm0, %v3410_v7, %v3406_v29 }
 0x385   : > { %v2798_v21 = vpop.permute.xlu1 %2797 }
 0x386   : > { %v3343_v37 = vrot.slane %v2798_v21, %v5713_v6  ;;  %v3365_v21 = vrot.slane %v2813_v61, %v5670_v23 }
 0x387   : > { %v6096_v49 = vpop.permute.xlu0 %2860 }
 0x388   : > { %v3348_v12 = vsel %vm2879_vm0, %v3347_v36, %v3343_v37  ;;  %v3437_v15 = vrot.slane %v6096_v49, %v5670_v23  ;;  %v3587_v37 = vunpack.c.0.s8 %v3586_v40 }
 0x389   : > { %v2846_v3 = vpop.permute.xlu1 %2845 }
 0x38a   : > { %v3415_v56 = vrot.slane %v2846_v3, %v5713_v6 }
 0x38b   : > { %v2771_v1 = vpop.permute.xlu0 %2770 }
 0x38c   : > { %v3302_v28 = vrot.slane %v2771_v1, %v5670_v23  ;;  %v3420_v43 = vsel %vm2879_vm0, %v3419_v62, %v3415_v56 }
 0x38d   : > { %v2804_v16 = vpop.permute.xlu1 %2803 }
 0x38e   : > { %v3352_v2 = vrot.slane %v2804_v16, %v5713_v6  ;;  %v3499_v16 = vsel %vm3452_vm8, %v3339_v19, %v3498_v24  ;;  %v3590_v19 = vsub.s32 %v3587_v37, %v4214_v25 }
 0x38f   : > { %v2819_v53 = vpop.permute.xlu0 %2818 }
 0x390   : > { %v3357_v33 = vsel %vm2879_vm0, %v3356_v30, %v3352_v2  ;;  %v3374_v27 = vrot.slane %v2819_v53, %v5670_v23  ;;  %v3598_v56 = vrot.slane %v3584_v17, %v3590_v19  ;;  %v3591_v25 = vrot.slane %v3583_v20, %v3590_v19 }
 0x391   : > { %v6098_v44 = vpop.permute.xlu1 %2851 }
 0x392   : > { %v3424_v5 = vrot.slane %v6098_v44, %v5713_v6 }
 0x393   : > { %v2867_v1 = vpop.permute.xlu0 %2866 }
 0x394   : > { %v3429_v39 = vsel %vm2879_vm0, %v3428_v8, %v3424_v5  ;;  %v3446_v52 = vrot.slane %v2867_v1, %v5670_v23 }
 0x395   : > { %v2810_v26 = vpop.permute.xlu1 %2809 }
 0x396   : > { %v3361_v63 = vrot.slane %v2810_v26, %v5713_v6  ;;  %v3500_v26 = vsel %vm3454_vm12, %v3348_v12, %v3499_v16 }
 0x397   : > { %v3501_v18 = vsel %vm3456_vm7, %v3357_v33, %v3500_v26 }
 0x398   : > { %v3366_v9 = vsel %vm2879_vm0, %v3365_v21, %v3361_v63  ;;  %v3614_v21 = vrot.slane %v3600_v13, %v3590_v19 }
 0x399   : > { %v2858_v31 = vpop.permute.xlu1 %2857  ;;  %v3502_v35 = vsel %vm3458_vm13, %v3366_v9, %v3501_v18 }
 0x39a   : > { %v3433_v22 = vrot.slane %v2858_v31, %v5713_v6 }
 0x39c   : > { %v3438_v11 = vsel %vm2879_vm0, %v3437_v15, %v3433_v22 }
 0x39d   : > { %v2768_v0 = vpop.permute.xlu1 %2767 }
 0x39e   : > { %v3298_v57 = vrot.slane %v2768_v0, %v5713_v6 }
 0x3a0   : > { %v3303_v3 = vsel %vm2879_vm0, %v3302_v28, %v3298_v57  ;;  %v3607_v28 = vrot.slane %v3599_v47, %v3590_v19 }
 0x3a1   : > { %v3496_v41 = vsel %vm3460_vm14, %v3303_v3, %v6088_v34  ;;  %v2816_v61 = vpop.permute.xlu1 %2815  ;;  %v3506_v34 = vsel %vm3452_vm8, %v3411_v45, %v3505_v50 }
 0x3a2   : > { %v3370_v44 = vrot.slane %v2816_v61, %v5713_v6  ;;  %v3507_v31 = vsel %vm3454_vm12, %v3420_v43, %v3506_v34 }
 0x3a3   : > { %v3508_v59 = vsel %vm3456_vm7, %v3429_v39, %v3507_v31 }
 0x3a4   : > { %v3375_v54 = vsel %vm2879_vm0, %v3374_v27, %v3370_v44  ;;  %v3509_v38 = vsel %vm3458_vm13, %v3438_v11, %v3508_v59 }
 0x3a5   : > { %v3503_v51 = vsel %vm3460_vm14, %v3375_v54, %v3502_v35  ;;  %v2864_v49 = vpop.permute.xlu1 %2863 }
 0x3a6   : > { %v3551_v4 = vcombine.low %v6064_v10, %v3503_v51  ;;  %v3552_v55 = vcombine.high %v6064_v10, %v3503_v51  ;;  %v3442_v7 = vrot.slane %v2864_v49, %v5713_v6 }
 0x3a8   : > { %v3447_v36 = vsel %vm2879_vm0, %v3446_v52, %v3442_v7  ;;  %v3559_v23 = vrot.slane %v3551_v4, %v6014_v42  ;;  %v3566_v29 = vrot.slane %v3552_v55, %v6014_v42 }
 0x3a9   : > { %v3510_v62 = vsel %vm3460_vm14, %v3447_v36, %v3509_v38 }
 0x3aa   : > { %v3567_v2 = vcombine.low %v3496_v41, %v3510_v62  ;;  %v3568_v24 = vcombine.high %v3496_v41, %v3510_v62 }
 0x3ac   : > { %v3575_v10 = vrot.slane %v3567_v2, %v6014_v42  ;;  %v3582_v6 = vrot.slane %v3568_v24, %v6014_v42 }
 0x3ae   : > { %v3616_v53 = vcombine.high %v3559_v23, %v3575_v10  ;;  %v3615_v63 = vcombine.low %v3559_v23, %v3575_v10  ;;  %v3631_v0 = vcombine.low %v3566_v29, %v3582_v6  ;;  %v3632_v30 = vcombine.high %v3566_v29, %v3582_v6 }
 0x3b0   : > { %v3630_v57 = vrot.slane %v3616_v53, %v3590_v19  ;;  %v3623_v32 = vrot.slane %v3615_v63, %v3590_v19  ;;  %v3639_v8 = vrot.slane %v3631_v0, %v3590_v19  ;;  %v3646_v42 = vrot.slane %v3632_v30, %v3590_v19 }
 0x3b2   : > { %v3649_v12 = vcombine.low %v3598_v56, %v3630_v57  ;;  %v3648_v16 = vcombine.high %v3591_v25, %v3623_v32  ;;  %v3651_v33 = vcombine.low %v3607_v28, %v3639_v8  ;;  %v3650_v17 = vcombine.high %v3598_v56, %v3630_v57 }
 0x3b3   : > { %v3653_v5 = vcombine.low %v3614_v21, %v3646_v42  ;;  %v3652_v3 = vcombine.high %v3607_v28, %v3639_v8  ;;  %v3654_v46 = vcombine.high %v3614_v21, %v3646_v42  ;;  %v3647_v60 = vcombine.low %v3591_v25, %v3623_v32 }
 0x3b4   : > { %3660 = vrot.lane.b32.xlu0 %v3649_v12, %s4061_s16  ;;  %3656 = vrot.lane.b32.xlu1 %v3648_v16, %s4062_s11 }
 0x3b8   : > { %3668 = vrot.lane.b32.xlu0 %v3651_v33, %s4063_s17  ;;  %3664 = vrot.lane.b32.xlu1 %v3650_v17, %s4064_s18 }
 0x3bc   : > { %3676 = vrot.lane.b32.xlu0 %v3653_v5, %s4065_s19  ;;  %3672 = vrot.lane.b32.xlu1 %v3652_v3, %s4066_s20 }
 0x3c0   : > { %3680 = vrot.lane.b32.xlu1 %v3654_v46, %s4067_s21 }
 0x426   : > { %v3661_v14 = vpop.permute.xlu0 %3660  ;;  %v3657_v48 = vpop.permute.xlu1 %3656 }
 0x427   : > { %v3684_v20 = vsel %vm3683_vm1, %v3647_v60, %v3657_v48 }
 0x428   : > { %v3686_v45 = vsel %vm3685_vm2, %v3684_v20, %v3661_v14 }
 0x42a   : > { %v3669_v47 = vpop.permute.xlu0 %3668  ;;  %v3665_v13 = vpop.permute.xlu1 %3664 }
 0x42b   : > { %v3688_v9 = vsel %vm3687_vm3, %v3686_v45, %v3665_v13 }
 0x42c   : > { %v3689_v41 = vsel %vm6329_vm6, %v3688_v9, %v3669_v47 }
 0x42e   : > { %v3673_v22 = vpop.permute.xlu1 %3672  ;;  %v3677_v61 = vpop.permute.xlu0 %3676 }
 0x42f   : > { %v3691_v26 = vsel %vm3690_vm10, %v3689_v41, %v3673_v22 }
 0x430   : > { %v3693_v27 = vsel %vm3692_vm4, %v3691_v26, %v3677_v61 }
 0x432   : > { %v3681_v43 = vpop.permute.xlu1 %3680 }
 0x433   : > { %v3695_v44 = vsel %vm3694_vm15, %v3693_v27, %v3681_v43 }
 0x434   : > { %3696 = vst [vmem:[%s357_s10] sm:$0xff] %v3695_v44 }
 0x435 PF: > { %s18_s30 = sadd.s32 1, %s4056_s30   ;;  %s6330_s26 = smov %s4048_s28 }
 0x436   : > { %p15_p8 = scmp.ge.s32.totalorder %s18_s30, 6   ;;  %s6331_s27 = smov %s4052_s29 }
 0x437   : > { %s6332_s28 = smov %s6335_s6  ;;  %s6333_s29 = smov %s6339_s8 }
 0x438   :  { %17 = sbr.rel (!%p15_p8) target bundleno = 3 (0x3), region = 81 }

</bundles_post_ra>
